<compile_context>
chip_gen: v5e
topology: v5e:2x2
jax: 0.10.0
libtpu: 0.0.40
codegen_flags: <defaults>
</compile_context>

<pallas_src>
import functools

import numpy as np
import jax
import jax.numpy as jnp
from jax.experimental import pallas as pl
from jax.experimental.pallas import tpu as pltpu


def _ru(x, m):
    return (x + m - 1) // m * m


# UpBlock's hard-coded shape dispatch: downsampled spatial -> convt output_size
_UP_OUTPUT_SIZES = {(8, 13): (15, 25), (9, 7): (18, 14), (4, 7): (8, 13)}


# ----------------------------------------------------------------------------
# Fused whole-UNet Pallas kernel (one grid step == one batch element)
# ----------------------------------------------------------------------------
def _unet_kernel(a1_ref, w1_ref, b1_ref,
                 s2_ref, w2_ref, b2_ref,
                 su_ref, wu_ref, bu_ref,
                 s3_ref, w3a_ref, w3b_ref, b3_ref,
                 w4_ref, b4_ref, o_ref):
    f32 = jnp.float32

    def mm(a, b):
        return jnp.dot(a, b, preferred_element_type=f32)

    # --- down1: Conv(nchannels->C1, 3x3, pad 1) + ReLU  (rows pre-im2col'd) ---
    x1 = jnp.maximum(mm(a1_ref[0], w1_ref[...]) + b1_ref[...], 0.0)     # (M1p, C1)

    # --- Conv(C1->C2, 3x3, stride 2, pad 1) + ReLU ---
    acc2 = jnp.zeros((s2_ref.shape[1], w2_ref.shape[2]), f32)           # (M2p, C2)
    for t in range(9):
        acc2 = acc2 + mm(mm(s2_ref[t], x1), w2_ref[t])
    x2 = jnp.maximum(acc2 + b2_ref[...], 0.0)

    # --- ConvTranspose2d(C2->C1, 3x3, stride 2, pad 1, output_size=...) ---
    #     SU folds the stride-2 zero dilation + padding + output_padding.
    accu = jnp.zeros((su_ref.shape[1], wu_ref.shape[2]), f32)           # (M1p, C1)
    for t in range(9):
        accu = accu + mm(mm(su_ref[t], x2), wu_ref[t])
    xup = accu + bu_ref[...]                                            # no ReLU

    # --- Conv(cat([skip, upsampled])->C1, 3x3, pad 1) + ReLU  (split-K) ---
    acc3 = jnp.zeros((s3_ref.shape[1], w3a_ref.shape[2]), f32)          # (M1p, C1)
    for t in range(9):
        g = s3_ref[t]
        acc3 = acc3 + mm(mm(g, x1), w3a_ref[t]) + mm(mm(g, xup), w3b_ref[t])
    x3 = jnp.maximum(acc3 + b3_ref[...], 0.0)

    # --- out: Conv(C1->nclasses, 1x1)  (class dim padded to 128 lanes) ---
    o_ref[0] = mm(x3, w4_ref[...]) + b4_ref[...]


# ----------------------------------------------------------------------------
# One-time parameter / gather-matrix preparation (host side, numpy)
# ----------------------------------------------------------------------------
def prepare_params(raw, height, width, nchannels=1, nclasses=1):
    H, W = height, width
    C1 = int(np.asarray(raw['w1']).shape[0])           # 64
    C2 = int(np.asarray(raw['w2']).shape[0])           # 128

    # strided conv output size (Conv2d k=3, s=2, p=1)
    Hd = (H + 2 - 3) // 2 + 1
    Wd = (W + 2 - 3) // 2 + 1
    if (Hd, Wd) not in _UP_OUTPUT_SIZES:
        # TODO(synk): PyTorch would skip the convt here and torch.cat would
        # then fail on mismatched spatial shapes; only dispatched sizes work.
        raise ValueError(f"unsupported downsampled spatial shape {(Hd, Wd)}")
    Ho, Wo = _UP_OUTPUT_SIZES[(Hd, Wd)]
    if (Ho, Wo) != (H, W):
        raise ValueError("convt output_size must match the skip connection")

    M1, M2 = H * W, Hd * Wd
    M1p, M2p = _ru(M1, 8), _ru(M2, 8)
    K1 = 9 * nchannels
    K1p = _ru(K1, 8)
    NCp = 128                                           # lane-dense final store

    # ---- constant 0/1 gather matrices (tap order t = ky*3 + kx) ----
    S2 = np.zeros((9, M2p, M1p), np.float32)            # strided conv, pad 1
    S3 = np.zeros((9, M1p, M1p), np.float32)            # stride-1 conv, pad 1
    SU = np.zeros((9, M1p, M2p), np.float32)            # convT as conv on dilated x2
    for ky in range(3):
        for kx in range(3):
            t = ky * 3 + kx
            for i in range(Hd):
                for j in range(Wd):
                    y, x = 2 * i - 1 + ky, 2 * j - 1 + kx
                    if 0 <= y < H and 0 <= x < W:
                        S2[t, i * Wd + j, y * W + x] = 1.0
            for oy in range(H):
                for ox in range(W):
                    y, x = oy - 1 + ky, ox - 1 + kx
                    if 0 <= y < H and 0 <= x < W:
                        S3[t, oy * W + ox, y * W + x] = 1.0
                    # convT: dilated coord = out coord + tap - p0   (p0 = 1)
                    du, dv = oy + ky - 1, ox + kx - 1
                    if du >= 0 and dv >= 0 and du % 2 == 0 and dv % 2 == 0:
                        i2, j2 = du // 2, dv // 2
                        if i2 < Hd and j2 < Wd:
                            SU[t, oy * W + ox, i2 * Wd + j2] = 1.0

    # ---- PyTorch-layout weights -> per-tap matmul matrices (done once) ----
    w1 = np.asarray(raw['w1'], np.float32)              # (C1, Cin, 3, 3)
    W1 = np.zeros((K1p, C1), np.float32)
    W1[:K1] = w1.transpose(2, 3, 1, 0).reshape(K1, C1)
    b1 = np.asarray(raw['b1'], np.float32).reshape(1, C1)

    w2 = np.asarray(raw['w2'], np.float32)              # (C2, C1, 3, 3)
    W2 = w2.transpose(2, 3, 1, 0).reshape(9, C1, C2)
    b2 = np.asarray(raw['b2'], np.float32).reshape(1, C2)

    wt = np.asarray(raw['wt'], np.float32)              # (C2, C1, 3, 3) = (Cin, Cout, kh, kw)
    WU = np.flip(wt, axis=(2, 3)).transpose(2, 3, 0, 1).reshape(9, C2, C1)
    bu = np.asarray(raw['bt'], np.float32).reshape(1, C1)

    w3 = np.asarray(raw['w3'], np.float32)              # (C1, 2*C1, 3, 3)
    W3 = w3.transpose(2, 3, 1, 0).reshape(9, 2 * C1, C1)
    W3a = np.ascontiguousarray(W3[:, :C1, :])           # cat order: [skip, upsampled]
    W3b = np.ascontiguousarray(W3[:, C1:, :])
    b3 = np.asarray(raw['b3'], np.float32).reshape(1, C1)

    w4 = np.asarray(raw['w4'], np.float32)              # (nclasses, C1, 1, 1)
    W4 = np.zeros((C1, NCp), np.float32)
    W4[:, :nclasses] = w4[:, :, 0, 0].T
    b4 = np.zeros((1, NCp), np.float32)
    b4[0, :nclasses] = np.asarray(raw['b4'], np.float32)

    arrays = {k: jnp.asarray(v) for k, v in dict(
        W1=W1, b1=b1, S2=S2, W2=W2, b2=b2, SU=SU, WU=WU, bu=bu,
        S3=S3, W3a=W3a, W3b=W3b, b3=b3, W4=W4, b4=b4).items()}
    dims = dict(H=H, W=W, Hd=Hd, Wd=Wd, M1=M1, M1p=M1p, M2p=M2p,
                K1=K1, K1p=K1p, C1=C1, C2=C2, NCp=NCp,
                nchannels=nchannels, nclasses=nclasses)
    return arrays, dims


# ----------------------------------------------------------------------------
# Forward wrapper (only layer-1 im2col + final reshape live outside Pallas)
# ----------------------------------------------------------------------------
def _im2col_3x3_pad1(x_nhwc):
    n, h, w, c = x_nhwc.shape
    xp = jnp.pad(x_nhwc, ((0, 0), (1, 1), (1, 1), (0, 0)))
    cols = [xp[:, ky:ky + h, kx:kx + w, :] for ky in range(3) for kx in range(3)]
    return jnp.stack(cols, axis=3).reshape(n, h * w, 9 * c)


def unet_forward(x_nchw, arrays, dims):
    d = dims
    n = x_nchw.shape[0]
    M1p, M2p, K1p = d['M1p'], d['M2p'], d['K1p']
    C1, C2, NCp = d['C1'], d['C2'], d['NCp']

    # layer-1 im2col (Cin=1 -> tiny; all big-layer im2col lives in-kernel)
    x = jnp.transpose(x_nchw, (0, 2, 3, 1)).astype(jnp.float32)       # NCHW -> NHWC
    a1 = _im2col_3x3_pad1(x)                                          # (n, M1, K1)
    a1 = jnp.zeros((n, M1p, K1p), jnp.float32).at[:, :d['M1'], :d['K1']].set(a1)

    def full(shape):
        return pl.BlockSpec(shape, lambda b, _s=shape: (0,) * len(_s))

    in_specs = [
        pl.BlockSpec((1, M1p, K1p), lambda b: (b, 0, 0)),             # a1 (per batch)
        full((K1p, C1)), full((1, C1)),                               # W1, b1
        full((9, M2p, M1p)), full((9, C1, C2)), full((1, C2)),        # S2, W2, b2
        full((9, M1p, M2p)), full((9, C2, C1)), full((1, C1)),        # SU, WU, bu
        full((9, M1p, M1p)), full((9, C1, C1)),
        full((9, C1, C1)), full((1, C1)),                             # S3, W3a, W3b, b3
        full((C1, NCp)), full((1, NCp)),                              # W4, b4
    ]

    operands = (a1, arrays['W1'], arrays['b1'],
                arrays['S2'], arrays['W2'], arrays['b2'],
                arrays['SU'], arrays['WU'], arrays['bu'],
                arrays['S3'], arrays['W3a'], arrays['W3b'], arrays['b3'],
                arrays['W4'], arrays['b4'])

    # rough roofline hint for XLA's scheduler
    flops = n * (
        2 * M1p * K1p * C1
        + 9 * (2 * M2p * M1p * C1 + 2 * M2p * C1 * C2)
        + 9 * (2 * M1p * M2p * C2 + 2 * M1p * C2 * C1)
        + 9 * (4 * M1p * M1p * C1 + 4 * M1p * C1 * C1)
        + 2 * M1p * C1 * NCp)
    bytes_accessed = (sum(int(np.prod(o.shape)) * 4 for o in operands)
                      + n * M1p * NCp * 4)

    out = pl.pallas_call(
        _unet_kernel,
        grid=(n,),
        in_specs=in_specs,
        out_specs=pl.BlockSpec((1, M1p, NCp), lambda b: (b, 0, 0)),
        out_shape=jax.ShapeDtypeStruct((n, M1p, NCp), jnp.float32),
        compiler_params=pltpu.CompilerParams(
            dimension_semantics=("parallel",),          # megacore on v7x
            vmem_limit_bytes=32 * 1024 * 1024),
        cost_estimate=pl.CostEstimate(flops=flops, transcendentals=0,
                                      bytes_accessed=bytes_accessed),
    )(*operands)

    out = out[:, :d['M1'], :d['nclasses']].reshape(n, d['H'], d['W'], d['nclasses'])
    return jnp.transpose(out, (0, 3, 1, 2))                           # NHWC -> NCHW


# ----------------------------------------------------------------------------
# Deterministic parameter init (PyTorch weight layouts)
# ----------------------------------------------------------------------------
def init_params(key, nchannels=1, nclasses=1):
    keys = jax.random.split(key, 10)

    def conv_init(kw_, kb_, cout, cin, k):
        bound = 1.0 / np.sqrt(cin * k * k)
        w = jax.random.uniform(kw_, (cout, cin, k, k), jnp.float32, -bound, bound)
        b = jax.random.uniform(kb_, (cout,), jnp.float32, -bound, bound)
        return w, b

    p = {}
    p['w1'], p['b1'] = conv_init(keys[0], keys[1], 64, nchannels, 3)        # down1
    p['w2'], p['b2'] = conv_init(keys[2], keys[3], 128, 64, 3)              # strided conv
    bound = 1.0 / np.sqrt(64 * 9)
    p['wt'] = jax.random.uniform(keys[4], (128, 64, 3, 3), jnp.float32, -bound, bound)
    p['bt'] = jax.random.uniform(keys[5], (64,), jnp.float32, -bound, bound)
    p['w3'], p['b3'] = conv_init(keys[6], keys[7], 64, 128, 3)              # UpBlock.conv
    p['w4'], p['b4'] = conv_init(keys[8], keys[9], nclasses, 64, 1)         # out 1x1
    return p


# ----------------------------------------------------------------------------
# Pure-JAX (XLA) reference for correctness checking (PyTorch semantics)
# ----------------------------------------------------------------------------
def _ref_conv(x_nhwc, w_oihw, b, stride, pad):
    w_hwio = jnp.transpose(w_oihw, (2, 3, 1, 0))
    y = jax.lax.conv_general_dilated(
        x_nhwc, w_hwio, window_strides=(stride, stride),
        padding=((pad, pad), (pad, pad)),
        dimension_numbers=('NHWC', 'HWIO', 'NHWC'),
        precision=jax.lax.Precision.HIGHEST)
    return y + b


def _ref_convt(x_nhwc, wt, b, stride, pad, out_pad):
    k = wt.shape[2]
    w_hwio = jnp.transpose(jnp.flip(wt, axis=(2, 3)), (2, 3, 0, 1))
    y = jax.lax.conv_general_dilated(
        x_nhwc, w_hwio, window_strides=(1, 1),
        padding=((k - 1 - pad, k - 1 - pad + out_pad[0]),
                 (k - 1 - pad, k - 1 - pad + out_pad[1])),
        lhs_dilation=(stride, stride),
        dimension_numbers=('NHWC', 'HWIO', 'NHWC'),
        precision=jax.lax.Precision.HIGHEST)
    return y + b


def unet_forward_ref(x_nchw, raw):
    x = jnp.transpose(x_nchw, (0, 2, 3, 1)).astype(jnp.float32)
    x1 = jax.nn.relu(_ref_conv(x, raw['w1'], raw['b1'], 1, 1))
    x2 = jax.nn.relu(_ref_conv(x1, raw['w2'], raw['b2'], 2, 1))
    h2, w2 = x2.shape[1], x2.shape[2]
    ho, wo = _UP_OUTPUT_SIZES[(h2, w2)]
    out_pad = (ho - ((h2 - 1) * 2 + 1), wo - ((w2 - 1) * 2 + 1))
    x_up = _ref_convt(x2, raw['wt'], raw['bt'], 2, 1, out_pad)
    xc = jnp.concatenate([x1, x_up], axis=-1)                # cat([skip, upsampled])
    x3 = jax.nn.relu(_ref_conv(xc, raw['w3'], raw['b3'], 1, 1))
    x4 = _ref_conv(x3, raw['w4'], raw['b4'], 1, 0)
    return jnp.transpose(x4, (0, 3, 1, 2))


if __name__ == "__main__":
    key = jax.random.PRNGKey(0)
    kp, kx = jax.random.split(key)
    raw = init_params(kp, nchannels=1, nclasses=1)

    # Input spatial (8, 13): strided conv gives (4, 7), which UpBlock's
    # hard-coded dispatch maps back to output_size (8, 13).
    x = jax.random.normal(kx, (2, 1, 8, 13), jnp.float32)

    arrays, dims = prepare_params(raw, height=8, width=13, nchannels=1, nclasses=1)
    unet_fwd = jax.jit(functools.partial(unet_forward, dims=dims))

    out = jax.block_until_ready(unet_fwd(x, arrays))
    ref = jax.block_until_ready(unet_forward_ref(x, raw))

    assert out.shape == (2, 1, 8, 13), out.shape
    max_err = float(np.max(np.abs(np.asarray(out) - np.asarray(ref))))
    assert np.allclose(np.asarray(out), np.asarray(ref), rtol=5e-3, atol=5e-3), max_err
    print("KERNEL_OK")
</pallas_src>

<mosaic_0001>
module attributes {stable_mosaic.version = 11 : i64} {
  func.func @_unet_kernel(%arg0: i32, %arg1: memref<1x104x16xf32, #tpu.memory_space<vmem>>, %arg2: memref<16x64xf32, #tpu.memory_space<vmem>>, %arg3: memref<1x64xf32, #tpu.memory_space<vmem>>, %arg4: memref<9x32x104xf32, #tpu.memory_space<vmem>>, %arg5: memref<9x64x128xf32, #tpu.memory_space<vmem>>, %arg6: memref<1x128xf32, #tpu.memory_space<vmem>>, %arg7: memref<9x104x32xf32, #tpu.memory_space<vmem>>, %arg8: memref<9x128x64xf32, #tpu.memory_space<vmem>>, %arg9: memref<1x64xf32, #tpu.memory_space<vmem>>, %arg10: memref<9x104x104xf32, #tpu.memory_space<vmem>>, %arg11: memref<9x64x64xf32, #tpu.memory_space<vmem>>, %arg12: memref<9x64x64xf32, #tpu.memory_space<vmem>>, %arg13: memref<1x64xf32, #tpu.memory_space<vmem>>, %arg14: memref<64x128xf32, #tpu.memory_space<vmem>>, %arg15: memref<1x128xf32, #tpu.memory_space<vmem>>, %arg16: memref<1x104x128xf32, #tpu.memory_space<vmem>>) attributes {dimension_semantics = [#tpu.dimension_semantics<parallel>], iteration_bounds = array<i64: 2>, scalar_prefetch = 0 : i64, scratch_operands = 0 : i64, tpu.core_type = #tpu.core_type<tc>, window_params = [{transform_indices = @transform_0, window_bounds = array<i64: 1, 104, 16>}, {pipeline_mode = #tpu.pipeline_mode<synchronous>, transform_indices = @transform_1, window_bounds = array<i64: 16, 64>}, {pipeline_mode = #tpu.pipeline_mode<synchronous>, transform_indices = @transform_2, window_bounds = array<i64: 1, 64>}, {pipeline_mode = #tpu.pipeline_mode<synchronous>, transform_indices = @transform_3, window_bounds = array<i64: 9, 32, 104>}, {pipeline_mode = #tpu.pipeline_mode<synchronous>, transform_indices = @transform_4, window_bounds = array<i64: 9, 64, 128>}, {pipeline_mode = #tpu.pipeline_mode<synchronous>, transform_indices = @transform_5, window_bounds = array<i64: 1, 128>}, {pipeline_mode = #tpu.pipeline_mode<synchronous>, transform_indices = @transform_6, window_bounds = array<i64: 9, 104, 32>}, {pipeline_mode = #tpu.pipeline_mode<synchronous>, transform_indices = @transform_7, window_bounds = array<i64: 9, 128, 64>}, {pipeline_mode = #tpu.pipeline_mode<synchronous>, transform_indices = @transform_8, window_bounds = array<i64: 1, 64>}, {pipeline_mode = #tpu.pipeline_mode<synchronous>, transform_indices = @transform_9, window_bounds = array<i64: 9, 104, 104>}, {pipeline_mode = #tpu.pipeline_mode<synchronous>, transform_indices = @transform_10, window_bounds = array<i64: 9, 64, 64>}, {pipeline_mode = #tpu.pipeline_mode<synchronous>, transform_indices = @transform_11, window_bounds = array<i64: 9, 64, 64>}, {pipeline_mode = #tpu.pipeline_mode<synchronous>, transform_indices = @transform_12, window_bounds = array<i64: 1, 64>}, {pipeline_mode = #tpu.pipeline_mode<synchronous>, transform_indices = @transform_13, window_bounds = array<i64: 64, 128>}, {pipeline_mode = #tpu.pipeline_mode<synchronous>, transform_indices = @transform_14, window_bounds = array<i64: 1, 128>}, {transform_indices = @transform_15, window_bounds = array<i64: 1, 104, 128>}]} {
    %c0 = arith.constant 0 : index
    %c0_0 = arith.constant 0 : index
    %c0_1 = arith.constant 0 : index
    %0 = vector.load %arg1[%c0, %c0_0, %c0_1] : memref<1x104x16xf32, #tpu.memory_space<vmem>>, vector<1x104x16xf32>
    %1 = vector.shape_cast %0 : vector<1x104x16xf32> to vector<104x16xf32>
    %c0_2 = arith.constant 0 : index
    %c0_3 = arith.constant 0 : index
    %2 = vector.load %arg2[%c0_2, %c0_3] : memref<16x64xf32, #tpu.memory_space<vmem>>, vector<16x64xf32>
    %cst = arith.constant dense<0.000000e+00> : vector<104x64xf32>
    %3 = tpu.matmul %1, %2, %cst {dimension_numbers = #tpu.dot_dimension_numbers<[1], [0], [0], [1], [0, 0, 1, 1], [], []>} : vector<104x16xf32>, vector<16x64xf32>, vector<104x64xf32> -> vector<104x64xf32>
    %c0_4 = arith.constant 0 : index
    %c0_5 = arith.constant 0 : index
    %4 = vector.load %arg3[%c0_4, %c0_5] : memref<1x64xf32, #tpu.memory_space<vmem>>, vector<1x64xf32>
    %5 = vector.broadcast %4 : vector<1x64xf32> to vector<104x64xf32>
    %6 = arith.addf %3, %5 : vector<104x64xf32>
    %cst_6 = arith.constant 0.000000e+00 : f32
    %7 = vector.broadcast %cst_6 : f32 to vector<104x64xf32>
    %8 = arith.maximumf %6, %7 : vector<104x64xf32>
    %cst_7 = arith.constant 0.000000e+00 : f32
    %9 = vector.broadcast %cst_7 : f32 to vector<32x128xf32>
    %c0_8 = arith.constant 0 : index
    %c0_9 = arith.constant 0 : index
    %c0_10 = arith.constant 0 : index
    %10 = vector.load %arg4[%c0_8, %c0_9, %c0_10] : memref<9x32x104xf32, #tpu.memory_space<vmem>>, vector<1x32x104xf32>
    %11 = vector.shape_cast %10 : vector<1x32x104xf32> to vector<32x104xf32>
    %cst_11 = arith.constant dense<0.000000e+00> : vector<32x64xf32>
    %12 = tpu.matmul %11, %8, %cst_11 {dimension_numbers = #tpu.dot_dimension_numbers<[1], [0], [0], [1], [0, 0, 1, 1], [], []>} : vector<32x104xf32>, vector<104x64xf32>, vector<32x64xf32> -> vector<32x64xf32>
    %c0_12 = arith.constant 0 : index
    %c0_13 = arith.constant 0 : index
    %c0_14 = arith.constant 0 : index
    %13 = vector.load %arg5[%c0_12, %c0_13, %c0_14] : memref<9x64x128xf32, #tpu.memory_space<vmem>>, vector<1x64x128xf32>
    %14 = vector.shape_cast %13 : vector<1x64x128xf32> to vector<64x128xf32>
    %cst_15 = arith.constant dense<0.000000e+00> : vector<32x128xf32>
    %15 = tpu.matmul %12, %14, %cst_15 {dimension_numbers = #tpu.dot_dimension_numbers<[1], [0], [0], [1], [0, 0, 1, 1], [], []>} : vector<32x64xf32>, vector<64x128xf32>, vector<32x128xf32> -> vector<32x128xf32>
    %16 = arith.addf %9, %15 : vector<32x128xf32>
    %c1 = arith.constant 1 : index
    %c0_16 = arith.constant 0 : index
    %c0_17 = arith.constant 0 : index
    %17 = vector.load %arg4[%c1, %c0_16, %c0_17] : memref<9x32x104xf32, #tpu.memory_space<vmem>>, vector<1x32x104xf32>
    %18 = vector.shape_cast %17 : vector<1x32x104xf32> to vector<32x104xf32>
    %cst_18 = arith.constant dense<0.000000e+00> : vector<32x64xf32>
    %19 = tpu.matmul %18, %8, %cst_18 {dimension_numbers = #tpu.dot_dimension_numbers<[1], [0], [0], [1], [0, 0, 1, 1], [], []>} : vector<32x104xf32>, vector<104x64xf32>, vector<32x64xf32> -> vector<32x64xf32>
    %c1_19 = arith.constant 1 : index
    %c0_20 = arith.constant 0 : index
    %c0_21 = arith.constant 0 : index
    %20 = vector.load %arg5[%c1_19, %c0_20, %c0_21] : memref<9x64x128xf32, #tpu.memory_space<vmem>>, vector<1x64x128xf32>
    %21 = vector.shape_cast %20 : vector<1x64x128xf32> to vector<64x128xf32>
    %cst_22 = arith.constant dense<0.000000e+00> : vector<32x128xf32>
    %22 = tpu.matmul %19, %21, %cst_22 {dimension_numbers = #tpu.dot_dimension_numbers<[1], [0], [0], [1], [0, 0, 1, 1], [], []>} : vector<32x64xf32>, vector<64x128xf32>, vector<32x128xf32> -> vector<32x128xf32>
    %23 = arith.addf %16, %22 : vector<32x128xf32>
    %c2 = arith.constant 2 : index
    %c0_23 = arith.constant 0 : index
    %c0_24 = arith.constant 0 : index
    %24 = vector.load %arg4[%c2, %c0_23, %c0_24] : memref<9x32x104xf32, #tpu.memory_space<vmem>>, vector<1x32x104xf32>
    %25 = vector.shape_cast %24 : vector<1x32x104xf32> to vector<32x104xf32>
    %cst_25 = arith.constant dense<0.000000e+00> : vector<32x64xf32>
    %26 = tpu.matmul %25, %8, %cst_25 {dimension_numbers = #tpu.dot_dimension_numbers<[1], [0], [0], [1], [0, 0, 1, 1], [], []>} : vector<32x104xf32>, vector<104x64xf32>, vector<32x64xf32> -> vector<32x64xf32>
    %c2_26 = arith.constant 2 : index
    %c0_27 = arith.constant 0 : index
    %c0_28 = arith.constant 0 : index
    %27 = vector.load %arg5[%c2_26, %c0_27, %c0_28] : memref<9x64x128xf32, #tpu.memory_space<vmem>>, vector<1x64x128xf32>
    %28 = vector.shape_cast %27 : vector<1x64x128xf32> to vector<64x128xf32>
    %cst_29 = arith.constant dense<0.000000e+00> : vector<32x128xf32>
    %29 = tpu.matmul %26, %28, %cst_29 {dimension_numbers = #tpu.dot_dimension_numbers<[1], [0], [0], [1], [0, 0, 1, 1], [], []>} : vector<32x64xf32>, vector<64x128xf32>, vector<32x128xf32> -> vector<32x128xf32>
    %30 = arith.addf %23, %29 : vector<32x128xf32>
    %c3 = arith.constant 3 : index
    %c0_30 = arith.constant 0 : index
    %c0_31 = arith.constant 0 : index
    %31 = vector.load %arg4[%c3, %c0_30, %c0_31] : memref<9x32x104xf32, #tpu.memory_space<vmem>>, vector<1x32x104xf32>
    %32 = vector.shape_cast %31 : vector<1x32x104xf32> to vector<32x104xf32>
    %cst_32 = arith.constant dense<0.000000e+00> : vector<32x64xf32>
    %33 = tpu.matmul %32, %8, %cst_32 {dimension_numbers = #tpu.dot_dimension_numbers<[1], [0], [0], [1], [0, 0, 1, 1], [], []>} : vector<32x104xf32>, vector<104x64xf32>, vector<32x64xf32> -> vector<32x64xf32>
    %c3_33 = arith.constant 3 : index
    %c0_34 = arith.constant 0 : index
    %c0_35 = arith.constant 0 : index
    %34 = vector.load %arg5[%c3_33, %c0_34, %c0_35] : memref<9x64x128xf32, #tpu.memory_space<vmem>>, vector<1x64x128xf32>
    %35 = vector.shape_cast %34 : vector<1x64x128xf32> to vector<64x128xf32>
    %cst_36 = arith.constant dense<0.000000e+00> : vector<32x128xf32>
    %36 = tpu.matmul %33, %35, %cst_36 {dimension_numbers = #tpu.dot_dimension_numbers<[1], [0], [0], [1], [0, 0, 1, 1], [], []>} : vector<32x64xf32>, vector<64x128xf32>, vector<32x128xf32> -> vector<32x128xf32>
    %37 = arith.addf %30, %36 : vector<32x128xf32>
    %c4 = arith.constant 4 : index
    %c0_37 = arith.constant 0 : index
    %c0_38 = arith.constant 0 : index
    %38 = vector.load %arg4[%c4, %c0_37, %c0_38] : memref<9x32x104xf32, #tpu.memory_space<vmem>>, vector<1x32x104xf32>
    %39 = vector.shape_cast %38 : vector<1x32x104xf32> to vector<32x104xf32>
    %cst_39 = arith.constant dense<0.000000e+00> : vector<32x64xf32>
    %40 = tpu.matmul %39, %8, %cst_39 {dimension_numbers = #tpu.dot_dimension_numbers<[1], [0], [0], [1], [0, 0, 1, 1], [], []>} : vector<32x104xf32>, vector<104x64xf32>, vector<32x64xf32> -> vector<32x64xf32>
    %c4_40 = arith.constant 4 : index
    %c0_41 = arith.constant 0 : index
    %c0_42 = arith.constant 0 : index
    %41 = vector.load %arg5[%c4_40, %c0_41, %c0_42] : memref<9x64x128xf32, #tpu.memory_space<vmem>>, vector<1x64x128xf32>
    %42 = vector.shape_cast %41 : vector<1x64x128xf32> to vector<64x128xf32>
    %cst_43 = arith.constant dense<0.000000e+00> : vector<32x128xf32>
    %43 = tpu.matmul %40, %42, %cst_43 {dimension_numbers = #tpu.dot_dimension_numbers<[1], [0], [0], [1], [0, 0, 1, 1], [], []>} : vector<32x64xf32>, vector<64x128xf32>, vector<32x128xf32> -> vector<32x128xf32>
    %44 = arith.addf %37, %43 : vector<32x128xf32>
    %c5 = arith.constant 5 : index
    %c0_44 = arith.constant 0 : index
    %c0_45 = arith.constant 0 : index
    %45 = vector.load %arg4[%c5, %c0_44, %c0_45] : memref<9x32x104xf32, #tpu.memory_space<vmem>>, vector<1x32x104xf32>
    %46 = vector.shape_cast %45 : vector<1x32x104xf32> to vector<32x104xf32>
    %cst_46 = arith.constant dense<0.000000e+00> : vector<32x64xf32>
    %47 = tpu.matmul %46, %8, %cst_46 {dimension_numbers = #tpu.dot_dimension_numbers<[1], [0], [0], [1], [0, 0, 1, 1], [], []>} : vector<32x104xf32>, vector<104x64xf32>, vector<32x64xf32> -> vector<32x64xf32>
    %c5_47 = arith.constant 5 : index
    %c0_48 = arith.constant 0 : index
    %c0_49 = arith.constant 0 : index
    %48 = vector.load %arg5[%c5_47, %c0_48, %c0_49] : memref<9x64x128xf32, #tpu.memory_space<vmem>>, vector<1x64x128xf32>
    %49 = vector.shape_cast %48 : vector<1x64x128xf32> to vector<64x128xf32>
    %cst_50 = arith.constant dense<0.000000e+00> : vector<32x128xf32>
    %50 = tpu.matmul %47, %49, %cst_50 {dimension_numbers = #tpu.dot_dimension_numbers<[1], [0], [0], [1], [0, 0, 1, 1], [], []>} : vector<32x64xf32>, vector<64x128xf32>, vector<32x128xf32> -> vector<32x128xf32>
    %51 = arith.addf %44, %50 : vector<32x128xf32>
    %c6 = arith.constant 6 : index
    %c0_51 = arith.constant 0 : index
    %c0_52 = arith.constant 0 : index
    %52 = vector.load %arg4[%c6, %c0_51, %c0_52] : memref<9x32x104xf32, #tpu.memory_space<vmem>>, vector<1x32x104xf32>
    %53 = vector.shape_cast %52 : vector<1x32x104xf32> to vector<32x104xf32>
    %cst_53 = arith.constant dense<0.000000e+00> : vector<32x64xf32>
    %54 = tpu.matmul %53, %8, %cst_53 {dimension_numbers = #tpu.dot_dimension_numbers<[1], [0], [0], [1], [0, 0, 1, 1], [], []>} : vector<32x104xf32>, vector<104x64xf32>, vector<32x64xf32> -> vector<32x64xf32>
    %c6_54 = arith.constant 6 : index
    %c0_55 = arith.constant 0 : index
    %c0_56 = arith.constant 0 : index
    %55 = vector.load %arg5[%c6_54, %c0_55, %c0_56] : memref<9x64x128xf32, #tpu.memory_space<vmem>>, vector<1x64x128xf32>
    %56 = vector.shape_cast %55 : vector<1x64x128xf32> to vector<64x128xf32>
    %cst_57 = arith.constant dense<0.000000e+00> : vector<32x128xf32>
    %57 = tpu.matmul %54, %56, %cst_57 {dimension_numbers = #tpu.dot_dimension_numbers<[1], [0], [0], [1], [0, 0, 1, 1], [], []>} : vector<32x64xf32>, vector<64x128xf32>, vector<32x128xf32> -> vector<32x128xf32>
    %58 = arith.addf %51, %57 : vector<32x128xf32>
    %c7 = arith.constant 7 : index
    %c0_58 = arith.constant 0 : index
    %c0_59 = arith.constant 0 : index
    %59 = vector.load %arg4[%c7, %c0_58, %c0_59] : memref<9x32x104xf32, #tpu.memory_space<vmem>>, vector<1x32x104xf32>
    %60 = vector.shape_cast %59 : vector<1x32x104xf32> to vector<32x104xf32>
    %cst_60 = arith.constant dense<0.000000e+00> : vector<32x64xf32>
    %61 = tpu.matmul %60, %8, %cst_60 {dimension_numbers = #tpu.dot_dimension_numbers<[1], [0], [0], [1], [0, 0, 1, 1], [], []>} : vector<32x104xf32>, vector<104x64xf32>, vector<32x64xf32> -> vector<32x64xf32>
    %c7_61 = arith.constant 7 : index
    %c0_62 = arith.constant 0 : index
    %c0_63 = arith.constant 0 : index
    %62 = vector.load %arg5[%c7_61, %c0_62, %c0_63] : memref<9x64x128xf32, #tpu.memory_space<vmem>>, vector<1x64x128xf32>
    %63 = vector.shape_cast %62 : vector<1x64x128xf32> to vector<64x128xf32>
    %cst_64 = arith.constant dense<0.000000e+00> : vector<32x128xf32>
    %64 = tpu.matmul %61, %63, %cst_64 {dimension_numbers = #tpu.dot_dimension_numbers<[1], [0], [0], [1], [0, 0, 1, 1], [], []>} : vector<32x64xf32>, vector<64x128xf32>, vector<32x128xf32> -> vector<32x128xf32>
    %65 = arith.addf %58, %64 : vector<32x128xf32>
    %c8 = arith.constant 8 : index
    %c0_65 = arith.constant 0 : index
    %c0_66 = arith.constant 0 : index
    %66 = vector.load %arg4[%c8, %c0_65, %c0_66] : memref<9x32x104xf32, #tpu.memory_space<vmem>>, vector<1x32x104xf32>
    %67 = vector.shape_cast %66 : vector<1x32x104xf32> to vector<32x104xf32>
    %cst_67 = arith.constant dense<0.000000e+00> : vector<32x64xf32>
    %68 = tpu.matmul %67, %8, %cst_67 {dimension_numbers = #tpu.dot_dimension_numbers<[1], [0], [0], [1], [0, 0, 1, 1], [], []>} : vector<32x104xf32>, vector<104x64xf32>, vector<32x64xf32> -> vector<32x64xf32>
    %c8_68 = arith.constant 8 : index
    %c0_69 = arith.constant 0 : index
    %c0_70 = arith.constant 0 : index
    %69 = vector.load %arg5[%c8_68, %c0_69, %c0_70] : memref<9x64x128xf32, #tpu.memory_space<vmem>>, vector<1x64x128xf32>
    %70 = vector.shape_cast %69 : vector<1x64x128xf32> to vector<64x128xf32>
    %cst_71 = arith.constant dense<0.000000e+00> : vector<32x128xf32>
    %71 = tpu.matmul %68, %70, %cst_71 {dimension_numbers = #tpu.dot_dimension_numbers<[1], [0], [0], [1], [0, 0, 1, 1], [], []>} : vector<32x64xf32>, vector<64x128xf32>, vector<32x128xf32> -> vector<32x128xf32>
    %72 = arith.addf %65, %71 : vector<32x128xf32>
    %c0_72 = arith.constant 0 : index
    %c0_73 = arith.constant 0 : index
    %73 = vector.load %arg6[%c0_72, %c0_73] : memref<1x128xf32, #tpu.memory_space<vmem>>, vector<1x128xf32>
    %74 = vector.broadcast %73 : vector<1x128xf32> to vector<32x128xf32>
    %75 = arith.addf %72, %74 : vector<32x128xf32>
    %cst_74 = arith.constant 0.000000e+00 : f32
    %76 = vector.broadcast %cst_74 : f32 to vector<32x128xf32>
    %77 = arith.maximumf %75, %76 : vector<32x128xf32>
    %cst_75 = arith.constant 0.000000e+00 : f32
    %78 = vector.broadcast %cst_75 : f32 to vector<104x64xf32>
    %c0_76 = arith.constant 0 : index
    %c0_77 = arith.constant 0 : index
    %c0_78 = arith.constant 0 : index
    %79 = vector.load %arg7[%c0_76, %c0_77, %c0_78] : memref<9x104x32xf32, #tpu.memory_space<vmem>>, vector<1x104x32xf32>
    %80 = vector.shape_cast %79 : vector<1x104x32xf32> to vector<104x32xf32>
    %cst_79 = arith.constant dense<0.000000e+00> : vector<104x128xf32>
    %81 = tpu.matmul %80, %77, %cst_79 {dimension_numbers = #tpu.dot_dimension_numbers<[1], [0], [0], [1], [0, 0, 1, 1], [], []>} : vector<104x32xf32>, vector<32x128xf32>, vector<104x128xf32> -> vector<104x128xf32>
    %c0_80 = arith.constant 0 : index
    %c0_81 = arith.constant 0 : index
    %c0_82 = arith.constant 0 : index
    %82 = vector.load %arg8[%c0_80, %c0_81, %c0_82] : memref<9x128x64xf32, #tpu.memory_space<vmem>>, vector<1x128x64xf32>
    %83 = vector.shape_cast %82 : vector<1x128x64xf32> to vector<128x64xf32>
    %cst_83 = arith.constant dense<0.000000e+00> : vector<104x64xf32>
    %84 = tpu.matmul %81, %83, %cst_83 {dimension_numbers = #tpu.dot_dimension_numbers<[1], [0], [0], [1], [0, 0, 1, 1], [], []>} : vector<104x128xf32>, vector<128x64xf32>, vector<104x64xf32> -> vector<104x64xf32>
    %85 = arith.addf %78, %84 : vector<104x64xf32>
    %c1_84 = arith.constant 1 : index
    %c0_85 = arith.constant 0 : index
    %c0_86 = arith.constant 0 : index
    %86 = vector.load %arg7[%c1_84, %c0_85, %c0_86] : memref<9x104x32xf32, #tpu.memory_space<vmem>>, vector<1x104x32xf32>
    %87 = vector.shape_cast %86 : vector<1x104x32xf32> to vector<104x32xf32>
    %cst_87 = arith.constant dense<0.000000e+00> : vector<104x128xf32>
    %88 = tpu.matmul %87, %77, %cst_87 {dimension_numbers = #tpu.dot_dimension_numbers<[1], [0], [0], [1], [0, 0, 1, 1], [], []>} : vector<104x32xf32>, vector<32x128xf32>, vector<104x128xf32> -> vector<104x128xf32>
    %c1_88 = arith.constant 1 : index
    %c0_89 = arith.constant 0 : index
    %c0_90 = arith.constant 0 : index
    %89 = vector.load %arg8[%c1_88, %c0_89, %c0_90] : memref<9x128x64xf32, #tpu.memory_space<vmem>>, vector<1x128x64xf32>
    %90 = vector.shape_cast %89 : vector<1x128x64xf32> to vector<128x64xf32>
    %cst_91 = arith.constant dense<0.000000e+00> : vector<104x64xf32>
    %91 = tpu.matmul %88, %90, %cst_91 {dimension_numbers = #tpu.dot_dimension_numbers<[1], [0], [0], [1], [0, 0, 1, 1], [], []>} : vector<104x128xf32>, vector<128x64xf32>, vector<104x64xf32> -> vector<104x64xf32>
    %92 = arith.addf %85, %91 : vector<104x64xf32>
    %c2_92 = arith.constant 2 : index
    %c0_93 = arith.constant 0 : index
    %c0_94 = arith.constant 0 : index
    %93 = vector.load %arg7[%c2_92, %c0_93, %c0_94] : memref<9x104x32xf32, #tpu.memory_space<vmem>>, vector<1x104x32xf32>
    %94 = vector.shape_cast %93 : vector<1x104x32xf32> to vector<104x32xf32>
    %cst_95 = arith.constant dense<0.000000e+00> : vector<104x128xf32>
    %95 = tpu.matmul %94, %77, %cst_95 {dimension_numbers = #tpu.dot_dimension_numbers<[1], [0], [0], [1], [0, 0, 1, 1], [], []>} : vector<104x32xf32>, vector<32x128xf32>, vector<104x128xf32> -> vector<104x128xf32>
    %c2_96 = arith.constant 2 : index
    %c0_97 = arith.constant 0 : index
    %c0_98 = arith.constant 0 : index
    %96 = vector.load %arg8[%c2_96, %c0_97, %c0_98] : memref<9x128x64xf32, #tpu.memory_space<vmem>>, vector<1x128x64xf32>
    %97 = vector.shape_cast %96 : vector<1x128x64xf32> to vector<128x64xf32>
    %cst_99 = arith.constant dense<0.000000e+00> : vector<104x64xf32>
    %98 = tpu.matmul %95, %97, %cst_99 {dimension_numbers = #tpu.dot_dimension_numbers<[1], [0], [0], [1], [0, 0, 1, 1], [], []>} : vector<104x128xf32>, vector<128x64xf32>, vector<104x64xf32> -> vector<104x64xf32>
    %99 = arith.addf %92, %98 : vector<104x64xf32>
    %c3_100 = arith.constant 3 : index
    %c0_101 = arith.constant 0 : index
    %c0_102 = arith.constant 0 : index
    %100 = vector.load %arg7[%c3_100, %c0_101, %c0_102] : memref<9x104x32xf32, #tpu.memory_space<vmem>>, vector<1x104x32xf32>
    %101 = vector.shape_cast %100 : vector<1x104x32xf32> to vector<104x32xf32>
    %cst_103 = arith.constant dense<0.000000e+00> : vector<104x128xf32>
    %102 = tpu.matmul %101, %77, %cst_103 {dimension_numbers = #tpu.dot_dimension_numbers<[1], [0], [0], [1], [0, 0, 1, 1], [], []>} : vector<104x32xf32>, vector<32x128xf32>, vector<104x128xf32> -> vector<104x128xf32>
    %c3_104 = arith.constant 3 : index
    %c0_105 = arith.constant 0 : index
    %c0_106 = arith.constant 0 : index
    %103 = vector.load %arg8[%c3_104, %c0_105, %c0_106] : memref<9x128x64xf32, #tpu.memory_space<vmem>>, vector<1x128x64xf32>
    %104 = vector.shape_cast %103 : vector<1x128x64xf32> to vector<128x64xf32>
    %cst_107 = arith.constant dense<0.000000e+00> : vector<104x64xf32>
    %105 = tpu.matmul %102, %104, %cst_107 {dimension_numbers = #tpu.dot_dimension_numbers<[1], [0], [0], [1], [0, 0, 1, 1], [], []>} : vector<104x128xf32>, vector<128x64xf32>, vector<104x64xf32> -> vector<104x64xf32>
    %106 = arith.addf %99, %105 : vector<104x64xf32>
    %c4_108 = arith.constant 4 : index
    %c0_109 = arith.constant 0 : index
    %c0_110 = arith.constant 0 : index
    %107 = vector.load %arg7[%c4_108, %c0_109, %c0_110] : memref<9x104x32xf32, #tpu.memory_space<vmem>>, vector<1x104x32xf32>
    %108 = vector.shape_cast %107 : vector<1x104x32xf32> to vector<104x32xf32>
    %cst_111 = arith.constant dense<0.000000e+00> : vector<104x128xf32>
    %109 = tpu.matmul %108, %77, %cst_111 {dimension_numbers = #tpu.dot_dimension_numbers<[1], [0], [0], [1], [0, 0, 1, 1], [], []>} : vector<104x32xf32>, vector<32x128xf32>, vector<104x128xf32> -> vector<104x128xf32>
    %c4_112 = arith.constant 4 : index
    %c0_113 = arith.constant 0 : index
    %c0_114 = arith.constant 0 : index
    %110 = vector.load %arg8[%c4_112, %c0_113, %c0_114] : memref<9x128x64xf32, #tpu.memory_space<vmem>>, vector<1x128x64xf32>
    %111 = vector.shape_cast %110 : vector<1x128x64xf32> to vector<128x64xf32>
    %cst_115 = arith.constant dense<0.000000e+00> : vector<104x64xf32>
    %112 = tpu.matmul %109, %111, %cst_115 {dimension_numbers = #tpu.dot_dimension_numbers<[1], [0], [0], [1], [0, 0, 1, 1], [], []>} : vector<104x128xf32>, vector<128x64xf32>, vector<104x64xf32> -> vector<104x64xf32>
    %113 = arith.addf %106, %112 : vector<104x64xf32>
    %c5_116 = arith.constant 5 : index
    %c0_117 = arith.constant 0 : index
    %c0_118 = arith.constant 0 : index
    %114 = vector.load %arg7[%c5_116, %c0_117, %c0_118] : memref<9x104x32xf32, #tpu.memory_space<vmem>>, vector<1x104x32xf32>
    %115 = vector.shape_cast %114 : vector<1x104x32xf32> to vector<104x32xf32>
    %cst_119 = arith.constant dense<0.000000e+00> : vector<104x128xf32>
    %116 = tpu.matmul %115, %77, %cst_119 {dimension_numbers = #tpu.dot_dimension_numbers<[1], [0], [0], [1], [0, 0, 1, 1], [], []>} : vector<104x32xf32>, vector<32x128xf32>, vector<104x128xf32> -> vector<104x128xf32>
    %c5_120 = arith.constant 5 : index
    %c0_121 = arith.constant 0 : index
    %c0_122 = arith.constant 0 : index
    %117 = vector.load %arg8[%c5_120, %c0_121, %c0_122] : memref<9x128x64xf32, #tpu.memory_space<vmem>>, vector<1x128x64xf32>
    %118 = vector.shape_cast %117 : vector<1x128x64xf32> to vector<128x64xf32>
    %cst_123 = arith.constant dense<0.000000e+00> : vector<104x64xf32>
    %119 = tpu.matmul %116, %118, %cst_123 {dimension_numbers = #tpu.dot_dimension_numbers<[1], [0], [0], [1], [0, 0, 1, 1], [], []>} : vector<104x128xf32>, vector<128x64xf32>, vector<104x64xf32> -> vector<104x64xf32>
    %120 = arith.addf %113, %119 : vector<104x64xf32>
    %c6_124 = arith.constant 6 : index
    %c0_125 = arith.constant 0 : index
    %c0_126 = arith.constant 0 : index
    %121 = vector.load %arg7[%c6_124, %c0_125, %c0_126] : memref<9x104x32xf32, #tpu.memory_space<vmem>>, vector<1x104x32xf32>
    %122 = vector.shape_cast %121 : vector<1x104x32xf32> to vector<104x32xf32>
    %cst_127 = arith.constant dense<0.000000e+00> : vector<104x128xf32>
    %123 = tpu.matmul %122, %77, %cst_127 {dimension_numbers = #tpu.dot_dimension_numbers<[1], [0], [0], [1], [0, 0, 1, 1], [], []>} : vector<104x32xf32>, vector<32x128xf32>, vector<104x128xf32> -> vector<104x128xf32>
    %c6_128 = arith.constant 6 : index
    %c0_129 = arith.constant 0 : index
    %c0_130 = arith.constant 0 : index
    %124 = vector.load %arg8[%c6_128, %c0_129, %c0_130] : memref<9x128x64xf32, #tpu.memory_space<vmem>>, vector<1x128x64xf32>
    %125 = vector.shape_cast %124 : vector<1x128x64xf32> to vector<128x64xf32>
    %cst_131 = arith.constant dense<0.000000e+00> : vector<104x64xf32>
    %126 = tpu.matmul %123, %125, %cst_131 {dimension_numbers = #tpu.dot_dimension_numbers<[1], [0], [0], [1], [0, 0, 1, 1], [], []>} : vector<104x128xf32>, vector<128x64xf32>, vector<104x64xf32> -> vector<104x64xf32>
    %127 = arith.addf %120, %126 : vector<104x64xf32>
    %c7_132 = arith.constant 7 : index
    %c0_133 = arith.constant 0 : index
    %c0_134 = arith.constant 0 : index
    %128 = vector.load %arg7[%c7_132, %c0_133, %c0_134] : memref<9x104x32xf32, #tpu.memory_space<vmem>>, vector<1x104x32xf32>
    %129 = vector.shape_cast %128 : vector<1x104x32xf32> to vector<104x32xf32>
    %cst_135 = arith.constant dense<0.000000e+00> : vector<104x128xf32>
    %130 = tpu.matmul %129, %77, %cst_135 {dimension_numbers = #tpu.dot_dimension_numbers<[1], [0], [0], [1], [0, 0, 1, 1], [], []>} : vector<104x32xf32>, vector<32x128xf32>, vector<104x128xf32> -> vector<104x128xf32>
    %c7_136 = arith.constant 7 : index
    %c0_137 = arith.constant 0 : index
    %c0_138 = arith.constant 0 : index
    %131 = vector.load %arg8[%c7_136, %c0_137, %c0_138] : memref<9x128x64xf32, #tpu.memory_space<vmem>>, vector<1x128x64xf32>
    %132 = vector.shape_cast %131 : vector<1x128x64xf32> to vector<128x64xf32>
    %cst_139 = arith.constant dense<0.000000e+00> : vector<104x64xf32>
    %133 = tpu.matmul %130, %132, %cst_139 {dimension_numbers = #tpu.dot_dimension_numbers<[1], [0], [0], [1], [0, 0, 1, 1], [], []>} : vector<104x128xf32>, vector<128x64xf32>, vector<104x64xf32> -> vector<104x64xf32>
    %134 = arith.addf %127, %133 : vector<104x64xf32>
    %c8_140 = arith.constant 8 : index
    %c0_141 = arith.constant 0 : index
    %c0_142 = arith.constant 0 : index
    %135 = vector.load %arg7[%c8_140, %c0_141, %c0_142] : memref<9x104x32xf32, #tpu.memory_space<vmem>>, vector<1x104x32xf32>
    %136 = vector.shape_cast %135 : vector<1x104x32xf32> to vector<104x32xf32>
    %cst_143 = arith.constant dense<0.000000e+00> : vector<104x128xf32>
    %137 = tpu.matmul %136, %77, %cst_143 {dimension_numbers = #tpu.dot_dimension_numbers<[1], [0], [0], [1], [0, 0, 1, 1], [], []>} : vector<104x32xf32>, vector<32x128xf32>, vector<104x128xf32> -> vector<104x128xf32>
    %c8_144 = arith.constant 8 : index
    %c0_145 = arith.constant 0 : index
    %c0_146 = arith.constant 0 : index
    %138 = vector.load %arg8[%c8_144, %c0_145, %c0_146] : memref<9x128x64xf32, #tpu.memory_space<vmem>>, vector<1x128x64xf32>
    %139 = vector.shape_cast %138 : vector<1x128x64xf32> to vector<128x64xf32>
    %cst_147 = arith.constant dense<0.000000e+00> : vector<104x64xf32>
    %140 = tpu.matmul %137, %139, %cst_147 {dimension_numbers = #tpu.dot_dimension_numbers<[1], [0], [0], [1], [0, 0, 1, 1], [], []>} : vector<104x128xf32>, vector<128x64xf32>, vector<104x64xf32> -> vector<104x64xf32>
    %141 = arith.addf %134, %140 : vector<104x64xf32>
    %c0_148 = arith.constant 0 : index
    %c0_149 = arith.constant 0 : index
    %142 = vector.load %arg9[%c0_148, %c0_149] : memref<1x64xf32, #tpu.memory_space<vmem>>, vector<1x64xf32>
    %143 = vector.broadcast %142 : vector<1x64xf32> to vector<104x64xf32>
    %144 = arith.addf %141, %143 : vector<104x64xf32>
    %cst_150 = arith.constant 0.000000e+00 : f32
    %145 = vector.broadcast %cst_150 : f32 to vector<104x64xf32>
    %c0_151 = arith.constant 0 : index
    %c0_152 = arith.constant 0 : index
    %c0_153 = arith.constant 0 : index
    %146 = vector.load %arg10[%c0_151, %c0_152, %c0_153] : memref<9x104x104xf32, #tpu.memory_space<vmem>>, vector<1x104x104xf32>
    %147 = vector.shape_cast %146 : vector<1x104x104xf32> to vector<104x104xf32>
    %cst_154 = arith.constant dense<0.000000e+00> : vector<104x64xf32>
    %148 = tpu.matmul %147, %8, %cst_154 {dimension_numbers = #tpu.dot_dimension_numbers<[1], [0], [0], [1], [0, 0, 1, 1], [], []>} : vector<104x104xf32>, vector<104x64xf32>, vector<104x64xf32> -> vector<104x64xf32>
    %c0_155 = arith.constant 0 : index
    %c0_156 = arith.constant 0 : index
    %c0_157 = arith.constant 0 : index
    %149 = vector.load %arg11[%c0_155, %c0_156, %c0_157] : memref<9x64x64xf32, #tpu.memory_space<vmem>>, vector<1x64x64xf32>
    %150 = vector.shape_cast %149 : vector<1x64x64xf32> to vector<64x64xf32>
    %cst_158 = arith.constant dense<0.000000e+00> : vector<104x64xf32>
    %151 = tpu.matmul %148, %150, %cst_158 {dimension_numbers = #tpu.dot_dimension_numbers<[1], [0], [0], [1], [0, 0, 1, 1], [], []>} : vector<104x64xf32>, vector<64x64xf32>, vector<104x64xf32> -> vector<104x64xf32>
    %152 = arith.addf %145, %151 : vector<104x64xf32>
    %cst_159 = arith.constant dense<0.000000e+00> : vector<104x64xf32>
    %153 = tpu.matmul %147, %144, %cst_159 {dimension_numbers = #tpu.dot_dimension_numbers<[1], [0], [0], [1], [0, 0, 1, 1], [], []>} : vector<104x104xf32>, vector<104x64xf32>, vector<104x64xf32> -> vector<104x64xf32>
    %c0_160 = arith.constant 0 : index
    %c0_161 = arith.constant 0 : index
    %c0_162 = arith.constant 0 : index
    %154 = vector.load %arg12[%c0_160, %c0_161, %c0_162] : memref<9x64x64xf32, #tpu.memory_space<vmem>>, vector<1x64x64xf32>
    %155 = vector.shape_cast %154 : vector<1x64x64xf32> to vector<64x64xf32>
    %cst_163 = arith.constant dense<0.000000e+00> : vector<104x64xf32>
    %156 = tpu.matmul %153, %155, %cst_163 {dimension_numbers = #tpu.dot_dimension_numbers<[1], [0], [0], [1], [0, 0, 1, 1], [], []>} : vector<104x64xf32>, vector<64x64xf32>, vector<104x64xf32> -> vector<104x64xf32>
    %157 = arith.addf %152, %156 : vector<104x64xf32>
    %c1_164 = arith.constant 1 : index
    %c0_165 = arith.constant 0 : index
    %c0_166 = arith.constant 0 : index
    %158 = vector.load %arg10[%c1_164, %c0_165, %c0_166] : memref<9x104x104xf32, #tpu.memory_space<vmem>>, vector<1x104x104xf32>
    %159 = vector.shape_cast %158 : vector<1x104x104xf32> to vector<104x104xf32>
    %cst_167 = arith.constant dense<0.000000e+00> : vector<104x64xf32>
    %160 = tpu.matmul %159, %8, %cst_167 {dimension_numbers = #tpu.dot_dimension_numbers<[1], [0], [0], [1], [0, 0, 1, 1], [], []>} : vector<104x104xf32>, vector<104x64xf32>, vector<104x64xf32> -> vector<104x64xf32>
    %c1_168 = arith.constant 1 : index
    %c0_169 = arith.constant 0 : index
    %c0_170 = arith.constant 0 : index
    %161 = vector.load %arg11[%c1_168, %c0_169, %c0_170] : memref<9x64x64xf32, #tpu.memory_space<vmem>>, vector<1x64x64xf32>
    %162 = vector.shape_cast %161 : vector<1x64x64xf32> to vector<64x64xf32>
    %cst_171 = arith.constant dense<0.000000e+00> : vector<104x64xf32>
    %163 = tpu.matmul %160, %162, %cst_171 {dimension_numbers = #tpu.dot_dimension_numbers<[1], [0], [0], [1], [0, 0, 1, 1], [], []>} : vector<104x64xf32>, vector<64x64xf32>, vector<104x64xf32> -> vector<104x64xf32>
    %164 = arith.addf %157, %163 : vector<104x64xf32>
    %cst_172 = arith.constant dense<0.000000e+00> : vector<104x64xf32>
    %165 = tpu.matmul %159, %144, %cst_172 {dimension_numbers = #tpu.dot_dimension_numbers<[1], [0], [0], [1], [0, 0, 1, 1], [], []>} : vector<104x104xf32>, vector<104x64xf32>, vector<104x64xf32> -> vector<104x64xf32>
    %c1_173 = arith.constant 1 : index
    %c0_174 = arith.constant 0 : index
    %c0_175 = arith.constant 0 : index
    %166 = vector.load %arg12[%c1_173, %c0_174, %c0_175] : memref<9x64x64xf32, #tpu.memory_space<vmem>>, vector<1x64x64xf32>
    %167 = vector.shape_cast %166 : vector<1x64x64xf32> to vector<64x64xf32>
    %cst_176 = arith.constant dense<0.000000e+00> : vector<104x64xf32>
    %168 = tpu.matmul %165, %167, %cst_176 {dimension_numbers = #tpu.dot_dimension_numbers<[1], [0], [0], [1], [0, 0, 1, 1], [], []>} : vector<104x64xf32>, vector<64x64xf32>, vector<104x64xf32> -> vector<104x64xf32>
    %169 = arith.addf %164, %168 : vector<104x64xf32>
    %c2_177 = arith.constant 2 : index
    %c0_178 = arith.constant 0 : index
    %c0_179 = arith.constant 0 : index
    %170 = vector.load %arg10[%c2_177, %c0_178, %c0_179] : memref<9x104x104xf32, #tpu.memory_space<vmem>>, vector<1x104x104xf32>
    %171 = vector.shape_cast %170 : vector<1x104x104xf32> to vector<104x104xf32>
    %cst_180 = arith.constant dense<0.000000e+00> : vector<104x64xf32>
    %172 = tpu.matmul %171, %8, %cst_180 {dimension_numbers = #tpu.dot_dimension_numbers<[1], [0], [0], [1], [0, 0, 1, 1], [], []>} : vector<104x104xf32>, vector<104x64xf32>, vector<104x64xf32> -> vector<104x64xf32>
    %c2_181 = arith.constant 2 : index
    %c0_182 = arith.constant 0 : index
    %c0_183 = arith.constant 0 : index
    %173 = vector.load %arg11[%c2_181, %c0_182, %c0_183] : memref<9x64x64xf32, #tpu.memory_space<vmem>>, vector<1x64x64xf32>
    %174 = vector.shape_cast %173 : vector<1x64x64xf32> to vector<64x64xf32>
    %cst_184 = arith.constant dense<0.000000e+00> : vector<104x64xf32>
    %175 = tpu.matmul %172, %174, %cst_184 {dimension_numbers = #tpu.dot_dimension_numbers<[1], [0], [0], [1], [0, 0, 1, 1], [], []>} : vector<104x64xf32>, vector<64x64xf32>, vector<104x64xf32> -> vector<104x64xf32>
    %176 = arith.addf %169, %175 : vector<104x64xf32>
    %cst_185 = arith.constant dense<0.000000e+00> : vector<104x64xf32>
    %177 = tpu.matmul %171, %144, %cst_185 {dimension_numbers = #tpu.dot_dimension_numbers<[1], [0], [0], [1], [0, 0, 1, 1], [], []>} : vector<104x104xf32>, vector<104x64xf32>, vector<104x64xf32> -> vector<104x64xf32>
    %c2_186 = arith.constant 2 : index
    %c0_187 = arith.constant 0 : index
    %c0_188 = arith.constant 0 : index
    %178 = vector.load %arg12[%c2_186, %c0_187, %c0_188] : memref<9x64x64xf32, #tpu.memory_space<vmem>>, vector<1x64x64xf32>
    %179 = vector.shape_cast %178 : vector<1x64x64xf32> to vector<64x64xf32>
    %cst_189 = arith.constant dense<0.000000e+00> : vector<104x64xf32>
    %180 = tpu.matmul %177, %179, %cst_189 {dimension_numbers = #tpu.dot_dimension_numbers<[1], [0], [0], [1], [0, 0, 1, 1], [], []>} : vector<104x64xf32>, vector<64x64xf32>, vector<104x64xf32> -> vector<104x64xf32>
    %181 = arith.addf %176, %180 : vector<104x64xf32>
    %c3_190 = arith.constant 3 : index
    %c0_191 = arith.constant 0 : index
    %c0_192 = arith.constant 0 : index
    %182 = vector.load %arg10[%c3_190, %c0_191, %c0_192] : memref<9x104x104xf32, #tpu.memory_space<vmem>>, vector<1x104x104xf32>
    %183 = vector.shape_cast %182 : vector<1x104x104xf32> to vector<104x104xf32>
    %cst_193 = arith.constant dense<0.000000e+00> : vector<104x64xf32>
    %184 = tpu.matmul %183, %8, %cst_193 {dimension_numbers = #tpu.dot_dimension_numbers<[1], [0], [0], [1], [0, 0, 1, 1], [], []>} : vector<104x104xf32>, vector<104x64xf32>, vector<104x64xf32> -> vector<104x64xf32>
    %c3_194 = arith.constant 3 : index
    %c0_195 = arith.constant 0 : index
    %c0_196 = arith.constant 0 : index
    %185 = vector.load %arg11[%c3_194, %c0_195, %c0_196] : memref<9x64x64xf32, #tpu.memory_space<vmem>>, vector<1x64x64xf32>
    %186 = vector.shape_cast %185 : vector<1x64x64xf32> to vector<64x64xf32>
    %cst_197 = arith.constant dense<0.000000e+00> : vector<104x64xf32>
    %187 = tpu.matmul %184, %186, %cst_197 {dimension_numbers = #tpu.dot_dimension_numbers<[1], [0], [0], [1], [0, 0, 1, 1], [], []>} : vector<104x64xf32>, vector<64x64xf32>, vector<104x64xf32> -> vector<104x64xf32>
    %188 = arith.addf %181, %187 : vector<104x64xf32>
    %cst_198 = arith.constant dense<0.000000e+00> : vector<104x64xf32>
    %189 = tpu.matmul %183, %144, %cst_198 {dimension_numbers = #tpu.dot_dimension_numbers<[1], [0], [0], [1], [0, 0, 1, 1], [], []>} : vector<104x104xf32>, vector<104x64xf32>, vector<104x64xf32> -> vector<104x64xf32>
    %c3_199 = arith.constant 3 : index
    %c0_200 = arith.constant 0 : index
    %c0_201 = arith.constant 0 : index
    %190 = vector.load %arg12[%c3_199, %c0_200, %c0_201] : memref<9x64x64xf32, #tpu.memory_space<vmem>>, vector<1x64x64xf32>
    %191 = vector.shape_cast %190 : vector<1x64x64xf32> to vector<64x64xf32>
    %cst_202 = arith.constant dense<0.000000e+00> : vector<104x64xf32>
    %192 = tpu.matmul %189, %191, %cst_202 {dimension_numbers = #tpu.dot_dimension_numbers<[1], [0], [0], [1], [0, 0, 1, 1], [], []>} : vector<104x64xf32>, vector<64x64xf32>, vector<104x64xf32> -> vector<104x64xf32>
    %193 = arith.addf %188, %192 : vector<104x64xf32>
    %c4_203 = arith.constant 4 : index
    %c0_204 = arith.constant 0 : index
    %c0_205 = arith.constant 0 : index
    %194 = vector.load %arg10[%c4_203, %c0_204, %c0_205] : memref<9x104x104xf32, #tpu.memory_space<vmem>>, vector<1x104x104xf32>
    %195 = vector.shape_cast %194 : vector<1x104x104xf32> to vector<104x104xf32>
    %cst_206 = arith.constant dense<0.000000e+00> : vector<104x64xf32>
    %196 = tpu.matmul %195, %8, %cst_206 {dimension_numbers = #tpu.dot_dimension_numbers<[1], [0], [0], [1], [0, 0, 1, 1], [], []>} : vector<104x104xf32>, vector<104x64xf32>, vector<104x64xf32> -> vector<104x64xf32>
    %c4_207 = arith.constant 4 : index
    %c0_208 = arith.constant 0 : index
    %c0_209 = arith.constant 0 : index
    %197 = vector.load %arg11[%c4_207, %c0_208, %c0_209] : memref<9x64x64xf32, #tpu.memory_space<vmem>>, vector<1x64x64xf32>
    %198 = vector.shape_cast %197 : vector<1x64x64xf32> to vector<64x64xf32>
    %cst_210 = arith.constant dense<0.000000e+00> : vector<104x64xf32>
    %199 = tpu.matmul %196, %198, %cst_210 {dimension_numbers = #tpu.dot_dimension_numbers<[1], [0], [0], [1], [0, 0, 1, 1], [], []>} : vector<104x64xf32>, vector<64x64xf32>, vector<104x64xf32> -> vector<104x64xf32>
    %200 = arith.addf %193, %199 : vector<104x64xf32>
    %cst_211 = arith.constant dense<0.000000e+00> : vector<104x64xf32>
    %201 = tpu.matmul %195, %144, %cst_211 {dimension_numbers = #tpu.dot_dimension_numbers<[1], [0], [0], [1], [0, 0, 1, 1], [], []>} : vector<104x104xf32>, vector<104x64xf32>, vector<104x64xf32> -> vector<104x64xf32>
    %c4_212 = arith.constant 4 : index
    %c0_213 = arith.constant 0 : index
    %c0_214 = arith.constant 0 : index
    %202 = vector.load %arg12[%c4_212, %c0_213, %c0_214] : memref<9x64x64xf32, #tpu.memory_space<vmem>>, vector<1x64x64xf32>
    %203 = vector.shape_cast %202 : vector<1x64x64xf32> to vector<64x64xf32>
    %cst_215 = arith.constant dense<0.000000e+00> : vector<104x64xf32>
    %204 = tpu.matmul %201, %203, %cst_215 {dimension_numbers = #tpu.dot_dimension_numbers<[1], [0], [0], [1], [0, 0, 1, 1], [], []>} : vector<104x64xf32>, vector<64x64xf32>, vector<104x64xf32> -> vector<104x64xf32>
    %205 = arith.addf %200, %204 : vector<104x64xf32>
    %c5_216 = arith.constant 5 : index
    %c0_217 = arith.constant 0 : index
    %c0_218 = arith.constant 0 : index
    %206 = vector.load %arg10[%c5_216, %c0_217, %c0_218] : memref<9x104x104xf32, #tpu.memory_space<vmem>>, vector<1x104x104xf32>
    %207 = vector.shape_cast %206 : vector<1x104x104xf32> to vector<104x104xf32>
    %cst_219 = arith.constant dense<0.000000e+00> : vector<104x64xf32>
    %208 = tpu.matmul %207, %8, %cst_219 {dimension_numbers = #tpu.dot_dimension_numbers<[1], [0], [0], [1], [0, 0, 1, 1], [], []>} : vector<104x104xf32>, vector<104x64xf32>, vector<104x64xf32> -> vector<104x64xf32>
    %c5_220 = arith.constant 5 : index
    %c0_221 = arith.constant 0 : index
    %c0_222 = arith.constant 0 : index
    %209 = vector.load %arg11[%c5_220, %c0_221, %c0_222] : memref<9x64x64xf32, #tpu.memory_space<vmem>>, vector<1x64x64xf32>
    %210 = vector.shape_cast %209 : vector<1x64x64xf32> to vector<64x64xf32>
    %cst_223 = arith.constant dense<0.000000e+00> : vector<104x64xf32>
    %211 = tpu.matmul %208, %210, %cst_223 {dimension_numbers = #tpu.dot_dimension_numbers<[1], [0], [0], [1], [0, 0, 1, 1], [], []>} : vector<104x64xf32>, vector<64x64xf32>, vector<104x64xf32> -> vector<104x64xf32>
    %212 = arith.addf %205, %211 : vector<104x64xf32>
    %cst_224 = arith.constant dense<0.000000e+00> : vector<104x64xf32>
    %213 = tpu.matmul %207, %144, %cst_224 {dimension_numbers = #tpu.dot_dimension_numbers<[1], [0], [0], [1], [0, 0, 1, 1], [], []>} : vector<104x104xf32>, vector<104x64xf32>, vector<104x64xf32> -> vector<104x64xf32>
    %c5_225 = arith.constant 5 : index
    %c0_226 = arith.constant 0 : index
    %c0_227 = arith.constant 0 : index
    %214 = vector.load %arg12[%c5_225, %c0_226, %c0_227] : memref<9x64x64xf32, #tpu.memory_space<vmem>>, vector<1x64x64xf32>
    %215 = vector.shape_cast %214 : vector<1x64x64xf32> to vector<64x64xf32>
    %cst_228 = arith.constant dense<0.000000e+00> : vector<104x64xf32>
    %216 = tpu.matmul %213, %215, %cst_228 {dimension_numbers = #tpu.dot_dimension_numbers<[1], [0], [0], [1], [0, 0, 1, 1], [], []>} : vector<104x64xf32>, vector<64x64xf32>, vector<104x64xf32> -> vector<104x64xf32>
    %217 = arith.addf %212, %216 : vector<104x64xf32>
    %c6_229 = arith.constant 6 : index
    %c0_230 = arith.constant 0 : index
    %c0_231 = arith.constant 0 : index
    %218 = vector.load %arg10[%c6_229, %c0_230, %c0_231] : memref<9x104x104xf32, #tpu.memory_space<vmem>>, vector<1x104x104xf32>
    %219 = vector.shape_cast %218 : vector<1x104x104xf32> to vector<104x104xf32>
    %cst_232 = arith.constant dense<0.000000e+00> : vector<104x64xf32>
    %220 = tpu.matmul %219, %8, %cst_232 {dimension_numbers = #tpu.dot_dimension_numbers<[1], [0], [0], [1], [0, 0, 1, 1], [], []>} : vector<104x104xf32>, vector<104x64xf32>, vector<104x64xf32> -> vector<104x64xf32>
    %c6_233 = arith.constant 6 : index
    %c0_234 = arith.constant 0 : index
    %c0_235 = arith.constant 0 : index
    %221 = vector.load %arg11[%c6_233, %c0_234, %c0_235] : memref<9x64x64xf32, #tpu.memory_space<vmem>>, vector<1x64x64xf32>
    %222 = vector.shape_cast %221 : vector<1x64x64xf32> to vector<64x64xf32>
    %cst_236 = arith.constant dense<0.000000e+00> : vector<104x64xf32>
    %223 = tpu.matmul %220, %222, %cst_236 {dimension_numbers = #tpu.dot_dimension_numbers<[1], [0], [0], [1], [0, 0, 1, 1], [], []>} : vector<104x64xf32>, vector<64x64xf32>, vector<104x64xf32> -> vector<104x64xf32>
    %224 = arith.addf %217, %223 : vector<104x64xf32>
    %cst_237 = arith.constant dense<0.000000e+00> : vector<104x64xf32>
    %225 = tpu.matmul %219, %144, %cst_237 {dimension_numbers = #tpu.dot_dimension_numbers<[1], [0], [0], [1], [0, 0, 1, 1], [], []>} : vector<104x104xf32>, vector<104x64xf32>, vector<104x64xf32> -> vector<104x64xf32>
    %c6_238 = arith.constant 6 : index
    %c0_239 = arith.constant 0 : index
    %c0_240 = arith.constant 0 : index
    %226 = vector.load %arg12[%c6_238, %c0_239, %c0_240] : memref<9x64x64xf32, #tpu.memory_space<vmem>>, vector<1x64x64xf32>
    %227 = vector.shape_cast %226 : vector<1x64x64xf32> to vector<64x64xf32>
    %cst_241 = arith.constant dense<0.000000e+00> : vector<104x64xf32>
    %228 = tpu.matmul %225, %227, %cst_241 {dimension_numbers = #tpu.dot_dimension_numbers<[1], [0], [0], [1], [0, 0, 1, 1], [], []>} : vector<104x64xf32>, vector<64x64xf32>, vector<104x64xf32> -> vector<104x64xf32>
    %229 = arith.addf %224, %228 : vector<104x64xf32>
    %c7_242 = arith.constant 7 : index
    %c0_243 = arith.constant 0 : index
    %c0_244 = arith.constant 0 : index
    %230 = vector.load %arg10[%c7_242, %c0_243, %c0_244] : memref<9x104x104xf32, #tpu.memory_space<vmem>>, vector<1x104x104xf32>
    %231 = vector.shape_cast %230 : vector<1x104x104xf32> to vector<104x104xf32>
    %cst_245 = arith.constant dense<0.000000e+00> : vector<104x64xf32>
    %232 = tpu.matmul %231, %8, %cst_245 {dimension_numbers = #tpu.dot_dimension_numbers<[1], [0], [0], [1], [0, 0, 1, 1], [], []>} : vector<104x104xf32>, vector<104x64xf32>, vector<104x64xf32> -> vector<104x64xf32>
    %c7_246 = arith.constant 7 : index
    %c0_247 = arith.constant 0 : index
    %c0_248 = arith.constant 0 : index
    %233 = vector.load %arg11[%c7_246, %c0_247, %c0_248] : memref<9x64x64xf32, #tpu.memory_space<vmem>>, vector<1x64x64xf32>
    %234 = vector.shape_cast %233 : vector<1x64x64xf32> to vector<64x64xf32>
    %cst_249 = arith.constant dense<0.000000e+00> : vector<104x64xf32>
    %235 = tpu.matmul %232, %234, %cst_249 {dimension_numbers = #tpu.dot_dimension_numbers<[1], [0], [0], [1], [0, 0, 1, 1], [], []>} : vector<104x64xf32>, vector<64x64xf32>, vector<104x64xf32> -> vector<104x64xf32>
    %236 = arith.addf %229, %235 : vector<104x64xf32>
    %cst_250 = arith.constant dense<0.000000e+00> : vector<104x64xf32>
    %237 = tpu.matmul %231, %144, %cst_250 {dimension_numbers = #tpu.dot_dimension_numbers<[1], [0], [0], [1], [0, 0, 1, 1], [], []>} : vector<104x104xf32>, vector<104x64xf32>, vector<104x64xf32> -> vector<104x64xf32>
    %c7_251 = arith.constant 7 : index
    %c0_252 = arith.constant 0 : index
    %c0_253 = arith.constant 0 : index
    %238 = vector.load %arg12[%c7_251, %c0_252, %c0_253] : memref<9x64x64xf32, #tpu.memory_space<vmem>>, vector<1x64x64xf32>
    %239 = vector.shape_cast %238 : vector<1x64x64xf32> to vector<64x64xf32>
    %cst_254 = arith.constant dense<0.000000e+00> : vector<104x64xf32>
    %240 = tpu.matmul %237, %239, %cst_254 {dimension_numbers = #tpu.dot_dimension_numbers<[1], [0], [0], [1], [0, 0, 1, 1], [], []>} : vector<104x64xf32>, vector<64x64xf32>, vector<104x64xf32> -> vector<104x64xf32>
    %241 = arith.addf %236, %240 : vector<104x64xf32>
    %c8_255 = arith.constant 8 : index
    %c0_256 = arith.constant 0 : index
    %c0_257 = arith.constant 0 : index
    %242 = vector.load %arg10[%c8_255, %c0_256, %c0_257] : memref<9x104x104xf32, #tpu.memory_space<vmem>>, vector<1x104x104xf32>
    %243 = vector.shape_cast %242 : vector<1x104x104xf32> to vector<104x104xf32>
    %cst_258 = arith.constant dense<0.000000e+00> : vector<104x64xf32>
    %244 = tpu.matmul %243, %8, %cst_258 {dimension_numbers = #tpu.dot_dimension_numbers<[1], [0], [0], [1], [0, 0, 1, 1], [], []>} : vector<104x104xf32>, vector<104x64xf32>, vector<104x64xf32> -> vector<104x64xf32>
    %c8_259 = arith.constant 8 : index
    %c0_260 = arith.constant 0 : index
    %c0_261 = arith.constant 0 : index
    %245 = vector.load %arg11[%c8_259, %c0_260, %c0_261] : memref<9x64x64xf32, #tpu.memory_space<vmem>>, vector<1x64x64xf32>
    %246 = vector.shape_cast %245 : vector<1x64x64xf32> to vector<64x64xf32>
    %cst_262 = arith.constant dense<0.000000e+00> : vector<104x64xf32>
    %247 = tpu.matmul %244, %246, %cst_262 {dimension_numbers = #tpu.dot_dimension_numbers<[1], [0], [0], [1], [0, 0, 1, 1], [], []>} : vector<104x64xf32>, vector<64x64xf32>, vector<104x64xf32> -> vector<104x64xf32>
    %248 = arith.addf %241, %247 : vector<104x64xf32>
    %cst_263 = arith.constant dense<0.000000e+00> : vector<104x64xf32>
    %249 = tpu.matmul %243, %144, %cst_263 {dimension_numbers = #tpu.dot_dimension_numbers<[1], [0], [0], [1], [0, 0, 1, 1], [], []>} : vector<104x104xf32>, vector<104x64xf32>, vector<104x64xf32> -> vector<104x64xf32>
    %c8_264 = arith.constant 8 : index
    %c0_265 = arith.constant 0 : index
    %c0_266 = arith.constant 0 : index
    %250 = vector.load %arg12[%c8_264, %c0_265, %c0_266] : memref<9x64x64xf32, #tpu.memory_space<vmem>>, vector<1x64x64xf32>
    %251 = vector.shape_cast %250 : vector<1x64x64xf32> to vector<64x64xf32>
    %cst_267 = arith.constant dense<0.000000e+00> : vector<104x64xf32>
    %252 = tpu.matmul %249, %251, %cst_267 {dimension_numbers = #tpu.dot_dimension_numbers<[1], [0], [0], [1], [0, 0, 1, 1], [], []>} : vector<104x64xf32>, vector<64x64xf32>, vector<104x64xf32> -> vector<104x64xf32>
    %253 = arith.addf %248, %252 : vector<104x64xf32>
    %c0_268 = arith.constant 0 : index
    %c0_269 = arith.constant 0 : index
    %254 = vector.load %arg13[%c0_268, %c0_269] : memref<1x64xf32, #tpu.memory_space<vmem>>, vector<1x64xf32>
    %255 = vector.broadcast %254 : vector<1x64xf32> to vector<104x64xf32>
    %256 = arith.addf %253, %255 : vector<104x64xf32>
    %cst_270 = arith.constant 0.000000e+00 : f32
    %257 = vector.broadcast %cst_270 : f32 to vector<104x64xf32>
    %258 = arith.maximumf %256, %257 : vector<104x64xf32>
    %c0_271 = arith.constant 0 : index
    %c0_272 = arith.constant 0 : index
    %259 = vector.load %arg14[%c0_271, %c0_272] : memref<64x128xf32, #tpu.memory_space<vmem>>, vector<64x128xf32>
    %cst_273 = arith.constant dense<0.000000e+00> : vector<104x128xf32>
    %260 = tpu.matmul %258, %259, %cst_273 {dimension_numbers = #tpu.dot_dimension_numbers<[1], [0], [0], [1], [0, 0, 1, 1], [], []>} : vector<104x64xf32>, vector<64x128xf32>, vector<104x128xf32> -> vector<104x128xf32>
    %c0_274 = arith.constant 0 : index
    %c0_275 = arith.constant 0 : index
    %261 = vector.load %arg15[%c0_274, %c0_275] : memref<1x128xf32, #tpu.memory_space<vmem>>, vector<1x128xf32>
    %262 = vector.broadcast %261 : vector<1x128xf32> to vector<104x128xf32>
    %263 = arith.addf %260, %262 : vector<104x128xf32>
    %c0_276 = arith.constant 0 : index
    %c0_277 = arith.constant 0 : index
    %c0_278 = arith.constant 0 : index
    %264 = vector.load %arg16[%c0_276, %c0_277, %c0_278] : memref<1x104x128xf32, #tpu.memory_space<vmem>>, vector<1x104x128xf32>
    %265 = vector.shape_cast %264 : vector<1x104x128xf32> to vector<104x128xf32>
    %266 = vector.shape_cast %263 : vector<104x128xf32> to vector<1x104x128xf32>
    tpu.vector_store %arg16[%c0_276, %c0_277, %c0_278], %266 {strides = array<i32>} : memref<1x104x128xf32, #tpu.memory_space<vmem>>, vector<1x104x128xf32>,
    return
  }
  func.func @transform_0(%arg0: i32) -> (i32, i32, i32) {
    %c0_i32 = arith.constant 0 : i32
    %c0_i32_0 = arith.constant 0 : i32
    %c0_i32_1 = arith.constant 0 : i32
    return %arg0, %c0_i32, %c0_i32_0 : i32, i32, i32
  }
  func.func @transform_1(%arg0: i32) -> (i32, i32) {
    %c0_i32 = arith.constant 0 : i32
    %c0_i32_0 = arith.constant 0 : i32
    %c0_i32_1 = arith.constant 0 : i32
    return %c0_i32, %c0_i32_0 : i32, i32
  }
  func.func @transform_2(%arg0: i32) -> (i32, i32) {
    %c0_i32 = arith.constant 0 : i32
    %c0_i32_0 = arith.constant 0 : i32
    %c0_i32_1 = arith.constant 0 : i32
    return %c0_i32, %c0_i32_0 : i32, i32
  }
  func.func @transform_3(%arg0: i32) -> (i32, i32, i32) {
    %c0_i32 = arith.constant 0 : i32
    %c0_i32_0 = arith.constant 0 : i32
    %c0_i32_1 = arith.constant 0 : i32
    %c0_i32_2 = arith.constant 0 : i32
    return %c0_i32, %c0_i32_0, %c0_i32_1 : i32, i32, i32
  }
  func.func @transform_4(%arg0: i32) -> (i32, i32, i32) {
    %c0_i32 = arith.constant 0 : i32
    %c0_i32_0 = arith.constant 0 : i32
    %c0_i32_1 = arith.constant 0 : i32
    %c0_i32_2 = arith.constant 0 : i32
    return %c0_i32, %c0_i32_0, %c0_i32_1 : i32, i32, i32
  }
  func.func @transform_5(%arg0: i32) -> (i32, i32) {
    %c0_i32 = arith.constant 0 : i32
    %c0_i32_0 = arith.constant 0 : i32
    %c0_i32_1 = arith.constant 0 : i32
    return %c0_i32, %c0_i32_0 : i32, i32
  }
  func.func @transform_6(%arg0: i32) -> (i32, i32, i32) {
    %c0_i32 = arith.constant 0 : i32
    %c0_i32_0 = arith.constant 0 : i32
    %c0_i32_1 = arith.constant 0 : i32
    %c0_i32_2 = arith.constant 0 : i32
    return %c0_i32, %c0_i32_0, %c0_i32_1 : i32, i32, i32
  }
  func.func @transform_7(%arg0: i32) -> (i32, i32, i32) {
    %c0_i32 = arith.constant 0 : i32
    %c0_i32_0 = arith.constant 0 : i32
    %c0_i32_1 = arith.constant 0 : i32
    %c0_i32_2 = arith.constant 0 : i32
    return %c0_i32, %c0_i32_0, %c0_i32_1 : i32, i32, i32
  }
  func.func @transform_8(%arg0: i32) -> (i32, i32) {
    %c0_i32 = arith.constant 0 : i32
    %c0_i32_0 = arith.constant 0 : i32
    %c0_i32_1 = arith.constant 0 : i32
    return %c0_i32, %c0_i32_0 : i32, i32
  }
  func.func @transform_9(%arg0: i32) -> (i32, i32, i32) {
    %c0_i32 = arith.constant 0 : i32
    %c0_i32_0 = arith.constant 0 : i32
    %c0_i32_1 = arith.constant 0 : i32
    %c0_i32_2 = arith.constant 0 : i32
    return %c0_i32, %c0_i32_0, %c0_i32_1 : i32, i32, i32
  }
  func.func @transform_10(%arg0: i32) -> (i32, i32, i32) {
    %c0_i32 = arith.constant 0 : i32
    %c0_i32_0 = arith.constant 0 : i32
    %c0_i32_1 = arith.constant 0 : i32
    %c0_i32_2 = arith.constant 0 : i32
    return %c0_i32, %c0_i32_0, %c0_i32_1 : i32, i32, i32
  }
  func.func @transform_11(%arg0: i32) -> (i32, i32, i32) {
    %c0_i32 = arith.constant 0 : i32
    %c0_i32_0 = arith.constant 0 : i32
    %c0_i32_1 = arith.constant 0 : i32
    %c0_i32_2 = arith.constant 0 : i32
    return %c0_i32, %c0_i32_0, %c0_i32_1 : i32, i32, i32
  }
  func.func @transform_12(%arg0: i32) -> (i32, i32) {
    %c0_i32 = arith.constant 0 : i32
    %c0_i32_0 = arith.constant 0 : i32
    %c0_i32_1 = arith.constant 0 : i32
    return %c0_i32, %c0_i32_0 : i32, i32
  }
  func.func @transform_13(%arg0: i32) -> (i32, i32) {
    %c0_i32 = arith.constant 0 : i32
    %c0_i32_0 = arith.constant 0 : i32
    %c0_i32_1 = arith.constant 0 : i32
    return %c0_i32, %c0_i32_0 : i32, i32
  }
  func.func @transform_14(%arg0: i32) -> (i32, i32) {
    %c0_i32 = arith.constant 0 : i32
    %c0_i32_0 = arith.constant 0 : i32
    %c0_i32_1 = arith.constant 0 : i32
    return %c0_i32, %c0_i32_0 : i32, i32
  }
  func.func @transform_15(%arg0: i32) -> (i32, i32, i32) {
    %c0_i32 = arith.constant 0 : i32
    %c0_i32_0 = arith.constant 0 : i32
    %c0_i32_1 = arith.constant 0 : i32
    return %arg0, %c0_i32, %c0_i32_0 : i32, i32, i32
  }
}

</mosaic_0001>

<bundles_post_ra>
// kernel: unet_forward.1
= control target key start
LH: loop header
LB: loop body
LE: loop exit
PB: predicated region body
PF: predicated region fallthrough
CT: control target
= control target key end

     0   :  { %s8448_s18 = smov 0   ;;  %s12950_s0 = inlined_call_operand.vmem [shape: f32[2,104,16], index: 0, kind: input, shape index: {}]   ;;  %s12951_s1 = inlined_call_operand.vmem [shape: f32[16,64], index: 1, kind: input, shape index: {}]   ;;  %s12952_s2 = inlined_call_operand.vmem [shape: f32[1,64], index: 2, kind: input, shape index: {}]   ;;  %s12953_s3 = inlined_call_operand.vmem [shape: f32[9,32,104], index: 3, kind: input, shape index: {}]   ;;  %s12954_s4 = inlined_call_operand.vmem [shape: f32[9,64,128], index: 4, kind: input, shape index: {}]   ;;  %s12955_s5 = inlined_call_operand.vmem [shape: f32[1,128], index: 5, kind: input, shape index: {}]   ;;  %s12956_s6 = inlined_call_operand.vmem [shape: f32[9,104,32], index: 6, kind: input, shape index: {}]   ;;  %s12957_s7 = inlined_call_operand.vmem [shape: f32[9,128,64], index: 7, kind: input, shape index: {}]   ;;  %s12958_s8 = inlined_call_operand.vmem [shape: f32[1,64], index: 8, kind: input, shape index: {}]   ;;  %s12959_s9 = inlined_call_operand.vmem [shape: f32[9,104,104], index: 9, kind: input, shape index: {}]   ;;  %s12960_s10 = inlined_call_operand.vmem [shape: f32[9,64,64], index: 10, kind: input, shape index: {}]   ;;  %s12961_s11 = inlined_call_operand.vmem [shape: f32[9,64,64], index: 11, kind: input, shape index: {}]   ;;  %s12962_s12 = inlined_call_operand.vmem [shape: f32[1,64], index: 12, kind: input, shape index: {}]   ;;  %s12963_s13 = inlined_call_operand.vmem [shape: f32[64,128], index: 13, kind: input, shape index: {}]   ;;  %s12964_s14 = inlined_call_operand.vmem [shape: f32[1,128], index: 14, kind: input, shape index: {}]   ;;  %s12965_s15 = inlined_call_operand.vmem [shape: f32[2,104,128], index: 15, kind: output, shape index: {}]  }
   0x1 LB: > { %s7039_s19 = sadd.s32 4294967295, %s8366_s18   ;;  %p7043_p0 = scmp.ge.s32.totalorder %s8366_s18, 1  ;;  %s8366_s18 = sphi %s8448_s18, %s25_s18  }
   0x2   : > { %p437_p1 = scmp.lt.s32.totalorder %s8366_s18, 3 }
   0x4   : > { %p438_p2 = pnand %p7043_p0, %p437_p1 }
   0x6   : > { %441 = sbr.rel (%p438_p2) target bundleno = 3110 (0xc26), region = 80 }
   0xb   : > { %v509_v0 = vld [vmem:[%s12951_s1 + $0x8] sm:$0xff]  ;;  %v508_v1 = vld [vmem:[%s12951_s1] sm:$0xff]  ;;  %p485_p3 = scmp.lt.s32.totalorder %s7039_s19, 1  ;;  %vm514_vm0 = vcmask 130048   ;;  %vm627_vm1 = vcmask 850944   ;;  %v7102_v57 = vld [vmem:[%s12954_s4 + $0xb8] sm:$0xff] }
   0xc   : > { %568 = vmatpush.msra.mxu0 %v509_v0  ;;  %v8317_v27 = vld [vmem:[%s12952_s2] ss:$0 sm:$0xff]  ;;  %v7101_v58 = vld [vmem:[%s12954_s4 + $0xb0] sm:$0xff]  ;;  %v7100_v59 = vld [vmem:[%s12954_s4 + $0xa8] sm:$0xff]  ;;  %vm732_vm2 = vcmask 523264   ;;  %vm1540_vm3 = vcmask 261120  }
   0xd   : > { %s13180_s19 = smov (!%p485_p3, %s7039_s19), 1  ;;  %v7063_v55 = vld [vmem:[%s12953_s3 + $0x20] sm:$0xff]  ;;  %v7064_v61 = vld [vmem:[%s12953_s3 + $0x28] sm:$0xff]  ;;  %v7098_v63 = vld [vmem:[%s12954_s4 + $0x98] sm:$0xff] }
   0xe   : > { %569 = vmatpush.msra.mxu0 %v508_v1  ;;  %s8308_s24 = smul.u32 104, %s13180_s19  ;;  %v7087_v56 = vld [vmem:[%s12953_s3 + $0x40] sm:$0xff]  ;;  %v7088_v62 = vld [vmem:[%s12953_s3 + $0x48] sm:$0xff]  ;;  %v7097_v1 = vld [vmem:[%s12954_s4 + $0x90] sm:$0xff] }
   0xf   : > { %v7099_v60 = vld [vmem:[%s12954_s4 + $0xa0] sm:$0xff] }
  0x10   : > { %s489_s27 = scalar_lea.vmem %s12950_s0, %s8308_s24  ;;  %v623_v0 = vld [vmem:[%s12953_s3] sm:$0xff]  ;;  %s12932_s23 = scalar_lea.vmem %s12965_s15, %s8308_s24 }
  0x11   : > { %v495_v2 = vld [vmem:[%s489_s27] sm:$0xff]  ;;  %v496_v3 = vld [vmem:[%s489_s27 + $0x8] sm:$0xff]  ;;  %v497_v4 = vld [vmem:[%s489_s27 + $0x10] sm:$0xff] }
  0x12   : > { %7046 = vmatmul.msk.f32.vlgmr.msra.gmra.mxu0 %vm514_vm0, %v495_v2  ;;  %v498_v5 = vld [vmem:[%s489_s27 + $0x18] sm:$0xff]  ;;  %v499_v6 = vld [vmem:[%s489_s27 + $0x20] sm:$0xff]  ;;  %v500_v7 = vld [vmem:[%s489_s27 + $0x28] sm:$0xff] }
  0x13   : > { %v501_v8 = vld [vmem:[%s489_s27 + $0x30] sm:$0xff]  ;;  %v502_v9 = vld [vmem:[%s489_s27 + $0x38] sm:$0xff]  ;;  %v503_v10 = vld [vmem:[%s489_s27 + $0x40] sm:$0xff] }
  0x14   : > { %v504_v11 = vld [vmem:[%s489_s27 + $0x48] sm:$0xff]  ;;  %v505_v12 = vld [vmem:[%s489_s27 + $0x50] sm:$0xff]  ;;  %v506_v13 = vld [vmem:[%s489_s27 + $0x58] sm:$0xff] }
  0x15   : > { %v507_v14 = vld [vmem:[%s489_s27 + $0x60] sm:$0xff]  ;;  %v7078_v2 = vld [vmem:[%s12954_s4 + $0x78] sm:$0xff] }
  0x16   : > { %753 = vmatpush.msra.mxu3 %v7078_v2  ;;  %v7148_v2 = vld [vmem:[%s12953_s3 + $0xa8] sm:$0xff] }
  0x1a   : > { %7047 = vmatmul.msk.f32.gmra.mxu0 %vm514_vm0, %v496_v3  ;;  %v7077_v3 = vld [vmem:[%s12954_s4 + $0x70] sm:$0xff] }
  0x1b   : > { %754 = vmatpush.msra.mxu3 %v7077_v3  ;;  %v7208_v3 = vld [vmem:[%s12953_s3 + $0x108] sm:$0xff] }
  0x22   : > { %7048 = vmatmul.msk.f32.gmra.mxu0 %vm514_vm0, %v497_v4  ;;  %v7096_v4 = vld [vmem:[%s12954_s4 + $0x88] sm:$0xff] }
  0x2a   : > { %7049 = vmatmul.msk.f32.gmra.mxu0 %vm514_vm0, %v498_v5  ;;  %v7076_v5 = vld [vmem:[%s12954_s4 + $0x68] sm:$0xff] }
  0x2b   : > { %755 = vmatpush.msra.mxu3 %v7076_v5  ;;  %v7209_v5 = vld [vmem:[%s12953_s3 + $0x110] sm:$0xff] }
  0x32   : > { %7050 = vmatmul.msk.f32.gmra.mxu0 %vm514_vm0, %v499_v6  ;;  %v7095_v6 = vld [vmem:[%s12954_s4 + $0x80] sm:$0xff] }
  0x3a   : > { %7051 = vmatmul.msk.f32.gmra.mxu0 %vm514_vm0, %v500_v7  ;;  %v624_v7 = vld [vmem:[%s12953_s3 + $0x8] sm:$0xff] }
  0x42   : > { %7052 = vmatmul.msk.f32.gmra.mxu0 %vm514_vm0, %v501_v8  ;;  %v7075_v8 = vld [vmem:[%s12954_s4 + $0x60] sm:$0xff] }
  0x43   : > { %756 = vmatpush.msra.mxu3 %v7075_v8  ;;  %v7187_v8 = vld [vmem:[%s12953_s3 + $0xe0] sm:$0xff] }
  0x4a   : > { %7053 = vmatmul.msk.f32.gmra.mxu0 %vm514_vm0, %v502_v9  ;;  %v7065_v9 = vld [vmem:[%s12953_s3 + $0x30] sm:$0xff] }
  0x52   : > { %7054 = vmatmul.msk.f32.gmra.mxu0 %vm514_vm0, %v503_v10  ;;  %v7089_v10 = vld [vmem:[%s12953_s3 + $0x50] sm:$0xff] }
  0x5a   : > { %7055 = vmatmul.msk.f32.gmra.mxu0 %vm514_vm0, %v504_v11  ;;  %v7074_v11 = vld [vmem:[%s12954_s4 + $0x58] sm:$0xff] }
  0x5b   : > { %757 = vmatpush.msra.mxu3 %v7074_v11  ;;  %v7188_v11 = vld [vmem:[%s12953_s3 + $0xe8] sm:$0xff] }
  0x62   : > { %7056 = vmatmul.msk.f32.gmra.mxu0 %vm514_vm0, %v505_v12  ;;  %v7073_v12 = vld [vmem:[%s12954_s4 + $0x50] sm:$0xff] }
  0x63   : > { %758 = vmatpush.msra.mxu3 %v7073_v12 }
  0x6a   : > { %7057 = vmatmul.msk.f32.gmra.mxu0 %vm514_vm0, %v506_v13  ;;  %v7072_v13 = vld [vmem:[%s12954_s4 + $0x48] sm:$0xff] }
  0x6b   : > { %759 = vmatpush.msra.mxu3 %v7072_v13 }
  0x72   : > { %7058 = vmatmul.msk.f32.gmra.mxu0 %vm514_vm0, %v507_v14  ;;  %v625_v14 = vld [vmem:[%s12953_s3 + $0x10] sm:$0xff] }
  0x8f   : > { %v8483_v15 = vpop.f32.mrf.mxu0 }
  0x90   : > { %v572_v51 = vadd.f32 %v8317_v27, %v8483_v15  ;;  %v7071_v15 = vld [vmem:[%s12954_s4 + $0x40] sm:$0xff] }
  0x91   : > { %760 = vmatpush.msra.mxu3 %v7071_v15 }
  0x92   : > { %v8546_v54 = vmax.f32 %v572_v51, 0.0 }
  0x94   : > { %13039 = vst [vmem:[#allocation14_spill] sm:$0xff] %v8546_v54 }
  0x97   : > { %v574_v16 = vpop.f32.mrf.mxu0 }
  0x98   : > { %v575_v49 = vadd.f32 %v8317_v27, %v574_v16  ;;  %v7066_v16 = vld [vmem:[%s12953_s3 + $0x38] sm:$0xff] }
  0x9a   : > { %v8541_v53 = vmax.f32 %v575_v49, 0.0  ;;  %v7129_v49 = vld [vmem:[%s12953_s3 + $0x90] sm:$0xff] }
  0x9c   : > { %13038 = vst [vmem:[#allocation13_spill] sm:$0xff] %v8541_v53 }
  0x9f   : > { %v577_v17 = vpop.f32.mrf.mxu0 }
  0xa0   : > { %v578_v47 = vadd.f32 %v8317_v27, %v577_v17  ;;  %v7090_v17 = vld [vmem:[%s12953_s3 + $0x58] sm:$0xff] }
  0xa2   : > { %v8536_v52 = vmax.f32 %v578_v47, 0.0 }
  0xa4   : > { %13037 = vst [vmem:[#allocation12_spill] sm:$0xff] %v8536_v52 }
  0xa7   : > { %v580_v18 = vpop.f32.mrf.mxu0 }
  0xa8   : > { %v581_v45 = vadd.f32 %v8317_v27, %v580_v18  ;;  %v676_v18 = vld [vmem:[%s12954_s4 + $0x38] sm:$0xff] }
  0xa9   : > { %794 = vmatpush.msrb.mxu3 %v676_v18  ;;  %v7122_v18 = vld [vmem:[%s12954_s4 + $0xf8] sm:$0xff] }
  0xaa   : > { %v8530_v50 = vmax.f32 %v581_v45, 0.0  ;;  %v7128_v45 = vld [vmem:[%s12953_s3 + $0x88] sm:$0xff] }
  0xac   : > { %13036 = vst [vmem:[#allocation11_spill] sm:$0xff] %v8530_v50 }
  0xaf   : > { %v583_v19 = vpop.f32.mrf.mxu0 }
  0xb0   : > { %v584_v43 = vadd.f32 %v8317_v27, %v583_v19  ;;  %v675_v19 = vld [vmem:[%s12954_s4 + $0x30] sm:$0xff] }
  0xb1   : > { %795 = vmatpush.msrb.mxu3 %v675_v19  ;;  %v7121_v19 = vld [vmem:[%s12954_s4 + $0xf0] sm:$0xff] }
  0xb2   : > { %v8525_v48 = vmax.f32 %v584_v43, 0.0 }
  0xb4   : > { %13035 = vst [vmem:[#allocation10_spill] sm:$0xff] %v8525_v48 }
  0xb7   : > { %v586_v20 = vpop.f32.mrf.mxu0 }
  0xb8   : > { %v587_v41 = vadd.f32 %v8317_v27, %v586_v20  ;;  %v674_v20 = vld [vmem:[%s12954_s4 + $0x28] sm:$0xff] }
  0xb9   : > { %796 = vmatpush.msrb.mxu3 %v674_v20  ;;  %v7142_v20 = vld [vmem:[%s12954_s4 + $0x138] sm:$0xff] }
  0xba   : > { %v8520_v46 = vmax.f32 %v587_v41, 0.0 }
  0xbc   : > { %13034 = vst [vmem:[#allocation9_spill] sm:$0xff] %v8520_v46 }
  0xbf   : > { %v589_v21 = vpop.f32.mrf.mxu0 }
  0xc0   : > { %v590_v39 = vadd.f32 %v8317_v27, %v589_v21  ;;  %v626_v21 = vld [vmem:[%s12953_s3 + $0x18] sm:$0xff] }
  0xc2   : > { %v8515_v44 = vmax.f32 %v590_v39, 0.0  ;;  %v7127_v39 = vld [vmem:[%s12953_s3 + $0x80] sm:$0xff] }
  0xc4   : > { %13033 = vst [vmem:[#allocation8_spill] sm:$0xff] %v8515_v44 }
  0xc7   : > { %v592_v22 = vpop.f32.mrf.mxu0 }
  0xc8   : > { %v593_v37 = vadd.f32 %v8317_v27, %v592_v22  ;;  %v673_v22 = vld [vmem:[%s12954_s4 + $0x20] sm:$0xff] }
  0xc9   : > { %797 = vmatpush.msrb.mxu3 %v673_v22  ;;  %v7141_v22 = vld [vmem:[%s12954_s4 + $0x130] sm:$0xff] }
  0xca   : > { %v8510_v42 = vmax.f32 %v593_v37, 0.0 }
  0xcc   : > { %13032 = vst [vmem:[#allocation7_spill] sm:$0xff] %v8510_v42 }
  0xcf   : > { %v595_v23 = vpop.f32.mrf.mxu0 }
  0xd0   : > { %v596_v35 = vadd.f32 %v8317_v27, %v595_v23  ;;  %v672_v23 = vld [vmem:[%s12954_s4 + $0x18] sm:$0xff] }
  0xd1   : > { %798 = vmatpush.msrb.mxu3 %v672_v23 }
  0xd2   : > { %v8505_v40 = vmax.f32 %v596_v35, 0.0 }
  0xd4   : > { %13031 = vst [vmem:[#allocation6_spill] sm:$0xff] %v8505_v40 }
  0xd7   : > { %v598_v24 = vpop.f32.mrf.mxu0 }
  0xd8   : > { %v599_v33 = vadd.f32 %v8317_v27, %v598_v24  ;;  %v671_v24 = vld [vmem:[%s12954_s4 + $0x10] sm:$0xff] }
  0xd9   : > { %799 = vmatpush.msrb.mxu3 %v671_v24  ;;  %v7119_v24 = vld [vmem:[%s12954_s4 + $0xe0] sm:$0xff] }
  0xda   : > { %v8500_v38 = vmax.f32 %v599_v33, 0.0 }
  0xdc   : > { %13030 = vst [vmem:[#allocation5_spill] sm:$0xff] %v8500_v38 }
  0xdf   : > { %v601_v25 = vpop.f32.mrf.mxu0 }
  0xe0   : > { %v602_v31 = vadd.f32 %v8317_v27, %v601_v25  ;;  %v670_v25 = vld [vmem:[%s12954_s4 + $0x8] sm:$0xff] }
  0xe1   : > { %800 = vmatpush.msrb.mxu3 %v670_v25  ;;  %v7140_v25 = vld [vmem:[%s12954_s4 + $0x128] sm:$0xff] }
  0xe2   : > { %v8495_v36 = vmax.f32 %v602_v31, 0.0 }
  0xe4   : > { %13029 = vst [vmem:[#allocation4_spill] sm:$0xff] %v8495_v36 }
  0xe7   : > { %v604_v26 = vpop.f32.mrf.mxu0 }
  0xe8   : > { %v605_v29 = vadd.f32 %v8317_v27, %v604_v26  ;;  %v669_v26 = vld [vmem:[%s12954_s4] sm:$0xff] }
  0xe9   : > { %801 = vmatpush.msrb.mxu3 %v669_v26 }
  0xea   : > { %v8490_v34 = vmax.f32 %v605_v29, 0.0 }
  0xec   : > { %13028 = vst [vmem:[#allocation3_spill] sm:$0xff] %v8490_v34 }
  0xef   : > { %v607_v28 = vpop.f32.mrf.mxu0 }
  0xf0   : > { %v608_v30 = vadd.f32 %v8317_v27, %v607_v28 }
  0xf2   : > { %v8488_v32 = vmax.f32 %v608_v30, 0.0 }
  0xf4   : > { %13027 = vst [vmem:[#allocation2_spill] sm:$0xff] %v8488_v32  ;;  %643 = vmatpush.msrb.mxu0 %v8488_v32  ;;  %697 = vmatpush.msra.mxu2 %v8488_v32 }
  0xf5   : > { %835 = vmatpush.msra.mxu1 %v8488_v32 }
  0xf6   : > { %644 = vmatpush.msrb.mxu0 %v8490_v34  ;;  %698 = vmatpush.msra.mxu2 %v8490_v34 }
  0xf7   : > { %836 = vmatpush.msra.mxu1 %v8490_v34 }
  0xf8   : > { %645 = vmatpush.msrb.mxu0 %v8495_v36  ;;  %699 = vmatpush.msra.mxu2 %v8495_v36 }
  0xf9   : > { %837 = vmatpush.msra.mxu1 %v8495_v36 }
  0xfa   : > { %646 = vmatpush.msrb.mxu0 %v8500_v38  ;;  %700 = vmatpush.msra.mxu2 %v8500_v38 }
  0xfb   : > { %838 = vmatpush.msra.mxu1 %v8500_v38 }
  0xfc   : > { %647 = vmatpush.msrb.mxu0 %v8505_v40  ;;  %701 = vmatpush.msra.mxu2 %v8505_v40 }
  0xfd   : > { %839 = vmatpush.msra.mxu1 %v8505_v40 }
  0xfe   : > { %648 = vmatpush.msrb.mxu0 %v8510_v42  ;;  %702 = vmatpush.msra.mxu2 %v8510_v42 }
  0xff   : > { %840 = vmatpush.msra.mxu1 %v8510_v42 }
 0x100   : > { %649 = vmatpush.msrb.mxu0 %v8515_v44  ;;  %703 = vmatpush.msra.mxu2 %v8515_v44 }
 0x101   : > { %841 = vmatpush.msra.mxu1 %v8515_v44 }
 0x102   : > { %650 = vmatpush.msrb.mxu0 %v8520_v46  ;;  %704 = vmatpush.msra.mxu2 %v8520_v46 }
 0x103   : > { %842 = vmatpush.msra.mxu1 %v8520_v46 }
 0x104   : > { %651 = vmatpush.msrb.mxu0 %v8525_v48  ;;  %705 = vmatpush.msra.mxu2 %v8525_v48 }
 0x105   : > { %843 = vmatpush.msra.mxu1 %v8525_v48 }
 0x106   : > { %652 = vmatpush.msrb.mxu0 %v8530_v50  ;;  %706 = vmatpush.msra.mxu2 %v8530_v50 }
 0x107   : > { %844 = vmatpush.msra.mxu1 %v8530_v50 }
 0x108   : > { %653 = vmatpush.msrb.mxu0 %v8536_v52  ;;  %707 = vmatpush.msra.mxu2 %v8536_v52 }
 0x109   : > { %845 = vmatpush.msra.mxu1 %v8536_v52 }
 0x10a   : > { %654 = vmatpush.msrb.mxu0 %v8541_v53  ;;  %708 = vmatpush.msra.mxu2 %v8541_v53 }
 0x10b   : > { %846 = vmatpush.msra.mxu1 %v8541_v53 }
 0x10c   : > { %655 = vmatpush.msrb.mxu0 %v8546_v54  ;;  %709 = vmatpush.msra.mxu2 %v8546_v54 }
 0x10d   : > { %847 = vmatpush.msra.mxu1 %v8546_v54  ;;  %7067 = vmatmul.msk.f32.vlgmr.msra.gmra.mxu2 %vm627_vm1, %v7063_v55  ;;  %v7130_v55 = vld [vmem:[%s12953_s3 + $0x98] sm:$0xff] }
 0x10e   : > { %7091 = vmatmul.msk.f32.vlgmr.msra.gmra.mxu1 %vm627_vm1, %v7087_v56  ;;  %890 = vmatpush.msrb.mxu2 %v7102_v57  ;;  %v7107_v56 = vld [vmem:[%s12953_s3 + $0x60] sm:$0xff] }
 0x10f   : > { %7059 = vmatmul.msk.f32.vlgmr.msrb.gmra.mxu0 %vm627_vm1, %v623_v0  ;;  %v7167_v57 = vld [vmem:[%s12953_s3 + $0xc0] sm:$0xff]  ;;  %990 = vmatpush.msrb.mxu1 %v7122_v18 }
 0x110   : > { %891 = vmatpush.msrb.mxu2 %v7101_v58  ;;  %v7108_v58 = vld [vmem:[%s12953_s3 + $0x68] sm:$0xff]  ;;  %v7147_v0 = vld [vmem:[%s12953_s3 + $0xa0] sm:$0xff]  ;;  %1090 = vmatpush.msra.mxu0 %v7142_v20  ;;  %v7202_v20 = vld [vmem:[%s12954_s4 + $0x1f8] sm:$0xff] }
 0x111   : > { %991 = vmatpush.msrb.mxu1 %v7121_v19 }
 0x112   : > { %892 = vmatpush.msrb.mxu2 %v7100_v59  ;;  %v7168_v59 = vld [vmem:[%s12953_s3 + $0xc8] sm:$0xff]  ;;  %1091 = vmatpush.msra.mxu0 %v7141_v22  ;;  %v7222_v22 = vld [vmem:[%s12954_s4 + $0x238] sm:$0xff] }
 0x114   : > { %893 = vmatpush.msrb.mxu2 %v7099_v60  ;;  %v7109_v60 = vld [vmem:[%s12953_s3 + $0x70] sm:$0xff]  ;;  %1092 = vmatpush.msra.mxu0 %v7140_v25 }
 0x115   : > { %7068 = vmatmul.msk.f32.gmra.mxu2 %vm627_vm1, %v7064_v61  ;;  %v7169_v61 = vld [vmem:[%s12953_s3 + $0xd0] sm:$0xff] }
 0x116   : > { %7092 = vmatmul.msk.f32.gmra.mxu1 %vm627_vm1, %v7088_v62  ;;  %894 = vmatpush.msrb.mxu2 %v7098_v63  ;;  %v7110_v62 = vld [vmem:[%s12953_s3 + $0x78] sm:$0xff]  ;;  %v7221_v25 = vld [vmem:[%s12954_s4 + $0x230] sm:$0xff] }
 0x117   : > { %7060 = vmatmul.msk.f32.gmra.mxu0 %vm627_vm1, %v624_v7  ;;  %v7170_v63 = vld [vmem:[%s12953_s3 + $0xd8] sm:$0xff] }
 0x118   : > { %895 = vmatpush.msrb.mxu2 %v7097_v1  ;;  %v7207_v1 = vld [vmem:[%s12953_s3 + $0x100] sm:$0xff]  ;;  %v7210_v7 = vld [vmem:[%s12953_s3 + $0x118] sm:$0xff] }
 0x11a   : > { %896 = vmatpush.msrb.mxu2 %v7096_v4  ;;  %v7149_v4 = vld [vmem:[%s12953_s3 + $0xb0] sm:$0xff] }
 0x11c   : > { %897 = vmatpush.msrb.mxu2 %v7095_v6  ;;  %v7150_v6 = vld [vmem:[%s12953_s3 + $0xb8] sm:$0xff] }
 0x11d   : > { %7069 = vmatmul.msk.f32.gmra.mxu2 %vm627_vm1, %v7065_v9 }
 0x11e   : > { %1035 = vmatpush.msra.mxu2 %v8488_v32  ;;  %7093 = vmatmul.msk.f32.gmra.mxu1 %vm627_vm1, %v7089_v10 }
 0x11f   : > { %7061 = vmatmul.msk.f32.gmra.mxu0 %vm627_vm1, %v625_v14  ;;  %v7189_v14 = vld [vmem:[%s12953_s3 + $0xf0] sm:$0xff] }
 0x120   : > { %1036 = vmatpush.msra.mxu2 %v8490_v34 }
 0x122   : > { %1037 = vmatpush.msra.mxu2 %v8495_v36 }
 0x124   : > { %1038 = vmatpush.msra.mxu2 %v8500_v38 }
 0x125   : > { %7070 = vmatmul.msk.f32.gmra.mxu2 %vm627_vm1, %v7066_v16 }
 0x126   : > { %1039 = vmatpush.msra.mxu2 %v8505_v40  ;;  %7094 = vmatmul.msk.f32.gmra.mxu1 %vm627_vm1, %v7090_v17  ;;  %v7190_v17 = vld [vmem:[%s12953_s3 + $0xf8] sm:$0xff] }
 0x127   : > { %7062 = vmatmul.msk.f32.gmra.mxu0 %vm627_vm1, %v626_v21  ;;  %v7120_v21 = vld [vmem:[%s12954_s4 + $0xe8] sm:$0xff] }
 0x128   : > { %1040 = vmatpush.msra.mxu2 %v8510_v42  ;;  %992 = vmatpush.msrb.mxu1 %v7120_v21  ;;  %v7201_v21 = vld [vmem:[%s12954_s4 + $0x1f0] sm:$0xff] }
 0x12a   : > { %1041 = vmatpush.msra.mxu2 %v8515_v44  ;;  %993 = vmatpush.msrb.mxu1 %v7119_v24 }
 0x12c   : > { %1042 = vmatpush.msra.mxu2 %v8520_v46 }
 0x12e   : > { %1043 = vmatpush.msra.mxu2 %v8525_v48 }
 0x130   : > { %1044 = vmatpush.msra.mxu2 %v8530_v50 }
 0x132   : > { %1045 = vmatpush.msra.mxu2 %v8536_v52 }
 0x134   : > { %1046 = vmatpush.msra.mxu2 %v8541_v53 }
 0x136   : > { %1047 = vmatpush.msra.mxu2 %v8546_v54 }
 0x18b   : > { %v849_v27 = vpop.f32.mrf.mxu1 }
 0x18c   : > { %7103 = vmatmul.msk.f32.vlgmr.msrb.gmra.mxu2 %vm732_vm2, %v849_v27  ;;  %v657_v41 = vpop.f32.mrf.mxu0  ;;  %v7118_v27 = vld [vmem:[%s12954_s4 + $0xd8] sm:$0xff] }
 0x18d   : > { %1235 = vmatpush.msrb.mxu2 %v8488_v32  ;;  %994 = vmatpush.msrb.mxu1 %v7118_v27  ;;  %v7200_v27 = vld [vmem:[%s12954_s4 + $0x1e8] sm:$0xff] }
 0x18f   : > { %1236 = vmatpush.msrb.mxu2 %v8490_v34 }
 0x190   : > { %v711_v28 = vpop.f32.mrf.mxu2 }
 0x191   : > { %1237 = vmatpush.msrb.mxu2 %v8495_v36  ;;  %7079 = vmatmul.msk.f32.vlgmr.msra.gmra.mxu3 %vm732_vm2, %v711_v28  ;;  %v7139_v28 = vld [vmem:[%s12954_s4 + $0x120] sm:$0xff] }
 0x192   : > { %935 = vmatpush.msra.mxu3 %v8488_v32  ;;  %1093 = vmatpush.msra.mxu0 %v7139_v28 }
 0x193   : > { %1238 = vmatpush.msrb.mxu2 %v8500_v38  ;;  %v852_v29 = vpop.f32.mrf.mxu1 }
 0x194   : > { %7104 = vmatmul.msk.f32.gmra.mxu2 %vm732_vm2, %v852_v29  ;;  %936 = vmatpush.msra.mxu3 %v8490_v34  ;;  %v660_v43 = vpop.f32.mrf.mxu0  ;;  %v7117_v29 = vld [vmem:[%s12954_s4 + $0xd0] sm:$0xff] }
 0x195   : > { %1239 = vmatpush.msrb.mxu2 %v8505_v40  ;;  %995 = vmatpush.msrb.mxu1 %v7117_v29  ;;  %v7199_v29 = vld [vmem:[%s12954_s4 + $0x1e0] sm:$0xff] }
 0x196   : > { %937 = vmatpush.msra.mxu3 %v8495_v36 }
 0x197   : > { %1240 = vmatpush.msrb.mxu2 %v8510_v42 }
 0x198   : > { %938 = vmatpush.msra.mxu3 %v8500_v38  ;;  %v714_v30 = vpop.f32.mrf.mxu2 }
 0x199   : > { %1241 = vmatpush.msrb.mxu2 %v8515_v44  ;;  %7080 = vmatmul.msk.f32.gmra.mxu3 %vm732_vm2, %v714_v30  ;;  %v7138_v30 = vld [vmem:[%s12954_s4 + $0x118] sm:$0xff] }
 0x19a   : > { %939 = vmatpush.msra.mxu3 %v8505_v40  ;;  %1094 = vmatpush.msra.mxu0 %v7138_v30  ;;  %v7220_v30 = vld [vmem:[%s12954_s4 + $0x228] sm:$0xff] }
 0x19b   : > { %1242 = vmatpush.msrb.mxu2 %v8520_v46  ;;  %v855_v31 = vpop.f32.mrf.mxu1 }
 0x19c   : > { %7105 = vmatmul.msk.f32.gmra.mxu2 %vm732_vm2, %v855_v31  ;;  %940 = vmatpush.msra.mxu3 %v8510_v42  ;;  %v663_v47 = vpop.f32.mrf.mxu0  ;;  %v7116_v31 = vld [vmem:[%s12954_s4 + $0xc8] sm:$0xff] }
 0x19d   : > { %1243 = vmatpush.msrb.mxu2 %v8525_v48  ;;  %996 = vmatpush.msrb.mxu1 %v7116_v31  ;;  %v7198_v31 = vld [vmem:[%s12954_s4 + $0x1d8] sm:$0xff] }
 0x19e   : > { %941 = vmatpush.msra.mxu3 %v8515_v44 }
 0x19f   : > { %1244 = vmatpush.msrb.mxu2 %v8530_v50 }
 0x1a0   : > { %942 = vmatpush.msra.mxu3 %v8520_v46  ;;  %v717_v33 = vpop.f32.mrf.mxu2 }
 0x1a1   : > { %1245 = vmatpush.msrb.mxu2 %v8536_v52  ;;  %7081 = vmatmul.msk.f32.gmra.mxu3 %vm732_vm2, %v717_v33  ;;  %v7137_v33 = vld [vmem:[%s12954_s4 + $0x110] sm:$0xff] }
 0x1a2   : > { %943 = vmatpush.msra.mxu3 %v8525_v48  ;;  %1095 = vmatpush.msra.mxu0 %v7137_v33  ;;  %v7219_v33 = vld [vmem:[%s12954_s4 + $0x220] sm:$0xff] }
 0x1a3   : > { %1246 = vmatpush.msrb.mxu2 %v8541_v53  ;;  %v858_v35 = vpop.f32.mrf.mxu1 }
 0x1a4   : > { %7106 = vmatmul.msk.f32.gmra.mxu2 %vm732_vm2, %v858_v35  ;;  %944 = vmatpush.msra.mxu3 %v8530_v50  ;;  %v666_v51 = vpop.f32.mrf.mxu0 }
 0x1a5   : > { %1247 = vmatpush.msrb.mxu2 %v8546_v54 }
 0x1a6   : > { %945 = vmatpush.msra.mxu3 %v8536_v52 }
 0x1a8   : > { %946 = vmatpush.msra.mxu3 %v8541_v53  ;;  %v720_v37 = vpop.f32.mrf.mxu2 }
 0x1a9   : > { %7082 = vmatmul.msk.f32.gmra.mxu3 %vm732_vm2, %v720_v37  ;;  %v7115_v37 = vld [vmem:[%s12954_s4 + $0xc0] sm:$0xff] }
 0x1aa   : > { %947 = vmatpush.msra.mxu3 %v8546_v54  ;;  %997 = vmatpush.msrb.mxu1 %v7115_v37 }
 0x1ac   : > { %7131 = vmatmul.msk.f32.vlgmr.msra.gmra.mxu2 %vm627_vm1, %v7127_v39  ;;  %v7136_v39 = vld [vmem:[%s12954_s4 + $0x108] sm:$0xff] }
 0x1ad   : > { %1435 = vmatpush.msra.mxu2 %v8488_v32  ;;  %1096 = vmatpush.msra.mxu0 %v7136_v39  ;;  %v7218_v39 = vld [vmem:[%s12954_s4 + $0x218] sm:$0xff] }
 0x1af   : > { %1436 = vmatpush.msra.mxu2 %v8490_v34 }
 0x1b1   : > { %1437 = vmatpush.msra.mxu2 %v8495_v36  ;;  %7083 = vmatmul.msk.f32.vlgmr.msrb.gmra.mxu3 %vm732_vm2, %v657_v41 }
 0x1b2   : > { %1135 = vmatpush.msrb.mxu3 %v8488_v32 }
 0x1b3   : > { %1438 = vmatpush.msra.mxu2 %v8500_v38 }
 0x1b4   : > { %1136 = vmatpush.msrb.mxu3 %v8490_v34  ;;  %7132 = vmatmul.msk.f32.gmra.mxu2 %vm627_vm1, %v7128_v45 }
 0x1b5   : > { %1439 = vmatpush.msra.mxu2 %v8505_v40 }
 0x1b6   : > { %1137 = vmatpush.msrb.mxu3 %v8495_v36 }
 0x1b7   : > { %1440 = vmatpush.msra.mxu2 %v8510_v42 }
 0x1b8   : > { %1138 = vmatpush.msrb.mxu3 %v8500_v38 }
 0x1b9   : > { %1441 = vmatpush.msra.mxu2 %v8515_v44  ;;  %7084 = vmatmul.msk.f32.gmra.mxu3 %vm732_vm2, %v660_v43  ;;  %v7135_v43 = vld [vmem:[%s12954_s4 + $0x100] sm:$0xff] }
 0x1ba   : > { %1139 = vmatpush.msrb.mxu3 %v8505_v40  ;;  %1097 = vmatpush.msra.mxu0 %v7135_v43  ;;  %v7217_v43 = vld [vmem:[%s12954_s4 + $0x210] sm:$0xff] }
 0x1bb   : > { %1442 = vmatpush.msra.mxu2 %v8520_v46 }
 0x1bc   : > { %1140 = vmatpush.msrb.mxu3 %v8510_v42  ;;  %7133 = vmatmul.msk.f32.gmra.mxu2 %vm627_vm1, %v7129_v49 }
 0x1bd   : > { %1443 = vmatpush.msra.mxu2 %v8525_v48 }
 0x1be   : > { %1141 = vmatpush.msrb.mxu3 %v8515_v44 }
 0x1bf   : > { %1444 = vmatpush.msra.mxu2 %v8530_v50 }
 0x1c0   : > { %1142 = vmatpush.msrb.mxu3 %v8520_v46 }
 0x1c1   : > { %1445 = vmatpush.msra.mxu2 %v8536_v52  ;;  %7085 = vmatmul.msk.f32.gmra.mxu3 %vm732_vm2, %v663_v47 }
 0x1c2   : > { %1143 = vmatpush.msrb.mxu3 %v8525_v48 }
 0x1c3   : > { %1446 = vmatpush.msra.mxu2 %v8541_v53 }
 0x1c4   : > { %1144 = vmatpush.msrb.mxu3 %v8530_v50  ;;  %7134 = vmatmul.msk.f32.gmra.mxu2 %vm627_vm1, %v7130_v55  ;;  %v7161_v55 = vld [vmem:[%s12954_s4 + $0x170] sm:$0xff] }
 0x1c5   : > { %1447 = vmatpush.msra.mxu2 %v8546_v54 }
 0x1c6   : > { %1145 = vmatpush.msrb.mxu3 %v8536_v52 }
 0x1c8   : > { %1146 = vmatpush.msrb.mxu3 %v8541_v53 }
 0x1c9   : > { %7086 = vmatmul.msk.f32.gmra.mxu3 %vm732_vm2, %v666_v51  ;;  %v7162_v51 = vld [vmem:[%s12954_s4 + $0x178] sm:$0xff] }
 0x1ca   : > { %1147 = vmatpush.msrb.mxu3 %v8546_v54  ;;  %1190 = vmatpush.msra.mxu1 %v7162_v51 }
 0x1cc   : > { %7171 = vmatmul.msk.f32.vlgmr.msrb.gmra.mxu2 %vm627_vm1, %v7167_v57  ;;  %1191 = vmatpush.msra.mxu1 %v7161_v55  ;;  %v7195_v55 = vld [vmem:[%s12954_s4 + $0x1c0] sm:$0xff] }
 0x1d1   : > { %7111 = vmatmul.msk.f32.vlgmr.msra.gmra.mxu3 %vm627_vm1, %v7107_v56  ;;  %v7182_v56 = vld [vmem:[%s12954_s4 + $0x1b8] sm:$0xff] }
 0x1d2   : > { %1335 = vmatpush.msra.mxu3 %v8488_v32  ;;  %1290 = vmatpush.msrb.mxu0 %v7182_v56  ;;  %v7216_v56 = vld [vmem:[%s12954_s4 + $0x208] sm:$0xff] }
 0x1d4   : > { %1336 = vmatpush.msra.mxu3 %v8490_v34  ;;  %7172 = vmatmul.msk.f32.gmra.mxu2 %vm627_vm1, %v7168_v59  ;;  %v7160_v59 = vld [vmem:[%s12954_s4 + $0x168] sm:$0xff] }
 0x1d5   : > { %1192 = vmatpush.msra.mxu1 %v7160_v59 }
 0x1d6   : > { %1337 = vmatpush.msra.mxu3 %v8495_v36 }
 0x1d8   : > { %1338 = vmatpush.msra.mxu3 %v8500_v38 }
 0x1d9   : > { %7112 = vmatmul.msk.f32.gmra.mxu3 %vm627_vm1, %v7108_v58  ;;  %v7181_v58 = vld [vmem:[%s12954_s4 + $0x1b0] sm:$0xff] }
 0x1da   : > { %1339 = vmatpush.msra.mxu3 %v8505_v40  ;;  %1291 = vmatpush.msrb.mxu0 %v7181_v58 }
 0x1dc   : > { %1340 = vmatpush.msra.mxu3 %v8510_v42  ;;  %7173 = vmatmul.msk.f32.gmra.mxu2 %vm627_vm1, %v7169_v61  ;;  %v7159_v61 = vld [vmem:[%s12954_s4 + $0x160] sm:$0xff] }
 0x1dd   : > { %1193 = vmatpush.msra.mxu1 %v7159_v61 }
 0x1de   : > { %1341 = vmatpush.msra.mxu3 %v8515_v44 }
 0x1e0   : > { %1342 = vmatpush.msra.mxu3 %v8520_v46 }
 0x1e1   : > { %7113 = vmatmul.msk.f32.gmra.mxu3 %vm627_vm1, %v7109_v60 }
 0x1e2   : > { %1343 = vmatpush.msra.mxu3 %v8525_v48 }
 0x1e4   : > { %1344 = vmatpush.msra.mxu3 %v8530_v50  ;;  %7174 = vmatmul.msk.f32.gmra.mxu2 %vm627_vm1, %v7170_v63  ;;  %v7158_v63 = vld [vmem:[%s12954_s4 + $0x158] sm:$0xff] }
 0x1e5   : > { %1194 = vmatpush.msra.mxu1 %v7158_v63 }
 0x1e6   : > { %1345 = vmatpush.msra.mxu3 %v8536_v52 }
 0x1e8   : > { %1346 = vmatpush.msra.mxu3 %v8541_v53 }
 0x1e9   : > { %7114 = vmatmul.msk.f32.gmra.mxu3 %vm627_vm1, %v7110_v62  ;;  %v7180_v62 = vld [vmem:[%s12954_s4 + $0x1a8] sm:$0xff] }
 0x1ea   : > { %1347 = vmatpush.msra.mxu3 %v8546_v54  ;;  %1292 = vmatpush.msrb.mxu0 %v7180_v62 }
 0x1ec   : > { %7211 = vmatmul.msk.f32.vlgmr.msra.gmra.mxu2 %vm627_vm1, %v7207_v1 }
 0x1f1   : > { %7151 = vmatmul.msk.f32.vlgmr.msrb.gmra.mxu3 %vm627_vm1, %v7147_v0  ;;  %v7179_v0 = vld [vmem:[%s12954_s4 + $0x1a0] sm:$0xff] }
 0x1f2   : > { %1293 = vmatpush.msrb.mxu0 %v7179_v0 }
 0x1f4   : > { %7212 = vmatmul.msk.f32.gmra.mxu2 %vm627_vm1, %v7208_v3  ;;  %v7178_v3 = vld [vmem:[%s12954_s4 + $0x198] sm:$0xff] }
 0x1f5   : > { %1294 = vmatpush.msrb.mxu0 %v7178_v3 }
 0x1f9   : > { %7152 = vmatmul.msk.f32.gmra.mxu3 %vm627_vm1, %v7148_v2  ;;  %v7157_v2 = vld [vmem:[%s12954_s4 + $0x150] sm:$0xff] }
 0x1fa   : > { %1195 = vmatpush.msra.mxu1 %v7157_v2 }
 0x1fc   : > { %7213 = vmatmul.msk.f32.gmra.mxu2 %vm627_vm1, %v7209_v5  ;;  %v7177_v5 = vld [vmem:[%s12954_s4 + $0x190] sm:$0xff] }
 0x1fd   : > { %1295 = vmatpush.msrb.mxu0 %v7177_v5 }
 0x201   : > { %7153 = vmatmul.msk.f32.gmra.mxu3 %vm627_vm1, %v7149_v4  ;;  %v7156_v4 = vld [vmem:[%s12954_s4 + $0x148] sm:$0xff] }
 0x202   : > { %1196 = vmatpush.msra.mxu1 %v7156_v4 }
 0x204   : > { %7214 = vmatmul.msk.f32.gmra.mxu2 %vm627_vm1, %v7210_v7  ;;  %v7155_v7 = vld [vmem:[%s12954_s4 + $0x140] sm:$0xff] }
 0x205   : > { %1197 = vmatpush.msra.mxu1 %v7155_v7 }
 0x209   : > { %7154 = vmatmul.msk.f32.gmra.mxu3 %vm627_vm1, %v7150_v6 }
 0x20f   : > { %v8850_v10 = vpop.f32.mrf.mxu2 }
 0x211   : > { %7191 = vmatmul.msk.f32.vlgmr.msra.gmra.mxu3 %vm627_vm1, %v7187_v8  ;;  %v7176_v8 = vld [vmem:[%s12954_s4 + $0x188] sm:$0xff] }
 0x212   : > { %1296 = vmatpush.msrb.mxu0 %v7176_v8 }
 0x214   : > { %v8848_v9 = vpop.f32.mrf.mxu3 }
 0x217   : > { %v8858_v13 = vpop.f32.mrf.mxu2 }
 0x219   : > { %7192 = vmatmul.msk.f32.gmra.mxu3 %vm627_vm1, %v7188_v11  ;;  %v7175_v11 = vld [vmem:[%s12954_s4 + $0x180] sm:$0xff] }
 0x21a   : > { %1297 = vmatpush.msrb.mxu0 %v7175_v11 }
 0x21c   : > { %v8856_v12 = vpop.f32.mrf.mxu3 }
 0x21f   : > { %v8866_v16 = vpop.f32.mrf.mxu2 }
 0x221   : > { %7193 = vmatmul.msk.f32.gmra.mxu3 %vm627_vm1, %v7189_v14 }
 0x224   : > { %v8864_v15 = vpop.f32.mrf.mxu3 }
 0x227   : > { %v8895_v26 = vpop.f32.mrf.mxu2 }
 0x229   : > { %7194 = vmatmul.msk.f32.gmra.mxu3 %vm627_vm1, %v7190_v17 }
 0x22c   : > { %v8887_v23 = vpop.f32.mrf.mxu3 }
 0x22f   : > { %v1049_v41 = vpop.f32.mrf.mxu2 }
 0x230   : > { %7143 = vmatmul.msk.f32.vlgmr.msra.gmra.mxu0 %vm732_vm2, %v1049_v41  ;;  %v7197_v41 = vld [vmem:[%s12954_s4 + $0x1d0] sm:$0xff] }
 0x231   : > { %1490 = vmatpush.msra.mxu0 %v7222_v22 }
 0x233   : > { %1491 = vmatpush.msra.mxu0 %v7221_v25  ;;  %v7280_v25 = vld [vmem:[%s12957_s7 + $0xf0] sm:$0xff] }
 0x234   : > { %v8915_v35 = vpop.f32.mrf.mxu3 }
 0x235   : > { %1492 = vmatpush.msra.mxu0 %v7220_v30  ;;  %v7278_v30 = vld [vmem:[%s12957_s7 + $0xe0] sm:$0xff] }
 0x237   : > { %v1052_v47 = vpop.f32.mrf.mxu2  ;;  %1493 = vmatpush.msra.mxu0 %v7219_v33  ;;  %v7276_v33 = vld [vmem:[%s12957_s7 + $0xd0] sm:$0xff] }
 0x238   : > { %7144 = vmatmul.msk.f32.gmra.mxu0 %vm732_vm2, %v1052_v47  ;;  %v7196_v47 = vld [vmem:[%s12954_s4 + $0x1c8] sm:$0xff] }
 0x239   : > { %1494 = vmatpush.msra.mxu0 %v7218_v39 }
 0x23b   : > { %1495 = vmatpush.msra.mxu0 %v7217_v43  ;;  %v7274_v43 = vld [vmem:[%s12957_s7 + $0xc0] sm:$0xff] }
 0x23c   : > { %v8927_v45 = vpop.f32.mrf.mxu3 }
 0x23d   : > { %1496 = vmatpush.msra.mxu0 %v7216_v56 }
 0x23f   : > { %v1055_v57 = vpop.f32.mrf.mxu2 }
 0x240   : > { %7145 = vmatmul.msk.f32.gmra.mxu0 %vm732_vm2, %v1055_v57  ;;  %v7215_v57 = vld [vmem:[%s12954_s4 + $0x200] sm:$0xff] }
 0x241   : > { %1497 = vmatpush.msra.mxu0 %v7215_v57  ;;  %v7270_v57 = vld [vmem:[%s12957_s7 + $0xa0] sm:$0xff] }
 0x244   : > { %v8930_v49 = vpop.f32.mrf.mxu3 }
 0x247   : > { %v1058_v1 = vpop.f32.mrf.mxu2 }
 0x248   : > { %7146 = vmatmul.msk.f32.gmra.mxu0 %vm732_vm2, %v1058_v1 }
 0x24c   : > { %v8948_v60 = vpop.f32.mrf.mxu3 }
 0x24f   : > { %v1249_v14 = vpop.f32.mrf.mxu2 }
 0x250   : > { %7183 = vmatmul.msk.f32.vlgmr.msrb.gmra.mxu0 %vm732_vm2, %v1249_v14 }
 0x254   : > { %v949_v6 = vpop.f32.mrf.mxu3 }
 0x255   : > { %7123 = vmatmul.msk.f32.vlgmr.msrb.gmra.mxu1 %vm732_vm2, %v949_v6 }
 0x256   : > { %1390 = vmatpush.msrb.mxu1 %v7202_v20 }
 0x257   : > { %v1252_v18 = vpop.f32.mrf.mxu2 }
 0x258   : > { %7184 = vmatmul.msk.f32.gmra.mxu0 %vm732_vm2, %v1252_v18  ;;  %1391 = vmatpush.msrb.mxu1 %v7201_v21 }
 0x25a   : > { %1392 = vmatpush.msrb.mxu1 %v7200_v27 }
 0x25c   : > { %v952_v17 = vpop.f32.mrf.mxu3  ;;  %1393 = vmatpush.msrb.mxu1 %v7199_v29 }
 0x25d   : > { %7124 = vmatmul.msk.f32.gmra.mxu1 %vm732_vm2, %v952_v17 }
 0x25e   : > { %1394 = vmatpush.msrb.mxu1 %v7198_v31  ;;  %v7277_v31 = vld [vmem:[%s12957_s7 + $0xd8] sm:$0xff] }
 0x25f   : > { %v1255_v24 = vpop.f32.mrf.mxu2 }
 0x260   : > { %7185 = vmatmul.msk.f32.gmra.mxu0 %vm732_vm2, %v1255_v24  ;;  %1395 = vmatpush.msrb.mxu1 %v7197_v41  ;;  %v7281_v24 = vld [vmem:[%s12957_s7 + $0xf8] sm:$0xff] }
 0x261   : > { %1778 = vmatpush.msrb.mxu2 %v7281_v24  ;;  %v813_v24 = vadd.f32 %v8948_v60, %v8887_v23 }
 0x262   : > { %1396 = vmatpush.msrb.mxu1 %v7196_v47  ;;  %v7273_v47 = vld [vmem:[%s12957_s7 + $0xb8] sm:$0xff] }
 0x263   : > { %1779 = vmatpush.msrb.mxu2 %v7280_v25 }
 0x264   : > { %v955_v19 = vpop.f32.mrf.mxu3  ;;  %1397 = vmatpush.msrb.mxu1 %v7195_v55  ;;  %v7271_v55 = vld [vmem:[%s12957_s7 + $0xa8] sm:$0xff] }
 0x265   : > { %7125 = vmatmul.msk.f32.gmra.mxu1 %vm732_vm2, %v955_v19 }
 0x267   : > { %v1258_v37 = vpop.f32.mrf.mxu2 }
 0x268   : > { %7186 = vmatmul.msk.f32.gmra.mxu0 %vm732_vm2, %v1258_v37  ;;  %v7275_v37 = vld [vmem:[%s12957_s7 + $0xc8] sm:$0xff] }
 0x26c   : > { %v958_v28 = vpop.f32.mrf.mxu3 }
 0x26d   : > { %7126 = vmatmul.msk.f32.gmra.mxu1 %vm732_vm2, %v958_v28  ;;  %v7279_v28 = vld [vmem:[%s12957_s7 + $0xe8] sm:$0xff] }
 0x26e   : > { %1780 = vmatpush.msrb.mxu2 %v7279_v28 }
 0x26f   : > { %v1449_v58 = vpop.f32.mrf.mxu2 }
 0x270   : > { %7223 = vmatmul.msk.f32.vlgmr.msra.gmra.mxu0 %vm732_vm2, %v1449_v58  ;;  %1781 = vmatpush.msrb.mxu2 %v7278_v30 }
 0x272   : > { %1782 = vmatpush.msrb.mxu2 %v7277_v31 }
 0x274   : > { %v1149_v51 = vpop.f32.mrf.mxu3  ;;  %1783 = vmatpush.msrb.mxu2 %v7276_v33 }
 0x275   : > { %7163 = vmatmul.msk.f32.vlgmr.msra.gmra.mxu1 %vm732_vm2, %v1149_v51  ;;  %v7272_v51 = vld [vmem:[%s12957_s7 + $0xb0] sm:$0xff] }
 0x276   : > { %1784 = vmatpush.msrb.mxu2 %v7275_v37 }
 0x277   : > { %v1452_v61 = vpop.f32.mrf.mxu2 }
 0x278   : > { %7224 = vmatmul.msk.f32.gmra.mxu0 %vm732_vm2, %v1452_v61  ;;  %1785 = vmatpush.msrb.mxu2 %v7274_v43  ;;  %v7268_v61 = vld [vmem:[%s12957_s7 + $0x90] sm:$0xff] }
 0x27a   : > { %1786 = vmatpush.msrb.mxu2 %v7273_v47 }
 0x27c   : > { %v1152_v59 = vpop.f32.mrf.mxu3  ;;  %1787 = vmatpush.msrb.mxu2 %v7272_v51 }
 0x27d   : > { %7164 = vmatmul.msk.f32.gmra.mxu1 %vm732_vm2, %v1152_v59  ;;  %v7269_v59 = vld [vmem:[%s12957_s7 + $0x98] sm:$0xff] }
 0x27e   : > { %1788 = vmatpush.msrb.mxu2 %v7271_v55 }
 0x27f   : > { %v1455_v63 = vpop.f32.mrf.mxu2 }
 0x280   : > { %7225 = vmatmul.msk.f32.gmra.mxu0 %vm732_vm2, %v1455_v63  ;;  %1789 = vmatpush.msrb.mxu2 %v7270_v57  ;;  %v7266_v63 = vld [vmem:[%s12957_s7 + $0x80] sm:$0xff] }
 0x282   : > { %1790 = vmatpush.msrb.mxu2 %v7269_v59 }
 0x284   : > { %v1155_v62 = vpop.f32.mrf.mxu3  ;;  %1791 = vmatpush.msrb.mxu2 %v7268_v61  ;;  %v1527_v61 = vld [vmem:[%s12956_s6] sm:$0xff] }
 0x285   : > { %7165 = vmatmul.msk.f32.gmra.mxu1 %vm732_vm2, %v1155_v62  ;;  %v7267_v62 = vld [vmem:[%s12957_s7 + $0x88] sm:$0xff] }
 0x286   : > { %1792 = vmatpush.msrb.mxu2 %v7267_v62  ;;  %v1528_v62 = vld [vmem:[%s12956_s6 + $0x8] sm:$0xff] }
 0x287   : > { %v1458_v1 = vpop.f32.mrf.mxu2 }
 0x288   : > { %7226 = vmatmul.msk.f32.gmra.mxu0 %vm732_vm2, %v1458_v1  ;;  %1793 = vmatpush.msrb.mxu2 %v7266_v63  ;;  %v810_v1 = vadd.f32 %v8930_v49, %v8864_v15  ;;  %v914_v15 = vadd.f32 %v8895_v26, %v813_v24  ;;  %v7240_v63 = vld [vmem:[%s12956_s6 + $0x68] sm:$0xff] }
 0x289   : > { %v1532_v24 = vld [vmem:[%s12956_s6 + $0x28] sm:$0xff] }
 0x28c   : > { %v1158_v0 = vpop.f32.mrf.mxu3 }
 0x28d   : > { %7166 = vmatmul.msk.f32.gmra.mxu1 %vm732_vm2, %v1158_v0 }
 0x294   : > { %v1349_v2 = vpop.f32.mrf.mxu3 }
 0x295   : > { %7203 = vmatmul.msk.f32.vlgmr.msrb.gmra.mxu1 %vm732_vm2, %v1349_v2 }
 0x29c   : > { %v1352_v3 = vpop.f32.mrf.mxu3 }
 0x29d   : > { %7204 = vmatmul.msk.f32.gmra.mxu1 %vm732_vm2, %v1352_v3  ;;  %v807_v3 = vadd.f32 %v8927_v45, %v8856_v12 }
 0x29f   : > { %v912_v28 = vadd.f32 %v8858_v13, %v807_v3  ;;  %v7242_v3 = vld [vmem:[%s12956_s6 + $0x78] sm:$0xff] }
 0x2a4   : > { %v1355_v4 = vpop.f32.mrf.mxu3 }
 0x2a5   : > { %7205 = vmatmul.msk.f32.gmra.mxu1 %vm732_vm2, %v1355_v4  ;;  %v804_v4 = vadd.f32 %v8915_v35, %v8848_v9 }
 0x2a7   : > { %v911_v31 = vadd.f32 %v8850_v10, %v804_v4  ;;  %v1531_v4 = vld [vmem:[%s12956_s6 + $0x20] sm:$0xff] }
 0x2ac   : > { %v1358_v5 = vpop.f32.mrf.mxu3 }
 0x2ad   : > { %7206 = vmatmul.msk.f32.gmra.mxu1 %vm732_vm2, %v1358_v5  ;;  %v9052_v6 = vpop.f32.mrf.mxu0  ;;  %v913_v5 = vadd.f32 %v8866_v16, %v810_v1  ;;  %v7241_v1 = vld [vmem:[%s12956_s6 + $0x70] sm:$0xff] }
 0x2b5   : > { %v9054_v7 = vpop.f32.mrf.mxu0 }
 0x2bd   : > { %v1105_v8 = vpop.f32.mrf.mxu0 }
 0x2c5   : > { %v9056_v17 = vpop.f32.mrf.mxu0 }
 0x2cd   : > { %v9058_v19 = vpop.f32.mrf.mxu0 }
 0x2d2   : > { %v999_v11 = vpop.f32.mrf.mxu1 }
 0x2d3   : > { %v1011_v33 = vadd.f32 %v999_v11, %v911_v31  ;;  %v1534_v31 = vld [vmem:[%s12956_s6 + $0x38] sm:$0xff] }
 0x2d5   : > { %v9060_v21 = vpop.f32.mrf.mxu0  ;;  %v1111_v43 = vadd.f32 %v9052_v6, %v1011_v33  ;;  %v8318_v6 = vld [vmem:[%s12955_s5] ss:$0 sm:$0xff]  ;;  %v1651_v33 = vld [vmem:[%s12957_s7 + $0x78] sm:$0xff] }
 0x2d6   : > { %1834 = vmatpush.msrb.mxu0 %v1651_v33  ;;  %v7322_v33 = vld [vmem:[%s12957_s7 + $0x170] sm:$0xff] }
 0x2da   : > { %v1002_v14 = vpop.f32.mrf.mxu1 }
 0x2db   : > { %v1012_v49 = vadd.f32 %v1002_v14, %v912_v28  ;;  %v1533_v28 = vld [vmem:[%s12956_s6 + $0x30] sm:$0xff] }
 0x2dd   : > { %v1305_v27 = vpop.f32.mrf.mxu0  ;;  %v1112_v9 = vadd.f32 %v9054_v7, %v1012_v49  ;;  %v1535_v49 = vld [vmem:[%s12956_s6 + $0x40] sm:$0xff] }
 0x2e2   : > { %v1005_v18 = vpop.f32.mrf.mxu1 }
 0x2e3   : > { %v1013_v30 = vadd.f32 %v1005_v18, %v913_v5  ;;  %v7243_v5 = vld [vmem:[%s12956_s6 + $0x80] sm:$0xff] }
 0x2e5   : > { %v1308_v41 = vpop.f32.mrf.mxu0  ;;  %v1113_v37 = vadd.f32 %v1105_v8, %v1013_v30  ;;  %v7245_v30 = vld [vmem:[%s12956_s6 + $0x90] sm:$0xff] }
 0x2ea   : > { %v1008_v20 = vpop.f32.mrf.mxu1 }
 0x2eb   : > { %v1014_v12 = vadd.f32 %v1008_v20, %v914_v15  ;;  %v7246_v15 = vld [vmem:[%s12956_s6 + $0x98] sm:$0xff] }
 0x2ed   : > { %v1499_v58 = vpop.f32.mrf.mxu0  ;;  %v1114_v23 = vadd.f32 %v9056_v17, %v1014_v12  ;;  %v1536_v12 = vld [vmem:[%s12956_s6 + $0x48] sm:$0xff] }
 0x2f2   : > { %v1199_v22 = vpop.f32.mrf.mxu1 }
 0x2f3   : > { %v1211_v13 = vadd.f32 %v1199_v22, %v1111_v43  ;;  %v1648_v43 = vld [vmem:[%s12957_s7 + $0x60] sm:$0xff] }
 0x2f5   : > { %v1502_v2 = vpop.f32.mrf.mxu0  ;;  %v1311_v11 = vadd.f32 %v9058_v19, %v1211_v13  ;;  %v1645_v13 = vld [vmem:[%s12957_s7 + $0x48] sm:$0xff] }
 0x2fa   : > { %v1202_v29 = vpop.f32.mrf.mxu1 }
 0x2fb   : > { %v1212_v60 = vadd.f32 %v1202_v29, %v1112_v9  ;;  %v7248_v9 = vld [vmem:[%s12956_s6 + $0xa8] sm:$0xff] }
 0x2fd   : > { %v1505_v45 = vpop.f32.mrf.mxu0  ;;  %v1312_v10 = vadd.f32 %v9060_v21, %v1212_v60  ;;  %v1646_v60 = vld [vmem:[%s12957_s7 + $0x50] sm:$0xff] }
 0x302   : > { %v1205_v39 = vpop.f32.mrf.mxu1 }
 0x303   : > { %v1213_v35 = vadd.f32 %v1205_v39, %v1113_v37  ;;  %v7247_v37 = vld [vmem:[%s12956_s6 + $0xa0] sm:$0xff] }
 0x305   : > { %v1313_v18 = vadd.f32 %v1305_v27, %v1213_v35  ;;  %v1508_v51 = vpop.f32.mrf.mxu0  ;;  %v1649_v35 = vld [vmem:[%s12957_s7 + $0x68] sm:$0xff] }
 0x30a   : > { %v1208_v56 = vpop.f32.mrf.mxu1 }
 0x30b   : > { %v1214_v47 = vadd.f32 %v1208_v56, %v1114_v23  ;;  %v1647_v23 = vld [vmem:[%s12957_s7 + $0x58] sm:$0xff] }
 0x30d   : > { %v1314_v8 = vadd.f32 %v1308_v41, %v1214_v47  ;;  %v1644_v47 = vld [vmem:[%s12957_s7 + $0x40] sm:$0xff] }
 0x312   : > { %v1399_v0 = vpop.f32.mrf.mxu1 }
 0x313   : > { %v1411_v7 = vadd.f32 %v1399_v0, %v1311_v11  ;;  %v1529_v0 = vld [vmem:[%s12956_s6 + $0x10] sm:$0xff] }
 0x314   : > { %v1642_v11 = vld [vmem:[%s12957_s7 + $0x30] sm:$0xff] }
 0x315   : > { %v1511_v27 = vadd.f32 %v1499_v58, %v1411_v7  ;;  %v1639_v7 = vld [vmem:[%s12957_s7 + $0x18] sm:$0xff] }
 0x317   : > { %v1519_v19 = vadd.f32 %v8318_v6, %v1511_v27  ;;  %v7252_v27 = vld [vmem:[%s12956_s6 + $0xc8] sm:$0xff] }
 0x319   : > { %v9142_v58 = vmax.f32 %v1519_v19, 0.0 }
 0x31a   : > { %v1402_v25 = vpop.f32.mrf.mxu1 }
 0x31b   : > { %v1412_v14 = vadd.f32 %v1402_v25, %v1312_v10  ;;  %v7244_v25 = vld [vmem:[%s12956_s6 + $0x88] sm:$0xff]  ;;  %v1538_v10 = vld [vmem:[%s12956_s6 + $0x58] sm:$0xff] }
 0x31d   : > { %v1512_v17 = vadd.f32 %v1502_v2, %v1412_v14  ;;  %v1530_v2 = vld [vmem:[%s12956_s6 + $0x18] sm:$0xff] }
 0x31e   : > { %v7250_v14 = vld [vmem:[%s12956_s6 + $0xb8] sm:$0xff] }
 0x31f   : > { %v1520_v21 = vadd.f32 %v8318_v6, %v1512_v17  ;;  %v1636_v17 = vld [vmem:[%s12957_s7] sm:$0xff] }
 0x321   : > { %v9137_v59 = vmax.f32 %v1520_v21, 0.0  ;;  %v7285_v21 = vld [vmem:[%s12956_s6 + $0xe8] sm:$0xff] }
 0x322   : > { %v1405_v16 = vpop.f32.mrf.mxu1 }
 0x323   : > { %v1413_v26 = vadd.f32 %v1405_v16, %v1313_v18  ;;  %v1537_v16 = vld [vmem:[%s12956_s6 + $0x50] sm:$0xff] }
 0x324   : > { %v7249_v18 = vld [vmem:[%s12956_s6 + $0xb0] sm:$0xff] }
 0x325   : > { %v1513_v39 = vadd.f32 %v1505_v45, %v1413_v26  ;;  %v1650_v45 = vld [vmem:[%s12957_s7 + $0x70] sm:$0xff]  ;;  %v1643_v26 = vld [vmem:[%s12957_s7 + $0x38] sm:$0xff] }
 0x326   : > { %1835 = vmatpush.msrb.mxu0 %v1650_v45 }
 0x327   : > { %v1521_v29 = vadd.f32 %v8318_v6, %v1513_v39  ;;  %v1638_v39 = vld [vmem:[%s12957_s7 + $0x10] sm:$0xff] }
 0x328   : > { %1836 = vmatpush.msrb.mxu0 %v1649_v35  ;;  %v7320_v35 = vld [vmem:[%s12957_s7 + $0x160] sm:$0xff] }
 0x329   : > { %v9132_v41 = vmax.f32 %v1521_v29, 0.0  ;;  %v7283_v29 = vld [vmem:[%s12956_s6 + $0xd8] sm:$0xff] }
 0x32a   : > { %v1408_v20 = vpop.f32.mrf.mxu1  ;;  %1837 = vmatpush.msrb.mxu0 %v1648_v43  ;;  %v7319_v43 = vld [vmem:[%s12957_s7 + $0x158] sm:$0xff] }
 0x32b   : > { %v1414_v55 = vadd.f32 %v1408_v20, %v1314_v8  ;;  %v1641_v8 = vld [vmem:[%s12957_s7 + $0x28] sm:$0xff]  ;;  %v1640_v20 = vld [vmem:[%s12957_s7 + $0x20] sm:$0xff] }
 0x32c   : > { %1838 = vmatpush.msrb.mxu0 %v1647_v23  ;;  %v7318_v23 = vld [vmem:[%s12957_s7 + $0x150] sm:$0xff] }
 0x32d   : > { %v1514_v22 = vadd.f32 %v1508_v51, %v1414_v55  ;;  %v1539_v51 = vld [vmem:[%s12956_s6 + $0x60] sm:$0xff]  ;;  %v1637_v55 = vld [vmem:[%s12957_s7 + $0x8] sm:$0xff] }
 0x32e   : > { %1839 = vmatpush.msrb.mxu0 %v1646_v60  ;;  %v7317_v60 = vld [vmem:[%s12957_s7 + $0x148] sm:$0xff] }
 0x32f   : > { %v1522_v56 = vadd.f32 %v8318_v6, %v1514_v22  ;;  %v7251_v6 = vld [vmem:[%s12956_s6 + $0xc0] sm:$0xff]  ;;  %v7282_v22 = vld [vmem:[%s12956_s6 + $0xd0] sm:$0xff] }
 0x330   : > { %1840 = vmatpush.msrb.mxu0 %v1645_v13 }
 0x331   : > { %v9130_v57 = vmax.f32 %v1522_v56, 0.0  ;;  %v7284_v56 = vld [vmem:[%s12956_s6 + $0xe0] sm:$0xff] }
 0x332   : > { %1841 = vmatpush.msrb.mxu0 %v1644_v47  ;;  %v7316_v47 = vld [vmem:[%s12957_s7 + $0x140] sm:$0xff] }
 0x333   : > { %1592 = vmatpush.msra.mxu1 %v9130_v57  ;;  %8291 = vmatpush.msrb.mxu3 %v9130_v57 }
 0x334   : > { %2150 = vmatpush.msra.mxu2 %v9130_v57  ;;  %1842 = vmatpush.msrb.mxu0 %v1643_v26  ;;  %v7293_v26 = vld [vmem:[%s12956_s6 + $0x128] sm:$0xff] }
 0x335   : > { %1593 = vmatpush.msra.mxu1 %v9132_v41  ;;  %8292 = vmatpush.msrb.mxu3 %v9132_v41 }
 0x336   : > { %2151 = vmatpush.msra.mxu2 %v9132_v41  ;;  %1843 = vmatpush.msrb.mxu0 %v1642_v11  ;;  %v7314_v11 = vld [vmem:[%s12957_s7 + $0x130] sm:$0xff] }
 0x337   : > { %1594 = vmatpush.msra.mxu1 %v9137_v59  ;;  %8293 = vmatpush.msrb.mxu3 %v9137_v59 }
 0x338   : > { %2152 = vmatpush.msra.mxu2 %v9137_v59  ;;  %1844 = vmatpush.msrb.mxu0 %v1641_v8  ;;  %v7313_v8 = vld [vmem:[%s12957_s7 + $0x128] sm:$0xff] }
 0x339   : > { %1595 = vmatpush.msra.mxu1 %v9142_v58  ;;  %8294 = vmatpush.msrb.mxu3 %v9142_v58 }
 0x33a   : > { %2153 = vmatpush.msra.mxu2 %v9142_v58  ;;  %7227 = vmatmul.msk.f32.vlgmr.msra.gmra.mxu1 %vm1540_vm3, %v1527_v61  ;;  %v7286_v61 = vld [vmem:[%s12956_s6 + $0xf0] sm:$0xff] }
 0x33b   : > { %7228 = vmatmul.msk.f32.vlgmr.msrb.gmra.mxu3 %vm1540_vm3, %v1528_v62  ;;  %1717 = vmatpush.msrb.mxu1 %v9130_v57 }
 0x33c   : > { %1955 = vmatpush.msra.mxu3 %v9130_v57  ;;  %1845 = vmatpush.msrb.mxu0 %v1640_v20 }
 0x33d   : > { %1718 = vmatpush.msrb.mxu1 %v9132_v41 }
 0x33e   : > { %1956 = vmatpush.msra.mxu3 %v9132_v41  ;;  %1846 = vmatpush.msrb.mxu0 %v1639_v7  ;;  %v7311_v7 = vld [vmem:[%s12957_s7 + $0x118] sm:$0xff] }
 0x33f   : > { %1719 = vmatpush.msrb.mxu1 %v9137_v59 }
 0x340   : > { %1957 = vmatpush.msra.mxu3 %v9137_v59  ;;  %1847 = vmatpush.msrb.mxu0 %v1638_v39  ;;  %v7294_v39 = vld [vmem:[%s12956_s6 + $0x130] sm:$0xff] }
 0x341   : > { %1720 = vmatpush.msrb.mxu1 %v9142_v58 }
 0x342   : > { %1958 = vmatpush.msra.mxu3 %v9142_v58  ;;  %7253 = vmatmul.msk.f32.vlgmr.msrb.gmra.mxu1 %vm1540_vm3, %v7240_v63 }
 0x343   : > { %7229 = vmatmul.msk.f32.gmra.mxu3 %vm1540_vm3, %v1529_v0  ;;  %1848 = vmatpush.msrb.mxu0 %v1637_v55  ;;  %v7287_v0 = vld [vmem:[%s12956_s6 + $0xf8] sm:$0xff]  ;;  %v7310_v55 = vld [vmem:[%s12957_s7 + $0x110] sm:$0xff] }
 0x344   : > { %2345 = vmatpush.msrb.mxu3 %v9130_v57 }
 0x345   : > { %1849 = vmatpush.msrb.mxu0 %v1636_v17 }
 0x346   : > { %2346 = vmatpush.msrb.mxu3 %v9132_v41 }
 0x348   : > { %2347 = vmatpush.msrb.mxu3 %v9137_v59 }
 0x34a   : > { %2348 = vmatpush.msrb.mxu3 %v9142_v58  ;;  %7254 = vmatmul.msk.f32.gmra.mxu1 %vm1540_vm3, %v7241_v1 }
 0x34b   : > { %7230 = vmatmul.msk.f32.gmra.mxu3 %vm1540_vm3, %v1530_v2 }
 0x352   : > { %7255 = vmatmul.msk.f32.gmra.mxu1 %vm1540_vm3, %v7242_v3  ;;  %v7288_v3 = vld [vmem:[%s12956_s6 + $0x100] sm:$0xff] }
 0x353   : > { %7231 = vmatmul.msk.f32.gmra.mxu3 %vm1540_vm3, %v1531_v4 }
 0x35a   : > { %7256 = vmatmul.msk.f32.gmra.mxu1 %vm1540_vm3, %v7243_v5 }
 0x35b   : > { %7232 = vmatmul.msk.f32.gmra.mxu3 %vm1540_vm3, %v1532_v24  ;;  %v7289_v24 = vld [vmem:[%s12956_s6 + $0x108] sm:$0xff] }
 0x362   : > { %7257 = vmatmul.msk.f32.gmra.mxu1 %vm1540_vm3, %v7244_v25 }
 0x363   : > { %7233 = vmatmul.msk.f32.gmra.mxu3 %vm1540_vm3, %v1533_v28 }
 0x36a   : > { %7258 = vmatmul.msk.f32.gmra.mxu1 %vm1540_vm3, %v7245_v30  ;;  %v7290_v30 = vld [vmem:[%s12956_s6 + $0x110] sm:$0xff] }
 0x36b   : > { %7234 = vmatmul.msk.f32.gmra.mxu3 %vm1540_vm3, %v1534_v31 }
 0x372   : > { %7259 = vmatmul.msk.f32.gmra.mxu1 %vm1540_vm3, %v7246_v15 }
 0x373   : > { %7235 = vmatmul.msk.f32.gmra.mxu3 %vm1540_vm3, %v1535_v49  ;;  %v7323_v49 = vld [vmem:[%s12957_s7 + $0x178] sm:$0xff] }
 0x374   : > { %2016 = vmatpush.msra.mxu1 %v7323_v49  ;;  %v7373_v49 = vld [vmem:[%s12956_s6 + $0x1d8] sm:$0xff] }
 0x376   : > { %2017 = vmatpush.msra.mxu1 %v7322_v33 }
 0x37a   : > { %7260 = vmatmul.msk.f32.gmra.mxu1 %vm1540_vm3, %v7247_v37  ;;  %v7291_v37 = vld [vmem:[%s12956_s6 + $0x118] sm:$0xff] }
 0x37b   : > { %7236 = vmatmul.msk.f32.gmra.mxu3 %vm1540_vm3, %v1536_v12  ;;  %v7321_v12 = vld [vmem:[%s12957_s7 + $0x168] sm:$0xff] }
 0x37c   : > { %2018 = vmatpush.msra.mxu1 %v7321_v12 }
 0x37e   : > { %2019 = vmatpush.msra.mxu1 %v7320_v35  ;;  %v7329_v35 = vld [vmem:[%s12956_s6 + $0x160] sm:$0xff] }
 0x380   : > { %2020 = vmatpush.msra.mxu1 %v7319_v43  ;;  %v7375_v43 = vld [vmem:[%s12956_s6 + $0x1e8] sm:$0xff] }
 0x382   : > { %7261 = vmatmul.msk.f32.gmra.mxu1 %vm1540_vm3, %v7248_v9 }
 0x383   : > { %7237 = vmatmul.msk.f32.gmra.mxu3 %vm1540_vm3, %v1537_v16  ;;  %v7292_v16 = vld [vmem:[%s12956_s6 + $0x120] sm:$0xff]  ;;  %2021 = vmatpush.msra.mxu1 %v7318_v23 }
 0x385   : > { %2022 = vmatpush.msra.mxu1 %v7317_v60  ;;  %v7330_v60 = vld [vmem:[%s12956_s6 + $0x168] sm:$0xff] }
 0x387   : > { %2023 = vmatpush.msra.mxu1 %v7316_v47 }
 0x38a   : > { %7262 = vmatmul.msk.f32.gmra.mxu1 %vm1540_vm3, %v7249_v18 }
 0x38b   : > { %7238 = vmatmul.msk.f32.gmra.mxu3 %vm1540_vm3, %v1538_v10  ;;  %v7315_v10 = vld [vmem:[%s12957_s7 + $0x138] sm:$0xff] }
 0x38c   : > { %2024 = vmatpush.msra.mxu1 %v7315_v10  ;;  %v7331_v10 = vld [vmem:[%s12956_s6 + $0x170] sm:$0xff] }
 0x38e   : > { %2025 = vmatpush.msra.mxu1 %v7314_v11  ;;  %v7377_v11 = vld [vmem:[%s12956_s6 + $0x1f8] sm:$0xff] }
 0x390   : > { %2026 = vmatpush.msra.mxu1 %v7313_v8 }
 0x392   : > { %7263 = vmatmul.msk.f32.gmra.mxu1 %vm1540_vm3, %v7250_v14 }
 0x393   : > { %7239 = vmatmul.msk.f32.gmra.mxu3 %vm1540_vm3, %v1539_v51  ;;  %v7312_v51 = vld [vmem:[%s12957_s7 + $0x120] sm:$0xff] }
 0x394   : > { %2027 = vmatpush.msra.mxu1 %v7312_v51  ;;  %v7378_v51 = vld [vmem:[%s12956_s6 + $0x200] sm:$0xff] }
 0x396   : > { %2028 = vmatpush.msra.mxu1 %v7311_v7 }
 0x398   : > { %2029 = vmatpush.msra.mxu1 %v7310_v55  ;;  %v7364_v55 = vld [vmem:[%s12957_s7 + $0x1f0] sm:$0xff] }
 0x39a   : > { %7264 = vmatmul.msk.f32.gmra.mxu1 %vm1540_vm3, %v7251_v6  ;;  %v7309_v6 = vld [vmem:[%s12957_s7 + $0x108] sm:$0xff] }
 0x39b   : > { %7295 = vmatmul.msk.f32.vlgmr.msra.gmra.mxu3 %vm1540_vm3, %v7282_v22  ;;  %2030 = vmatpush.msra.mxu1 %v7309_v6  ;;  %v7407_v6 = vld [vmem:[%s12957_s7 + $0x278] sm:$0xff] }
 0x39c   : > { %2735 = vmatpush.msra.mxu3 %v9130_v57 }
 0x39e   : > { %2736 = vmatpush.msra.mxu3 %v9132_v41 }
 0x3a0   : > { %2737 = vmatpush.msra.mxu3 %v9137_v59 }
 0x3a2   : > { %7265 = vmatmul.msk.f32.gmra.mxu1 %vm1540_vm3, %v7252_v27  ;;  %2738 = vmatpush.msra.mxu3 %v9142_v58  ;;  %v7308_v27 = vld [vmem:[%s12957_s7 + $0x100] sm:$0xff] }
 0x3a3   : > { %7296 = vmatmul.msk.f32.gmra.mxu3 %vm1540_vm3, %v7283_v29  ;;  %v7366_v29 = vld [vmem:[%s12956_s6 + $0x1a0] sm:$0xff]  ;;  %2031 = vmatpush.msra.mxu1 %v7308_v27  ;;  %v7363_v27 = vld [vmem:[%s12957_s7 + $0x1e8] sm:$0xff] }
 0x3a5   : > { %2406 = vmatpush.msrb.mxu1 %v7407_v6 }
 0x3ab   : > { %7297 = vmatmul.msk.f32.gmra.mxu3 %vm1540_vm3, %v7284_v56 }
 0x3b3   : > { %7298 = vmatmul.msk.f32.gmra.mxu3 %vm1540_vm3, %v7285_v21 }
 0x3b7   : > { %v1597_v19 = vpop.f32.mrf.mxu1 }
 0x3b8   : > { %1850 = vmatmul.f32.vlgmr.msrb.gmra.mxu0 %v1597_v19 }
 0x3bb   : > { %7299 = vmatmul.msk.f32.gmra.mxu3 %vm1540_vm3, %v7286_v61 }
 0x3be   : > { %v1600_v62 = vpop.f32.mrf.mxu3 }
 0x3bf   : > { %v1722_v63 = vpop.f32.mrf.mxu1 }
 0x3c0   : > { %1794 = vmatmul.f32.vlgmr.msrb.gmra.mxu2 %v1722_v63  ;;  %1853 = vmatmul.f32.gmra.mxu0 %v1600_v62  ;;  %v7367_v62 = vld [vmem:[%s12956_s6 + $0x1a8] sm:$0xff] }
 0x3c1   : > { %2540 = vmatpush.msrb.mxu2 %v9130_v57 }
 0x3c3   : > { %2541 = vmatpush.msrb.mxu2 %v9132_v41  ;;  %7300 = vmatmul.msk.f32.gmra.mxu3 %vm1540_vm3, %v7287_v0 }
 0x3c5   : > { %2542 = vmatpush.msrb.mxu2 %v9137_v59 }
 0x3c6   : > { %v1603_v1 = vpop.f32.mrf.mxu3 }
 0x3c7   : > { %2543 = vmatpush.msrb.mxu2 %v9142_v58  ;;  %v1725_v2 = vpop.f32.mrf.mxu1 }
 0x3c8   : > { %1797 = vmatmul.f32.gmra.mxu2 %v1725_v2  ;;  %1856 = vmatmul.f32.gmra.mxu0 %v1603_v1  ;;  %v7368_v1 = vld [vmem:[%s12956_s6 + $0x1b0] sm:$0xff] }
 0x3cb   : > { %7301 = vmatmul.msk.f32.gmra.mxu3 %vm1540_vm3, %v7288_v3 }
 0x3ce   : > { %v1606_v4 = vpop.f32.mrf.mxu3 }
 0x3cf   : > { %v1728_v5 = vpop.f32.mrf.mxu1 }
 0x3d0   : > { %1800 = vmatmul.f32.gmra.mxu2 %v1728_v5  ;;  %1859 = vmatmul.f32.gmra.mxu0 %v1606_v4  ;;  %v7369_v4 = vld [vmem:[%s12956_s6 + $0x1b8] sm:$0xff] }
 0x3d1   : > { %v7324_v5 = vld [vmem:[%s12956_s6 + $0x138] sm:$0xff] }
 0x3d3   : > { %7302 = vmatmul.msk.f32.gmra.mxu3 %vm1540_vm3, %v7289_v24 }
 0x3d6   : > { %v1609_v25 = vpop.f32.mrf.mxu3 }
 0x3d7   : > { %v1731_v28 = vpop.f32.mrf.mxu1 }
 0x3d8   : > { %1803 = vmatmul.f32.gmra.mxu2 %v1731_v28  ;;  %1862 = vmatmul.f32.gmra.mxu0 %v1609_v25  ;;  %v7370_v25 = vld [vmem:[%s12956_s6 + $0x1c0] sm:$0xff] }
 0x3d9   : > { %v7325_v28 = vld [vmem:[%s12956_s6 + $0x140] sm:$0xff] }
 0x3db   : > { %7303 = vmatmul.msk.f32.gmra.mxu3 %vm1540_vm3, %v7290_v30 }
 0x3de   : > { %v1612_v31 = vpop.f32.mrf.mxu3 }
 0x3df   : > { %v1734_v15 = vpop.f32.mrf.mxu1 }
 0x3e0   : > { %1806 = vmatmul.f32.gmra.mxu2 %v1734_v15  ;;  %1865 = vmatmul.f32.gmra.mxu0 %v1612_v31  ;;  %v7327_v31 = vld [vmem:[%s12956_s6 + $0x150] sm:$0xff] }
 0x3e3   : > { %7304 = vmatmul.msk.f32.gmra.mxu3 %vm1540_vm3, %v7291_v37  ;;  %v7328_v37 = vld [vmem:[%s12956_s6 + $0x158] sm:$0xff] }
 0x3e6   : > { %v1615_v45 = vpop.f32.mrf.mxu3 }
 0x3e7   : > { %v1737_v9 = vpop.f32.mrf.mxu1 }
 0x3e8   : > { %1809 = vmatmul.f32.gmra.mxu2 %v1737_v9  ;;  %1868 = vmatmul.f32.gmra.mxu0 %v1615_v45  ;;  %v7374_v45 = vld [vmem:[%s12956_s6 + $0x1e0] sm:$0xff] }
 0x3eb   : > { %7305 = vmatmul.msk.f32.gmra.mxu3 %vm1540_vm3, %v7292_v16 }
 0x3ee   : > { %v1618_v13 = vpop.f32.mrf.mxu3 }
 0x3ef   : > { %v1740_v18 = vpop.f32.mrf.mxu1 }
 0x3f0   : > { %1812 = vmatmul.f32.gmra.mxu2 %v1740_v18  ;;  %1871 = vmatmul.f32.gmra.mxu0 %v1618_v13  ;;  %v7376_v18 = vld [vmem:[%s12956_s6 + $0x1f0] sm:$0xff] }
 0x3f3   : > { %7306 = vmatmul.msk.f32.gmra.mxu3 %vm1540_vm3, %v7293_v26 }
 0x3f6   : > { %v1621_v14 = vpop.f32.mrf.mxu3 }
 0x3f7   : > { %v1743_v20 = vpop.f32.mrf.mxu1 }
 0x3f8   : > { %1815 = vmatmul.f32.gmra.mxu2 %v1743_v20  ;;  %1874 = vmatmul.f32.gmra.mxu0 %v1621_v14  ;;  %v7332_v14 = vld [vmem:[%s12956_s6 + $0x178] sm:$0xff] }
 0x3fb   : > { %7307 = vmatmul.msk.f32.gmra.mxu3 %vm1540_vm3, %v7294_v39  ;;  %v7365_v39 = vld [vmem:[%s12957_s7 + $0x1f8] sm:$0xff] }
 0x3fc   : > { %2211 = vmatpush.msra.mxu0 %v7365_v39  ;;  %v7350_v39 = vld [vmem:[%s12957_s7 + $0x180] sm:$0xff] }
 0x3fe   : > { %v1624_v17 = vpop.f32.mrf.mxu3  ;;  %2212 = vmatpush.msra.mxu0 %v7364_v55  ;;  %v7393_v55 = vld [vmem:[%s12957_s7 + $0x208] sm:$0xff] }
 0x3ff   : > { %v1746_v22 = vpop.f32.mrf.mxu1 }
 0x400   : > { %1818 = vmatmul.f32.gmra.mxu2 %v1746_v22  ;;  %1877 = vmatmul.f32.gmra.mxu0 %v1624_v17  ;;  %v7333_v17 = vld [vmem:[%s12956_s6 + $0x180] sm:$0xff] }
 0x401   : > { %2213 = vmatpush.msra.mxu0 %v7363_v27 }
 0x403   : > { %7379 = vmatmul.msk.f32.vlgmr.msrb.gmra.mxu3 %vm1540_vm3, %v7366_v29  ;;  %v7406_v29 = vld [vmem:[%s12957_s7 + $0x270] sm:$0xff] }
 0x404   : > { %3125 = vmatpush.msrb.mxu3 %v9130_v57  ;;  %2407 = vmatpush.msrb.mxu1 %v7406_v29  ;;  %v7409_v29 = vld [vmem:[%s12956_s6 + $0x210] sm:$0xff] }
 0x406   : > { %3126 = vmatpush.msrb.mxu3 %v9132_v41  ;;  %v1627_v56 = vpop.f32.mrf.mxu3 }
 0x407   : > { %v1749_v21 = vpop.f32.mrf.mxu1 }
 0x408   : > { %1821 = vmatmul.f32.gmra.mxu2 %v1749_v21  ;;  %1880 = vmatmul.f32.gmra.mxu0 %v1627_v56  ;;  %v7450_v56 = vld [vmem:[%s12956_s6 + $0x270] sm:$0xff] }
 0x409   : > { %3127 = vmatpush.msrb.mxu3 %v9137_v59 }
 0x40b   : > { %3128 = vmatpush.msrb.mxu3 %v9142_v58 }
 0x40c   : > { %7380 = vmatmul.msk.f32.gmra.mxu3 %vm1540_vm3, %v7367_v62  ;;  %v7334_v62 = vld [vmem:[%s12956_s6 + $0x188] sm:$0xff] }
 0x40e   : > { %v1630_v19 = vpop.f32.mrf.mxu3 }
 0x40f   : > { %v1752_v61 = vpop.f32.mrf.mxu1 }
 0x410   : > { %1824 = vmatmul.f32.gmra.mxu2 %v1752_v61  ;;  %1883 = vmatmul.f32.gmra.mxu0 %v1630_v19  ;;  %v7362_v19 = vld [vmem:[%s12957_s7 + $0x1e0] sm:$0xff]  ;;  %v7405_v61 = vld [vmem:[%s12957_s7 + $0x268] sm:$0xff] }
 0x411   : > { %2214 = vmatpush.msra.mxu0 %v7362_v19  ;;  %2408 = vmatpush.msrb.mxu1 %v7405_v61  ;;  %v7455_v19 = vld [vmem:[%s12956_s6 + $0x298] sm:$0xff] }
 0x414   : > { %7381 = vmatmul.msk.f32.gmra.mxu3 %vm1540_vm3, %v7368_v1 }
 0x416   : > { %v1633_v63 = vpop.f32.mrf.mxu3 }
 0x417   : > { %v1755_v0 = vpop.f32.mrf.mxu1 }
 0x418   : > { %1827 = vmatmul.f32.gmra.mxu2 %v1755_v0  ;;  %1886 = vmatmul.f32.gmra.mxu0 %v1633_v63  ;;  %v7361_v63 = vld [vmem:[%s12957_s7 + $0x1d8] sm:$0xff]  ;;  %v7404_v0 = vld [vmem:[%s12957_s7 + $0x260] sm:$0xff] }
 0x419   : > { %2215 = vmatpush.msra.mxu0 %v7361_v63  ;;  %2409 = vmatpush.msrb.mxu1 %v7404_v0  ;;  %v7410_v63 = vld [vmem:[%s12956_s6 + $0x218] sm:$0xff] }
 0x41c   : > { %7382 = vmatmul.msk.f32.gmra.mxu3 %vm1540_vm3, %v7369_v4  ;;  %v7359_v4 = vld [vmem:[%s12957_s7 + $0x1c8] sm:$0xff] }
 0x41e   : > { %v1960_v2 = vpop.f32.mrf.mxu3 }
 0x41f   : > { %v1758_v3 = vpop.f32.mrf.mxu1  ;;  %2032 = vmatmul.f32.vlgmr.msra.gmra.mxu1 %v1960_v2  ;;  %v7360_v2 = vld [vmem:[%s12957_s7 + $0x1d0] sm:$0xff] }
 0x420   : > { %1830 = vmatmul.f32.gmra.mxu2 %v1758_v3  ;;  %v7403_v3 = vld [vmem:[%s12957_s7 + $0x258] sm:$0xff]  ;;  %2216 = vmatpush.msra.mxu0 %v7360_v2 }
 0x421   : > { %2410 = vmatpush.msrb.mxu1 %v7403_v3 }
 0x422   : > { %2217 = vmatpush.msra.mxu0 %v7359_v4  ;;  %v7411_v4 = vld [vmem:[%s12956_s6 + $0x220] sm:$0xff] }
 0x424   : > { %7383 = vmatmul.msk.f32.gmra.mxu3 %vm1540_vm3, %v7370_v25 }
 0x426   : > { %v1963_v24 = vpop.f32.mrf.mxu3 }
 0x427   : > { %2035 = vmatmul.f32.gmra.mxu1 %v1963_v24  ;;  %v7451_v24 = vld [vmem:[%s12956_s6 + $0x278] sm:$0xff] }
 0x428   : > { %7337 = vmatmul.msk.f32.vlgmr.msra.gmra.mxu2 %vm1540_vm3, %v7324_v5  ;;  %v7402_v5 = vld [vmem:[%s12957_s7 + $0x250] sm:$0xff] }
 0x429   : > { %2930 = vmatpush.msra.mxu2 %v9130_v57  ;;  %v7371_v57 = vld [vmem:[%s12956_s6 + $0x1c8] sm:$0xff]  ;;  %2411 = vmatpush.msrb.mxu1 %v7402_v5 }
 0x42b   : > { %2931 = vmatpush.msra.mxu2 %v9132_v41  ;;  %v7326_v41 = vld [vmem:[%s12956_s6 + $0x148] sm:$0xff] }
 0x42c   : > { %7384 = vmatmul.msk.f32.gmra.mxu3 %vm1540_vm3, %v7371_v57  ;;  %v7401_v57 = vld [vmem:[%s12957_s7 + $0x248] sm:$0xff] }
 0x42d   : > { %2932 = vmatpush.msra.mxu2 %v9137_v59  ;;  %2412 = vmatpush.msrb.mxu1 %v7401_v57 }
 0x42e   : > { %v1966_v30 = vpop.f32.mrf.mxu3 }
 0x42f   : > { %2933 = vmatpush.msra.mxu2 %v9142_v58  ;;  %2038 = vmatmul.f32.gmra.mxu1 %v1966_v30  ;;  %v7372_v58 = vld [vmem:[%s12956_s6 + $0x1d0] sm:$0xff]  ;;  %v7358_v30 = vld [vmem:[%s12957_s7 + $0x1c0] sm:$0xff] }
 0x430   : > { %7338 = vmatmul.msk.f32.gmra.mxu2 %vm1540_vm3, %v7325_v28  ;;  %v7335_v28 = vld [vmem:[%s12956_s6 + $0x190] sm:$0xff]  ;;  %2218 = vmatpush.msra.mxu0 %v7358_v30 }
 0x434   : > { %7385 = vmatmul.msk.f32.gmra.mxu3 %vm1540_vm3, %v7372_v58 }
 0x436   : > { %v1969_v59 = vpop.f32.mrf.mxu3 }
 0x437   : > { %2041 = vmatmul.f32.gmra.mxu1 %v1969_v59  ;;  %v7400_v59 = vld [vmem:[%s12957_s7 + $0x240] sm:$0xff] }
 0x438   : > { %7339 = vmatmul.msk.f32.gmra.mxu2 %vm1540_vm3, %v7326_v41  ;;  %v7357_v41 = vld [vmem:[%s12957_s7 + $0x1b8] sm:$0xff]  ;;  %2413 = vmatpush.msrb.mxu1 %v7400_v59 }
 0x439   : > { %2219 = vmatpush.msra.mxu0 %v7357_v41  ;;  %v7412_v41 = vld [vmem:[%s12956_s6 + $0x228] sm:$0xff] }
 0x43c   : > { %7386 = vmatmul.msk.f32.gmra.mxu3 %vm1540_vm3, %v7373_v49  ;;  %v7452_v49 = vld [vmem:[%s12956_s6 + $0x280] sm:$0xff] }
 0x43e   : > { %v1972_v15 = vpop.f32.mrf.mxu3 }
 0x43f   : > { %2044 = vmatmul.f32.gmra.mxu1 %v1972_v15  ;;  %v7399_v15 = vld [vmem:[%s12957_s7 + $0x238] sm:$0xff] }
 0x440   : > { %7340 = vmatmul.msk.f32.gmra.mxu2 %vm1540_vm3, %v7327_v31  ;;  %v7356_v31 = vld [vmem:[%s12957_s7 + $0x1b0] sm:$0xff]  ;;  %2414 = vmatpush.msrb.mxu1 %v7399_v15 }
 0x441   : > { %2220 = vmatpush.msra.mxu0 %v7356_v31 }
 0x443   : > { %v9478_v33 = vpop.f32.mrf.mxu2 }
 0x444   : > { %7387 = vmatmul.msk.f32.gmra.mxu3 %vm1540_vm3, %v7374_v45 }
 0x446   : > { %v1975_v12 = vpop.f32.mrf.mxu3 }
 0x447   : > { %2047 = vmatmul.f32.gmra.mxu1 %v1975_v12  ;;  %v7398_v12 = vld [vmem:[%s12957_s7 + $0x230] sm:$0xff] }
 0x448   : > { %7341 = vmatmul.msk.f32.gmra.mxu2 %vm1540_vm3, %v7328_v37  ;;  %v7355_v37 = vld [vmem:[%s12957_s7 + $0x1a8] sm:$0xff]  ;;  %2415 = vmatpush.msrb.mxu1 %v7398_v12 }
 0x449   : > { %2221 = vmatpush.msra.mxu0 %v7355_v37  ;;  %v7413_v37 = vld [vmem:[%s12956_s6 + $0x230] sm:$0xff] }
 0x44b   : > { %v9488_v9 = vpop.f32.mrf.mxu2 }
 0x44c   : > { %7388 = vmatmul.msk.f32.gmra.mxu3 %vm1540_vm3, %v7375_v43  ;;  %v7397_v43 = vld [vmem:[%s12957_s7 + $0x228] sm:$0xff] }
 0x44d   : > { %2416 = vmatpush.msrb.mxu1 %v7397_v43 }
 0x44e   : > { %v1978_v16 = vpop.f32.mrf.mxu3 }
 0x44f   : > { %2050 = vmatmul.f32.gmra.mxu1 %v1978_v16  ;;  %v7354_v16 = vld [vmem:[%s12957_s7 + $0x1a0] sm:$0xff] }
 0x450   : > { %7342 = vmatmul.msk.f32.gmra.mxu2 %vm1540_vm3, %v7329_v35  ;;  %v7336_v35 = vld [vmem:[%s12956_s6 + $0x198] sm:$0xff]  ;;  %2222 = vmatpush.msra.mxu0 %v7354_v16 }
 0x453   : > { %v9498_v23 = vpop.f32.mrf.mxu2 }
 0x454   : > { %7389 = vmatmul.msk.f32.gmra.mxu3 %vm1540_vm3, %v7376_v18  ;;  %v7352_v18 = vld [vmem:[%s12957_s7 + $0x190] sm:$0xff] }
 0x456   : > { %v1981_v13 = vpop.f32.mrf.mxu3 }
 0x457   : > { %2053 = vmatmul.f32.gmra.mxu1 %v1981_v13  ;;  %v7396_v13 = vld [vmem:[%s12957_s7 + $0x220] sm:$0xff] }
 0x458   : > { %7343 = vmatmul.msk.f32.gmra.mxu2 %vm1540_vm3, %v7330_v60  ;;  %v7353_v60 = vld [vmem:[%s12957_s7 + $0x198] sm:$0xff]  ;;  %2417 = vmatpush.msrb.mxu1 %v7396_v13 }
 0x459   : > { %2223 = vmatpush.msra.mxu0 %v7353_v60  ;;  %v7414_v13 = vld [vmem:[%s12956_s6 + $0x238] sm:$0xff] }
 0x45b   : > { %v9508_v47 = vpop.f32.mrf.mxu2  ;;  %2224 = vmatpush.msra.mxu0 %v7352_v18 }
 0x45c   : > { %7390 = vmatmul.msk.f32.gmra.mxu3 %vm1540_vm3, %v7377_v11  ;;  %v7351_v11 = vld [vmem:[%s12957_s7 + $0x188] sm:$0xff] }
 0x45d   : > { %2225 = vmatpush.msra.mxu0 %v7351_v11 }
 0x45e   : > { %v1984_v26 = vpop.f32.mrf.mxu3 }
 0x45f   : > { %2056 = vmatmul.f32.gmra.mxu1 %v1984_v26  ;;  %v7453_v26 = vld [vmem:[%s12956_s6 + $0x288] sm:$0xff]  ;;  %2226 = vmatpush.msra.mxu0 %v7350_v39 }
 0x460   : > { %7344 = vmatmul.msk.f32.gmra.mxu2 %vm1540_vm3, %v7331_v10  ;;  %v7395_v10 = vld [vmem:[%s12957_s7 + $0x218] sm:$0xff] }
 0x461   : > { %2418 = vmatpush.msrb.mxu1 %v7395_v10  ;;  %v7460_v10 = vld [vmem:[%s12956_s6 + $0x2c0] sm:$0xff] }
 0x463   : > { %v9518_v8 = vpop.f32.mrf.mxu2 }
 0x464   : > { %7391 = vmatmul.msk.f32.gmra.mxu3 %vm1540_vm3, %v7378_v51  ;;  %v7408_v51 = vld [vmem:[%s12956_s6 + $0x208] sm:$0xff] }
 0x466   : > { %v1987_v20 = vpop.f32.mrf.mxu3 }
 0x467   : > { %2059 = vmatmul.f32.gmra.mxu1 %v1987_v20 }
 0x468   : > { %7345 = vmatmul.msk.f32.gmra.mxu2 %vm1540_vm3, %v7332_v14  ;;  %v7394_v14 = vld [vmem:[%s12957_s7 + $0x210] sm:$0xff] }
 0x469   : > { %2419 = vmatpush.msrb.mxu1 %v7394_v14  ;;  %v7415_v14 = vld [vmem:[%s12956_s6 + $0x240] sm:$0xff] }
 0x46b   : > { %v9528_v7 = vpop.f32.mrf.mxu2  ;;  %2420 = vmatpush.msrb.mxu1 %v7393_v55  ;;  %v7461_v55 = vld [vmem:[%s12956_s6 + $0x2c8] sm:$0xff] }
 0x46c   : > { %7463 = vmatmul.msk.f32.vlgmr.msra.gmra.mxu3 %vm1540_vm3, %v7450_v56 }
 0x46e   : > { %v1990_v22 = vpop.f32.mrf.mxu3 }
 0x46f   : > { %2062 = vmatmul.f32.gmra.mxu1 %v1990_v22  ;;  %v7454_v22 = vld [vmem:[%s12956_s6 + $0x290] sm:$0xff] }
 0x470   : > { %7346 = vmatmul.msk.f32.gmra.mxu2 %vm1540_vm3, %v7333_v17  ;;  %v7392_v17 = vld [vmem:[%s12957_s7 + $0x200] sm:$0xff] }
 0x471   : > { %2421 = vmatpush.msrb.mxu1 %v7392_v17 }
 0x473   : > { %v9552_v21 = vpop.f32.mrf.mxu2 }
 0x474   : > { %7464 = vmatmul.msk.f32.gmra.mxu3 %vm1540_vm3, %v7451_v24  ;;  %v7457_v24 = vld [vmem:[%s12956_s6 + $0x2a8] sm:$0xff] }
 0x476   : > { %v1993_v1 = vpop.f32.mrf.mxu3 }
 0x477   : > { %2065 = vmatmul.f32.gmra.mxu1 %v1993_v1  ;;  %v7456_v1 = vld [vmem:[%s12956_s6 + $0x2a0] sm:$0xff] }
 0x478   : > { %7347 = vmatmul.msk.f32.gmra.mxu2 %vm1540_vm3, %v7334_v62 }
 0x47b   : > { %v9586_v25 = vpop.f32.mrf.mxu2 }
 0x47c   : > { %7465 = vmatmul.msk.f32.gmra.mxu3 %vm1540_vm3, %v7452_v49 }
 0x47e   : > { %v1996_v58 = vpop.f32.mrf.mxu3 }
 0x47f   : > { %2068 = vmatmul.f32.gmra.mxu1 %v1996_v58  ;;  %v7458_v58 = vld [vmem:[%s12956_s6 + $0x2b0] sm:$0xff] }
 0x480   : > { %7348 = vmatmul.msk.f32.gmra.mxu2 %vm1540_vm3, %v7335_v28  ;;  %v9720_v28 = vpop.f32.mrf.mxu0 }
 0x483   : > { %v9620_v45 = vpop.f32.mrf.mxu2 }
 0x484   : > { %7466 = vmatmul.msk.f32.gmra.mxu3 %vm1540_vm3, %v7453_v26 }
 0x486   : > { %v2350_v6 = vpop.f32.mrf.mxu3 }
 0x487   : > { %2422 = vmatmul.f32.vlgmr.msrb.gmra.mxu1 %v2350_v6 }
 0x488   : > { %7349 = vmatmul.msk.f32.gmra.mxu2 %vm1540_vm3, %v7336_v35  ;;  %v9732_v31 = vpop.f32.mrf.mxu0  ;;  %v7459_v35 = vld [vmem:[%s12956_s6 + $0x2b8] sm:$0xff] }
 0x48b   : > { %v9654_v20 = vpop.f32.mrf.mxu2 }
 0x48c   : > { %7467 = vmatmul.msk.f32.gmra.mxu3 %vm1540_vm3, %v7454_v22  ;;  %v7416_v22 = vld [vmem:[%s12956_s6 + $0x248] sm:$0xff] }
 0x48f   : > { %v2353_v56 = vpop.f32.mrf.mxu3 }
 0x490   : > { %7421 = vmatmul.msk.f32.vlgmr.msrb.gmra.mxu2 %vm1540_vm3, %v7408_v51  ;;  %2425 = vmatmul.f32.gmra.mxu1 %v2353_v56  ;;  %v9744_v43 = vpop.f32.mrf.mxu0 }
 0x491   : > { %3327 = vmatpush.msrb.mxu2 %v8488_v32 }
 0x493   : > { %3328 = vmatpush.msrb.mxu2 %v8490_v34  ;;  %v9675_v27 = vpop.f32.mrf.mxu2 }
 0x494   : > { %7468 = vmatmul.msk.f32.gmra.mxu3 %vm1540_vm3, %v7455_v19  ;;  %v7462_v19 = vld [vmem:[%s12956_s6 + $0x2d0] sm:$0xff] }
 0x495   : > { %3329 = vmatpush.msrb.mxu2 %v8495_v36 }
 0x497   : > { %3330 = vmatpush.msrb.mxu2 %v8500_v38  ;;  %v2356_v0 = vpop.f32.mrf.mxu3 }
 0x498   : > { %7422 = vmatmul.msk.f32.gmra.mxu2 %vm1540_vm3, %v7409_v29  ;;  %2428 = vmatmul.f32.gmra.mxu1 %v2356_v0  ;;  %v9762_v51 = vpop.f32.mrf.mxu0 }
 0x499   : > { %3331 = vmatpush.msrb.mxu2 %v8505_v40 }
 0x49b   : > { %3332 = vmatpush.msrb.mxu2 %v8510_v42  ;;  %v9689_v61 = vpop.f32.mrf.mxu2 }
 0x49c   : > { %v9692_v62 = vpop.f32.mrf.mxu1  ;;  %7469 = vmatmul.msk.f32.gmra.mxu3 %vm1540_vm3, %v7456_v1  ;;  %v7417_v1 = vld [vmem:[%s12956_s6 + $0x250] sm:$0xff] }
 0x49d   : > { %3333 = vmatpush.msrb.mxu2 %v8515_v44 }
 0x49f   : > { %3334 = vmatpush.msrb.mxu2 %v8520_v46  ;;  %v2359_v5 = vpop.f32.mrf.mxu3 }
 0x4a0   : > { %7423 = vmatmul.msk.f32.gmra.mxu2 %vm1540_vm3, %v7410_v63  ;;  %2431 = vmatmul.f32.gmra.mxu1 %v2359_v5  ;;  %v9774_v56 = vpop.f32.mrf.mxu0  ;;  %v7449_v5 = vld [vmem:[%s12957_s7 + $0x2f8] sm:$0xff] }
 0x4a1   : > { %3335 = vmatpush.msrb.mxu2 %v8525_v48  ;;  %2601 = vmatpush.msrb.mxu0 %v7449_v5 }
 0x4a3   : > { %3336 = vmatpush.msrb.mxu2 %v8530_v50  ;;  %v9705_v2 = vpop.f32.mrf.mxu2 }
 0x4a4   : > { %v9708_v3 = vpop.f32.mrf.mxu1  ;;  %7470 = vmatmul.msk.f32.gmra.mxu3 %vm1540_vm3, %v7457_v24  ;;  %v7448_v24 = vld [vmem:[%s12957_s7 + $0x2f0] sm:$0xff] }
 0x4a5   : > { %3337 = vmatpush.msrb.mxu2 %v8536_v52  ;;  %2602 = vmatpush.msrb.mxu0 %v7448_v24  ;;  %v7441_v24 = vld [vmem:[%s12957_s7 + $0x2b8] sm:$0xff] }
 0x4a7   : > { %3338 = vmatpush.msrb.mxu2 %v8541_v53  ;;  %v2362_v59 = vpop.f32.mrf.mxu3 }
 0x4a8   : > { %7424 = vmatmul.msk.f32.gmra.mxu2 %vm1540_vm3, %v7411_v4  ;;  %2434 = vmatmul.f32.gmra.mxu1 %v2362_v59  ;;  %v7490_v59 = vld [vmem:[%s12957_s7 + $0x370] sm:$0xff] }
 0x4a9   : > { %3339 = vmatpush.msrb.mxu2 %v8546_v54 }
 0x4ab   : > { %v2155_v30 = vpop.f32.mrf.mxu2 }
 0x4ac   : > { %2227 = vmatmul.f32.vlgmr.msra.gmra.mxu0 %v2155_v30  ;;  %v9723_v57 = vpop.f32.mrf.mxu1  ;;  %7471 = vmatmul.msk.f32.gmra.mxu3 %vm1540_vm3, %v7458_v58  ;;  %v7491_v30 = vld [vmem:[%s12957_s7 + $0x378] sm:$0xff]  ;;  %v7534_v58 = vld [vmem:[%s12956_s6 + $0x340] sm:$0xff] }
 0x4ad   : > { %2796 = vmatpush.msra.mxu1 %v7491_v30  ;;  %v7484_v30 = vld [vmem:[%s12957_s7 + $0x340] sm:$0xff] }
 0x4af   : > { %v2365_v12 = vpop.f32.mrf.mxu3  ;;  %2797 = vmatpush.msra.mxu1 %v7490_v59  ;;  %v7483_v59 = vld [vmem:[%s12957_s7 + $0x338] sm:$0xff] }
 0x4b0   : > { %7425 = vmatmul.msk.f32.gmra.mxu2 %vm1540_vm3, %v7412_v41  ;;  %2437 = vmatmul.f32.gmra.mxu1 %v2365_v12  ;;  %v7447_v41 = vld [vmem:[%s12957_s7 + $0x2e8] sm:$0xff]  ;;  %v7418_v12 = vld [vmem:[%s12956_s6 + $0x258] sm:$0xff] }
 0x4b1   : > { %2603 = vmatpush.msrb.mxu0 %v7447_v41  ;;  %v7440_v41 = vld [vmem:[%s12957_s7 + $0x2b0] sm:$0xff] }
 0x4b3   : > { %v2158_v15 = vpop.f32.mrf.mxu2 }
 0x4b4   : > { %2230 = vmatmul.f32.gmra.mxu0 %v2158_v15  ;;  %v9735_v49 = vpop.f32.mrf.mxu1  ;;  %7472 = vmatmul.msk.f32.gmra.mxu3 %vm1540_vm3, %v7459_v35  ;;  %v9805_v15 = vpop.f32.mrf.mxu0  ;;  %v7446_v35 = vld [vmem:[%s12957_s7 + $0x2e0] sm:$0xff] }
 0x4b5   : > { %2604 = vmatpush.msrb.mxu0 %v7446_v35  ;;  %v7482_v35 = vld [vmem:[%s12957_s7 + $0x330] sm:$0xff] }
 0x4b7   : > { %v2368_v18 = vpop.f32.mrf.mxu3 }
 0x4b8   : > { %7426 = vmatmul.msk.f32.gmra.mxu2 %vm1540_vm3, %v7413_v37  ;;  %2440 = vmatmul.f32.gmra.mxu1 %v2368_v18  ;;  %v7445_v18 = vld [vmem:[%s12957_s7 + $0x2d8] sm:$0xff] }
 0x4b9   : > { %2605 = vmatpush.msrb.mxu0 %v7445_v18  ;;  %v7481_v18 = vld [vmem:[%s12957_s7 + $0x328] sm:$0xff] }
 0x4bb   : > { %v2161_v16 = vpop.f32.mrf.mxu2 }
 0x4bc   : > { %2233 = vmatmul.f32.gmra.mxu0 %v2161_v16  ;;  %v9747_v60 = vpop.f32.mrf.mxu1  ;;  %7473 = vmatmul.msk.f32.gmra.mxu3 %vm1540_vm3, %v7460_v10  ;;  %v7489_v16 = vld [vmem:[%s12957_s7 + $0x368] sm:$0xff]  ;;  %v7488_v10 = vld [vmem:[%s12957_s7 + $0x360] sm:$0xff] }
 0x4bd   : > { %2798 = vmatpush.msra.mxu1 %v7489_v16 }
 0x4bf   : > { %v2371_v39 = vpop.f32.mrf.mxu3  ;;  %2799 = vmatpush.msra.mxu1 %v7488_v10  ;;  %v7420_v10 = vld [vmem:[%s12956_s6 + $0x268] sm:$0xff] }
 0x4c0   : > { %7427 = vmatmul.msk.f32.gmra.mxu2 %vm1540_vm3, %v7414_v13  ;;  %2443 = vmatmul.f32.gmra.mxu1 %v2371_v39  ;;  %v7487_v39 = vld [vmem:[%s12957_s7 + $0x358] sm:$0xff] }
 0x4c1   : > { %2800 = vmatpush.msra.mxu1 %v7487_v39 }
 0x4c3   : > { %v2164_v26 = vpop.f32.mrf.mxu2 }
 0x4c4   : > { %2236 = vmatmul.f32.gmra.mxu0 %v2164_v26  ;;  %v9757_v11 = vpop.f32.mrf.mxu1  ;;  %7474 = vmatmul.msk.f32.gmra.mxu3 %vm1540_vm3, %v7461_v55  ;;  %v7535_v55 = vld [vmem:[%s12956_s6 + $0x348] sm:$0xff] }
 0x4c7   : > { %v2374_v29 = vpop.f32.mrf.mxu3 }
 0x4c8   : > { %7428 = vmatmul.msk.f32.gmra.mxu2 %vm1540_vm3, %v7415_v14  ;;  %2446 = vmatmul.f32.gmra.mxu1 %v2374_v29  ;;  %v7444_v14 = vld [vmem:[%s12957_s7 + $0x2d0] sm:$0xff] }
 0x4c9   : > { %2606 = vmatpush.msrb.mxu0 %v7444_v14 }
 0x4cb   : > { %v2167_v6 = vpop.f32.mrf.mxu2 }
 0x4cc   : > { %2239 = vmatmul.f32.gmra.mxu0 %v2167_v6  ;;  %v9769_v17 = vpop.f32.mrf.mxu1  ;;  %7475 = vmatmul.msk.f32.gmra.mxu3 %vm1540_vm3, %v7462_v19  ;;  %v7443_v6 = vld [vmem:[%s12957_s7 + $0x2c8] sm:$0xff]  ;;  %v9841_v19 = vpop.f32.mrf.mxu0 }
 0x4cd   : > { %2607 = vmatpush.msrb.mxu0 %v7443_v6  ;;  %v7480_v6 = vld [vmem:[%s12957_s7 + $0x320] sm:$0xff] }
 0x4cf   : > { %v2377_v4 = vpop.f32.mrf.mxu3 }
 0x4d0   : > { %7429 = vmatmul.msk.f32.gmra.mxu2 %vm1540_vm3, %v7416_v22  ;;  %2449 = vmatmul.f32.gmra.mxu1 %v2377_v4  ;;  %v7486_v22 = vld [vmem:[%s12957_s7 + $0x350] sm:$0xff]  ;;  %v7419_v4 = vld [vmem:[%s12956_s6 + $0x260] sm:$0xff] }
 0x4d1   : > { %2801 = vmatpush.msra.mxu1 %v7486_v22  ;;  %v7436_v22 = vld [vmem:[%s12957_s7 + $0x290] sm:$0xff] }
 0x4d3   : > { %v2170_v63 = vpop.f32.mrf.mxu2 }
 0x4d4   : > { %2242 = vmatmul.f32.gmra.mxu0 %v2170_v63  ;;  %v9781_v0 = vpop.f32.mrf.mxu1  ;;  %7547 = vmatmul.msk.f32.vlgmr.msrb.gmra.mxu3 %vm1540_vm3, %v7534_v58  ;;  %v7442_v63 = vld [vmem:[%s12957_s7 + $0x2c0] sm:$0xff]  ;;  %v9887_v14 = vpop.f32.mrf.mxu0 }
 0x4d5   : > { %2608 = vmatpush.msrb.mxu0 %v7442_v63  ;;  %v7537_v63 = vld [vmem:[%s12956_s6 + $0x358] sm:$0xff] }
 0x4d7   : > { %v2380_v13 = vpop.f32.mrf.mxu3  ;;  %2609 = vmatpush.msrb.mxu0 %v7441_v24 }
 0x4d8   : > { %7430 = vmatmul.msk.f32.gmra.mxu2 %vm1540_vm3, %v7417_v1  ;;  %2452 = vmatmul.f32.gmra.mxu1 %v2380_v13  ;;  %v7485_v1 = vld [vmem:[%s12957_s7 + $0x348] sm:$0xff]  ;;  %v7438_v13 = vld [vmem:[%s12957_s7 + $0x2a0] sm:$0xff] }
 0x4d9   : > { %2802 = vmatpush.msra.mxu1 %v7485_v1  ;;  %2610 = vmatpush.msrb.mxu0 %v7440_v41  ;;  %v7435_v1 = vld [vmem:[%s12957_s7 + $0x288] sm:$0xff] }
 0x4da   : > { %v7477_v41 = vld [vmem:[%s12957_s7 + $0x308] sm:$0xff] }
 0x4db   : > { %v2173_v37 = vpop.f32.mrf.mxu2  ;;  %2803 = vmatpush.msra.mxu1 %v7484_v30  ;;  %v7434_v30 = vld [vmem:[%s12957_s7 + $0x280] sm:$0xff] }
 0x4dc   : > { %2245 = vmatmul.f32.gmra.mxu0 %v2173_v37  ;;  %v9823_v26 = vpop.f32.mrf.mxu1  ;;  %7548 = vmatmul.msk.f32.gmra.mxu3 %vm1540_vm3, %v7535_v55  ;;  %v7536_v37 = vld [vmem:[%s12956_s6 + $0x350] sm:$0xff]  ;;  %v7437_v55 = vld [vmem:[%s12957_s7 + $0x298] sm:$0xff] }
 0x4dd   : > { %2804 = vmatpush.msra.mxu1 %v7483_v59  ;;  %v7492_v59 = vld [vmem:[%s12956_s6 + $0x2d8] sm:$0xff] }
 0x4df   : > { %v2383_v5 = vpop.f32.mrf.mxu3  ;;  %2805 = vmatpush.msra.mxu1 %v7482_v35  ;;  %v9926_v35 = vpop.f32.mrf.mxu0 }
 0x4e0   : > { %7431 = vmatmul.msk.f32.gmra.mxu2 %vm1540_vm3, %v7418_v12  ;;  %2455 = vmatmul.f32.gmra.mxu1 %v2383_v5  ;;  %v7439_v12 = vld [vmem:[%s12957_s7 + $0x2a8] sm:$0xff] }
 0x4e1   : > { %2611 = vmatpush.msrb.mxu0 %v7439_v12  ;;  %2806 = vmatpush.msra.mxu1 %v7481_v18  ;;  %v7476_v12 = vld [vmem:[%s12957_s7 + $0x300] sm:$0xff] }
 0x4e3   : > { %v2176_v29 = vpop.f32.mrf.mxu2  ;;  %2612 = vmatpush.msrb.mxu0 %v7438_v13  ;;  %2807 = vmatpush.msra.mxu1 %v7480_v6 }
 0x4e4   : > { %2248 = vmatmul.f32.gmra.mxu0 %v2176_v29  ;;  %v9866_v58 = vpop.f32.mrf.mxu1  ;;  %7549 = vmatmul.msk.f32.gmra.mxu3 %vm1540_vm3, %v7536_v37  ;;  %v7479_v29 = vld [vmem:[%s12957_s7 + $0x318] sm:$0xff] }
 0x4e5   : > { %2613 = vmatpush.msrb.mxu0 %v7437_v55  ;;  %2808 = vmatpush.msra.mxu1 %v7479_v29  ;;  %v7539_v55 = vld [vmem:[%s12956_s6 + $0x368] sm:$0xff] }
 0x4e6   : > { %v7494_v29 = vld [vmem:[%s12956_s6 + $0x2e8] sm:$0xff] }
 0x4e7   : > { %v2386_v39 = vpop.f32.mrf.mxu3  ;;  %2614 = vmatpush.msrb.mxu0 %v7436_v22  ;;  %v9947_v6 = vpop.f32.mrf.mxu0 }
 0x4e8   : > { %7432 = vmatmul.msk.f32.gmra.mxu2 %vm1540_vm3, %v7419_v4  ;;  %2458 = vmatmul.f32.gmra.mxu1 %v2386_v39  ;;  %v7478_v4 = vld [vmem:[%s12957_s7 + $0x310] sm:$0xff] }
 0x4e9   : > { %2615 = vmatpush.msrb.mxu0 %v7435_v1  ;;  %2809 = vmatpush.msra.mxu1 %v7478_v4  ;;  %v7540_v4 = vld [vmem:[%s12956_s6 + $0x370] sm:$0xff] }
 0x4eb   : > { %v2179_v16 = vpop.f32.mrf.mxu2  ;;  %2616 = vmatpush.msrb.mxu0 %v7434_v30  ;;  %2810 = vmatpush.msra.mxu1 %v7477_v41  ;;  %v7495_v41 = vld [vmem:[%s12956_s6 + $0x2f0] sm:$0xff] }
 0x4ec   : > { %2251 = vmatmul.f32.gmra.mxu0 %v2179_v16  ;;  %v9911_v5 = vpop.f32.mrf.mxu1  ;;  %7550 = vmatmul.msk.f32.gmra.mxu3 %vm1540_vm3, %v7537_v63  ;;  %v7538_v16 = vld [vmem:[%s12956_s6 + $0x360] sm:$0xff] }
 0x4ed   : > { %2811 = vmatpush.msra.mxu1 %v7476_v12  ;;  %v7541_v12 = vld [vmem:[%s12956_s6 + $0x378] sm:$0xff] }
 0x4ef   : > { %v2740_v37 = vpop.f32.mrf.mxu3  ;;  %v9964_v30 = vpop.f32.mrf.mxu0 }
 0x4f0   : > { %7433 = vmatmul.msk.f32.gmra.mxu2 %vm1540_vm3, %v7420_v10  ;;  %2812 = vmatmul.f32.vlgmr.msra.gmra.mxu1 %v2740_v37  ;;  %v7493_v10 = vld [vmem:[%s12956_s6 + $0x2e0] sm:$0xff] }
 0x4f3   : > { %v2182_v24 = vpop.f32.mrf.mxu2 }
 0x4f4   : > { %2254 = vmatmul.f32.gmra.mxu0 %v2182_v24  ;;  %7551 = vmatmul.msk.f32.gmra.mxu3 %vm1540_vm3, %v7538_v16  ;;  %v9935_v18 = vpop.f32.mrf.mxu1 }
 0x4f7   : > { %v2743_v39 = vpop.f32.mrf.mxu3 }
 0x4f8   : > { %7505 = vmatmul.msk.f32.vlgmr.msra.gmra.mxu2 %vm1540_vm3, %v7492_v59  ;;  %2815 = vmatmul.f32.gmra.mxu1 %v2743_v39 }
 0x4f9   : > { %8295 = vmatpush.msra.mxu2 %v8488_v32 }
 0x4fb   : > { %8296 = vmatpush.msra.mxu2 %v8490_v34  ;;  %v2185_v13 = vpop.f32.mrf.mxu2 }
 0x4fc   : > { %2257 = vmatmul.f32.gmra.mxu0 %v2185_v13  ;;  %7552 = vmatmul.msk.f32.gmra.mxu3 %vm1540_vm3, %v7539_v55  ;;  %v9955_v63 = vpop.f32.mrf.mxu1  ;;  %v7496_v13 = vld [vmem:[%s12956_s6 + $0x2f8] sm:$0xff] }
 0x4fd   : > { %8297 = vmatpush.msra.mxu2 %v8495_v36  ;;  %13040 = vst [vmem:[#allocation15_spill] sm:$0xff] %v9955_v63 }
 0x4ff   : > { %8298 = vmatpush.msra.mxu2 %v8500_v38  ;;  %v2746_v1 = vpop.f32.mrf.mxu3 }
 0x500   : > { %7506 = vmatmul.msk.f32.gmra.mxu2 %vm1540_vm3, %v7493_v10  ;;  %2818 = vmatmul.f32.gmra.mxu1 %v2746_v1  ;;  %v9981_v10 = vpop.f32.mrf.mxu0  ;;  %v7497_v1 = vld [vmem:[%s12956_s6 + $0x300] sm:$0xff] }
 0x501   : > { %8299 = vmatpush.msra.mxu2 %v8505_v40 }
 0x503   : > { %8300 = vmatpush.msra.mxu2 %v8510_v42  ;;  %v2188_v22 = vpop.f32.mrf.mxu2 }
 0x504   : > { %2260 = vmatmul.f32.gmra.mxu0 %v2188_v22  ;;  %7553 = vmatmul.msk.f32.gmra.mxu3 %vm1540_vm3, %v7540_v4  ;;  %v2423_v59 = vpop.f32.mrf.mxu1  ;;  %v7542_v22 = vld [vmem:[%s12956_s6 + $0x380] sm:$0xff] }
 0x505   : > { %8301 = vmatpush.msra.mxu2 %v8515_v44 }
 0x507   : > { %8302 = vmatpush.msra.mxu2 %v8520_v46  ;;  %v2749_v37 = vpop.f32.mrf.mxu3 }
 0x508   : > { %7507 = vmatmul.msk.f32.gmra.mxu2 %vm1540_vm3, %v7494_v29  ;;  %2821 = vmatmul.f32.gmra.mxu1 %v2749_v37  ;;  %v7543_v37 = vld [vmem:[%s12956_s6 + $0x388] sm:$0xff] }
 0x509   : > { %8303 = vmatpush.msra.mxu2 %v8525_v48 }
 0x50b   : > { %8304 = vmatpush.msra.mxu2 %v8530_v50  ;;  %v2191_v24 = vpop.f32.mrf.mxu2 }
 0x50c   : > { %2263 = vmatmul.f32.gmra.mxu0 %v2191_v24  ;;  %7554 = vmatmul.msk.f32.gmra.mxu3 %vm1540_vm3, %v7541_v12 }
 0x50d   : > { %8305 = vmatpush.msra.mxu2 %v8536_v52  ;;  %v2426_v39 = vpop.f32.mrf.mxu1 }
 0x50f   : > { %8306 = vmatpush.msra.mxu2 %v8541_v53  ;;  %v2752_v55 = vpop.f32.mrf.mxu3 }
 0x510   : > { %7508 = vmatmul.msk.f32.gmra.mxu2 %vm1540_vm3, %v7495_v41  ;;  %2824 = vmatmul.f32.gmra.mxu1 %v2752_v55  ;;  %v9992_v41 = vpop.f32.mrf.mxu0 }
 0x511   : > { %8307 = vmatpush.msra.mxu2 %v8546_v54 }
 0x513   : > { %v2545_v16 = vpop.f32.mrf.mxu2 }
 0x514   : > { %2617 = vmatmul.f32.vlgmr.msrb.gmra.mxu0 %v2545_v16  ;;  %7555 = vmatmul.msk.f32.gmra.mxu3 %vm1540_vm3, %v7542_v22  ;;  %v7498_v16 = vld [vmem:[%s12956_s6 + $0x308] sm:$0xff] }
 0x515   : > { %v2429_v4 = vpop.f32.mrf.mxu1 }
 0x517   : > { %v2755_v24 = vpop.f32.mrf.mxu3 }
 0x518   : > { %7509 = vmatmul.msk.f32.gmra.mxu2 %vm1540_vm3, %v7496_v13  ;;  %2827 = vmatmul.f32.gmra.mxu1 %v2755_v24  ;;  %v1852_v13 = vadd.f32 %v9720_v28, %v9478_v33  ;;  %v7499_v33 = vld [vmem:[%s12956_s6 + $0x310] sm:$0xff] }
 0x51b   : > { %v2548_v29 = vpop.f32.mrf.mxu2 }
 0x51c   : > { %2620 = vmatmul.f32.gmra.mxu0 %v2548_v29  ;;  %7556 = vmatmul.msk.f32.gmra.mxu3 %vm1540_vm3, %v7543_v37  ;;  %v2072_v29 = vadd.f32 %v9692_v62, %v1852_v13  ;;  %v7544_v37 = vld [vmem:[%s12956_s6 + $0x390] sm:$0xff]  ;;  %v1855_v62 = vadd.f32 %v9732_v31, %v9488_v9  ;;  %v7500_v9 = vld [vmem:[%s12956_s6 + $0x318] sm:$0xff] }
 0x51d   : > { %v2432_v55 = vpop.f32.mrf.mxu1 }
 0x51e   : > { %v2073_v13 = vadd.f32 %v9708_v3, %v1855_v62  ;;  %v1858_v3 = vadd.f32 %v9744_v43, %v9498_v23  ;;  %v7546_v62 = vld [vmem:[%s12956_s6 + $0x3a0] sm:$0xff]  ;;  %v7533_v23 = vld [vmem:[%s12957_s7 + $0x3f8] sm:$0xff] }
 0x51f   : > { %v2758_v22 = vpop.f32.mrf.mxu3  ;;  %v7575_v43 = vld [vmem:[%s12957_s7 + $0x478] sm:$0xff]  ;;  %2991 = vmatpush.msra.mxu0 %v7533_v23 }
 0x520   : > { %7510 = vmatmul.msk.f32.gmra.mxu2 %vm1540_vm3, %v7497_v1  ;;  %2830 = vmatmul.f32.gmra.mxu1 %v2758_v22 }
 0x521   : > { %3186 = vmatpush.msrb.mxu1 %v7575_v43  ;;  %v7528_v43 = vld [vmem:[%s12957_s7 + $0x3d0] sm:$0xff] }
 0x523   : > { %v2551_v12 = vpop.f32.mrf.mxu2 }
 0x524   : > { %2623 = vmatmul.f32.gmra.mxu0 %v2551_v12  ;;  %7557 = vmatmul.msk.f32.gmra.mxu3 %vm1540_vm3, %v7544_v37 }
 0x525   : > { %v10016_v28 = vpop.f32.mrf.mxu1 }
 0x528   : > { %7511 = vmatmul.msk.f32.gmra.mxu2 %vm1540_vm3, %v7498_v16  ;;  %v2761_v16 = vpop.f32.mrf.mxu3 }
 0x529   : > { %v2228_v1 = vpop.f32.mrf.mxu0  ;;  %2833 = vmatmul.f32.gmra.mxu1 %v2761_v16 }
 0x52a   : > { %v2267_v24 = vadd.f32 %v2228_v1, %v2072_v29  ;;  %v7545_v29 = vld [vmem:[%s12956_s6 + $0x398] sm:$0xff] }
 0x52b   : > { %v2554_v12 = vpop.f32.mrf.mxu2 }
 0x52c   : > { %v10008_v63 = vadd.f32 %v2423_v59, %v2267_v24  ;;  %2626 = vmatmul.f32.gmra.mxu0 %v2554_v12  ;;  %7558 = vmatmul.msk.f32.gmra.mxu3 %vm1540_vm3, %v7545_v29  ;;  %v2074_v12 = vadd.f32 %v9723_v57, %v1858_v3  ;;  %v7532_v57 = vld [vmem:[%s12957_s7 + $0x3f0] sm:$0xff] }
 0x52d   : > { %v10031_v31 = vpop.f32.mrf.mxu1  ;;  %2992 = vmatpush.msra.mxu0 %v7532_v57 }
 0x530   : > { %7512 = vmatmul.msk.f32.gmra.mxu2 %vm1540_vm3, %v7499_v33  ;;  %v2764_v37 = vpop.f32.mrf.mxu3 }
 0x531   : > { %v2231_v22 = vpop.f32.mrf.mxu0  ;;  %2836 = vmatmul.f32.gmra.mxu1 %v2764_v37  ;;  %v7531_v37 = vld [vmem:[%s12957_s7 + $0x3e8] sm:$0xff] }
 0x532   : > { %v2268_v59 = vadd.f32 %v2231_v22, %v2073_v13  ;;  %v1861_v22 = vadd.f32 %v9762_v51, %v9508_v47  ;;  %2993 = vmatpush.msra.mxu0 %v7531_v37  ;;  %v7569_v37 = vld [vmem:[%s12957_s7 + $0x448] sm:$0xff] }
 0x533   : > { %v2557_v1 = vpop.f32.mrf.mxu2 }
 0x534   : > { %v10023_v24 = vadd.f32 %v2426_v39, %v2268_v59  ;;  %2629 = vmatmul.f32.gmra.mxu0 %v2557_v1  ;;  %7559 = vmatmul.msk.f32.gmra.mxu3 %vm1540_vm3, %v7546_v62  ;;  %v2075_v1 = vadd.f32 %v9735_v49, %v1861_v22  ;;  %v7530_v49 = vld [vmem:[%s12957_s7 + $0x3e0] sm:$0xff] }
 0x535   : > { %v10055_v59 = vpop.f32.mrf.mxu1  ;;  %2994 = vmatpush.msra.mxu0 %v7530_v49  ;;  %v7572_v62 = vld [vmem:[%s12957_s7 + $0x460] sm:$0xff]  ;;  %v1867_v49 = vadd.f32 %v9805_v15, %v9528_v7  ;;  %v7523_v15 = vld [vmem:[%s12957_s7 + $0x3a8] sm:$0xff] }
 0x538   : > { %7513 = vmatmul.msk.f32.gmra.mxu2 %vm1540_vm3, %v7500_v9  ;;  %v2767_v29 = vpop.f32.mrf.mxu3 }
 0x539   : > { %v2234_v33 = vpop.f32.mrf.mxu0  ;;  %2839 = vmatmul.f32.gmra.mxu1 %v2767_v29 }
 0x53a   : > { %v2269_v39 = vadd.f32 %v2234_v33, %v2074_v12  ;;  %v7574_v12 = vld [vmem:[%s12957_s7 + $0x470] sm:$0xff]  ;;  %v7573_v33 = vld [vmem:[%s12957_s7 + $0x468] sm:$0xff] }
 0x53b   : > { %v2560_v16 = vpop.f32.mrf.mxu2  ;;  %3187 = vmatpush.msrb.mxu1 %v7574_v12  ;;  %v7503_v12 = vld [vmem:[%s12956_s6 + $0x330] sm:$0xff] }
 0x53c   : > { %v10038_v13 = vadd.f32 %v2429_v4, %v2269_v39  ;;  %2632 = vmatmul.f32.gmra.mxu0 %v2560_v16  ;;  %v7501_v4 = vld [vmem:[%s12956_s6 + $0x320] sm:$0xff]  ;;  %v7502_v39 = vld [vmem:[%s12956_s6 + $0x328] sm:$0xff]  ;;  %v1864_v16 = vadd.f32 %v9774_v56, %v9518_v8 }
 0x53d   : > { %3188 = vmatpush.msrb.mxu1 %v7573_v33  ;;  %v10084_v23 = vpop.f32.mrf.mxu1  ;;  %v7527_v56 = vld [vmem:[%s12957_s7 + $0x3c8] sm:$0xff] }
 0x53e   : > { %v2076_v22 = vadd.f32 %v9747_v60, %v1864_v16  ;;  %v2077_v16 = vadd.f32 %v9757_v11, %v1867_v49  ;;  %v7562_v49 = vld [vmem:[%s12957_s7 + $0x410] sm:$0xff] }
 0x53f   : > { %3189 = vmatpush.msrb.mxu1 %v7572_v62  ;;  %v7567_v62 = vld [vmem:[%s12957_s7 + $0x438] sm:$0xff] }
 0x540   : > { %7514 = vmatmul.msk.f32.gmra.mxu2 %vm1540_vm3, %v7501_v4  ;;  %v2770_v57 = vpop.f32.mrf.mxu3  ;;  %v7571_v4 = vld [vmem:[%s12957_s7 + $0x458] sm:$0xff] }
 0x541   : > { %v2237_v9 = vpop.f32.mrf.mxu0  ;;  %3190 = vmatpush.msrb.mxu1 %v7571_v4 }
 0x542   : > { %v2270_v3 = vadd.f32 %v2237_v9, %v2075_v1  ;;  %2842 = vmatmul.f32.gmra.mxu1 %v2770_v57  ;;  %v7570_v1 = vld [vmem:[%s12957_s7 + $0x450] sm:$0xff] }
 0x543   : > { %v2563_v47 = vpop.f32.mrf.mxu2  ;;  %3191 = vmatpush.msrb.mxu1 %v7570_v1  ;;  %v1870_v1 = vadd.f32 %v9841_v19, %v9552_v21  ;;  %v7519_v19 = vld [vmem:[%s12957_s7 + $0x388] sm:$0xff] }
 0x544   : > { %v10065_v51 = vadd.f32 %v2432_v55, %v2270_v3  ;;  %2635 = vmatmul.f32.gmra.mxu0 %v2563_v47  ;;  %v7529_v55 = vld [vmem:[%s12957_s7 + $0x3d8] sm:$0xff]  ;;  %v7526_v3 = vld [vmem:[%s12957_s7 + $0x3c0] sm:$0xff] }
 0x545   : > { %2995 = vmatpush.msra.mxu0 %v7529_v55  ;;  %3192 = vmatpush.msrb.mxu1 %v7569_v37  ;;  %v7568_v47 = vld [vmem:[%s12957_s7 + $0x440] sm:$0xff]  ;;  %v10120_v33 = vpop.f32.mrf.mxu1  ;;  %v7524_v55 = vld [vmem:[%s12957_s7 + $0x3b0] sm:$0xff] }
 0x546   : > { %v7520_v37 = vld [vmem:[%s12957_s7 + $0x390] sm:$0xff] }
 0x547   : > { %2996 = vmatpush.msra.mxu0 %v7528_v43  ;;  %3193 = vmatpush.msrb.mxu1 %v7568_v47  ;;  %v7566_v43 = vld [vmem:[%s12957_s7 + $0x430] sm:$0xff] }
 0x548   : > { %7515 = vmatmul.msk.f32.gmra.mxu2 %vm1540_vm3, %v7502_v39  ;;  %v2773_v39 = vpop.f32.mrf.mxu3 }
 0x549   : > { %v2240_v29 = vpop.f32.mrf.mxu0  ;;  %2997 = vmatpush.msra.mxu0 %v7527_v56  ;;  %3194 = vmatpush.msrb.mxu1 %v7567_v62  ;;  %v7564_v56 = vld [vmem:[%s12957_s7 + $0x420] sm:$0xff]  ;;  %v7561_v62 = vld [vmem:[%s12957_s7 + $0x408] sm:$0xff] }
 0x54a   : > { %v2271_v8 = vadd.f32 %v2240_v29, %v2076_v22  ;;  %2845 = vmatmul.f32.gmra.mxu1 %v2773_v39  ;;  %v7522_v22 = vld [vmem:[%s12957_s7 + $0x3a0] sm:$0xff]  ;;  %v7565_v29 = vld [vmem:[%s12957_s7 + $0x428] sm:$0xff] }
 0x54b   : > { %v2566_v9 = vpop.f32.mrf.mxu2  ;;  %2998 = vmatpush.msra.mxu0 %v7526_v3  ;;  %3195 = vmatpush.msrb.mxu1 %v7566_v43 }
 0x54c   : > { %v10101_v60 = vadd.f32 %v10016_v28, %v2271_v8  ;;  %2638 = vmatmul.f32.gmra.mxu0 %v2566_v9  ;;  %v7525_v28 = vld [vmem:[%s12957_s7 + $0x3b8] sm:$0xff] }
 0x54d   : > { %2999 = vmatpush.msra.mxu0 %v7525_v28  ;;  %v7504_v8 = vld [vmem:[%s12956_s6 + $0x338] sm:$0xff]  ;;  %3196 = vmatpush.msrb.mxu1 %v7565_v29  ;;  %v10156_v9 = vpop.f32.mrf.mxu1  ;;  %v2078_v28 = vadd.f32 %v9769_v17, %v1870_v1 }
 0x54f   : > { %3000 = vmatpush.msra.mxu0 %v7524_v55  ;;  %3197 = vmatpush.msrb.mxu1 %v7564_v56  ;;  %v7518_v55 = vld [vmem:[%s12957_s7 + $0x380] sm:$0xff] }
 0x550   : > { %7516 = vmatmul.msk.f32.gmra.mxu2 %vm1540_vm3, %v7503_v12  ;;  %v2776_v3 = vpop.f32.mrf.mxu3  ;;  %v7563_v12 = vld [vmem:[%s12957_s7 + $0x418] sm:$0xff] }
 0x551   : > { %v2243_v57 = vpop.f32.mrf.mxu0  ;;  %3001 = vmatpush.msra.mxu0 %v7523_v15  ;;  %3198 = vmatpush.msrb.mxu1 %v7563_v12 }
 0x552   : > { %v2272_v7 = vadd.f32 %v2243_v57, %v2077_v16  ;;  %2848 = vmatmul.f32.gmra.mxu1 %v2776_v3  ;;  %v7560_v16 = vld [vmem:[%s12957_s7 + $0x400] sm:$0xff] }
 0x553   : > { %v2569_v4 = vpop.f32.mrf.mxu2  ;;  %3002 = vmatpush.msra.mxu0 %v7522_v22  ;;  %3199 = vmatpush.msrb.mxu1 %v7562_v49  ;;  %v10187_v57 = vld [vmem:[%s12959_s9] sm:$0xff] }
 0x554   : > { %v10137_v11 = vadd.f32 %v10031_v31, %v2272_v7  ;;  %2641 = vmatmul.f32.gmra.mxu0 %v2569_v4  ;;  %v7521_v31 = vld [vmem:[%s12957_s7 + $0x398] sm:$0xff]  ;;  %13041 = vst [vmem:[#allocation16_spill] sm:$0xff] %v10187_v57 }
 0x555   : > { %3003 = vmatpush.msra.mxu0 %v7521_v31  ;;  %3200 = vmatpush.msrb.mxu1 %v7561_v62  ;;  %v2453_v7 = vpop.f32.mrf.mxu1 }
 0x557   : > { %3004 = vmatpush.msra.mxu0 %v7520_v37  ;;  %3201 = vmatpush.msrb.mxu1 %v7560_v16 }
 0x558   : > { %7517 = vmatmul.msk.f32.gmra.mxu2 %vm1540_vm3, %v7504_v8  ;;  %v3130_v15 = vpop.f32.mrf.mxu3 }
 0x559   : > { %v2246_v47 = vpop.f32.mrf.mxu0  ;;  %3005 = vmatpush.msra.mxu0 %v7519_v19 }
 0x55a   : > { %v2273_v21 = vadd.f32 %v2246_v47, %v2078_v28  ;;  %3202 = vmatmul.f32.vlgmr.msrb.gmra.mxu1 %v3130_v15 }
 0x55b   : > { %v2572_v39 = vpop.f32.mrf.mxu2  ;;  %3006 = vmatpush.msra.mxu0 %v7518_v55 }
 0x55c   : > { %v10173_v17 = vadd.f32 %v10055_v59, %v2273_v21  ;;  %2644 = vmatmul.f32.gmra.mxu0 %v2572_v39  ;;  %v1873_v59 = vadd.f32 %v9887_v14, %v9586_v25  ;;  %v10203_v25 = vld [vmem:[%s12959_s9 + $0x8] sm:$0xff] }
 0x55d   : > { %13042 = vst [vmem:[#allocation17_spill] sm:$0xff] %v10203_v25  ;;  %v2456_v14 = vpop.f32.mrf.mxu1 }
 0x55e   : > { %v2079_v43 = vadd.f32 %v9781_v0, %v1873_v59  ;;  %v1876_v0 = vadd.f32 %v9926_v35, %v9620_v45  ;;  %v10220_v45 = vld [vmem:[%s12959_s9 + $0x10] sm:$0xff] }
 0x55f   : > { %13043 = vst [vmem:[#allocation18_spill] sm:$0xff] %v10220_v45 }
 0x560   : > { %7576 = vmatmul.msk.f32.vlgmr.msrb.gmra.mxu2 %vm627_vm1, %v10187_v57  ;;  %v3133_v31 = vpop.f32.mrf.mxu3  ;;  %v2080_v56 = vadd.f32 %v9823_v26, %v1876_v0  ;;  %v1879_v26 = vadd.f32 %v9947_v6, %v9654_v20  ;;  %v10237_v20 = vld [vmem:[%s12959_s9 + $0x18] sm:$0xff]  ;;  %v13047_v0 = vld [vmem:[#allocation15_spill] sm:$0xff] }
 0x561   : > { %4097 = vmatpush.msrb.mxu2 %v8488_v32  ;;  %v2249_v4 = vpop.f32.mrf.mxu0  ;;  %13044 = vst [vmem:[#allocation19_spill] sm:$0xff] %v10237_v20 }
 0x562   : > { %v2274_v22 = vadd.f32 %v2249_v4, %v2079_v43  ;;  %3205 = vmatmul.f32.gmra.mxu1 %v3133_v31  ;;  %v2081_v28 = vadd.f32 %v9866_v58, %v1879_v26  ;;  %v1882_v58 = vadd.f32 %v9964_v30, %v9675_v27  ;;  %v10251_v27 = vld [vmem:[%s12959_s9 + $0x20] sm:$0xff] }
 0x563   : > { %4098 = vmatpush.msrb.mxu2 %v8490_v34  ;;  %v2575_v29 = vpop.f32.mrf.mxu2  ;;  %13045 = vst [vmem:[#allocation20_spill] sm:$0xff] %v10251_v27 }
 0x564   : > { %v10197_v8 = vadd.f32 %v10084_v23, %v2274_v22  ;;  %2647 = vmatmul.f32.gmra.mxu0 %v2575_v29  ;;  %v2082_v39 = vadd.f32 %v9911_v5, %v1882_v58  ;;  %v1885_v5 = vadd.f32 %v9981_v10, %v9689_v61  ;;  %v10263_v29 = vld [vmem:[%s12959_s9 + $0x28] sm:$0xff]  ;;  %v1888_v61 = vadd.f32 %v9992_v41, %v9705_v2 }
 0x565   : > { %4099 = vmatpush.msrb.mxu2 %v8495_v36  ;;  %v2459_v35 = vpop.f32.mrf.mxu1  ;;  %13046 = vst [vmem:[#allocation21_spill] sm:$0xff] %v10263_v29 }
 0x566   : > { %v2083_v15 = vadd.f32 %v9935_v18, %v1885_v5  ;;  %v2084_v31 = vadd.f32 %v13047_v0, %v1888_v61  ;;  %v10312_v5 = vld [vmem:[%s12959_s9 + $0x48] sm:$0xff] }
 0x567   : > { %4100 = vmatpush.msrb.mxu2 %v8500_v38  ;;  %13051 = vst [vmem:[#allocation24_spill] sm:$0xff] %v10312_v5 }
 0x568   : > { %7577 = vmatmul.msk.f32.gmra.mxu2 %vm627_vm1, %v10203_v25  ;;  %v3136_v12 = vpop.f32.mrf.mxu3 }
 0x569   : > { %4101 = vmatpush.msrb.mxu2 %v8505_v40  ;;  %v2252_v23 = vpop.f32.mrf.mxu0 }
 0x56a   : > { %v2275_v1 = vadd.f32 %v2252_v23, %v2080_v56  ;;  %3208 = vmatmul.f32.gmra.mxu1 %v3136_v12 }
 0x56b   : > { %4102 = vmatpush.msrb.mxu2 %v8510_v42  ;;  %v2578_v3 = vpop.f32.mrf.mxu2 }
 0x56c   : > { %v10214_v37 = vadd.f32 %v10120_v33, %v2275_v1  ;;  %2650 = vmatmul.f32.gmra.mxu0 %v2578_v3  ;;  %v10277_v3 = vld [vmem:[%s12959_s9 + $0x30] sm:$0xff] }
 0x56d   : > { %4103 = vmatpush.msrb.mxu2 %v8515_v44  ;;  %v2813_v6 = vpop.f32.mrf.mxu1  ;;  %13048 = vst [vmem:[#allocation15_spill] sm:$0xff] %v10277_v3 }
 0x56f   : > { %4104 = vmatpush.msrb.mxu2 %v8520_v46 }
 0x570   : > { %7578 = vmatmul.msk.f32.gmra.mxu2 %vm627_vm1, %v10220_v45  ;;  %v3139_v49 = vpop.f32.mrf.mxu3 }
 0x571   : > { %4105 = vmatpush.msrb.mxu2 %v8525_v48  ;;  %v2255_v33 = vpop.f32.mrf.mxu0 }
 0x572   : > { %v2276_v47 = vadd.f32 %v2255_v33, %v2081_v28  ;;  %3211 = vmatmul.f32.gmra.mxu1 %v3139_v49 }
 0x573   : > { %4106 = vmatpush.msrb.mxu2 %v8530_v50  ;;  %v2581_v21 = vpop.f32.mrf.mxu2 }
 0x574   : > { %v10231_v19 = vadd.f32 %v10156_v9, %v2276_v47  ;;  %2653 = vmatmul.f32.gmra.mxu0 %v2581_v21 }
 0x575   : > { %4107 = vmatpush.msrb.mxu2 %v8536_v52  ;;  %v2816_v30 = vpop.f32.mrf.mxu1 }
 0x577   : > { %4108 = vmatpush.msrb.mxu2 %v8541_v53 }
 0x578   : > { %7579 = vmatmul.msk.f32.gmra.mxu2 %vm627_vm1, %v10237_v20  ;;  %v3142_v59 = vpop.f32.mrf.mxu3 }
 0x579   : > { %4109 = vmatpush.msrb.mxu2 %v8546_v54  ;;  %v2258_v9 = vpop.f32.mrf.mxu0 }
 0x57a   : > { %v2277_v55 = vadd.f32 %v2258_v9, %v2082_v39  ;;  %3214 = vmatmul.f32.gmra.mxu1 %v3142_v59 }
 0x57b   : > { %v2935_v62 = vpop.f32.mrf.mxu2 }
 0x57c   : > { %v10246_v16 = vadd.f32 %v2453_v7, %v2277_v55  ;;  %3007 = vmatmul.f32.vlgmr.msra.gmra.mxu0 %v2935_v62 }
 0x57d   : > { %v10267_v10 = vpop.f32.mrf.mxu1 }
 0x580   : > { %7580 = vmatmul.msk.f32.gmra.mxu2 %vm627_vm1, %v10251_v27  ;;  %v3145_v18 = vpop.f32.mrf.mxu3 }
 0x581   : > { %v2261_v43 = vpop.f32.mrf.mxu0 }
 0x582   : > { %v2278_v4 = vadd.f32 %v2261_v43, %v2083_v15  ;;  %3217 = vmatmul.f32.gmra.mxu1 %v3145_v18 }
 0x583   : > { %v2938_v7 = vpop.f32.mrf.mxu2 }
 0x584   : > { %v10258_v22 = vadd.f32 %v2456_v14, %v2278_v4  ;;  %3010 = vmatmul.f32.gmra.mxu0 %v2938_v7  ;;  %v10323_v4 = vld [vmem:[%s12959_s9 + $0x50] sm:$0xff] }
 0x585   : > { %v10279_v2 = vpop.f32.mrf.mxu1  ;;  %13052 = vst [vmem:[#allocation25_spill] sm:$0xff] %v10323_v4 }
 0x588   : > { %7581 = vmatmul.msk.f32.gmra.mxu2 %vm627_vm1, %v10263_v29  ;;  %v3148_v41 = vpop.f32.mrf.mxu3 }
 0x589   : > { %v2264_v56 = vpop.f32.mrf.mxu0 }
 0x58a   : > { %v2279_v14 = vadd.f32 %v2264_v56, %v2084_v31  ;;  %3220 = vmatmul.f32.gmra.mxu1 %v3148_v41  ;;  %v10334_v31 = vld [vmem:[%s12959_s9 + $0x58] sm:$0xff] }
 0x58b   : > { %v2941_v23 = vpop.f32.mrf.mxu2  ;;  %13053 = vst [vmem:[#allocation26_spill] sm:$0xff] %v10334_v31 }
 0x58c   : > { %v10272_v1 = vadd.f32 %v2459_v35, %v2279_v14  ;;  %3013 = vmatmul.f32.gmra.mxu0 %v2941_v23  ;;  %v10289_v35 = vld [vmem:[%s12959_s9 + $0x38] sm:$0xff] }
 0x58d   : > { %13049 = vst [vmem:[#allocation22_spill] sm:$0xff] %v10289_v35  ;;  %v10291_v47 = vpop.f32.mrf.mxu1 }
 0x590   : > { %7582 = vmatmul.msk.f32.gmra.mxu2 %vm627_vm1, %v10277_v3  ;;  %v3151_v21 = vpop.f32.mrf.mxu3 }
 0x591   : > { %v2618_v26 = vpop.f32.mrf.mxu0 }
 0x592   : > { %v2657_v12 = vadd.f32 %v2618_v26, %v10008_v63  ;;  %3223 = vmatmul.f32.gmra.mxu1 %v3151_v21  ;;  %v10345_v26 = vld [vmem:[%s12959_s9 + $0x60] sm:$0xff] }
 0x593   : > { %v2944_v28 = vpop.f32.mrf.mxu2  ;;  %13054 = vst [vmem:[#allocation27_spill] sm:$0xff] %v10345_v26 }
 0x594   : > { %v10284_v33 = vadd.f32 %v2813_v6, %v2657_v12  ;;  %3016 = vmatmul.f32.gmra.mxu0 %v2944_v28  ;;  %v10301_v6 = vld [vmem:[%s12959_s9 + $0x40] sm:$0xff] }
 0x595   : > { %13050 = vst [vmem:[#allocation23_spill] sm:$0xff] %v10301_v6  ;;  %v10303_v9 = vpop.f32.mrf.mxu1 }
 0x598   : > { %7583 = vmatmul.msk.f32.gmra.mxu2 %vm627_vm1, %v10289_v35  ;;  %v3154_v55 = vpop.f32.mrf.mxu3 }
 0x599   : > { %v2621_v58 = vpop.f32.mrf.mxu0 }
 0x59a   : > { %v2658_v49 = vadd.f32 %v2621_v58, %v10023_v24  ;;  %3226 = vmatmul.f32.gmra.mxu1 %v3154_v55 }
 0x59b   : > { %v2947_v63 = vpop.f32.mrf.mxu2 }
 0x59c   : > { %v10296_v39 = vadd.f32 %v2816_v30, %v2658_v49  ;;  %3019 = vmatmul.f32.gmra.mxu0 %v2947_v63  ;;  %v10356_v49 = vld [vmem:[%s12959_s9 + $0x80] sm:$0xff] }
 0x59d   : > { %v10314_v30 = vpop.f32.mrf.mxu1  ;;  %13055 = vst [vmem:[#allocation28_spill] sm:$0xff] %v10356_v49 }
 0x5a0   : > { %7584 = vmatmul.msk.f32.gmra.mxu2 %vm627_vm1, %v10301_v6  ;;  %v3157_v59 = vpop.f32.mrf.mxu3 }
 0x5a1   : > { %v10307_v62 = vpop.f32.mrf.mxu0 }
 0x5a2   : > { %3229 = vmatmul.f32.gmra.mxu1 %v3157_v59  ;;  %v10370_v59 = vld [vmem:[%s12959_s9 + $0x88] sm:$0xff] }
 0x5a3   : > { %v2950_v24 = vpop.f32.mrf.mxu2  ;;  %13056 = vst [vmem:[#allocation29_spill] sm:$0xff] %v10370_v59 }
 0x5a4   : > { %3022 = vmatmul.f32.gmra.mxu0 %v2950_v24 }
 0x5a6   : > { %v10325_v7 = vpop.f32.mrf.mxu1 }
 0x5a8   : > { %7585 = vmatmul.msk.f32.gmra.mxu2 %vm627_vm1, %v10312_v5  ;;  %v3160_v61 = vpop.f32.mrf.mxu3  ;;  %v10444_v5 = vld [vmem:[%s12959_s9 + $0xb8] sm:$0xff] }
 0x5a9   : > { %v10318_v15 = vpop.f32.mrf.mxu0  ;;  %13065 = vst [vmem:[#allocation38_spill] sm:$0xff] %v10444_v5 }
 0x5aa   : > { %3232 = vmatmul.f32.gmra.mxu1 %v3160_v61 }
 0x5ab   : > { %v2953_v43 = vpop.f32.mrf.mxu2 }
 0x5ac   : > { %3025 = vmatmul.f32.gmra.mxu0 %v2953_v43 }
 0x5ae   : > { %v10336_v56 = vpop.f32.mrf.mxu1 }
 0x5b0   : > { %7586 = vmatmul.msk.f32.gmra.mxu2 %vm627_vm1, %v10323_v4  ;;  %v3163_v14 = vpop.f32.mrf.mxu3 }
 0x5b1   : > { %v10329_v18 = vpop.f32.mrf.mxu0 }
 0x5b2   : > { %3235 = vmatmul.f32.gmra.mxu1 %v3163_v14  ;;  %v10385_v14 = vld [vmem:[%s12959_s9 + $0x90] sm:$0xff] }
 0x5b3   : > { %v2956_v0 = vpop.f32.mrf.mxu2  ;;  %13057 = vst [vmem:[#allocation30_spill] sm:$0xff] %v10385_v14 }
 0x5b4   : > { %3028 = vmatmul.f32.gmra.mxu0 %v2956_v0 }
 0x5b6   : > { %v10347_v12 = vpop.f32.mrf.mxu1 }
 0x5b8   : > { %7587 = vmatmul.msk.f32.gmra.mxu2 %vm627_vm1, %v10334_v31  ;;  %v3166_v28 = vpop.f32.mrf.mxu3  ;;  %v10433_v31 = vld [vmem:[%s12959_s9 + $0xb0] sm:$0xff] }
 0x5b9   : > { %v10340_v23 = vpop.f32.mrf.mxu0  ;;  %13063 = vst [vmem:[#allocation36_spill] sm:$0xff] %v10433_v31 }
 0x5ba   : > { %3238 = vmatmul.f32.gmra.mxu1 %v3166_v28 }
 0x5bb   : > { %v2959_v41 = vpop.f32.mrf.mxu2 }
 0x5bc   : > { %3031 = vmatmul.f32.gmra.mxu0 %v2959_v41 }
 0x5bf   : > { %v10358_v63 = vpop.f32.mrf.mxu1 }
 0x5c0   : > { %7588 = vmatmul.msk.f32.gmra.mxu2 %vm627_vm1, %v10345_v26 }
 0x5c1   : > { %v10351_v21 = vpop.f32.mrf.mxu0 }
 0x5c3   : > { %v2962_v58 = vpop.f32.mrf.mxu2 }
 0x5c4   : > { %3034 = vmatmul.f32.gmra.mxu0 %v2962_v58 }
 0x5c7   : > { %v10373_v43 = vpop.f32.mrf.mxu1 }
 0x5c8   : > { %7644 = vmatmul.msk.f32.vlgmr.msra.gmra.mxu2 %vm627_vm1, %v10356_v49 }
 0x5c9   : > { %4496 = vmatpush.msra.mxu2 %v8488_v32  ;;  %v10363_v55 = vpop.f32.mrf.mxu0 }
 0x5cb   : > { %4497 = vmatpush.msra.mxu2 %v8490_v34  ;;  %v2965_v24 = vpop.f32.mrf.mxu2 }
 0x5cc   : > { %3037 = vmatmul.f32.gmra.mxu0 %v2965_v24  ;;  %v10400_v24 = vld [vmem:[%s12959_s9 + $0x98] sm:$0xff] }
 0x5cd   : > { %4498 = vmatpush.msra.mxu2 %v8495_v36  ;;  %13058 = vst [vmem:[#allocation31_spill] sm:$0xff] %v10400_v24 }
 0x5cf   : > { %4499 = vmatpush.msra.mxu2 %v8500_v38  ;;  %v10388_v41 = vpop.f32.mrf.mxu1 }
 0x5d0   : > { %7645 = vmatmul.msk.f32.gmra.mxu2 %vm627_vm1, %v10370_v59 }
 0x5d1   : > { %4500 = vmatpush.msra.mxu2 %v8505_v40  ;;  %v10378_v61 = vpop.f32.mrf.mxu0 }
 0x5d3   : > { %4501 = vmatpush.msra.mxu2 %v8510_v42  ;;  %v2968_v0 = vpop.f32.mrf.mxu2 }
 0x5d4   : > { %3040 = vmatmul.f32.gmra.mxu0 %v2968_v0 }
 0x5d5   : > { %4502 = vmatpush.msra.mxu2 %v8515_v44 }
 0x5d7   : > { %4503 = vmatpush.msra.mxu2 %v8520_v46 }
 0x5d8   : > { %7646 = vmatmul.msk.f32.gmra.mxu2 %vm627_vm1, %v10385_v14  ;;  %v10408_v14 = vpop.f32.mrf.mxu1 }
 0x5d9   : > { %4504 = vmatpush.msra.mxu2 %v8525_v48  ;;  %v10393_v28 = vpop.f32.mrf.mxu0  ;;  %13059 = vst [vmem:[#allocation32_spill] sm:$0xff] %v10408_v14 }
 0x5db   : > { %4505 = vmatpush.msra.mxu2 %v8530_v50  ;;  %v2971_v58 = vpop.f32.mrf.mxu2 }
 0x5dc   : > { %3043 = vmatmul.f32.gmra.mxu0 %v2971_v58  ;;  %v10413_v58 = vld [vmem:[%s12959_s9 + $0xa0] sm:$0xff] }
 0x5dd   : > { %4506 = vmatpush.msra.mxu2 %v8536_v52  ;;  %13060 = vst [vmem:[#allocation33_spill] sm:$0xff] %v10413_v58 }
 0x5df   : > { %4507 = vmatpush.msra.mxu2 %v8541_v53 }
 0x5e0   : > { %7647 = vmatmul.msk.f32.gmra.mxu2 %vm627_vm1, %v10400_v24  ;;  %v10419_v49 = vpop.f32.mrf.mxu1  ;;  %v10424_v24 = vld [vmem:[%s12959_s9 + $0xa8] sm:$0xff] }
 0x5e1   : > { %4508 = vmatpush.msra.mxu2 %v8546_v54  ;;  %v10406_v0 = vpop.f32.mrf.mxu0  ;;  %13061 = vst [vmem:[#allocation34_spill] sm:$0xff] %v10419_v49  ;;  %v2666_v49 = vadd.f32 %v10393_v28, %v10231_v19 }
 0x5e2   : > { %13062 = vst [vmem:[#allocation35_spill] sm:$0xff] %v10424_v24 }
 0x5e3   : > { %v10448_v6 = vpop.f32.mrf.mxu2  ;;  %v2861_v19 = vadd.f32 %v10347_v12, %v2666_v49 }
 0x5e4   : > { %13066 = vst [vmem:[#allocation39_spill] sm:$0xff] %v10448_v6 }
 0x5e8   : > { %7648 = vmatmul.msk.f32.gmra.mxu2 %vm627_vm1, %v10413_v58  ;;  %v10435_v58 = vpop.f32.mrf.mxu1 }
 0x5e9   : > { %v10417_v59 = vpop.f32.mrf.mxu0  ;;  %13064 = vst [vmem:[#allocation37_spill] sm:$0xff] %v10435_v58  ;;  %v2664_v58 = vadd.f32 %v10363_v55, %v10197_v8  ;;  %v2662_v8 = vadd.f32 %v10340_v23, %v10137_v11 }
 0x5eb   : > { %v10459_v3 = vpop.f32.mrf.mxu2  ;;  %v2859_v12 = vadd.f32 %v10325_v7, %v2664_v58  ;;  %v2660_v58 = vadd.f32 %v10318_v15, %v10065_v51 }
 0x5ec   : > { %13068 = vst [vmem:[#allocation41_spill] sm:$0xff] %v10459_v3 }
 0x5f0   : > { %7649 = vmatmul.msk.f32.gmra.mxu2 %vm627_vm1, %v10424_v24  ;;  %v10446_v24 = vpop.f32.mrf.mxu1 }
 0x5f1   : > { %v10428_v26 = vpop.f32.mrf.mxu0 }
 0x5f3   : > { %v10470_v6 = vpop.f32.mrf.mxu2 }
 0x5f4   : > { %13069 = vst [vmem:[#allocation42_spill] sm:$0xff] %v10470_v6 }
 0x5f8   : > { %7650 = vmatmul.msk.f32.gmra.mxu2 %vm627_vm1, %v10433_v31  ;;  %v10457_v31 = vld [vmem:[%s12959_s9 + $0xc0] sm:$0xff]  ;;  %v10465_v27 = vpop.f32.mrf.mxu1 }
 0x5f9   : > { %v10439_v4 = vpop.f32.mrf.mxu0  ;;  %13067 = vst [vmem:[#allocation40_spill] sm:$0xff] %v10457_v31 }
 0x5fb   : > { %v10480_v3 = vpop.f32.mrf.mxu2 }
 0x5fc   : > { %13070 = vst [vmem:[#allocation43_spill] sm:$0xff] %v10480_v3  ;;  %v7711_v3 = vld [vmem:[%s12959_s9 + $0xe0] sm:$0xff] }
 0x600   : > { %7651 = vmatmul.msk.f32.gmra.mxu2 %vm627_vm1, %v10444_v5  ;;  %v7640_v5 = vld [vmem:[%s12959_s9 + $0xc8] sm:$0xff]  ;;  %v10475_v45 = vpop.f32.mrf.mxu1 }
 0x601   : > { %v10452_v35 = vpop.f32.mrf.mxu0 }
 0x603   : > { %v10494_v57 = vpop.f32.mrf.mxu2 }
 0x604   : > { %13071 = vst [vmem:[#allocation44_spill] sm:$0xff] %v10494_v57  ;;  %v7712_v57 = vld [vmem:[%s12959_s9 + $0xe8] sm:$0xff] }
 0x608   : > { %7652 = vmatmul.msk.f32.gmra.mxu2 %vm627_vm1, %v10457_v31  ;;  %v7709_v31 = vld [vmem:[%s12959_s9 + $0xd0] sm:$0xff]  ;;  %v10491_v6 = vpop.f32.mrf.mxu1 }
 0x609   : > { %v10463_v29 = vpop.f32.mrf.mxu0 }
 0x610   : > { %7653 = vmatmul.msk.f32.gmra.mxu2 %vm627_vm1, %v7640_v5  ;;  %v7710_v5 = vld [vmem:[%s12959_s9 + $0xd8] sm:$0xff] }
 0x611   : > { %v10473_v20 = vpop.f32.mrf.mxu0 }
 0x618   : > { %7722 = vmatmul.msk.f32.vlgmr.msrb.gmra.mxu2 %vm627_vm1, %v7709_v31 }
 0x619   : > { %4895 = vmatpush.msrb.mxu2 %v8488_v32  ;;  %v10484_v25 = vpop.f32.mrf.mxu0  ;;  %v7716_v32 = vld [vmem:[%s12959_s9 + $0x108] sm:$0xff] }
 0x61b   : > { %4896 = vmatpush.msrb.mxu2 %v8490_v34 }
 0x61d   : > { %4897 = vmatpush.msrb.mxu2 %v8495_v36  ;;  %v10506_v36 = vpop.f32.mrf.mxu1 }
 0x61f   : > { %4898 = vmatpush.msrb.mxu2 %v8500_v38  ;;  %v10508_v38 = vpop.f32.mrf.mxu2 }
 0x620   : > { %7723 = vmatmul.msk.f32.gmra.mxu2 %vm627_vm1, %v7710_v5  ;;  %13072 = vst [vmem:[#allocation45_spill] sm:$0xff] %v10508_v38 }
 0x621   : > { %4899 = vmatpush.msrb.mxu2 %v8505_v40  ;;  %v10498_v31 = vpop.f32.mrf.mxu0 }
 0x623   : > { %4900 = vmatpush.msrb.mxu2 %v8510_v42  ;;  %v3446_v42 = vld [vmem:[%s12961_s11 + $0x10] sm:$0xff] }
 0x625   : > { %4901 = vmatpush.msrb.mxu2 %v8515_v44  ;;  %v10526_v38 = vpop.f32.mrf.mxu1  ;;  %v7714_v44 = vld [vmem:[%s12959_s9 + $0xf8] sm:$0xff] }
 0x627   : > { %4902 = vmatpush.msrb.mxu2 %v8520_v46  ;;  %v10520_v46 = vpop.f32.mrf.mxu2 }
 0x628   : > { %7724 = vmatmul.msk.f32.gmra.mxu2 %vm627_vm1, %v7711_v3  ;;  %13073 = vst [vmem:[#allocation46_spill] sm:$0xff] %v10520_v46  ;;  %v3450_v46 = vld [vmem:[%s12961_s11 + $0x30] sm:$0xff] }
 0x629   : > { %4903 = vmatpush.msrb.mxu2 %v8525_v48  ;;  %v10512_v5 = vpop.f32.mrf.mxu0  ;;  %v3447_v48 = vld [vmem:[%s12961_s11 + $0x18] sm:$0xff] }
 0x62b   : > { %4904 = vmatpush.msrb.mxu2 %v8530_v50  ;;  %v7713_v50 = vld [vmem:[%s12959_s9 + $0xf0] sm:$0xff] }
 0x62d   : > { %4905 = vmatpush.msrb.mxu2 %v8536_v52  ;;  %v3451_v52 = vld [vmem:[%s12961_s11 + $0x38] sm:$0xff] }
 0x62e   : > { %3499 = vmatpush.msra.mxu3 %v3451_v52 }
 0x62f   : > { %4906 = vmatpush.msrb.mxu2 %v8541_v53  ;;  %v10543_v53 = vpop.f32.mrf.mxu2 }
 0x630   : > { %7725 = vmatmul.msk.f32.gmra.mxu2 %vm627_vm1, %v7712_v57  ;;  %3500 = vmatpush.msra.mxu3 %v3450_v46  ;;  %v3449_v57 = vld [vmem:[%s12961_s11 + $0x28] sm:$0xff]  ;;  %13074 = vst [vmem:[#allocation47_spill] sm:$0xff] %v10543_v53  ;;  %v3230_v46 = vpop.f32.mrf.mxu1  ;;  %v7715_v53 = vld [vmem:[%s12959_s9 + $0x100] sm:$0xff] }
 0x631   : > { %4907 = vmatpush.msrb.mxu2 %v8546_v54  ;;  %v10524_v3 = vpop.f32.mrf.mxu0  ;;  %v3448_v54 = vld [vmem:[%s12961_s11 + $0x20] sm:$0xff] }
 0x632   : > { %3501 = vmatpush.msra.mxu3 %v3449_v57 }
 0x634   : > { %3502 = vmatpush.msra.mxu3 %v3448_v54  ;;  %v3444_v54 = vld [vmem:[%s12961_s11] sm:$0xff] }
 0x636   : > { %3503 = vmatpush.msra.mxu3 %v3447_v48 }
 0x637   : > { %v10561_v57 = vpop.f32.mrf.mxu2 }
 0x638   : > { %7726 = vmatmul.msk.f32.gmra.mxu2 %vm627_vm1, %v7713_v50  ;;  %3504 = vmatpush.msra.mxu3 %v3446_v42  ;;  %v3445_v50 = vld [vmem:[%s12961_s11 + $0x8] sm:$0xff]  ;;  %13075 = vst [vmem:[#allocation48_spill] sm:$0xff] %v10561_v57  ;;  %v3233_v42 = vpop.f32.mrf.mxu1 }
 0x639   : > { %v3032_v52 = vpop.f32.mrf.mxu0 }
 0x63a   : > { %3505 = vmatpush.msra.mxu3 %v3445_v50  ;;  %v2668_v50 = vadd.f32 %v10417_v59, %v10258_v22  ;;  %v2665_v22 = vadd.f32 %v10378_v61, %v10214_v37 }
 0x63c   : > { %3506 = vmatpush.msra.mxu3 %v3444_v54  ;;  %v2667_v54 = vadd.f32 %v10406_v0, %v10246_v16  ;;  %v2860_v37 = vadd.f32 %v10336_v56, %v2665_v22  ;;  %v2661_v56 = vadd.f32 %v10329_v18, %v10101_v60 }
 0x63e   : > { %v2862_v59 = vadd.f32 %v10358_v63, %v2667_v54  ;;  %v10604_v63 = vld [vmem:[%s12958_s8] ss:$0 sm:$0xff]  ;;  %v2856_v51 = vadd.f32 %v10291_v47, %v2661_v56 }
 0x63f   : > { %v10567_v40 = vpop.f32.mrf.mxu2 }
 0x640   : > { %7727 = vmatmul.msk.f32.gmra.mxu2 %vm627_vm1, %v7714_v44  ;;  %13076 = vst [vmem:[#allocation49_spill] sm:$0xff] %v10567_v40  ;;  %v3236_v57 = vpop.f32.mrf.mxu1  ;;  %v7717_v40 = vld [vmem:[%s12959_s9 + $0x110] sm:$0xff] }
 0x641   : > { %v3035_v48 = vpop.f32.mrf.mxu0 }
 0x647   : > { %v10573_v14 = vpop.f32.mrf.mxu2 }
 0x648   : > { %7728 = vmatmul.msk.f32.gmra.mxu2 %vm627_vm1, %v7715_v53  ;;  %13077 = vst [vmem:[#allocation50_spill] sm:$0xff] %v10573_v14  ;;  %v2669_v53 = vadd.f32 %v10428_v26, %v10272_v1  ;;  %v2863_v14 = vadd.f32 %v10373_v43, %v2668_v50  ;;  %v3239_v26 = vpop.f32.mrf.mxu1  ;;  %v2663_v50 = vadd.f32 %v10351_v21, %v10173_v17  ;;  %v10615_v17 = vld [vmem:[%s12959_s9 + $0x118] sm:$0xff] }
 0x649   : > { %v3038_v34 = vpop.f32.mrf.mxu0 }
 0x64a   : > { %v2864_v16 = vadd.f32 %v10388_v41, %v2669_v53  ;;  %v3057_v43 = vadd.f32 %v3038_v34, %v2862_v59  ;;  %v3055_v34 = vadd.f32 %v3032_v52, %v2860_v37  ;;  %v2858_v21 = vadd.f32 %v10314_v30, %v2663_v50  ;;  %v13085_v50 = vld [vmem:[#allocation4_spill] sm:$0xff]  ;;  %v10748_v37 = vld [vmem:[%s12959_s9 + $0x138] sm:$0xff] }
 0x64b   : > { %v3054_v41 = vadd.f32 %v10524_v3, %v2859_v12  ;;  %v2857_v52 = vadd.f32 %v10303_v9, %v2662_v8  ;;  %v2659_v3 = vadd.f32 %v10307_v62, %v10038_v13  ;;  %v13090_v8 = vld [vmem:[#allocation7_spill] sm:$0xff]  ;;  %v13091_v12 = vld [vmem:[#allocation8_spill] sm:$0xff] }
 0x64c   : > { %v3252_v49 = vadd.f32 %v3233_v42, %v3057_v43  ;;  %v3053_v60 = vadd.f32 %v10512_v5, %v2858_v21  ;;  %v3250_v30 = vadd.f32 %v10526_v38, %v3055_v34  ;;  %v2855_v38 = vadd.f32 %v10279_v2, %v2660_v58  ;;  %v13083_v43 = vld [vmem:[#allocation2_spill] sm:$0xff]  ;;  %v13097_v58 = vld [vmem:[#allocation12_spill] sm:$0xff] }
 0x64d   : > { %v3052_v9 = vadd.f32 %v10498_v31, %v2857_v52  ;;  %v3249_v15 = vadd.f32 %v10506_v36, %v3054_v41  ;;  %v10661_v36 = vld [vmem:[%s12959_s9 + $0x120] sm:$0xff]  ;;  %v2854_v47 = vadd.f32 %v10267_v10, %v2659_v3  ;;  %v10785_v52 = vld [vmem:[%s12959_s9 + $0x148] sm:$0xff] }
 0x64e   : > { %v10636_v18 = vadd.f32 %v10604_v63, %v3252_v49  ;;  %v10654_v13 = vadd.f32 %v10604_v63, %v3250_v30  ;;  %v3050_v2 = vadd.f32 %v10473_v20, %v2855_v38  ;;  %v10766_v34 = vld [vmem:[%s12959_s9 + $0x140] sm:$0xff]  ;;  %v13093_v49 = vld [vmem:[#allocation9_spill] sm:$0xff]  ;;  %v13100_v3 = vld [vmem:[#allocation19_spill] sm:$0xff] }
 0x64f   : > { %v3049_v31 = vadd.f32 %v10463_v29, %v2854_v47  ;;  %v13078_v29 = vld [vmem:[#allocation37_spill] sm:$0xff]  ;;  %v13094_v21 = vld [vmem:[#allocation18_spill] sm:$0xff]  ;;  %v13103_v38 = vld [vmem:[#allocation20_spill] sm:$0xff] }
 0x650   : > { %7729 = vmatmul.msk.f32.gmra.mxu2 %vm627_vm1, %v7716_v32  ;;  %v10588_v32 = vpop.f32.mrf.mxu2  ;;  %v13095_v41 = vld [vmem:[#allocation10_spill] sm:$0xff]  ;;  %v13105_v47 = vld [vmem:[#allocation21_spill] sm:$0xff] }
 0x651   : > { %v3041_v44 = vpop.f32.mrf.mxu0 }
 0x652   : > { %v3058_v0 = vadd.f32 %v3041_v44, %v2863_v14  ;;  %v3244_v44 = vadd.f32 %v13078_v29, %v3049_v31  ;;  %v13107_v31 = vld [vmem:[#allocation15_spill] sm:$0xff] }
 0x654   : > { %v3253_v61 = vadd.f32 %v3236_v57, %v3058_v0  ;;  %v3248_v57 = vadd.f32 %v10491_v6, %v3053_v60  ;;  %v10667_v6 = vadd.f32 %v10604_v63, %v3249_v15  ;;  %v10715_v59 = vadd.f32 %v10604_v63, %v3244_v44  ;;  %v13099_v60 = vld [vmem:[#allocation13_spill] sm:$0xff]  ;;  %v13111_v44 = vld [vmem:[#allocation23_spill] sm:$0xff] }
 0x656   : > { %v10622_v7 = vadd.f32 %v10604_v63, %v3253_v61  ;;  %v10678_v20 = vadd.f32 %v10604_v63, %v3248_v57  ;;  %v13088_v61 = vld [vmem:[#allocation17_spill] sm:$0xff] }
 0x658   : > { %7730 = vmatmul.msk.f32.gmra.mxu2 %vm627_vm1, %v7717_v40  ;;  %v3056_v40 = vadd.f32 %v3035_v48, %v2861_v19  ;;  %v10626_v23 = vpop.f32.mrf.mxu2  ;;  %v3245_v48 = vadd.f32 %v10446_v24, %v3050_v2  ;;  %v13082_v19 = vld [vmem:[#allocation16_spill] sm:$0xff]  ;;  %v10826_v2 = vld [vmem:[%s12959_s9 + $0x160] sm:$0xff] }
 0x659   : > { %v3044_v1 = vpop.f32.mrf.mxu0  ;;  %13098 = vst [vmem:[#allocation16_spill] sm:$0xff] %v10785_v52 }
 0x65a   : > { %v3059_v28 = vadd.f32 %v3044_v1, %v2864_v16  ;;  %v3251_v11 = vadd.f32 %v3230_v46, %v3056_v40  ;;  %v3051_v46 = vadd.f32 %v10484_v25, %v2856_v51  ;;  %v3247_v25 = vadd.f32 %v10475_v45, %v3052_v9  ;;  %v10732_v1 = vld [vmem:[%s12959_s9 + $0x130] sm:$0xff]  ;;  %v13101_v51 = vld [vmem:[#allocation14_spill] sm:$0xff]  ;;  %13106 = vst [vmem:[#allocation4_spill] sm:$0xff] %v10826_v2 }
 0x65b   : > { %v3048_v45 = vadd.f32 %v10452_v35, %v10296_v39  ;;  %v10701_v35 = vld [vmem:[%s12959_s9 + $0x128] sm:$0xff]  ;;  %v13079_v39 = vld [vmem:[#allocation34_spill] sm:$0xff]  ;;  %v10705_v53 = vadd.f32 %v10604_v63, %v3245_v48  ;;  %13081 = vst [vmem:[#allocation37_spill] sm:$0xff] %v10732_v1  ;;  %v10802_v9 = vld [vmem:[%s12959_s9 + $0x150] sm:$0xff] }
 0x65c   : > { %v3254_v14 = vadd.f32 %v3239_v26, %v3059_v28  ;;  %v10646_v5 = vadd.f32 %v10604_v63, %v3251_v11  ;;  %v3246_v10 = vadd.f32 %v10465_v27, %v3051_v46  ;;  %v10686_v42 = vadd.f32 %v10604_v63, %v3247_v25  ;;  %v13084_v28 = vld [vmem:[#allocation3_spill] sm:$0xff]  ;;  %13086 = vst [vmem:[#allocation34_spill] sm:$0xff] %v10748_v37  ;;  %v10815_v46 = vld [vmem:[%s12959_s9 + $0x158] sm:$0xff]  ;;  %v13109_v48 = vld [vmem:[#allocation22_spill] sm:$0xff] }
 0x65d   : > { %v3047_v27 = vadd.f32 %v10439_v4, %v10284_v33  ;;  %v3243_v24 = vadd.f32 %v13079_v39, %v3048_v45  ;;  %v13080_v4 = vld [vmem:[#allocation32_spill] sm:$0xff]  ;;  %v13096_v11 = vld [vmem:[#allocation11_spill] sm:$0xff]  ;;  %13102 = vst [vmem:[#allocation2_spill] sm:$0xff] %v10802_v9  ;;  %v10859_v39 = vld [vmem:[%s12959_s9 + $0x178] sm:$0xff] }
 0x65e   : > { %v10610_v55 = vadd.f32 %v10604_v63, %v3254_v14  ;;  %v10694_v54 = vadd.f32 %v10604_v63, %v3246_v10  ;;  %v13089_v14 = vld [vmem:[#allocation6_spill] sm:$0xff]  ;;  %13092 = vst [vmem:[#allocation32_spill] sm:$0xff] %v10766_v34  ;;  %v10837_v10 = vld [vmem:[%s12959_s9 + $0x168] sm:$0xff] }
 0x65f   : > { %v3242_v22 = vadd.f32 %v13080_v4, %v3047_v27  ;;  %v10720_v16 = vadd.f32 %v10604_v63, %v3243_v24  ;;  %13104 = vst [vmem:[#allocation3_spill] sm:$0xff] %v10815_v46  ;;  %v10848_v27 = vld [vmem:[%s12959_s9 + $0x170] sm:$0xff] }
 0x660   : > { %3391 = vmatpush.msrb.mxu0 %v10610_v55  ;;  %3871 = vmatpush.msrb.mxu3 %v10610_v55  ;;  %v10671_v62 = vpop.f32.mrf.mxu2  ;;  %13110 = vst [vmem:[#allocation17_spill] sm:$0xff] %v10848_v27  ;;  %v13113_v4 = vld [vmem:[#allocation24_spill] sm:$0xff] }
 0x661   : > { %7731 = vmatmul.msk.f32.gmra.mxu2 %vm627_vm1, %v10615_v17  ;;  %v10725_v0 = vadd.f32 %v10604_v63, %v3242_v22  ;;  %v13087_v63 = vld [vmem:[#allocation5_spill] sm:$0xff]  ;;  %13112 = vst [vmem:[#allocation6_spill] sm:$0xff] %v10859_v39  ;;  %v10870_v22 = vld [vmem:[%s12959_s9 + $0x180] sm:$0xff] }
 0x662   : > { %3392 = vmatpush.msrb.mxu0 %v10622_v7  ;;  %3872 = vmatpush.msrb.mxu3 %v10622_v7  ;;  %13108 = vst [vmem:[#allocation5_spill] sm:$0xff] %v10837_v10 }
 0x663   : > { %13114 = vst [vmem:[#allocation7_spill] sm:$0xff] %v10870_v22 }
 0x664   : > { %3393 = vmatpush.msrb.mxu0 %v10636_v18  ;;  %3873 = vmatpush.msrb.mxu3 %v10636_v18 }
 0x666   : > { %3394 = vmatpush.msrb.mxu0 %v10646_v5  ;;  %3874 = vmatpush.msrb.mxu3 %v10646_v5 }
 0x668   : > { %3395 = vmatpush.msrb.mxu0 %v10654_v13  ;;  %3875 = vmatpush.msrb.mxu3 %v10654_v13  ;;  %v10709_v33 = vpop.f32.mrf.mxu2 }
 0x669   : > { %7732 = vmatmul.msk.f32.gmra.mxu2 %vm627_vm1, %v10661_v36 }
 0x66a   : > { %3396 = vmatpush.msrb.mxu0 %v10667_v6  ;;  %3876 = vmatpush.msrb.mxu3 %v10667_v6 }
 0x66c   : > { %3397 = vmatpush.msrb.mxu0 %v10678_v20  ;;  %3877 = vmatpush.msrb.mxu3 %v10678_v20 }
 0x66e   : > { %3398 = vmatpush.msrb.mxu0 %v10686_v42  ;;  %3878 = vmatpush.msrb.mxu3 %v10686_v42 }
 0x670   : > { %3399 = vmatpush.msrb.mxu0 %v10694_v54  ;;  %3879 = vmatpush.msrb.mxu3 %v10694_v54  ;;  %v10736_v26 = vpop.f32.mrf.mxu2 }
 0x671   : > { %7733 = vmatmul.msk.f32.gmra.mxu2 %vm627_vm1, %v10701_v35 }
 0x672   : > { %3400 = vmatpush.msrb.mxu0 %v10705_v53  ;;  %3880 = vmatpush.msrb.mxu3 %v10705_v53 }
 0x674   : > { %3401 = vmatpush.msrb.mxu0 %v10715_v59  ;;  %3881 = vmatpush.msrb.mxu3 %v10715_v59 }
 0x676   : > { %3402 = vmatpush.msrb.mxu0 %v10720_v16  ;;  %3882 = vmatpush.msrb.mxu3 %v10720_v16 }
 0x678   : > { %3403 = vmatpush.msrb.mxu0 %v10725_v0  ;;  %3883 = vmatpush.msrb.mxu3 %v10725_v0  ;;  %v10751_v40 = vpop.f32.mrf.mxu2 }
 0x679   : > { %7734 = vmatmul.msk.f32.gmra.mxu2 %vm627_vm1, %v10732_v1  ;;  %7589 = vmatmul.msk.f32.vlgmr.msrb.gmra.mxu0 %vm627_vm1, %v13082_v19  ;;  %v13129_v1 = vld [vmem:[#allocation48_spill] sm:$0xff] }
 0x67a   : > { %3698 = vmatpush.msra.mxu0 %v13083_v43 }
 0x67c   : > { %3699 = vmatpush.msra.mxu0 %v13084_v28 }
 0x67e   : > { %3700 = vmatpush.msra.mxu0 %v13085_v50 }
 0x680   : > { %3701 = vmatpush.msra.mxu0 %v13087_v63  ;;  %v10770_v56 = vpop.f32.mrf.mxu2 }
 0x681   : > { %7803 = vmatmul.msk.f32.vlgmr.msra.gmra.mxu2 %vm627_vm1, %v10748_v37  ;;  %7590 = vmatmul.msk.f32.gmra.mxu0 %vm627_vm1, %v13088_v61  ;;  %v13115_v61 = vld [vmem:[#allocation25_spill] sm:$0xff] }
 0x682   : > { %5294 = vmatpush.msra.mxu2 %v13083_v43  ;;  %3702 = vmatpush.msra.mxu0 %v13089_v14 }
 0x684   : > { %5295 = vmatpush.msra.mxu2 %v13084_v28  ;;  %3703 = vmatpush.msra.mxu0 %v13090_v8 }
 0x686   : > { %5296 = vmatpush.msra.mxu2 %v13085_v50  ;;  %3704 = vmatpush.msra.mxu0 %v13091_v12 }
 0x688   : > { %5297 = vmatpush.msra.mxu2 %v13087_v63  ;;  %3705 = vmatpush.msra.mxu0 %v13093_v49  ;;  %v10789_v30 = vpop.f32.mrf.mxu2 }
 0x689   : > { %7804 = vmatmul.msk.f32.gmra.mxu2 %vm627_vm1, %v10766_v34  ;;  %7591 = vmatmul.msk.f32.gmra.mxu0 %vm627_vm1, %v13094_v21  ;;  %v10881_v21 = vld [vmem:[%s12959_s9 + $0x188] sm:$0xff] }
 0x68a   : > { %5298 = vmatpush.msra.mxu2 %v13089_v14  ;;  %3706 = vmatpush.msra.mxu0 %v13095_v41  ;;  %13116 = vst [vmem:[#allocation8_spill] sm:$0xff] %v10881_v21 }
 0x68c   : > { %5299 = vmatpush.msra.mxu2 %v13090_v8  ;;  %3707 = vmatpush.msra.mxu0 %v13096_v11 }
 0x68e   : > { %5300 = vmatpush.msra.mxu2 %v13091_v12  ;;  %3708 = vmatpush.msra.mxu0 %v13097_v58 }
 0x690   : > { %5301 = vmatpush.msra.mxu2 %v13093_v49  ;;  %3709 = vmatpush.msra.mxu0 %v13099_v60  ;;  %v10805_v15 = vpop.f32.mrf.mxu2 }
 0x691   : > { %7805 = vmatmul.msk.f32.gmra.mxu2 %vm627_vm1, %v10785_v52  ;;  %7592 = vmatmul.msk.f32.gmra.mxu0 %vm627_vm1, %v13100_v3  ;;  %v7877_v52 = vld [vmem:[%s12959_s9 + $0x1d0] sm:$0xff] }
 0x692   : > { %5302 = vmatpush.msra.mxu2 %v13095_v41  ;;  %3710 = vmatpush.msra.mxu0 %v13101_v51 }
 0x694   : > { %5303 = vmatpush.msra.mxu2 %v13096_v11 }
 0x696   : > { %5304 = vmatpush.msra.mxu2 %v13097_v58 }
 0x698   : > { %5305 = vmatpush.msra.mxu2 %v13099_v60  ;;  %v10817_v57 = vpop.f32.mrf.mxu2 }
 0x699   : > { %7806 = vmatmul.msk.f32.gmra.mxu2 %vm627_vm1, %v10802_v9  ;;  %7593 = vmatmul.msk.f32.gmra.mxu0 %vm627_vm1, %v13103_v38  ;;  %v3387_v38 = vld [vmem:[%s12960_s10 + $0x38] sm:$0xff] }
 0x69a   : > { %5306 = vmatpush.msra.mxu2 %v13101_v51  ;;  %3594 = vmatpush.msra.mxu1 %v3387_v38  ;;  %v3383_v38 = vld [vmem:[%s12960_s10 + $0x18] sm:$0xff] }
 0x6a0   : > { %v10828_v25 = vpop.f32.mrf.mxu2 }
 0x6a1   : > { %7807 = vmatmul.msk.f32.gmra.mxu2 %vm627_vm1, %v10815_v46  ;;  %7594 = vmatmul.msk.f32.gmra.mxu0 %vm627_vm1, %v13105_v47  ;;  %v13117_v47 = vld [vmem:[#allocation26_spill] sm:$0xff] }
 0x6a8   : > { %v10839_v45 = vpop.f32.mrf.mxu2 }
 0x6a9   : > { %7808 = vmatmul.msk.f32.gmra.mxu2 %vm627_vm1, %v10826_v2  ;;  %7595 = vmatmul.msk.f32.gmra.mxu0 %vm627_vm1, %v13107_v31  ;;  %v3386_v31 = vld [vmem:[%s12960_s10 + $0x30] sm:$0xff]  ;;  %v7875_v2 = vld [vmem:[%s12959_s9 + $0x1c0] sm:$0xff] }
 0x6aa   : > { %3595 = vmatpush.msra.mxu1 %v3386_v31  ;;  %v3382_v31 = vld [vmem:[%s12960_s10 + $0x10] sm:$0xff] }
 0x6b0   : > { %v10850_v29 = vpop.f32.mrf.mxu2 }
 0x6b1   : > { %7809 = vmatmul.msk.f32.gmra.mxu2 %vm627_vm1, %v10837_v10  ;;  %7596 = vmatmul.msk.f32.gmra.mxu0 %vm627_vm1, %v13109_v48  ;;  %v3385_v48 = vld [vmem:[%s12960_s10 + $0x28] sm:$0xff]  ;;  %v13124_v10 = vld [vmem:[#allocation44_spill] sm:$0xff] }
 0x6b2   : > { %3596 = vmatpush.msra.mxu1 %v3385_v48  ;;  %v3381_v48 = vld [vmem:[%s12960_s10 + $0x8] sm:$0xff] }
 0x6b8   : > { %v10861_v24 = vpop.f32.mrf.mxu2 }
 0x6b9   : > { %7810 = vmatmul.msk.f32.gmra.mxu2 %vm627_vm1, %v10848_v27  ;;  %7597 = vmatmul.msk.f32.gmra.mxu0 %vm627_vm1, %v13111_v44  ;;  %v10901_v44 = vld [vmem:[%s12959_s9 + $0x190] sm:$0xff] }
 0x6ba   : > { %13118 = vst [vmem:[#allocation9_spill] sm:$0xff] %v10901_v44  ;;  %v7873_v27 = vld [vmem:[%s12959_s9 + $0x1b0] sm:$0xff] }
 0x6c0   : > { %v10872_v19 = vpop.f32.mrf.mxu2 }
 0x6c1   : > { %7811 = vmatmul.msk.f32.gmra.mxu2 %vm627_vm1, %v10859_v39  ;;  %7598 = vmatmul.msk.f32.gmra.mxu0 %vm627_vm1, %v13113_v4  ;;  %v3384_v4 = vld [vmem:[%s12960_s10 + $0x20] sm:$0xff] }
 0x6c2   : > { %3597 = vmatpush.msra.mxu1 %v3384_v4  ;;  %v7802_v4 = vld [vmem:[%s12959_s9 + $0x198] sm:$0xff] }
 0x6c4   : > { %3598 = vmatpush.msra.mxu1 %v3383_v38  ;;  %v3380_v38 = vld [vmem:[%s12960_s10] sm:$0xff] }
 0x6c6   : > { %3599 = vmatpush.msra.mxu1 %v3382_v31  ;;  %v13120_v31 = vld [vmem:[#allocation39_spill] sm:$0xff] }
 0x6c8   : > { %v10883_v3 = vpop.f32.mrf.mxu2  ;;  %3600 = vmatpush.msra.mxu1 %v3381_v48  ;;  %v10945_v48 = vld [vmem:[%s12959_s9 + $0x70] sm:$0xff] }
 0x6c9   : > { %7812 = vmatmul.msk.f32.gmra.mxu2 %vm627_vm1, %v10870_v22  ;;  %7599 = vmatmul.msk.f32.gmra.mxu0 %vm627_vm1, %v13115_v61 }
 0x6ca   : > { %3601 = vmatpush.msra.mxu1 %v3380_v38  ;;  %v7872_v38 = vld [vmem:[%s12959_s9 + $0x1a8] sm:$0xff] }
 0x6cb   : > { %7615 = vmatmul.msk.f32.vlgmr.msra.gmra.mxu1 %vm732_vm2, %v13120_v31 }
 0x6d0   : > { %v10906_v61 = vpop.f32.mrf.mxu2 }
 0x6d1   : > { %7813 = vmatmul.msk.f32.gmra.mxu2 %vm627_vm1, %v10881_v21  ;;  %7600 = vmatmul.msk.f32.gmra.mxu0 %vm627_vm1, %v13117_v47  ;;  %v13119_v47 = vld [vmem:[#allocation27_spill] sm:$0xff]  ;;  %v7871_v21 = vld [vmem:[%s12959_s9 + $0x1a0] sm:$0xff] }
 0x6d9   : > { %7814 = vmatmul.msk.f32.gmra.mxu2 %vm627_vm1, %v10901_v44  ;;  %7601 = vmatmul.msk.f32.gmra.mxu0 %vm627_vm1, %v13119_v47  ;;  %v10927_v44 = vld [vmem:[%s12959_s9 + $0x68] sm:$0xff]  ;;  %v10932_v47 = vpop.f32.mrf.mxu2 }
 0x6e1   : > { %7815 = vmatmul.msk.f32.gmra.mxu2 %vm627_vm1, %v7802_v4  ;;  %7641 = vmatmul.msk.f32.vlgmr.msra.gmra.mxu0 %vm627_vm1, %v10927_v44  ;;  %v10947_v22 = vpop.f32.mrf.mxu2  ;;  %v13121_v4 = vld [vmem:[#allocation41_spill] sm:$0xff] }
 0x6e2   : > { %7616 = vmatmul.msk.f32.gmra.mxu1 %vm732_vm2, %v13121_v4  ;;  %v13122_v4 = vld [vmem:[#allocation42_spill] sm:$0xff] }
 0x6e9   : > { %7884 = vmatmul.msk.f32.vlgmr.msrb.gmra.mxu2 %vm627_vm1, %v7871_v21  ;;  %7642 = vmatmul.msk.f32.gmra.mxu0 %vm627_vm1, %v10945_v48  ;;  %v10963_v21 = vld [vmem:[%s12959_s9 + $0x78] sm:$0xff]  ;;  %v10966_v31 = vpop.f32.mrf.mxu2 }
 0x6ea   : > { %5693 = vmatpush.msrb.mxu2 %v13083_v43  ;;  %7617 = vmatmul.msk.f32.gmra.mxu1 %vm732_vm2, %v13122_v4  ;;  %v13123_v4 = vld [vmem:[#allocation43_spill] sm:$0xff] }
 0x6ec   : > { %5694 = vmatpush.msrb.mxu2 %v13084_v28 }
 0x6ee   : > { %5695 = vmatpush.msrb.mxu2 %v13085_v50 }
 0x6f0   : > { %5696 = vmatpush.msrb.mxu2 %v13087_v63 }
 0x6f1   : > { %7885 = vmatmul.msk.f32.gmra.mxu2 %vm627_vm1, %v7872_v38  ;;  %7643 = vmatmul.msk.f32.gmra.mxu0 %vm627_vm1, %v10963_v21  ;;  %v10982_v38 = vpop.f32.mrf.mxu2 }
 0x6f2   : > { %5697 = vmatpush.msrb.mxu2 %v13089_v14  ;;  %7618 = vmatmul.msk.f32.gmra.mxu1 %vm732_vm2, %v13123_v4 }
 0x6f4   : > { %5698 = vmatpush.msrb.mxu2 %v13090_v8 }
 0x6f6   : > { %5699 = vmatpush.msrb.mxu2 %v13091_v12  ;;  %v3405_v39 = vpop.f32.mrf.mxu0 }
 0x6f7   : > { %7602 = vmatmul.msk.f32.vlgmr.msra.gmra.mxu3 %vm732_vm2, %v3405_v39 }
 0x6f8   : > { %5700 = vmatpush.msrb.mxu2 %v13093_v49  ;;  %4270 = vmatpush.msra.mxu3 %v10610_v55 }
 0x6f9   : > { %7886 = vmatmul.msk.f32.gmra.mxu2 %vm627_vm1, %v7873_v27  ;;  %v7874_v27 = vld [vmem:[%s12959_s9 + $0x1b8] sm:$0xff]  ;;  %v10999_v4 = vpop.f32.mrf.mxu2 }
 0x6fa   : > { %5701 = vmatpush.msrb.mxu2 %v13095_v41  ;;  %4271 = vmatpush.msra.mxu3 %v10622_v7 }
 0x6fb   : > { %7619 = vmatmul.msk.f32.gmra.mxu1 %vm732_vm2, %v13124_v10  ;;  %v13125_v10 = vld [vmem:[#allocation45_spill] sm:$0xff] }
 0x6fc   : > { %5702 = vmatpush.msrb.mxu2 %v13096_v11  ;;  %4272 = vmatpush.msra.mxu3 %v10636_v18 }
 0x6fe   : > { %5703 = vmatpush.msrb.mxu2 %v13097_v58  ;;  %4273 = vmatpush.msra.mxu3 %v10646_v5  ;;  %v3408_v39 = vpop.f32.mrf.mxu0 }
 0x6ff   : > { %7603 = vmatmul.msk.f32.gmra.mxu3 %vm732_vm2, %v3408_v39 }
 0x700   : > { %5704 = vmatpush.msrb.mxu2 %v13099_v60  ;;  %4274 = vmatpush.msra.mxu3 %v10654_v13 }
 0x701   : > { %7887 = vmatmul.msk.f32.gmra.mxu2 %vm627_vm1, %v7874_v27  ;;  %v11013_v27 = vpop.f32.mrf.mxu2 }
 0x702   : > { %5705 = vmatpush.msrb.mxu2 %v13101_v51  ;;  %4275 = vmatpush.msra.mxu3 %v10667_v6 }
 0x703   : > { %7620 = vmatmul.msk.f32.gmra.mxu1 %vm732_vm2, %v13125_v10 }
 0x704   : > { %4276 = vmatpush.msra.mxu3 %v10678_v20 }
 0x706   : > { %4277 = vmatpush.msra.mxu3 %v10686_v42  ;;  %v3411_v39 = vpop.f32.mrf.mxu0 }
 0x707   : > { %7604 = vmatmul.msk.f32.gmra.mxu3 %vm732_vm2, %v3411_v39  ;;  %v7876_v39 = vld [vmem:[%s12959_s9 + $0x1c8] sm:$0xff] }
 0x708   : > { %4278 = vmatpush.msra.mxu3 %v10694_v54 }
 0x709   : > { %7888 = vmatmul.msk.f32.gmra.mxu2 %vm627_vm1, %v7875_v2  ;;  %v11026_v9 = vpop.f32.mrf.mxu2  ;;  %v13126_v2 = vld [vmem:[#allocation46_spill] sm:$0xff] }
 0x70a   : > { %4279 = vmatpush.msra.mxu3 %v10705_v53 }
 0x70b   : > { %7621 = vmatmul.msk.f32.gmra.mxu1 %vm732_vm2, %v13126_v2 }
 0x70c   : > { %4280 = vmatpush.msra.mxu3 %v10715_v59 }
 0x70e   : > { %4281 = vmatpush.msra.mxu3 %v10720_v16  ;;  %v3414_v46 = vpop.f32.mrf.mxu0 }
 0x70f   : > { %7605 = vmatmul.msk.f32.gmra.mxu3 %vm732_vm2, %v3414_v46  ;;  %v13128_v46 = vld [vmem:[#allocation47_spill] sm:$0xff] }
 0x710   : > { %4282 = vmatpush.msra.mxu3 %v10725_v0 }
 0x711   : > { %7889 = vmatmul.msk.f32.gmra.mxu2 %vm627_vm1, %v7876_v39  ;;  %v11035_v34 = vpop.f32.mrf.mxu2  ;;  %v7878_v39 = vld [vmem:[%s12959_s9 + $0x1d8] sm:$0xff] }
 0x712   : > { %13127 = vst [vmem:[#allocation18_spill] sm:$0xff] %v11035_v34  ;;  %v13131_v34 = vld [vmem:[#allocation49_spill] sm:$0xff] }
 0x713   : > { %7622 = vmatmul.msk.f32.gmra.mxu1 %vm732_vm2, %v13128_v46 }
 0x716   : > { %v3417_v10 = vpop.f32.mrf.mxu0 }
 0x717   : > { %7606 = vmatmul.msk.f32.gmra.mxu3 %vm732_vm2, %v3417_v10 }
 0x719   : > { %7890 = vmatmul.msk.f32.gmra.mxu2 %vm627_vm1, %v7877_v52  ;;  %v11045_v2 = vpop.f32.mrf.mxu2  ;;  %v7879_v52 = vld [vmem:[%s12959_s9 + $0x1e0] sm:$0xff] }
 0x71b   : > { %7623 = vmatmul.msk.f32.gmra.mxu1 %vm732_vm2, %v13129_v1  ;;  %v7661_v1 = vld [vmem:[%s12960_s10 + $0x78] sm:$0xff] }
 0x71c   : > { %3807 = vmatpush.msrb.mxu0 %v7661_v1  ;;  %v7658_v1 = vld [vmem:[%s12960_s10 + $0x60] sm:$0xff] }
 0x71e   : > { %v3420_v37 = vpop.f32.mrf.mxu0 }
 0x71f   : > { %7607 = vmatmul.msk.f32.gmra.mxu3 %vm732_vm2, %v3420_v37 }
 0x721   : > { %7891 = vmatmul.msk.f32.gmra.mxu2 %vm627_vm1, %v7878_v39  ;;  %v11054_v46 = vpop.f32.mrf.mxu2  ;;  %v7880_v39 = vld [vmem:[%s12959_s9 + $0x1e8] sm:$0xff] }
 0x722   : > { %13130 = vst [vmem:[#allocation10_spill] sm:$0xff] %v11054_v46 }
 0x723   : > { %7624 = vmatmul.msk.f32.gmra.mxu1 %vm732_vm2, %v13131_v34  ;;  %v13132_v34 = vld [vmem:[#allocation50_spill] sm:$0xff] }
 0x726   : > { %v3423_v10 = vpop.f32.mrf.mxu0 }
 0x727   : > { %7608 = vmatmul.msk.f32.gmra.mxu3 %vm732_vm2, %v3423_v10  ;;  %v7660_v10 = vld [vmem:[%s12960_s10 + $0x70] sm:$0xff] }
 0x728   : > { %3808 = vmatpush.msrb.mxu0 %v7660_v10  ;;  %v7657_v10 = vld [vmem:[%s12960_s10 + $0x58] sm:$0xff] }
 0x729   : > { %7892 = vmatmul.msk.f32.gmra.mxu2 %vm627_vm1, %v7879_v52  ;;  %v7659_v52 = vld [vmem:[%s12960_s10 + $0x68] sm:$0xff] }
 0x72a   : > { %3809 = vmatpush.msrb.mxu0 %v7659_v52 }
 0x72b   : > { %7625 = vmatmul.msk.f32.gmra.mxu1 %vm732_vm2, %v13132_v34  ;;  %v7656_v34 = vld [vmem:[%s12960_s10 + $0x50] sm:$0xff] }
 0x72c   : > { %3810 = vmatpush.msrb.mxu0 %v7658_v1  ;;  %v7882_v1 = vld [vmem:[%s12959_s9 + $0x1f8] sm:$0xff] }
 0x72e   : > { %v3426_v37 = vpop.f32.mrf.mxu0  ;;  %3811 = vmatpush.msrb.mxu0 %v7657_v10 }
 0x72f   : > { %7609 = vmatmul.msk.f32.gmra.mxu3 %vm732_vm2, %v3426_v37  ;;  %v11074_v37 = vpop.f32.mrf.mxu2 }
 0x730   : > { %3812 = vmatpush.msrb.mxu0 %v7656_v34  ;;  %v7883_v34 = vld [vmem:[%s12959_s9 + $0x200] sm:$0xff] }
 0x731   : > { %7893 = vmatmul.msk.f32.gmra.mxu2 %vm627_vm1, %v7880_v39  ;;  %v7881_v39 = vld [vmem:[%s12959_s9 + $0x1f0] sm:$0xff] }
 0x733   : > { %7626 = vmatmul.msk.f32.gmra.mxu1 %vm732_vm2, %v10588_v32 }
 0x736   : > { %v3429_v46 = vpop.f32.mrf.mxu0 }
 0x737   : > { %7610 = vmatmul.msk.f32.gmra.mxu3 %vm732_vm2, %v3429_v46  ;;  %v7655_v46 = vld [vmem:[%s12960_s10 + $0x48] sm:$0xff]  ;;  %v11102_v10 = vpop.f32.mrf.mxu2 }
 0x738   : > { %3813 = vmatpush.msrb.mxu0 %v7655_v46 }
 0x739   : > { %7894 = vmatmul.msk.f32.gmra.mxu2 %vm627_vm1, %v7881_v39  ;;  %v7654_v39 = vld [vmem:[%s12960_s10 + $0x40] sm:$0xff] }
 0x73a   : > { %3814 = vmatpush.msrb.mxu0 %v7654_v39  ;;  %v7952_v39 = vld [vmem:[%s12959_s9 + $0x208] sm:$0xff] }
 0x73b   : > { %7627 = vmatmul.msk.f32.gmra.mxu1 %vm732_vm2, %v10626_v23 }
 0x73e   : > { %v3432_v52 = vpop.f32.mrf.mxu0 }
 0x73f   : > { %7611 = vmatmul.msk.f32.gmra.mxu3 %vm732_vm2, %v3432_v52  ;;  %v11112_v46 = vpop.f32.mrf.mxu2 }
 0x741   : > { %7895 = vmatmul.msk.f32.gmra.mxu2 %vm627_vm1, %v7882_v1 }
 0x746   : > { %v3435_v32 = vpop.f32.mrf.mxu0 }
 0x747   : > { %7612 = vmatmul.msk.f32.gmra.mxu3 %vm732_vm2, %v3435_v32  ;;  %v11120_v23 = vpop.f32.mrf.mxu2  ;;  %v7953_v32 = vld [vmem:[%s12959_s9 + $0x210] sm:$0xff] }
 0x749   : > { %7896 = vmatmul.msk.f32.gmra.mxu2 %vm627_vm1, %v7883_v34 }
 0x74e   : > { %v3438_v52 = vpop.f32.mrf.mxu0 }
 0x74f   : > { %7613 = vmatmul.msk.f32.gmra.mxu3 %vm732_vm2, %v3438_v52  ;;  %v11132_v34 = vpop.f32.mrf.mxu2 }
 0x751   : > { %7965 = vmatmul.msk.f32.vlgmr.msra.gmra.mxu2 %vm627_vm1, %v7952_v39  ;;  %v7954_v39 = vld [vmem:[%s12959_s9 + $0x218] sm:$0xff] }
 0x752   : > { %6092 = vmatpush.msra.mxu2 %v13083_v43 }
 0x754   : > { %6093 = vmatpush.msra.mxu2 %v13084_v28 }
 0x756   : > { %6094 = vmatpush.msra.mxu2 %v13085_v50  ;;  %v3441_v1 = vpop.f32.mrf.mxu0 }
 0x757   : > { %7614 = vmatmul.msk.f32.gmra.mxu3 %vm732_vm2, %v3441_v1 }
 0x758   : > { %6095 = vmatpush.msra.mxu2 %v13087_v63 }
 0x759   : > { %7966 = vmatmul.msk.f32.gmra.mxu2 %vm627_vm1, %v7953_v32  ;;  %v11156_v32 = vpop.f32.mrf.mxu2 }
 0x75a   : > { %6096 = vmatpush.msra.mxu2 %v13089_v14 }
 0x75c   : > { %6097 = vmatpush.msra.mxu2 %v13090_v8 }
 0x75e   : > { %6098 = vmatpush.msra.mxu2 %v13091_v12  ;;  %v3712_v52 = vpop.f32.mrf.mxu0 }
 0x75f   : > { %7662 = vmatmul.msk.f32.vlgmr.msrb.gmra.mxu0 %vm732_vm2, %v3712_v52  ;;  %7675 = vmatmul.msk.f32.vlgmr.msrb.gmra.mxu3 %vm627_vm1, %v10927_v44  ;;  %v7955_v44 = vld [vmem:[%s12959_s9 + $0x220] sm:$0xff] }
 0x760   : > { %6099 = vmatpush.msra.mxu2 %v13093_v49  ;;  %4669 = vmatpush.msrb.mxu3 %v10610_v55 }
 0x761   : > { %7967 = vmatmul.msk.f32.gmra.mxu2 %vm627_vm1, %v7954_v39  ;;  %v11173_v39 = vpop.f32.mrf.mxu2 }
 0x762   : > { %6100 = vmatpush.msra.mxu2 %v13095_v41  ;;  %4670 = vmatpush.msrb.mxu3 %v10622_v7  ;;  %13133 = vst [vmem:[#allocation11_spill] sm:$0xff] %v11173_v39  ;;  %v13136_v39 = vld [vmem:[#allocation29_spill] sm:$0xff] }
 0x764   : > { %6101 = vmatpush.msra.mxu2 %v13096_v11  ;;  %4671 = vmatpush.msrb.mxu3 %v10636_v18 }
 0x766   : > { %6102 = vmatpush.msra.mxu2 %v13097_v58  ;;  %4672 = vmatpush.msrb.mxu3 %v10646_v5  ;;  %v3715_v1 = vpop.f32.mrf.mxu0 }
 0x767   : > { %7663 = vmatmul.msk.f32.gmra.mxu0 %vm732_vm2, %v3715_v1  ;;  %7676 = vmatmul.msk.f32.gmra.mxu3 %vm627_vm1, %v10945_v48  ;;  %v7956_v48 = vld [vmem:[%s12959_s9 + $0x228] sm:$0xff]  ;;  %v7957_v1 = vld [vmem:[%s12959_s9 + $0x230] sm:$0xff] }
 0x768   : > { %6103 = vmatpush.msra.mxu2 %v13099_v60  ;;  %4673 = vmatpush.msrb.mxu3 %v10654_v13 }
 0x769   : > { %7968 = vmatmul.msk.f32.gmra.mxu2 %vm627_vm1, %v7955_v44 }
 0x76a   : > { %6104 = vmatpush.msra.mxu2 %v13101_v51  ;;  %4674 = vmatpush.msrb.mxu3 %v10667_v6 }
 0x76c   : > { %4675 = vmatpush.msrb.mxu3 %v10678_v20 }
 0x76e   : > { %4676 = vmatpush.msrb.mxu3 %v10686_v42  ;;  %v3718_v52 = vpop.f32.mrf.mxu0 }
 0x76f   : > { %7664 = vmatmul.msk.f32.gmra.mxu0 %vm732_vm2, %v3718_v52  ;;  %7677 = vmatmul.msk.f32.gmra.mxu3 %vm627_vm1, %v10963_v21  ;;  %v13134_v21 = vld [vmem:[#allocation28_spill] sm:$0xff]  ;;  %v11189_v52 = vpop.f32.mrf.mxu2 }
 0x770   : > { %4677 = vmatpush.msrb.mxu3 %v10694_v54  ;;  %13135 = vst [vmem:[#allocation12_spill] sm:$0xff] %v11189_v52  ;;  %v13138_v52 = vld [vmem:[#allocation30_spill] sm:$0xff] }
 0x771   : > { %7969 = vmatmul.msk.f32.gmra.mxu2 %vm627_vm1, %v7956_v48  ;;  %v7958_v48 = vld [vmem:[%s12959_s9 + $0x238] sm:$0xff] }
 0x772   : > { %4678 = vmatpush.msrb.mxu3 %v10705_v53 }
 0x774   : > { %4679 = vmatpush.msrb.mxu3 %v10715_v59 }
 0x776   : > { %4680 = vmatpush.msrb.mxu3 %v10720_v16 }
 0x777   : > { %7665 = vmatmul.msk.f32.gmra.mxu0 %vm732_vm2, %v10671_v62  ;;  %7678 = vmatmul.msk.f32.gmra.mxu3 %vm627_vm1, %v13134_v21  ;;  %v11201_v21 = vpop.f32.mrf.mxu2 }
 0x778   : > { %4681 = vmatpush.msrb.mxu3 %v10725_v0  ;;  %13137 = vst [vmem:[#allocation13_spill] sm:$0xff] %v11201_v21 }
 0x779   : > { %7970 = vmatmul.msk.f32.gmra.mxu2 %vm627_vm1, %v7957_v1  ;;  %v7959_v1 = vld [vmem:[%s12959_s9 + $0x240] sm:$0xff] }
 0x77a   : > { %v11187_v44 = vpop.f32.mrf.mxu3 }
 0x77f   : > { %7666 = vmatmul.msk.f32.gmra.mxu0 %vm732_vm2, %v10709_v33  ;;  %7679 = vmatmul.msk.f32.gmra.mxu3 %vm627_vm1, %v13136_v39  ;;  %v7960_v39 = vld [vmem:[%s12959_s9 + $0x248] sm:$0xff]  ;;  %v11220_v21 = vpop.f32.mrf.mxu2 }
 0x780   : > { %13140 = vst [vmem:[#allocation19_spill] sm:$0xff] %v11220_v21  ;;  %v13143_v21 = vld [vmem:[#allocation35_spill] sm:$0xff] }
 0x781   : > { %7971 = vmatmul.msk.f32.gmra.mxu2 %vm627_vm1, %v7958_v48  ;;  %v13139_v48 = vld [vmem:[#allocation31_spill] sm:$0xff] }
 0x782   : > { %v11199_v62 = vpop.f32.mrf.mxu3 }
 0x787   : > { %7667 = vmatmul.msk.f32.gmra.mxu0 %vm732_vm2, %v10736_v26  ;;  %7680 = vmatmul.msk.f32.gmra.mxu3 %vm627_vm1, %v13138_v52  ;;  %v7961_v52 = vld [vmem:[%s12959_s9 + $0x250] sm:$0xff] }
 0x789   : > { %7972 = vmatmul.msk.f32.gmra.mxu2 %vm627_vm1, %v7959_v1  ;;  %v13141_v1 = vld [vmem:[#allocation33_spill] sm:$0xff] }
 0x78a   : > { %v11211_v33 = vpop.f32.mrf.mxu3 }
 0x78f   : > { %7668 = vmatmul.msk.f32.gmra.mxu0 %vm732_vm2, %v10751_v40  ;;  %7681 = vmatmul.msk.f32.gmra.mxu3 %vm627_vm1, %v13139_v48  ;;  %v11233_v40 = vpop.f32.mrf.mxu2 }
 0x790   : > { %13142 = vst [vmem:[#allocation14_spill] sm:$0xff] %v11233_v40  ;;  %v13145_v40 = vld [vmem:[#allocation36_spill] sm:$0xff] }
 0x791   : > { %7973 = vmatmul.msk.f32.gmra.mxu2 %vm627_vm1, %v7960_v39  ;;  %v7962_v39 = vld [vmem:[%s12959_s9 + $0x258] sm:$0xff] }
 0x792   : > { %v11223_v26 = vpop.f32.mrf.mxu3 }
 0x797   : > { %7669 = vmatmul.msk.f32.gmra.mxu0 %vm732_vm2, %v10770_v56  ;;  %7682 = vmatmul.msk.f32.gmra.mxu3 %vm627_vm1, %v13141_v1  ;;  %v11247_v1 = vpop.f32.mrf.mxu2 }
 0x798   : > { %13144 = vst [vmem:[#allocation20_spill] sm:$0xff] %v11247_v1  ;;  %v7964_v1 = vld [vmem:[%s12959_s9 + $0x268] sm:$0xff] }
 0x799   : > { %7974 = vmatmul.msk.f32.gmra.mxu2 %vm627_vm1, %v7961_v52  ;;  %v7963_v52 = vld [vmem:[%s12959_s9 + $0x260] sm:$0xff] }
 0x79a   : > { %v11235_v48 = vpop.f32.mrf.mxu3 }
 0x79f   : > { %7670 = vmatmul.msk.f32.gmra.mxu0 %vm732_vm2, %v10789_v30  ;;  %7683 = vmatmul.msk.f32.gmra.mxu3 %vm627_vm1, %v13143_v21  ;;  %v7695_v21 = vld [vmem:[%s12961_s11 + $0x78] sm:$0xff] }
 0x7a0   : > { %3980 = vmatpush.msrb.mxu1 %v7695_v21  ;;  %v7694_v21 = vld [vmem:[%s12961_s11 + $0x70] sm:$0xff] }
 0x7a1   : > { %7975 = vmatmul.msk.f32.gmra.mxu2 %vm627_vm1, %v7962_v39  ;;  %v11262_v39 = vpop.f32.mrf.mxu2 }
 0x7a2   : > { %v11245_v56 = vpop.f32.mrf.mxu3  ;;  %13146 = vst [vmem:[#allocation21_spill] sm:$0xff] %v11262_v39  ;;  %v7742_v39 = vld [vmem:[%s12960_s10 + $0xb8] sm:$0xff]  ;;  %3981 = vmatpush.msrb.mxu1 %v7694_v21  ;;  %v7692_v21 = vld [vmem:[%s12961_s11 + $0x60] sm:$0xff] }
 0x7a3   : > { %4206 = vmatpush.msra.mxu0 %v7742_v39  ;;  %v7740_v39 = vld [vmem:[%s12960_s10 + $0xa8] sm:$0xff] }
 0x7a7   : > { %7671 = vmatmul.msk.f32.gmra.mxu0 %vm732_vm2, %v10805_v15  ;;  %7684 = vmatmul.msk.f32.gmra.mxu3 %vm627_vm1, %v13145_v40  ;;  %v13147_v15 = vld [vmem:[#allocation38_spill] sm:$0xff] }
 0x7a9   : > { %7976 = vmatmul.msk.f32.gmra.mxu2 %vm627_vm1, %v7963_v52  ;;  %v8033_v52 = vld [vmem:[%s12959_s9 + $0x270] sm:$0xff] }
 0x7aa   : > { %v11257_v30 = vpop.f32.mrf.mxu3 }
 0x7af   : > { %7672 = vmatmul.msk.f32.gmra.mxu0 %vm732_vm2, %v10817_v57  ;;  %7685 = vmatmul.msk.f32.gmra.mxu3 %vm627_vm1, %v13147_v15  ;;  %v13149_v57 = vld [vmem:[#allocation40_spill] sm:$0xff]  ;;  %v7693_v15 = vld [vmem:[%s12961_s11 + $0x68] sm:$0xff] }
 0x7b0   : > { %3982 = vmatpush.msrb.mxu1 %v7693_v15 }
 0x7b1   : > { %7977 = vmatmul.msk.f32.gmra.mxu2 %vm627_vm1, %v7964_v1  ;;  %v11287_v1 = vpop.f32.mrf.mxu2 }
 0x7b2   : > { %v11272_v40 = vpop.f32.mrf.mxu3  ;;  %3983 = vmatpush.msrb.mxu1 %v7692_v21  ;;  %v7688_v21 = vld [vmem:[%s12961_s11 + $0x40] sm:$0xff] }
 0x7b3   : > { %13148 = vst [vmem:[#allocation15_spill] sm:$0xff] %v11272_v40  ;;  %v7741_v40 = vld [vmem:[%s12960_s10 + $0xb0] sm:$0xff] }
 0x7b4   : > { %4207 = vmatpush.msra.mxu0 %v7741_v40  ;;  %v7738_v40 = vld [vmem:[%s12960_s10 + $0x98] sm:$0xff] }
 0x7b6   : > { %4208 = vmatpush.msra.mxu0 %v7740_v39  ;;  %v8323_v39 = vld [vmem:[%s12959_s9 + $0xd0] sm:$0xff] }
 0x7b7   : > { %7673 = vmatmul.msk.f32.gmra.mxu0 %vm732_vm2, %v10828_v25  ;;  %7686 = vmatmul.msk.f32.gmra.mxu3 %vm627_vm1, %v13149_v57  ;;  %v7690_v57 = vld [vmem:[%s12961_s11 + $0x50] sm:$0xff] }
 0x7b9   : > { %8046 = vmatmul.msk.f32.vlgmr.msrb.gmra.mxu2 %vm627_vm1, %v8033_v52  ;;  %v7739_v52 = vld [vmem:[%s12960_s10 + $0xa0] sm:$0xff] }
 0x7ba   : > { %6491 = vmatpush.msrb.mxu2 %v13083_v43  ;;  %v11297_v25 = vpop.f32.mrf.mxu3  ;;  %v7691_v43 = vld [vmem:[%s12961_s11 + $0x58] sm:$0xff]  ;;  %4209 = vmatpush.msra.mxu0 %v7739_v52 }
 0x7bb   : > { %3984 = vmatpush.msrb.mxu1 %v7691_v43 }
 0x7bc   : > { %6492 = vmatpush.msrb.mxu2 %v13084_v28  ;;  %v8322_v28 = vld [vmem:[%s12959_s9 + $0xc8] sm:$0xff]  ;;  %4210 = vmatpush.msra.mxu0 %v7738_v40 }
 0x7bd   : > { %3985 = vmatpush.msrb.mxu1 %v7690_v57 }
 0x7be   : > { %6493 = vmatpush.msrb.mxu2 %v13085_v50  ;;  %v7689_v50 = vld [vmem:[%s12961_s11 + $0x48] sm:$0xff] }
 0x7bf   : > { %7674 = vmatmul.msk.f32.gmra.mxu0 %vm732_vm2, %v10839_v45  ;;  %7687 = vmatmul.msk.f32.gmra.mxu3 %vm627_vm1, %v8322_v28  ;;  %v7737_v45 = vld [vmem:[%s12960_s10 + $0x90] sm:$0xff] }
 0x7c0   : > { %6494 = vmatpush.msrb.mxu2 %v13087_v63  ;;  %3986 = vmatpush.msrb.mxu1 %v7689_v50  ;;  %v7736_v63 = vld [vmem:[%s12960_s10 + $0x88] sm:$0xff] }
 0x7c1   : > { %4211 = vmatpush.msra.mxu0 %v7737_v45 }
 0x7c2   : > { %6495 = vmatpush.msrb.mxu2 %v13089_v14  ;;  %v11333_v15 = vpop.f32.mrf.mxu3  ;;  %3987 = vmatpush.msrb.mxu1 %v7688_v21  ;;  %v7735_v14 = vld [vmem:[%s12960_s10 + $0x80] sm:$0xff] }
 0x7c3   : > { %4212 = vmatpush.msra.mxu0 %v7736_v63 }
 0x7c4   : > { %6496 = vmatpush.msrb.mxu2 %v13090_v8 }
 0x7c5   : > { %4213 = vmatpush.msra.mxu0 %v7735_v14 }
 0x7c6   : > { %6497 = vmatpush.msrb.mxu2 %v13091_v12  ;;  %v8324_v12 = vld [vmem:[%s12959_s9 + $0xd8] sm:$0xff] }
 0x7c7   : > { %7756 = vmatmul.msk.f32.vlgmr.msra.gmra.mxu3 %vm627_vm1, %v8323_v39  ;;  %7743 = vmatmul.msk.f32.vlgmr.msra.gmra.mxu0 %vm732_vm2, %v10850_v29 }
 0x7c8   : > { %6498 = vmatpush.msrb.mxu2 %v13093_v49  ;;  %5068 = vmatpush.msra.mxu3 %v10610_v55 }
 0x7ca   : > { %6499 = vmatpush.msrb.mxu2 %v13095_v41  ;;  %5069 = vmatpush.msra.mxu3 %v10622_v7  ;;  %v11354_v8 = vpop.f32.mrf.mxu3  ;;  %v8325_v41 = vld [vmem:[%s12959_s9 + $0xe0] sm:$0xff] }
 0x7cc   : > { %6500 = vmatpush.msrb.mxu2 %v13096_v11  ;;  %5070 = vmatpush.msra.mxu3 %v10636_v18 }
 0x7ce   : > { %6501 = vmatpush.msrb.mxu2 %v13097_v58  ;;  %5071 = vmatpush.msra.mxu3 %v10646_v5 }
 0x7cf   : > { %7757 = vmatmul.msk.f32.gmra.mxu3 %vm627_vm1, %v8324_v12  ;;  %7744 = vmatmul.msk.f32.gmra.mxu0 %vm732_vm2, %v10861_v24 }
 0x7d0   : > { %6502 = vmatpush.msrb.mxu2 %v13099_v60  ;;  %5072 = vmatpush.msra.mxu3 %v10654_v13  ;;  %v8326_v60 = vld [vmem:[%s12959_s9 + $0xe8] sm:$0xff] }
 0x7d2   : > { %6503 = vmatpush.msrb.mxu2 %v13101_v51  ;;  %5073 = vmatpush.msra.mxu3 %v10667_v6  ;;  %v11370_v49 = vpop.f32.mrf.mxu3  ;;  %v11394_v51 = vpop.f32.mrf.mxu1 }
 0x7d4   : > { %5074 = vmatpush.msra.mxu3 %v10678_v20 }
 0x7d6   : > { %5075 = vmatpush.msra.mxu3 %v10686_v42 }
 0x7d7   : > { %7758 = vmatmul.msk.f32.gmra.mxu3 %vm627_vm1, %v8325_v41  ;;  %7745 = vmatmul.msk.f32.gmra.mxu0 %vm732_vm2, %v10872_v19  ;;  %v8327_v19 = vld [vmem:[%s12959_s9 + $0xf0] sm:$0xff] }
 0x7d8   : > { %5076 = vmatpush.msra.mxu3 %v10694_v54 }
 0x7da   : > { %5077 = vmatpush.msra.mxu3 %v10705_v53  ;;  %v11382_v11 = vpop.f32.mrf.mxu3  ;;  %v11406_v43 = vpop.f32.mrf.mxu1 }
 0x7db   : > { %13150 = vst [vmem:[#allocation22_spill] sm:$0xff] %v11382_v11 }
 0x7dc   : > { %5078 = vmatpush.msra.mxu3 %v10715_v59  ;;  %v11387_v58 = vpop.f32.mrf.mxu0 }
 0x7de   : > { %5079 = vmatpush.msra.mxu3 %v10720_v16 }
 0x7df   : > { %7759 = vmatmul.msk.f32.gmra.mxu3 %vm627_vm1, %v8326_v60  ;;  %7746 = vmatmul.msk.f32.gmra.mxu0 %vm732_vm2, %v10883_v3  ;;  %v8328_v3 = vld [vmem:[%s12959_s9 + $0xf8] sm:$0xff] }
 0x7e0   : > { %5080 = vmatpush.msra.mxu3 %v10725_v0 }
 0x7e2   : > { %v3885_v29 = vpop.f32.mrf.mxu3  ;;  %v11420_v40 = vpop.f32.mrf.mxu1 }
 0x7e3   : > { %7696 = vmatmul.msk.f32.vlgmr.msrb.gmra.mxu1 %vm732_vm2, %v3885_v29 }
 0x7e4   : > { %v11400_v24 = vpop.f32.mrf.mxu0 }
 0x7e7   : > { %7760 = vmatmul.msk.f32.gmra.mxu3 %vm627_vm1, %v8327_v19  ;;  %7747 = vmatmul.msk.f32.gmra.mxu0 %vm732_vm2, %v10906_v61  ;;  %v8329_v61 = vld [vmem:[%s12959_s9 + $0x100] sm:$0xff]  ;;  %v7776_v19 = vld [vmem:[%s12961_s11 + $0xb8] sm:$0xff] }
 0x7e8   : > { %4379 = vmatpush.msra.mxu1 %v7776_v19  ;;  %v13151_v19 = vld [vmem:[#allocation37_spill] sm:$0xff] }
 0x7ea   : > { %v3888_v52 = vpop.f32.mrf.mxu3  ;;  %v11433_v63 = vpop.f32.mrf.mxu1 }
 0x7eb   : > { %7697 = vmatmul.msk.f32.gmra.mxu1 %vm732_vm2, %v3888_v52 }
 0x7ec   : > { %v11411_v57 = vpop.f32.mrf.mxu0 }
 0x7ef   : > { %7761 = vmatmul.msk.f32.gmra.mxu3 %vm627_vm1, %v8328_v3  ;;  %7748 = vmatmul.msk.f32.gmra.mxu0 %vm732_vm2, %v10932_v47  ;;  %v8330_v47 = vld [vmem:[%s12959_s9 + $0x108] sm:$0xff] }
 0x7f2   : > { %v3891_v28 = vpop.f32.mrf.mxu3  ;;  %v11448_v12 = vpop.f32.mrf.mxu1 }
 0x7f3   : > { %7698 = vmatmul.msk.f32.gmra.mxu1 %vm732_vm2, %v3891_v28  ;;  %v7823_v28 = vld [vmem:[%s12960_s10 + $0xf8] sm:$0xff] }
 0x7f4   : > { %v11422_v50 = vpop.f32.mrf.mxu0  ;;  %4605 = vmatpush.msrb.mxu0 %v7823_v28 }
 0x7f7   : > { %7762 = vmatmul.msk.f32.gmra.mxu3 %vm627_vm1, %v8329_v61  ;;  %7749 = vmatmul.msk.f32.gmra.mxu0 %vm732_vm2, %v10947_v22  ;;  %v8331_v22 = vld [vmem:[%s12959_s9 + $0x110] sm:$0xff] }
 0x7fa   : > { %v3894_v45 = vpop.f32.mrf.mxu3 }
 0x7fb   : > { %7699 = vmatmul.msk.f32.gmra.mxu1 %vm732_vm2, %v3894_v45  ;;  %v7773_v45 = vld [vmem:[%s12961_s11 + $0xa0] sm:$0xff] }
 0x7fc   : > { %v11431_v21 = vpop.f32.mrf.mxu0 }
 0x7ff   : > { %7763 = vmatmul.msk.f32.gmra.mxu3 %vm627_vm1, %v8330_v47  ;;  %7750 = vmatmul.msk.f32.gmra.mxu0 %vm732_vm2, %v10966_v31  ;;  %v11457_v31 = vpop.f32.mrf.mxu1 }
 0x802   : > { %v3897_v14 = vpop.f32.mrf.mxu3 }
 0x803   : > { %7700 = vmatmul.msk.f32.gmra.mxu1 %vm732_vm2, %v3897_v14  ;;  %v7772_v14 = vld [vmem:[%s12961_s11 + $0x98] sm:$0xff] }
 0x804   : > { %v11442_v39 = vpop.f32.mrf.mxu0 }
 0x807   : > { %7764 = vmatmul.msk.f32.gmra.mxu3 %vm627_vm1, %v8331_v22  ;;  %7751 = vmatmul.msk.f32.gmra.mxu0 %vm732_vm2, %v10982_v38  ;;  %v7820_v22 = vld [vmem:[%s12960_s10 + $0xe0] sm:$0xff] }
 0x80a   : > { %v3900_v41 = vpop.f32.mrf.mxu3 }
 0x80b   : > { %7701 = vmatmul.msk.f32.gmra.mxu1 %vm732_vm2, %v3900_v41 }
 0x80c   : > { %v11453_v60 = vpop.f32.mrf.mxu0 }
 0x80f   : > { %7765 = vmatmul.msk.f32.gmra.mxu3 %vm627_vm1, %v10615_v17  ;;  %7752 = vmatmul.msk.f32.gmra.mxu0 %vm732_vm2, %v10999_v4  ;;  %v11472_v17 = vpop.f32.mrf.mxu1  ;;  %v7775_v4 = vld [vmem:[%s12961_s11 + $0xb0] sm:$0xff] }
 0x810   : > { %4380 = vmatpush.msra.mxu1 %v7775_v4  ;;  %v7818_v4 = vld [vmem:[%s12960_s10 + $0xd0] sm:$0xff] }
 0x812   : > { %v3903_v29 = vpop.f32.mrf.mxu3 }
 0x813   : > { %7702 = vmatmul.msk.f32.gmra.mxu1 %vm732_vm2, %v3903_v29  ;;  %v7819_v29 = vld [vmem:[%s12960_s10 + $0xd8] sm:$0xff] }
 0x814   : > { %v11465_v52 = vpop.f32.mrf.mxu0 }
 0x817   : > { %7766 = vmatmul.msk.f32.gmra.mxu3 %vm627_vm1, %v10661_v36  ;;  %7753 = vmatmul.msk.f32.gmra.mxu0 %vm732_vm2, %v11013_v27  ;;  %v7774_v36 = vld [vmem:[%s12961_s11 + $0xa8] sm:$0xff]  ;;  %v7822_v27 = vld [vmem:[%s12960_s10 + $0xf0] sm:$0xff]  ;;  %v11507_v41 = vpop.f32.mrf.mxu1 }
 0x818   : > { %4381 = vmatpush.msra.mxu1 %v7774_v36  ;;  %4606 = vmatpush.msrb.mxu0 %v7822_v27  ;;  %v7769_v36 = vld [vmem:[%s12961_s11 + $0x80] sm:$0xff]  ;;  %v7817_v27 = vld [vmem:[%s12960_s10 + $0xc8] sm:$0xff] }
 0x81a   : > { %v3906_v38 = vpop.f32.mrf.mxu3  ;;  %4382 = vmatpush.msra.mxu1 %v7773_v45  ;;  %v7816_v45 = vld [vmem:[%s12960_s10 + $0xc0] sm:$0xff] }
 0x81b   : > { %7703 = vmatmul.msk.f32.gmra.mxu1 %vm732_vm2, %v3906_v38  ;;  %v7770_v38 = vld [vmem:[%s12961_s11 + $0x88] sm:$0xff] }
 0x81c   : > { %v11474_v3 = vpop.f32.mrf.mxu0  ;;  %4383 = vmatpush.msra.mxu1 %v7772_v14  ;;  %v13153_v14 = vld [vmem:[#allocation34_spill] sm:$0xff] }
 0x81f   : > { %7767 = vmatmul.msk.f32.gmra.mxu3 %vm627_vm1, %v10701_v35  ;;  %v7821_v35 = vld [vmem:[%s12960_s10 + $0xe8] sm:$0xff]  ;;  %7754 = vmatmul.msk.f32.gmra.mxu0 %vm732_vm2, %v11026_v9  ;;  %v7771_v9 = vld [vmem:[%s12961_s11 + $0x90] sm:$0xff] }
 0x820   : > { %4607 = vmatpush.msrb.mxu0 %v7821_v35  ;;  %4384 = vmatpush.msra.mxu1 %v7771_v9 }
 0x822   : > { %v3909_v61 = vpop.f32.mrf.mxu3  ;;  %4608 = vmatpush.msrb.mxu0 %v7820_v22  ;;  %4385 = vmatpush.msra.mxu1 %v7770_v38  ;;  %v11539_v22 = vpop.f32.mrf.mxu1 }
 0x823   : > { %7704 = vmatmul.msk.f32.gmra.mxu1 %vm732_vm2, %v3909_v61  ;;  %v13152_v61 = vld [vmem:[#allocation18_spill] sm:$0xff] }
 0x824   : > { %v11499_v47 = vpop.f32.mrf.mxu0  ;;  %4609 = vmatpush.msrb.mxu0 %v7819_v29  ;;  %4386 = vmatpush.msra.mxu1 %v7769_v36 }
 0x826   : > { %4610 = vmatpush.msrb.mxu0 %v7818_v4 }
 0x827   : > { %7768 = vmatmul.msk.f32.gmra.mxu3 %vm627_vm1, %v13151_v19  ;;  %7755 = vmatmul.msk.f32.gmra.mxu0 %vm732_vm2, %v13152_v61  ;;  %v13154_v19 = vld [vmem:[#allocation32_spill] sm:$0xff] }
 0x828   : > { %4611 = vmatpush.msrb.mxu0 %v7817_v27 }
 0x82a   : > { %v3912_v28 = vpop.f32.mrf.mxu3  ;;  %4612 = vmatpush.msrb.mxu0 %v7816_v45  ;;  %v11553_v38 = vpop.f32.mrf.mxu1  ;;  %v13158_v45 = vld [vmem:[#allocation2_spill] sm:$0xff] }
 0x82b   : > { %7705 = vmatmul.msk.f32.gmra.mxu1 %vm732_vm2, %v3912_v28  ;;  %v13155_v28 = vld [vmem:[#allocation10_spill] sm:$0xff] }
 0x82c   : > { %v11535_v35 = vpop.f32.mrf.mxu0 }
 0x82f   : > { %7837 = vmatmul.msk.f32.vlgmr.msrb.gmra.mxu3 %vm627_vm1, %v13153_v14  ;;  %7824 = vmatmul.msk.f32.vlgmr.msrb.gmra.mxu0 %vm732_vm2, %v11045_v2  ;;  %v13156_v2 = vld [vmem:[#allocation16_spill] sm:$0xff] }
 0x830   : > { %5467 = vmatpush.msrb.mxu3 %v10610_v55 }
 0x832   : > { %5468 = vmatpush.msrb.mxu3 %v10622_v7  ;;  %v3915_v9 = vpop.f32.mrf.mxu3  ;;  %v11570_v61 = vpop.f32.mrf.mxu1 }
 0x833   : > { %7706 = vmatmul.msk.f32.gmra.mxu1 %vm732_vm2, %v3915_v9 }
 0x834   : > { %5469 = vmatpush.msrb.mxu3 %v10636_v18  ;;  %v11547_v29 = vpop.f32.mrf.mxu0 }
 0x836   : > { %5470 = vmatpush.msrb.mxu3 %v10646_v5 }
 0x837   : > { %7838 = vmatmul.msk.f32.gmra.mxu3 %vm627_vm1, %v13154_v19  ;;  %7825 = vmatmul.msk.f32.gmra.mxu0 %vm732_vm2, %v13155_v28 }
 0x838   : > { %5471 = vmatpush.msrb.mxu3 %v10654_v13 }
 0x83a   : > { %5472 = vmatpush.msrb.mxu3 %v10667_v6  ;;  %v3918_v4 = vpop.f32.mrf.mxu3  ;;  %v11580_v19 = vpop.f32.mrf.mxu1 }
 0x83b   : > { %7707 = vmatmul.msk.f32.gmra.mxu1 %vm732_vm2, %v3918_v4 }
 0x83c   : > { %5473 = vmatpush.msrb.mxu3 %v10678_v20  ;;  %v11563_v36 = vpop.f32.mrf.mxu0 }
 0x83d   : > { %13157 = vst [vmem:[#allocation23_spill] sm:$0xff] %v11563_v36 }
 0x83e   : > { %5474 = vmatpush.msrb.mxu3 %v10686_v42 }
 0x83f   : > { %7839 = vmatmul.msk.f32.gmra.mxu3 %vm627_vm1, %v13156_v2  ;;  %7826 = vmatmul.msk.f32.gmra.mxu0 %vm732_vm2, %v11074_v37  ;;  %v13159_v37 = vld [vmem:[#allocation3_spill] sm:$0xff]  ;;  %v13160_v2 = vld [vmem:[#allocation4_spill] sm:$0xff] }
 0x840   : > { %5475 = vmatpush.msrb.mxu3 %v10694_v54 }
 0x842   : > { %5476 = vmatpush.msrb.mxu3 %v10705_v53  ;;  %v3921_v27 = vpop.f32.mrf.mxu3 }
 0x843   : > { %7708 = vmatmul.msk.f32.gmra.mxu1 %vm732_vm2, %v3921_v27  ;;  %v11589_v27 = vpop.f32.mrf.mxu1 }
 0x844   : > { %5477 = vmatpush.msrb.mxu3 %v10715_v59  ;;  %v4215_v14 = vpop.f32.mrf.mxu0  ;;  %13161 = vst [vmem:[#allocation24_spill] sm:$0xff] %v11589_v27 }
 0x846   : > { %5478 = vmatpush.msrb.mxu3 %v10720_v16 }
 0x847   : > { %7840 = vmatmul.msk.f32.gmra.mxu3 %vm627_vm1, %v13158_v45  ;;  %7827 = vmatmul.msk.f32.gmra.mxu0 %vm732_vm2, %v11102_v10  ;;  %v3604_v10 = vadd.f32 %v11394_v51, %v11187_v44 }
 0x848   : > { %5479 = vmatpush.msrb.mxu3 %v10725_v0 }
 0x84a   : > { %v4284_v9 = vpop.f32.mrf.mxu3 }
 0x84b   : > { %7777 = vmatmul.msk.f32.vlgmr.msra.gmra.mxu1 %vm732_vm2, %v4284_v9 }
 0x84c   : > { %v4218_v4 = vpop.f32.mrf.mxu0 }
 0x84f   : > { %7841 = vmatmul.msk.f32.gmra.mxu3 %vm627_vm1, %v13159_v37  ;;  %7828 = vmatmul.msk.f32.gmra.mxu0 %vm732_vm2, %v11112_v46  ;;  %v3855_v37 = vadd.f32 %v11387_v58, %v3604_v10  ;;  %v13163_v58 = vld [vmem:[#allocation17_spill] sm:$0xff] }
 0x852   : > { %v4287_v28 = vpop.f32.mrf.mxu3 }
 0x853   : > { %7778 = vmatmul.msk.f32.gmra.mxu1 %vm732_vm2, %v4287_v28  ;;  %v13162_v28 = vld [vmem:[#allocation5_spill] sm:$0xff] }
 0x854   : > { %v4221_v45 = vpop.f32.mrf.mxu0 }
 0x857   : > { %7842 = vmatmul.msk.f32.gmra.mxu3 %vm627_vm1, %v13160_v2  ;;  %7829 = vmatmul.msk.f32.gmra.mxu0 %vm732_vm2, %v11120_v23  ;;  %v3607_v23 = vadd.f32 %v11406_v43, %v11199_v62 }
 0x859   : > { %v3856_v44 = vadd.f32 %v11400_v24, %v3607_v23 }
 0x85a   : > { %v4290_v9 = vpop.f32.mrf.mxu3 }
 0x85b   : > { %7779 = vmatmul.msk.f32.gmra.mxu1 %vm732_vm2, %v4290_v9 }
 0x85c   : > { %v4224_v36 = vpop.f32.mrf.mxu0 }
 0x85f   : > { %7843 = vmatmul.msk.f32.gmra.mxu3 %vm627_vm1, %v13162_v28  ;;  %7830 = vmatmul.msk.f32.gmra.mxu0 %vm732_vm2, %v11132_v34  ;;  %v3610_v34 = vadd.f32 %v11420_v40, %v11211_v33 }
 0x860   : > { %v3989_v46 = vpop.f32.mrf.mxu1 }
 0x861   : > { %v4028_v2 = vadd.f32 %v3989_v46, %v3855_v37  ;;  %v3857_v62 = vadd.f32 %v11411_v57, %v3610_v34  ;;  %v13166_v57 = vld [vmem:[#allocation7_spill] sm:$0xff] }
 0x862   : > { %v4293_v11 = vpop.f32.mrf.mxu3 }
 0x863   : > { %v11599_v27 = vadd.f32 %v4215_v14, %v4028_v2  ;;  %7780 = vmatmul.msk.f32.gmra.mxu1 %vm732_vm2, %v4293_v11  ;;  %v13164_v11 = vld [vmem:[#allocation6_spill] sm:$0xff] }
 0x864   : > { %v4227_v9 = vpop.f32.mrf.mxu0 }
 0x867   : > { %7844 = vmatmul.msk.f32.gmra.mxu3 %vm627_vm1, %v13163_v58  ;;  %7831 = vmatmul.msk.f32.gmra.mxu0 %vm732_vm2, %v11156_v32  ;;  %v3613_v32 = vadd.f32 %v11433_v63, %v11223_v26  ;;  %v7857_v26 = vld [vmem:[%s12961_s11 + $0xf8] sm:$0xff] }
 0x868   : > { %v3992_v51 = vpop.f32.mrf.mxu1  ;;  %4778 = vmatpush.msrb.mxu1 %v7857_v26  ;;  %v7852_v26 = vld [vmem:[%s12961_s11 + $0xd0] sm:$0xff] }
 0x869   : > { %v4029_v10 = vadd.f32 %v3992_v51, %v3856_v44  ;;  %v3858_v33 = vadd.f32 %v11422_v50, %v3613_v32  ;;  %v3616_v50 = vadd.f32 %v11448_v12, %v11235_v48  ;;  %v3619_v48 = vadd.f32 %v11457_v31, %v11245_v56  ;;  %v7904_v12 = vld [vmem:[%s12960_s10 + $0x138] sm:$0xff]  ;;  %v7855_v56 = vld [vmem:[%s12961_s11 + $0xe8] sm:$0xff]  ;;  %v7903_v31 = vld [vmem:[%s12960_s10 + $0x130] sm:$0xff] }
 0x86a   : > { %v4296_v37 = vpop.f32.mrf.mxu3  ;;  %5004 = vmatpush.msra.mxu0 %v7904_v12  ;;  %v7898_v12 = vld [vmem:[%s12960_s10 + $0x108] sm:$0xff] }
 0x86b   : > { %v11609_v28 = vadd.f32 %v4218_v4, %v4029_v10  ;;  %7781 = vmatmul.msk.f32.gmra.mxu1 %vm732_vm2, %v4296_v37  ;;  %v13165_v4 = vld [vmem:[#allocation11_spill] sm:$0xff]  ;;  %v3859_v63 = vadd.f32 %v11431_v21, %v3616_v50  ;;  %v13168_v10 = vld [vmem:[#allocation8_spill] sm:$0xff]  ;;  %v7900_v50 = vld [vmem:[%s12960_s10 + $0x118] sm:$0xff] }
 0x86c   : > { %v4230_v43 = vpop.f32.mrf.mxu0  ;;  %v7856_v21 = vld [vmem:[%s12961_s11 + $0xf0] sm:$0xff]  ;;  %5005 = vmatpush.msra.mxu0 %v7903_v31 }
 0x86d   : > { %4779 = vmatpush.msrb.mxu1 %v7856_v21  ;;  %v7850_v21 = vld [vmem:[%s12961_s11 + $0xc0] sm:$0xff] }
 0x86f   : > { %7845 = vmatmul.msk.f32.gmra.mxu3 %vm627_vm1, %v13164_v11  ;;  %7832 = vmatmul.msk.f32.gmra.mxu0 %vm732_vm2, %v13165_v4 }
 0x870   : > { %v3995_v24 = vpop.f32.mrf.mxu1  ;;  %4780 = vmatpush.msrb.mxu1 %v7855_v56 }
 0x871   : > { %v4030_v14 = vadd.f32 %v3995_v24, %v3857_v62  ;;  %v13169_v24 = vld [vmem:[#allocation13_spill] sm:$0xff] }
 0x872   : > { %v4299_v46 = vpop.f32.mrf.mxu3 }
 0x873   : > { %v11619_v2 = vadd.f32 %v4221_v45, %v4030_v14  ;;  %7782 = vmatmul.msk.f32.gmra.mxu1 %vm732_vm2, %v4299_v46  ;;  %v13167_v45 = vld [vmem:[#allocation12_spill] sm:$0xff]  ;;  %v3860_v14 = vadd.f32 %v11442_v39, %v3619_v48  ;;  %v13172_v48 = vld [vmem:[#allocation14_spill] sm:$0xff] }
 0x874   : > { %v4233_v23 = vpop.f32.mrf.mxu0 }
 0x877   : > { %7846 = vmatmul.msk.f32.gmra.mxu3 %vm627_vm1, %v13166_v57  ;;  %7833 = vmatmul.msk.f32.gmra.mxu0 %vm732_vm2, %v13167_v45  ;;  %v13171_v57 = vld [vmem:[#allocation19_spill] sm:$0xff]  ;;  %v3622_v45 = vadd.f32 %v11472_v17, %v11257_v30 }
 0x878   : > { %v3998_v40 = vpop.f32.mrf.mxu1 }
 0x879   : > { %v4031_v44 = vadd.f32 %v3998_v40, %v3858_v33  ;;  %v7854_v40 = vld [vmem:[%s12961_s11 + $0xe0] sm:$0xff] }
 0x87a   : > { %v4302_v58 = vpop.f32.mrf.mxu3  ;;  %4781 = vmatpush.msrb.mxu1 %v7854_v40 }
 0x87b   : > { %v11629_v51 = vadd.f32 %v4224_v36, %v4031_v44  ;;  %7783 = vmatmul.msk.f32.gmra.mxu1 %vm732_vm2, %v4302_v58  ;;  %v7902_v44 = vld [vmem:[%s12960_s10 + $0x128] sm:$0xff]  ;;  %v7901_v58 = vld [vmem:[%s12960_s10 + $0x120] sm:$0xff] }
 0x87c   : > { %v11642_v37 = vpop.f32.mrf.mxu0  ;;  %5006 = vmatpush.msra.mxu0 %v7902_v44 }
 0x87e   : > { %5007 = vmatpush.msra.mxu0 %v7901_v58 }
 0x87f   : > { %7847 = vmatmul.msk.f32.gmra.mxu3 %vm627_vm1, %v13168_v10  ;;  %7834 = vmatmul.msk.f32.gmra.mxu0 %vm732_vm2, %v13169_v24  ;;  %v8332_v10 = vld [vmem:[%s12959_s9 + $0x198] sm:$0xff] }
 0x880   : > { %v4001_v36 = vpop.f32.mrf.mxu1  ;;  %5008 = vmatpush.msra.mxu0 %v7900_v50 }
 0x881   : > { %v4032_v34 = vadd.f32 %v4001_v36, %v3859_v63  ;;  %v3861_v63 = vadd.f32 %v11453_v60, %v3622_v45 }
 0x882   : > { %v4305_v62 = vpop.f32.mrf.mxu3 }
 0x883   : > { %v11644_v11 = vadd.f32 %v4227_v9, %v4032_v34  ;;  %7784 = vmatmul.msk.f32.gmra.mxu1 %vm732_vm2, %v4305_v62  ;;  %v13170_v9 = vld [vmem:[#allocation9_spill] sm:$0xff]  ;;  %v7851_v34 = vld [vmem:[%s12961_s11 + $0xc8] sm:$0xff]  ;;  %v7899_v62 = vld [vmem:[%s12960_s10 + $0x110] sm:$0xff] }
 0x884   : > { %v11660_v4 = vpop.f32.mrf.mxu0  ;;  %5009 = vmatpush.msra.mxu0 %v7899_v62 }
 0x886   : > { %5010 = vmatpush.msra.mxu0 %v7898_v12  ;;  %v8337_v12 = vld [vmem:[%s12959_s9 + $0x1c0] sm:$0xff] }
 0x887   : > { %7848 = vmatmul.msk.f32.gmra.mxu3 %vm627_vm1, %v13170_v9  ;;  %7835 = vmatmul.msk.f32.gmra.mxu0 %vm732_vm2, %v13171_v57 }
 0x888   : > { %v4004_v46 = vpop.f32.mrf.mxu1 }
 0x889   : > { %v4033_v32 = vadd.f32 %v4004_v46, %v3860_v14  ;;  %v7897_v14 = vld [vmem:[%s12960_s10 + $0x100] sm:$0xff] }
 0x88a   : > { %v4308_v33 = vpop.f32.mrf.mxu3  ;;  %5011 = vmatpush.msra.mxu0 %v7897_v14 }
 0x88b   : > { %v11668_v39 = vadd.f32 %v4230_v43, %v4033_v32  ;;  %7785 = vmatmul.msk.f32.gmra.mxu1 %vm732_vm2, %v4308_v33  ;;  %v7853_v43 = vld [vmem:[%s12961_s11 + $0xd8] sm:$0xff]  ;;  %v8333_v32 = vld [vmem:[%s12959_s9 + $0x1a0] sm:$0xff] }
 0x88c   : > { %4782 = vmatpush.msrb.mxu1 %v7853_v43  ;;  %v4242_v30 = vpop.f32.mrf.mxu0  ;;  %v8334_v43 = vld [vmem:[%s12959_s9 + $0x1a8] sm:$0xff] }
 0x88e   : > { %4783 = vmatpush.msrb.mxu1 %v7852_v26 }
 0x88f   : > { %7849 = vmatmul.msk.f32.gmra.mxu3 %vm627_vm1, %v8332_v10  ;;  %7836 = vmatmul.msk.f32.gmra.mxu0 %vm732_vm2, %v13172_v48 }
 0x890   : > { %v4007_v36 = vpop.f32.mrf.mxu1  ;;  %4784 = vmatpush.msrb.mxu1 %v7851_v34 }
 0x891   : > { %v4034_v17 = vadd.f32 %v4007_v36, %v3861_v63  ;;  %v8335_v63 = vld [vmem:[%s12959_s9 + $0x1b0] sm:$0xff] }
 0x892   : > { %v4311_v60 = vpop.f32.mrf.mxu3  ;;  %4785 = vmatpush.msrb.mxu1 %v7850_v21 }
 0x893   : > { %v11704_v24 = vadd.f32 %v4233_v23, %v4034_v17  ;;  %7786 = vmatmul.msk.f32.gmra.mxu1 %vm732_vm2, %v4311_v60  ;;  %v13173_v23 = vld [vmem:[#allocation15_spill] sm:$0xff] }
 0x894   : > { %v3625_v9 = vadd.f32 %v11507_v41, %v13173_v23  ;;  %v4245_v31 = vpop.f32.mrf.mxu0  ;;  %v3628_v41 = vadd.f32 %v11539_v22, %v11297_v25  ;;  %v3631_v22 = vadd.f32 %v11553_v38, %v11333_v15  ;;  %v4918_v15 = vpop.f32.mrf.mxu2 }
 0x896   : > { %v3862_v46 = vadd.f32 %v11465_v52, %v3625_v9  ;;  %v13174_v52 = vld [vmem:[#allocation20_spill] sm:$0xff]  ;;  %v3863_v44 = vadd.f32 %v11474_v3, %v3628_v41  ;;  %v13175_v3 = vld [vmem:[#allocation21_spill] sm:$0xff]  ;;  %v3864_v50 = vadd.f32 %v11499_v47, %v3631_v22  ;;  %v3634_v47 = vadd.f32 %v11570_v61, %v11354_v8 }
 0x897   : > { %7918 = vmatmul.msk.f32.vlgmr.msra.gmra.mxu3 %vm627_vm1, %v8333_v32  ;;  %7905 = vmatmul.msk.f32.vlgmr.msra.gmra.mxu0 %vm732_vm2, %v13174_v52 }
 0x898   : > { %5866 = vmatpush.msra.mxu3 %v10610_v55  ;;  %v4010_v56 = vpop.f32.mrf.mxu1  ;;  %v3865_v38 = vadd.f32 %v11535_v35, %v3634_v47  ;;  %v3637_v35 = vadd.f32 %v11580_v19, %v11370_v49  ;;  %v13176_v49 = vld [vmem:[#allocation22_spill] sm:$0xff]  ;;  %v13177_v19 = vld [vmem:[#allocation24_spill] sm:$0xff] }
 0x899   : > { %v4035_v33 = vadd.f32 %v4010_v56, %v3862_v46 }
 0x89a   : > { %5867 = vmatpush.msra.mxu3 %v10622_v7  ;;  %v4314_v57 = vpop.f32.mrf.mxu3  ;;  %v3866_v61 = vadd.f32 %v11547_v29, %v3637_v35  ;;  %v3640_v29 = vadd.f32 %v13177_v19, %v13176_v49  ;;  %v8342_v35 = vld [vmem:[%s12959_s9 + $0x1e8] sm:$0xff] }
 0x89b   : > { %v11728_v40 = vadd.f32 %v11642_v37, %v4035_v33  ;;  %7787 = vmatmul.msk.f32.gmra.mxu1 %vm732_vm2, %v4314_v57  ;;  %v8338_v57 = vld [vmem:[%s12959_s9 + $0x1c8] sm:$0xff] }
 0x89c   : > { %5868 = vmatpush.msra.mxu3 %v10636_v18  ;;  %v4248_v58 = vpop.f32.mrf.mxu0  ;;  %v4921_v8 = vpop.f32.mrf.mxu2 }
 0x89e   : > { %5869 = vmatpush.msra.mxu3 %v10646_v5 }
 0x89f   : > { %7919 = vmatmul.msk.f32.gmra.mxu3 %vm627_vm1, %v8334_v43  ;;  %7906 = vmatmul.msk.f32.gmra.mxu0 %vm732_vm2, %v13175_v3 }
 0x8a0   : > { %5870 = vmatpush.msra.mxu3 %v10654_v13  ;;  %v4013_v37 = vpop.f32.mrf.mxu1 }
 0x8a1   : > { %v4036_v45 = vadd.f32 %v4013_v37, %v3863_v44 }
 0x8a2   : > { %5871 = vmatpush.msra.mxu3 %v10667_v6  ;;  %v4317_v26 = vpop.f32.mrf.mxu3 }
 0x8a3   : > { %v11745_v25 = vadd.f32 %v11660_v4, %v4036_v45  ;;  %7788 = vmatmul.msk.f32.gmra.mxu1 %vm732_vm2, %v4317_v26  ;;  %v8339_v45 = vld [vmem:[%s12959_s9 + $0x1d0] sm:$0xff] }
 0x8a4   : > { %5872 = vmatpush.msra.mxu3 %v10678_v20  ;;  %v4251_v10 = vpop.f32.mrf.mxu0  ;;  %v4924_v56 = vpop.f32.mrf.mxu2 }
 0x8a6   : > { %5873 = vmatpush.msra.mxu3 %v10686_v42 }
 0x8a7   : > { %7920 = vmatmul.msk.f32.gmra.mxu3 %vm627_vm1, %v8335_v63  ;;  %7907 = vmatmul.msk.f32.gmra.mxu0 %vm732_vm2, %v11287_v1 }
 0x8a8   : > { %5874 = vmatpush.msra.mxu3 %v10694_v54  ;;  %v4016_v4 = vpop.f32.mrf.mxu1 }
 0x8a9   : > { %v4037_v36 = vadd.f32 %v4016_v4, %v3864_v50 }
 0x8aa   : > { %5875 = vmatpush.msra.mxu3 %v10705_v53  ;;  %v4320_v17 = vpop.f32.mrf.mxu3 }
 0x8ab   : > { %v11761_v34 = vadd.f32 %v4242_v30, %v4037_v36  ;;  %7789 = vmatmul.msk.f32.gmra.mxu1 %vm732_vm2, %v4320_v17  ;;  %v8336_v30 = vld [vmem:[%s12959_s9 + $0x1b8] sm:$0xff] }
 0x8ac   : > { %5876 = vmatpush.msra.mxu3 %v10715_v59  ;;  %v4614_v1 = vpop.f32.mrf.mxu0 }
 0x8ae   : > { %5877 = vmatpush.msra.mxu3 %v10720_v16 }
 0x8af   : > { %7921 = vmatmul.msk.f32.gmra.mxu3 %vm627_vm1, %v8336_v30  ;;  %7908 = vmatmul.msk.f32.gmra.mxu0 %vm732_vm2, %v4918_v15  ;;  %v8341_v30 = vld [vmem:[%s12959_s9 + $0x1e0] sm:$0xff] }
 0x8b0   : > { %5878 = vmatpush.msra.mxu3 %v10725_v0  ;;  %v4019_v62 = vpop.f32.mrf.mxu1 }
 0x8b1   : > { %v4038_v60 = vadd.f32 %v4019_v62, %v3865_v38 }
 0x8b2   : > { %v4683_v48 = vpop.f32.mrf.mxu3 }
 0x8b3   : > { %v11776_v21 = vadd.f32 %v4245_v31, %v4038_v60  ;;  %7858 = vmatmul.msk.f32.vlgmr.msrb.gmra.mxu1 %vm732_vm2, %v4683_v48  ;;  %v13178_v31 = vld [vmem:[#allocation23_spill] sm:$0xff] }
 0x8b4   : > { %v4617_v23 = vpop.f32.mrf.mxu0  ;;  %v3867_v33 = vadd.f32 %v13178_v31, %v3640_v29  ;;  %v11853_v29 = vld [vmem:[%s12959_s9 + $0x278] sm:$0xff] }
 0x8b5   : > { %8047 = vmatmul.msk.f32.gmra.mxu2 %vm627_vm1, %v11853_v29 }
 0x8b7   : > { %7922 = vmatmul.msk.f32.gmra.mxu3 %vm627_vm1, %v8337_v12  ;;  %7909 = vmatmul.msk.f32.gmra.mxu0 %vm732_vm2, %v4921_v8 }
 0x8b8   : > { %v4022_v14 = vpop.f32.mrf.mxu1 }
 0x8b9   : > { %v4039_v9 = vadd.f32 %v4022_v14, %v3866_v61 }
 0x8ba   : > { %v4686_v46 = vpop.f32.mrf.mxu3 }
 0x8bb   : > { %v11787_v32 = vadd.f32 %v4248_v58, %v4039_v9  ;;  %7859 = vmatmul.msk.f32.gmra.mxu1 %vm732_vm2, %v4686_v46  ;;  %v4927_v58 = vpop.f32.mrf.mxu2  ;;  %v7938_v9 = vld [vmem:[%s12961_s11 + $0x138] sm:$0xff] }
 0x8bc   : > { %v4620_v41 = vpop.f32.mrf.mxu0  ;;  %5177 = vmatpush.msra.mxu1 %v7938_v9  ;;  %v8346_v9 = vld [vmem:[%s12959_s9 + $0x208] sm:$0xff] }
 0x8bf   : > { %7923 = vmatmul.msk.f32.gmra.mxu3 %vm627_vm1, %v8338_v57  ;;  %7910 = vmatmul.msk.f32.gmra.mxu0 %vm732_vm2, %v4924_v56  ;;  %v8343_v56 = vld [vmem:[%s12959_s9 + $0x1f0] sm:$0xff] }
 0x8c0   : > { %v4025_v52 = vpop.f32.mrf.mxu1 }
 0x8c1   : > { %v4040_v44 = vadd.f32 %v4025_v52, %v3867_v33  ;;  %v7985_v52 = vld [vmem:[%s12960_s10 + $0x178] sm:$0xff] }
 0x8c2   : > { %v4689_v43 = vpop.f32.mrf.mxu3  ;;  %5403 = vmatpush.msrb.mxu0 %v7985_v52 }
 0x8c3   : > { %v11798_v37 = vadd.f32 %v4251_v10, %v4040_v44  ;;  %7860 = vmatmul.msk.f32.gmra.mxu1 %vm732_vm2, %v4689_v43  ;;  %v4930_v4 = vpop.f32.mrf.mxu2  ;;  %v8340_v10 = vld [vmem:[%s12959_s9 + $0x1d8] sm:$0xff] }
 0x8c4   : > { %v4623_v3 = vpop.f32.mrf.mxu0 }
 0x8c7   : > { %7924 = vmatmul.msk.f32.gmra.mxu3 %vm627_vm1, %v8339_v45  ;;  %7911 = vmatmul.msk.f32.gmra.mxu0 %vm732_vm2, %v4927_v58  ;;  %v7936_v45 = vld [vmem:[%s12961_s11 + $0x128] sm:$0xff] }
 0x8c8   : > { %v4388_v26 = vpop.f32.mrf.mxu1 }
 0x8c9   : > { %v4427_v22 = vadd.f32 %v4388_v26, %v11599_v27  ;;  %v7984_v26 = vld [vmem:[%s12960_s10 + $0x170] sm:$0xff] }
 0x8ca   : > { %v4692_v50 = vpop.f32.mrf.mxu3  ;;  %5404 = vmatpush.msrb.mxu0 %v7984_v26  ;;  %v8348_v26 = vld [vmem:[%s12959_s9 + $0x218] sm:$0xff] }
 0x8cb   : > { %v11807_v63 = vadd.f32 %v4614_v1, %v4427_v22  ;;  %7861 = vmatmul.msk.f32.gmra.mxu1 %vm732_vm2, %v4692_v50  ;;  %v4933_v38 = vpop.f32.mrf.mxu2 }
 0x8cc   : > { %v4626_v17 = vpop.f32.mrf.mxu0 }
 0x8cf   : > { %7925 = vmatmul.msk.f32.gmra.mxu3 %vm627_vm1, %v8340_v10  ;;  %7912 = vmatmul.msk.f32.gmra.mxu0 %vm732_vm2, %v4930_v4  ;;  %v7983_v4 = vld [vmem:[%s12960_s10 + $0x168] sm:$0xff] }
 0x8d0   : > { %v4391_v36 = vpop.f32.mrf.mxu1  ;;  %5405 = vmatpush.msrb.mxu0 %v7983_v4  ;;  %v11992_v4 = vld [vmem:[%s12959_s9 + $0x2a0] sm:$0xff] }
 0x8d1   : > { %v4428_v15 = vadd.f32 %v4391_v36, %v11609_v28  ;;  %v7934_v36 = vld [vmem:[%s12961_s11 + $0x118] sm:$0xff] }
 0x8d2   : > { %v4695_v47 = vpop.f32.mrf.mxu3 }
 0x8d3   : > { %v11816_v27 = vadd.f32 %v4617_v23, %v4428_v15  ;;  %7862 = vmatmul.msk.f32.gmra.mxu1 %vm732_vm2, %v4695_v47  ;;  %v4936_v8 = vpop.f32.mrf.mxu2  ;;  %v7933_v15 = vld [vmem:[%s12961_s11 + $0x110] sm:$0xff]  ;;  %v7981_v47 = vld [vmem:[%s12960_s10 + $0x158] sm:$0xff] }
 0x8d4   : > { %v4629_v1 = vpop.f32.mrf.mxu0 }
 0x8d7   : > { %7926 = vmatmul.msk.f32.gmra.mxu3 %vm627_vm1, %v8341_v30  ;;  %7913 = vmatmul.msk.f32.gmra.mxu0 %vm732_vm2, %v4933_v38  ;;  %v8345_v38 = vld [vmem:[%s12959_s9 + $0x200] sm:$0xff] }
 0x8d8   : > { %v4394_v62 = vpop.f32.mrf.mxu1 }
 0x8d9   : > { %v4429_v60 = vadd.f32 %v4394_v62, %v11619_v2 }
 0x8da   : > { %v4698_v48 = vpop.f32.mrf.mxu3 }
 0x8db   : > { %v11825_v28 = vadd.f32 %v4620_v41, %v4429_v60  ;;  %7863 = vmatmul.msk.f32.gmra.mxu1 %vm732_vm2, %v4698_v48  ;;  %v4939_v46 = vpop.f32.mrf.mxu2  ;;  %v8344_v41 = vld [vmem:[%s12959_s9 + $0x1f8] sm:$0xff]  ;;  %v7932_v60 = vld [vmem:[%s12961_s11 + $0x108] sm:$0xff]  ;;  %v7980_v48 = vld [vmem:[%s12960_s10 + $0x150] sm:$0xff] }
 0x8dc   : > { %v11833_v12 = vpop.f32.mrf.mxu0 }
 0x8df   : > { %7927 = vmatmul.msk.f32.gmra.mxu3 %vm627_vm1, %v8342_v35  ;;  %7914 = vmatmul.msk.f32.gmra.mxu0 %vm732_vm2, %v4936_v8  ;;  %v11923_v8 = vld [vmem:[%s12959_s9 + $0x288] sm:$0xff] }
 0x8e0   : > { %v4397_v61 = vpop.f32.mrf.mxu1 }
 0x8e1   : > { %v4430_v14 = vadd.f32 %v4397_v61, %v11629_v51 }
 0x8e2   : > { %v4701_v2 = vpop.f32.mrf.mxu3 }
 0x8e3   : > { %v11836_v23 = vadd.f32 %v4623_v3, %v4430_v14  ;;  %7864 = vmatmul.msk.f32.gmra.mxu1 %vm732_vm2, %v4701_v2  ;;  %v4942_v57 = vpop.f32.mrf.mxu2  ;;  %v11883_v3 = vld [vmem:[%s12959_s9 + $0x280] sm:$0xff]  ;;  %v7979_v14 = vld [vmem:[%s12960_s10 + $0x148] sm:$0xff] }
 0x8e4   : > { %v11847_v49 = vpop.f32.mrf.mxu0  ;;  %8048 = vmatmul.msk.f32.gmra.mxu2 %vm627_vm1, %v11883_v3 }
 0x8e7   : > { %7928 = vmatmul.msk.f32.gmra.mxu3 %vm627_vm1, %v8343_v56  ;;  %7915 = vmatmul.msk.f32.gmra.mxu0 %vm732_vm2, %v4939_v46 }
 0x8e8   : > { %v4400_v51 = vpop.f32.mrf.mxu1 }
 0x8e9   : > { %v4431_v19 = vadd.f32 %v4400_v51, %v11644_v11  ;;  %v7937_v11 = vld [vmem:[%s12961_s11 + $0x130] sm:$0xff] }
 0x8ea   : > { %v4704_v31 = vpop.f32.mrf.mxu3  ;;  %5178 = vmatpush.msra.mxu1 %v7937_v11  ;;  %v8347_v11 = vld [vmem:[%s12959_s9 + $0x210] sm:$0xff] }
 0x8eb   : > { %v11857_v33 = vadd.f32 %v4626_v17, %v4431_v19  ;;  %7865 = vmatmul.msk.f32.gmra.mxu1 %vm732_vm2, %v4704_v31  ;;  %v4945_v10 = vpop.f32.mrf.mxu2  ;;  %v7982_v17 = vld [vmem:[%s12960_s10 + $0x160] sm:$0xff]  ;;  %v11950_v19 = vld [vmem:[%s12959_s9 + $0x290] sm:$0xff] }
 0x8ec   : > { %v11871_v43 = vpop.f32.mrf.mxu0  ;;  %5179 = vmatpush.msra.mxu1 %v7936_v45  ;;  %5406 = vmatpush.msrb.mxu0 %v7982_v17  ;;  %v8349_v17 = vld [vmem:[%s12959_s9 + $0x220] sm:$0xff] }
 0x8ed   : > { %8049 = vmatmul.msk.f32.gmra.mxu2 %vm627_vm1, %v11923_v8 }
 0x8ee   : > { %5407 = vmatpush.msrb.mxu0 %v7981_v47 }
 0x8ef   : > { %7929 = vmatmul.msk.f32.gmra.mxu3 %vm627_vm1, %v8344_v41  ;;  %7916 = vmatmul.msk.f32.gmra.mxu0 %vm732_vm2, %v4942_v57 }
 0x8f0   : > { %v4403_v44 = vpop.f32.mrf.mxu1  ;;  %5408 = vmatpush.msrb.mxu0 %v7980_v48 }
 0x8f1   : > { %v4432_v58 = vadd.f32 %v4403_v44, %v11668_v39  ;;  %v7935_v39 = vld [vmem:[%s12961_s11 + $0x120] sm:$0xff]  ;;  %v11971_v44 = vld [vmem:[%s12959_s9 + $0x298] sm:$0xff] }
 0x8f2   : > { %v4707_v22 = vpop.f32.mrf.mxu3  ;;  %5180 = vmatpush.msra.mxu1 %v7935_v39  ;;  %5409 = vmatpush.msrb.mxu0 %v7979_v14  ;;  %v12028_v14 = vld [vmem:[%s12959_s9 + $0x2b0] sm:$0xff] }
 0x8f3   : > { %v11885_v50 = vadd.f32 %v4629_v1, %v4432_v58  ;;  %7866 = vmatmul.msk.f32.gmra.mxu1 %vm732_vm2, %v4707_v22  ;;  %v5308_v2 = vpop.f32.mrf.mxu2 }
 0x8f4   : > { %5181 = vmatpush.msra.mxu1 %v7934_v36  ;;  %v4641_v62 = vpop.f32.mrf.mxu0 }
 0x8f5   : > { %8050 = vmatmul.msk.f32.gmra.mxu2 %vm627_vm1, %v11950_v19 }
 0x8f6   : > { %5182 = vmatpush.msra.mxu1 %v7933_v15 }
 0x8f7   : > { %7930 = vmatmul.msk.f32.gmra.mxu3 %vm627_vm1, %v8345_v38  ;;  %7917 = vmatmul.msk.f32.gmra.mxu0 %vm732_vm2, %v4945_v10 }
 0x8f8   : > { %v4406_v30 = vpop.f32.mrf.mxu1  ;;  %5183 = vmatpush.msra.mxu1 %v7932_v60 }
 0x8f9   : > { %v4433_v1 = vadd.f32 %v4406_v30, %v11704_v24  ;;  %v7931_v24 = vld [vmem:[%s12961_s11 + $0x100] sm:$0xff]  ;;  %v12012_v30 = vld [vmem:[%s12959_s9 + $0x2a8] sm:$0xff] }
 0x8fa   : > { %v4710_v35 = vpop.f32.mrf.mxu3  ;;  %5184 = vmatpush.msra.mxu1 %v7931_v24 }
 0x8fb   : > { %v11926_v61 = vadd.f32 %v11833_v12, %v4433_v1  ;;  %7867 = vmatmul.msk.f32.gmra.mxu1 %vm732_vm2, %v4710_v35  ;;  %v7978_v12 = vld [vmem:[%s12960_s10 + $0x140] sm:$0xff] }
 0x8fc   : > { %v4644_v56 = vpop.f32.mrf.mxu0  ;;  %5410 = vmatpush.msrb.mxu0 %v7978_v12 }
 0x8fd   : > { %8051 = vmatmul.msk.f32.gmra.mxu2 %vm627_vm1, %v11971_v44 }
 0x8ff   : > { %7999 = vmatmul.msk.f32.vlgmr.msrb.gmra.mxu3 %vm627_vm1, %v8346_v9  ;;  %7986 = vmatmul.msk.f32.vlgmr.msrb.gmra.mxu0 %vm732_vm2, %v5308_v2 }
 0x900   : > { %6265 = vmatpush.msrb.mxu3 %v10610_v55  ;;  %v4409_v46 = vpop.f32.mrf.mxu1 }
 0x901   : > { %v4434_v51 = vadd.f32 %v4409_v46, %v11728_v40  ;;  %v5311_v40 = vpop.f32.mrf.mxu2 }
 0x902   : > { %6266 = vmatpush.msrb.mxu3 %v10622_v7  ;;  %v4713_v31 = vpop.f32.mrf.mxu3 }
 0x903   : > { %v11954_v57 = vadd.f32 %v11847_v49, %v4434_v51  ;;  %7868 = vmatmul.msk.f32.gmra.mxu1 %vm732_vm2, %v4713_v31  ;;  %v12044_v31 = vld [vmem:[%s12959_s9 + $0x2b8] sm:$0xff] }
 0x904   : > { %6267 = vmatpush.msrb.mxu3 %v10636_v18  ;;  %v4647_v52 = vpop.f32.mrf.mxu0 }
 0x905   : > { %8052 = vmatmul.msk.f32.gmra.mxu2 %vm627_vm1, %v11992_v4 }
 0x906   : > { %6268 = vmatpush.msrb.mxu3 %v10646_v5 }
 0x907   : > { %8000 = vmatmul.msk.f32.gmra.mxu3 %vm627_vm1, %v8347_v11  ;;  %7987 = vmatmul.msk.f32.gmra.mxu0 %vm732_vm2, %v5311_v40 }
 0x908   : > { %6269 = vmatpush.msrb.mxu3 %v10654_v13  ;;  %v4412_v49 = vpop.f32.mrf.mxu1 }
 0x909   : > { %v4435_v41 = vadd.f32 %v4412_v49, %v11745_v25  ;;  %v5314_v25 = vpop.f32.mrf.mxu2 }
 0x90a   : > { %6270 = vmatpush.msrb.mxu3 %v10667_v6  ;;  %v4716_v58 = vpop.f32.mrf.mxu3 }
 0x90b   : > { %v11975_v45 = vadd.f32 %v11871_v43, %v4435_v41  ;;  %7869 = vmatmul.msk.f32.gmra.mxu1 %vm732_vm2, %v4716_v58 }
 0x90c   : > { %6271 = vmatpush.msrb.mxu3 %v10678_v20  ;;  %v4650_v22 = vpop.f32.mrf.mxu0 }
 0x90d   : > { %8053 = vmatmul.msk.f32.gmra.mxu2 %vm627_vm1, %v12012_v30 }
 0x90e   : > { %6272 = vmatpush.msrb.mxu3 %v10686_v42 }
 0x90f   : > { %8001 = vmatmul.msk.f32.gmra.mxu3 %vm627_vm1, %v8348_v26  ;;  %7988 = vmatmul.msk.f32.gmra.mxu0 %vm732_vm2, %v5314_v25  ;;  %v12060_v25 = vld [vmem:[%s12959_s9 + $0x2c0] sm:$0xff] }
 0x910   : > { %6273 = vmatpush.msrb.mxu3 %v10694_v54  ;;  %v4415_v43 = vpop.f32.mrf.mxu1 }
 0x911   : > { %v4436_v39 = vadd.f32 %v4415_v43, %v11761_v34  ;;  %v5317_v34 = vpop.f32.mrf.mxu2 }
 0x912   : > { %6274 = vmatpush.msrb.mxu3 %v10705_v53  ;;  %v4719_v10 = vpop.f32.mrf.mxu3 }
 0x913   : > { %v11995_v36 = vadd.f32 %v4641_v62, %v4436_v39  ;;  %7870 = vmatmul.msk.f32.gmra.mxu1 %vm732_vm2, %v4719_v10 }
 0x914   : > { %6275 = vmatpush.msrb.mxu3 %v10715_v59  ;;  %v5013_v47 = vpop.f32.mrf.mxu0 }
 0x915   : > { %8054 = vmatmul.msk.f32.gmra.mxu2 %vm627_vm1, %v12028_v14 }
 0x916   : > { %6276 = vmatpush.msrb.mxu3 %v10720_v16 }
 0x917   : > { %8002 = vmatmul.msk.f32.gmra.mxu3 %vm627_vm1, %v8349_v17  ;;  %7989 = vmatmul.msk.f32.gmra.mxu0 %vm732_vm2, %v5317_v34  ;;  %v12076_v17 = vld [vmem:[%s12959_s9 + $0x2c8] sm:$0xff] }
 0x918   : > { %6277 = vmatpush.msrb.mxu3 %v10725_v0  ;;  %v4418_v15 = vpop.f32.mrf.mxu1 }
 0x919   : > { %v4437_v38 = vadd.f32 %v4418_v15, %v11776_v21  ;;  %v5320_v60 = vpop.f32.mrf.mxu2  ;;  %v8350_v21 = vld [vmem:[%s12959_s9 + $0x228] sm:$0xff] }
 0x91a   : > { %v5082_v62 = vpop.f32.mrf.mxu3 }
 0x91b   : > { %v12014_v1 = vadd.f32 %v4644_v56, %v4437_v38  ;;  %7939 = vmatmul.msk.f32.vlgmr.msra.gmra.mxu1 %vm732_vm2, %v5082_v62 }
 0x91c   : > { %v5016_v35 = vpop.f32.mrf.mxu0 }
 0x91d   : > { %8055 = vmatmul.msk.f32.gmra.mxu2 %vm627_vm1, %v12044_v31 }
 0x91f   : > { %8003 = vmatmul.msk.f32.gmra.mxu3 %vm627_vm1, %v8350_v21  ;;  %7990 = vmatmul.msk.f32.gmra.mxu0 %vm732_vm2, %v5320_v60 }
 0x920   : > { %v4421_v48 = vpop.f32.mrf.mxu1 }
 0x921   : > { %v4438_v24 = vadd.f32 %v4421_v48, %v11787_v32  ;;  %v5323_v9 = vpop.f32.mrf.mxu2  ;;  %v8351_v32 = vld [vmem:[%s12959_s9 + $0x230] sm:$0xff] }
 0x922   : > { %v5085_v2 = vpop.f32.mrf.mxu3  ;;  %v12092_v48 = vld [vmem:[%s12959_s9 + $0x2d0] sm:$0xff] }
 0x923   : > { %v12030_v12 = vadd.f32 %v4647_v52, %v4438_v24  ;;  %7940 = vmatmul.msk.f32.gmra.mxu1 %vm732_vm2, %v5085_v2 }
 0x924   : > { %v5019_v56 = vpop.f32.mrf.mxu0 }
 0x925   : > { %8056 = vmatmul.msk.f32.gmra.mxu2 %vm627_vm1, %v12060_v25 }
 0x927   : > { %8004 = vmatmul.msk.f32.gmra.mxu3 %vm627_vm1, %v8351_v32  ;;  %7991 = vmatmul.msk.f32.gmra.mxu0 %vm732_vm2, %v5323_v9 }
 0x928   : > { %v4424_v46 = vpop.f32.mrf.mxu1 }
 0x929   : > { %v4439_v51 = vadd.f32 %v4424_v46, %v11798_v37  ;;  %v5326_v49 = vpop.f32.mrf.mxu2  ;;  %v8352_v37 = vld [vmem:[%s12959_s9 + $0x238] sm:$0xff] }
 0x92a   : > { %v5088_v40 = vpop.f32.mrf.mxu3 }
 0x92b   : > { %v12046_v11 = vadd.f32 %v4650_v22, %v4439_v51  ;;  %7941 = vmatmul.msk.f32.gmra.mxu1 %vm732_vm2, %v5088_v40 }
 0x92c   : > { %v5022_v41 = vpop.f32.mrf.mxu0 }
 0x92d   : > { %8057 = vmatmul.msk.f32.gmra.mxu2 %vm627_vm1, %v12076_v17 }
 0x92f   : > { %8005 = vmatmul.msk.f32.gmra.mxu3 %vm627_vm1, %v8352_v37  ;;  %7992 = vmatmul.msk.f32.gmra.mxu0 %vm732_vm2, %v5326_v49  ;;  %v8019_v49 = vld [vmem:[%s12961_s11 + $0x178] sm:$0xff] }
 0x930   : > { %v4787_v52 = vpop.f32.mrf.mxu1  ;;  %5576 = vmatpush.msrb.mxu1 %v8019_v49  ;;  %v8356_v37 = vld [vmem:[%s12959_s9 + $0x258] sm:$0xff]  ;;  %v8014_v49 = vld [vmem:[%s12961_s11 + $0x150] sm:$0xff] }
 0x931   : > { %v4826_v58 = vadd.f32 %v4787_v52, %v11807_v63  ;;  %v5329_v22 = vpop.f32.mrf.mxu2  ;;  %v8353_v63 = vld [vmem:[%s12959_s9 + $0x240] sm:$0xff] }
 0x932   : > { %v5091_v26 = vpop.f32.mrf.mxu3 }
 0x933   : > { %v12062_v43 = vadd.f32 %v5013_v47, %v4826_v58  ;;  %7942 = vmatmul.msk.f32.gmra.mxu1 %vm732_vm2, %v5091_v26  ;;  %v12131_v26 = vld [vmem:[%s12959_s9 + $0x2e0] sm:$0xff] }
 0x934   : > { %v5025_v10 = vpop.f32.mrf.mxu0 }
 0x935   : > { %8058 = vmatmul.msk.f32.gmra.mxu2 %vm627_vm1, %v12092_v48 }
 0x937   : > { %8006 = vmatmul.msk.f32.gmra.mxu3 %vm627_vm1, %v8353_v63  ;;  %7993 = vmatmul.msk.f32.gmra.mxu0 %vm732_vm2, %v5329_v22 }
 0x938   : > { %v4790_v39 = vpop.f32.mrf.mxu1 }
 0x939   : > { %v4827_v34 = vadd.f32 %v4790_v39, %v11816_v27  ;;  %v5332_v38 = vpop.f32.mrf.mxu2  ;;  %v8354_v27 = vld [vmem:[%s12959_s9 + $0x248] sm:$0xff] }
 0x93a   : > { %v5094_v15 = vpop.f32.mrf.mxu3 }
 0x93b   : > { %v12078_v47 = vadd.f32 %v5016_v35, %v4827_v34  ;;  %7943 = vmatmul.msk.f32.gmra.mxu1 %vm732_vm2, %v5094_v15  ;;  %v8066_v34 = vld [vmem:[%s12960_s10 + $0x1b8] sm:$0xff] }
 0x93c   : > { %v5028_v60 = vpop.f32.mrf.mxu0  ;;  %5802 = vmatpush.msra.mxu0 %v8066_v34  ;;  %v12201_v34 = vld [vmem:[%s12959_s9 + $0x2f0] sm:$0xff] }
 0x93f   : > { %8007 = vmatmul.msk.f32.gmra.mxu3 %vm627_vm1, %v8354_v27  ;;  %7994 = vmatmul.msk.f32.gmra.mxu0 %vm732_vm2, %v5332_v38 }
 0x940   : > { %v4793_v62 = vpop.f32.mrf.mxu1 }
 0x941   : > { %v4828_v21 = vadd.f32 %v4793_v62, %v11825_v28  ;;  %v5335_v2 = vpop.f32.mrf.mxu2  ;;  %v8355_v28 = vld [vmem:[%s12959_s9 + $0x250] sm:$0xff]  ;;  %v8017_v62 = vld [vmem:[%s12961_s11 + $0x168] sm:$0xff] }
 0x942   : > { %v5097_v35 = vpop.f32.mrf.mxu3 }
 0x943   : > { %v12094_v24 = vadd.f32 %v5019_v56, %v4828_v21  ;;  %7944 = vmatmul.msk.f32.gmra.mxu1 %vm732_vm2, %v5097_v35  ;;  %v12110_v56 = vld [vmem:[%s12959_s9 + $0x2d8] sm:$0xff]  ;;  %v8065_v21 = vld [vmem:[%s12960_s10 + $0x1b0] sm:$0xff]  ;;  %v12161_v35 = vld [vmem:[%s12959_s9 + $0x2e8] sm:$0xff] }
 0x944   : > { %v12104_v32 = vpop.f32.mrf.mxu0  ;;  %8127 = vmatmul.msk.f32.vlgmr.msra.gmra.mxu2 %vm627_vm1, %v12110_v56  ;;  %5803 = vmatpush.msra.mxu0 %v8065_v21  ;;  %v8359_v21 = vld [vmem:[%s12959_s9 + $0x270] sm:$0xff] }
 0x947   : > { %8008 = vmatmul.msk.f32.gmra.mxu3 %vm627_vm1, %v8355_v28  ;;  %7995 = vmatmul.msk.f32.gmra.mxu0 %vm732_vm2, %v5335_v2 }
 0x948   : > { %v4796_v9 = vpop.f32.mrf.mxu1 }
 0x949   : > { %v4829_v46 = vadd.f32 %v4796_v9, %v11836_v23  ;;  %v5338_v23 = vpop.f32.mrf.mxu2  ;;  %v8064_v9 = vld [vmem:[%s12960_s10 + $0x1a8] sm:$0xff] }
 0x94a   : > { %v5100_v51 = vpop.f32.mrf.mxu3  ;;  %5804 = vmatpush.msra.mxu0 %v8064_v9 }
 0x94b   : > { %v12112_v40 = vadd.f32 %v5022_v41, %v4829_v46  ;;  %7945 = vmatmul.msk.f32.gmra.mxu1 %vm732_vm2, %v5100_v51  ;;  %v8063_v51 = vld [vmem:[%s12960_s10 + $0x1a0] sm:$0xff] }
 0x94c   : > { %v12125_v41 = vpop.f32.mrf.mxu0  ;;  %8128 = vmatmul.msk.f32.gmra.mxu2 %vm627_vm1, %v12131_v26  ;;  %5805 = vmatpush.msra.mxu0 %v8063_v51 }
 0x94f   : > { %8009 = vmatmul.msk.f32.gmra.mxu3 %vm627_vm1, %v8356_v37  ;;  %7996 = vmatmul.msk.f32.gmra.mxu0 %vm732_vm2, %v5338_v23  ;;  %v8062_v23 = vld [vmem:[%s12960_s10 + $0x198] sm:$0xff]  ;;  %v8358_v37 = vld [vmem:[%s12959_s9 + $0x268] sm:$0xff] }
 0x950   : > { %v4799_v52 = vpop.f32.mrf.mxu1  ;;  %5806 = vmatpush.msra.mxu0 %v8062_v23 }
 0x951   : > { %v4830_v58 = vadd.f32 %v4799_v52, %v11857_v33  ;;  %v5341_v39 = vpop.f32.mrf.mxu2  ;;  %v8018_v33 = vld [vmem:[%s12961_s11 + $0x170] sm:$0xff] }
 0x952   : > { %v5103_v22 = vpop.f32.mrf.mxu3  ;;  %5577 = vmatpush.msrb.mxu1 %v8018_v33  ;;  %v8061_v33 = vld [vmem:[%s12960_s10 + $0x190] sm:$0xff] }
 0x953   : > { %v12133_v63 = vadd.f32 %v5025_v10, %v4830_v58  ;;  %7946 = vmatmul.msk.f32.gmra.mxu1 %vm732_vm2, %v5103_v22  ;;  %v8357_v10 = vld [vmem:[%s12959_s9 + $0x260] sm:$0xff]  ;;  %5807 = vmatpush.msra.mxu0 %v8061_v33 }
 0x954   : > { %v12149_v38 = vpop.f32.mrf.mxu0  ;;  %5578 = vmatpush.msrb.mxu1 %v8017_v62  ;;  %8129 = vmatmul.msk.f32.gmra.mxu2 %vm627_vm1, %v12161_v35 }
 0x957   : > { %8010 = vmatmul.msk.f32.gmra.mxu3 %vm627_vm1, %v8357_v10  ;;  %7997 = vmatmul.msk.f32.gmra.mxu0 %vm732_vm2, %v5341_v39  ;;  %v8013_v39 = vld [vmem:[%s12961_s11 + $0x148] sm:$0xff] }
 0x958   : > { %v4802_v15 = vpop.f32.mrf.mxu1 }
 0x959   : > { %v4831_v27 = vadd.f32 %v4802_v15, %v11885_v50  ;;  %v8016_v50 = vld [vmem:[%s12961_s11 + $0x160] sm:$0xff]  ;;  %v5344_v46 = vpop.f32.mrf.mxu2 }
 0x95a   : > { %v5106_v2 = vpop.f32.mrf.mxu3  ;;  %5579 = vmatpush.msrb.mxu1 %v8016_v50 }
 0x95b   : > { %v12163_v28 = vadd.f32 %v5028_v60, %v4831_v27  ;;  %7947 = vmatmul.msk.f32.gmra.mxu1 %vm732_vm2, %v5106_v2  ;;  %v8015_v60 = vld [vmem:[%s12961_s11 + $0x158] sm:$0xff]  ;;  %v8060_v27 = vld [vmem:[%s12960_s10 + $0x188] sm:$0xff] }
 0x95c   : > { %5580 = vmatpush.msrb.mxu1 %v8015_v60  ;;  %v5040_v58 = vpop.f32.mrf.mxu0  ;;  %8130 = vmatmul.msk.f32.gmra.mxu2 %vm627_vm1, %v12201_v34 }
 0x95d   : > { %5808 = vmatpush.msra.mxu0 %v8060_v27 }
 0x95e   : > { %5581 = vmatpush.msrb.mxu1 %v8014_v49  ;;  %v12247_v49 = vld [vmem:[%s12959_s9 + $0x300] sm:$0xff] }
 0x95f   : > { %8011 = vmatmul.msk.f32.gmra.mxu3 %vm627_vm1, %v8358_v37  ;;  %7998 = vmatmul.msk.f32.gmra.mxu0 %vm732_vm2, %v5344_v46  ;;  %v12228_v46 = vld [vmem:[%s12959_s9 + $0x2f8] sm:$0xff] }
 0x960   : > { %v4805_v52 = vpop.f32.mrf.mxu1  ;;  %5582 = vmatpush.msrb.mxu1 %v8013_v39 }
 0x961   : > { %v4832_v22 = vadd.f32 %v4805_v52, %v11926_v61  ;;  %v8012_v61 = vld [vmem:[%s12961_s11 + $0x140] sm:$0xff]  ;;  %v5707_v62 = vpop.f32.mrf.mxu2  ;;  %v12298_v52 = vld [vmem:[%s12959_s9 + $0x318] sm:$0xff] }
 0x962   : > { %v5109_v10 = vpop.f32.mrf.mxu3  ;;  %5583 = vmatpush.msrb.mxu1 %v8012_v61 }
 0x963   : > { %v12204_v15 = vadd.f32 %v12104_v32, %v4832_v22  ;;  %7948 = vmatmul.msk.f32.gmra.mxu1 %vm732_vm2, %v5109_v10  ;;  %v8059_v32 = vld [vmem:[%s12960_s10 + $0x180] sm:$0xff] }
 0x964   : > { %v5043_v50 = vpop.f32.mrf.mxu0  ;;  %5809 = vmatpush.msra.mxu0 %v8059_v32  ;;  %8131 = vmatmul.msk.f32.gmra.mxu2 %vm627_vm1, %v12228_v46  ;;  %v12312_v10 = vld [vmem:[%s12959_s9 + $0x320] sm:$0xff] }
 0x967   : > { %8080 = vmatmul.msk.f32.vlgmr.msra.gmra.mxu3 %vm627_vm1, %v8359_v21  ;;  %8067 = vmatmul.msk.f32.vlgmr.msra.gmra.mxu0 %vm732_vm2, %v5707_v62  ;;  %v12326_v21 = vld [vmem:[%s12959_s9 + $0x328] sm:$0xff] }
 0x968   : > { %6664 = vmatpush.msra.mxu3 %v10610_v55  ;;  %v4808_v2 = vpop.f32.mrf.mxu1 }
 0x969   : > { %v4833_v9 = vadd.f32 %v4808_v2, %v11954_v57  ;;  %v5710_v55 = vpop.f32.mrf.mxu2 }
 0x96a   : > { %6665 = vmatpush.msra.mxu3 %v10622_v7  ;;  %v5112_v60 = vpop.f32.mrf.mxu3 }
 0x96b   : > { %v12232_v51 = vadd.f32 %v12125_v41, %v4833_v9  ;;  %7949 = vmatmul.msk.f32.gmra.mxu1 %vm732_vm2, %v5112_v60 }
 0x96c   : > { %6666 = vmatpush.msra.mxu3 %v10636_v18  ;;  %v5046_v57 = vpop.f32.mrf.mxu0  ;;  %8132 = vmatmul.msk.f32.gmra.mxu2 %vm627_vm1, %v12247_v49 }
 0x96e   : > { %6667 = vmatpush.msra.mxu3 %v10646_v5 }
 0x96f   : > { %8081 = vmatmul.msk.f32.gmra.mxu3 %vm627_vm1, %v11853_v29  ;;  %8068 = vmatmul.msk.f32.gmra.mxu0 %vm732_vm2, %v5710_v55  ;;  %v12340_v55 = vld [vmem:[%s12959_s9 + $0x330] sm:$0xff] }
 0x970   : > { %6668 = vmatpush.msra.mxu3 %v10654_v13  ;;  %v4811_v7 = vpop.f32.mrf.mxu1 }
 0x971   : > { %v4834_v41 = vadd.f32 %v4811_v7, %v11975_v45  ;;  %v5713_v5 = vpop.f32.mrf.mxu2  ;;  %v12266_v45 = vld [vmem:[%s12959_s9 + $0x308] sm:$0xff] }
 0x972   : > { %6669 = vmatpush.msra.mxu3 %v10667_v6  ;;  %v5115_v18 = vpop.f32.mrf.mxu3 }
 0x973   : > { %v12251_v23 = vadd.f32 %v12149_v38, %v4834_v41  ;;  %7950 = vmatmul.msk.f32.gmra.mxu1 %vm732_vm2, %v5115_v18 }
 0x974   : > { %6670 = vmatpush.msra.mxu3 %v10678_v20  ;;  %v5049_v6 = vpop.f32.mrf.mxu0  ;;  %8133 = vmatmul.msk.f32.gmra.mxu2 %vm627_vm1, %v12266_v45 }
 0x976   : > { %6671 = vmatpush.msra.mxu3 %v10686_v42 }
 0x977   : > { %8082 = vmatmul.msk.f32.gmra.mxu3 %vm627_vm1, %v11883_v3  ;;  %8069 = vmatmul.msk.f32.gmra.mxu0 %vm732_vm2, %v5713_v5  ;;  %v12354_v5 = vld [vmem:[%s12959_s9 + $0x338] sm:$0xff] }
 0x978   : > { %6672 = vmatpush.msra.mxu3 %v10694_v54  ;;  %v4814_v13 = vpop.f32.mrf.mxu1 }
 0x979   : > { %v4835_v29 = vadd.f32 %v4814_v13, %v11995_v36  ;;  %v5716_v42 = vpop.f32.mrf.mxu2  ;;  %v12284_v36 = vld [vmem:[%s12959_s9 + $0x310] sm:$0xff] }
 0x97a   : > { %6673 = vmatpush.msra.mxu3 %v10705_v53  ;;  %v5118_v20 = vpop.f32.mrf.mxu3 }
 0x97b   : > { %v12269_v38 = vadd.f32 %v5040_v58, %v4835_v29  ;;  %7951 = vmatmul.msk.f32.gmra.mxu1 %vm732_vm2, %v5118_v20 }
 0x97c   : > { %6674 = vmatpush.msra.mxu3 %v10715_v59  ;;  %v5412_v53 = vpop.f32.mrf.mxu0  ;;  %8134 = vmatmul.msk.f32.gmra.mxu2 %vm627_vm1, %v12284_v36 }
 0x97e   : > { %6675 = vmatpush.msra.mxu3 %v10720_v16 }
 0x97f   : > { %8083 = vmatmul.msk.f32.gmra.mxu3 %vm627_vm1, %v11923_v8  ;;  %8070 = vmatmul.msk.f32.gmra.mxu0 %vm732_vm2, %v5716_v42  ;;  %v12368_v42 = vld [vmem:[%s12959_s9 + $0x340] sm:$0xff] }
 0x980   : > { %6676 = vmatpush.msra.mxu3 %v10725_v0  ;;  %v4817_v54 = vpop.f32.mrf.mxu1 }
 0x981   : > { %v4836_v3 = vadd.f32 %v4817_v54, %v12014_v1  ;;  %v5719_v16 = vpop.f32.mrf.mxu2 }
 0x982   : > { %v5481_v59 = vpop.f32.mrf.mxu3 }
 0x983   : > { %v12286_v37 = vadd.f32 %v5043_v50, %v4836_v3  ;;  %8020 = vmatmul.msk.f32.vlgmr.msrb.gmra.mxu1 %vm732_vm2, %v5481_v59 }
 0x984   : > { %v5415_v8 = vpop.f32.mrf.mxu0  ;;  %8135 = vmatmul.msk.f32.gmra.mxu2 %vm627_vm1, %v12298_v52 }
 0x987   : > { %8084 = vmatmul.msk.f32.gmra.mxu3 %vm627_vm1, %v11950_v19  ;;  %8071 = vmatmul.msk.f32.gmra.mxu0 %vm732_vm2, %v5719_v16 }
 0x988   : > { %v4820_v0 = vpop.f32.mrf.mxu1 }
 0x989   : > { %v4837_v1 = vadd.f32 %v4820_v0, %v12030_v12  ;;  %v5722_v19 = vpop.f32.mrf.mxu2  ;;  %v12387_v0 = vld [vmem:[%s12959_s9 + $0x348] sm:$0xff] }
 0x98a   : > { %v5484_v58 = vpop.f32.mrf.mxu3 }
 0x98b   : > { %v12300_v22 = vadd.f32 %v5046_v57, %v4837_v1  ;;  %8021 = vmatmul.msk.f32.gmra.mxu1 %vm732_vm2, %v5484_v58 }
 0x98c   : > { %v5418_v39 = vpop.f32.mrf.mxu0  ;;  %8136 = vmatmul.msk.f32.gmra.mxu2 %vm627_vm1, %v12312_v10 }
 0x98f   : > { %8085 = vmatmul.msk.f32.gmra.mxu3 %vm627_vm1, %v11971_v44  ;;  %8072 = vmatmul.msk.f32.gmra.mxu0 %vm732_vm2, %v5722_v19 }
 0x990   : > { %v4823_v12 = vpop.f32.mrf.mxu1 }
 0x991   : > { %v4838_v33 = vadd.f32 %v4823_v12, %v12046_v11  ;;  %v5725_v44 = vpop.f32.mrf.mxu2 }
 0x992   : > { %v5487_v61 = vpop.f32.mrf.mxu3 }
 0x993   : > { %v12314_v27 = vadd.f32 %v5049_v6, %v4838_v33  ;;  %8022 = vmatmul.msk.f32.gmra.mxu1 %vm732_vm2, %v5487_v61  ;;  %v8098_v33 = vld [vmem:[%s12961_s11 + $0x1a8] sm:$0xff]  ;;  %v8146_v61 = vld [vmem:[%s12960_s10 + $0x1f0] sm:$0xff] }
 0x994   : > { %v5421_v62 = vpop.f32.mrf.mxu0  ;;  %8137 = vmatmul.msk.f32.gmra.mxu2 %vm627_vm1, %v12326_v21 }
 0x997   : > { %8086 = vmatmul.msk.f32.gmra.mxu3 %vm627_vm1, %v11992_v4  ;;  %8073 = vmatmul.msk.f32.gmra.mxu0 %vm732_vm2, %v5725_v44  ;;  %v12415_v44 = vld [vmem:[%s12959_s9 + $0x350] sm:$0xff] }
 0x998   : > { %v5186_v11 = vpop.f32.mrf.mxu1 }
 0x999   : > { %v5225_v32 = vadd.f32 %v5186_v11, %v12062_v43  ;;  %v5728_v4 = vpop.f32.mrf.mxu2 }
 0x99a   : > { %v5490_v2 = vpop.f32.mrf.mxu3 }
 0x99b   : > { %v12328_v50 = vadd.f32 %v5412_v53, %v5225_v32  ;;  %8023 = vmatmul.msk.f32.gmra.mxu1 %vm732_vm2, %v5490_v2  ;;  %v8096_v32 = vld [vmem:[%s12961_s11 + $0x198] sm:$0xff]  ;;  %v8144_v2 = vld [vmem:[%s12960_s10 + $0x1e0] sm:$0xff] }
 0x99c   : > { %v5424_v9 = vpop.f32.mrf.mxu0  ;;  %8138 = vmatmul.msk.f32.gmra.mxu2 %vm627_vm1, %v12340_v55 }
 0x99f   : > { %8087 = vmatmul.msk.f32.gmra.mxu3 %vm627_vm1, %v12012_v30  ;;  %8074 = vmatmul.msk.f32.gmra.mxu0 %vm732_vm2, %v5728_v4  ;;  %v8095_v4 = vld [vmem:[%s12961_s11 + $0x190] sm:$0xff] }
 0x9a0   : > { %v5189_v43 = vpop.f32.mrf.mxu1 }
 0x9a1   : > { %v5226_v60 = vadd.f32 %v5189_v43, %v12078_v47  ;;  %v5731_v30 = vpop.f32.mrf.mxu2  ;;  %v8143_v43 = vld [vmem:[%s12960_s10 + $0x1d8] sm:$0xff] }
 0x9a2   : > { %v5493_v7 = vpop.f32.mrf.mxu3 }
 0x9a3   : > { %v12342_v57 = vadd.f32 %v5415_v8, %v5226_v60  ;;  %8024 = vmatmul.msk.f32.gmra.mxu1 %vm732_vm2, %v5493_v7 }
 0x9a4   : > { %v5427_v41 = vpop.f32.mrf.mxu0  ;;  %8139 = vmatmul.msk.f32.gmra.mxu2 %vm627_vm1, %v12354_v5 }
 0x9a7   : > { %8088 = vmatmul.msk.f32.gmra.mxu3 %vm627_vm1, %v12028_v14  ;;  %8075 = vmatmul.msk.f32.gmra.mxu0 %vm732_vm2, %v5731_v30 }
 0x9a8   : > { %v5192_v47 = vpop.f32.mrf.mxu1 }
 0x9a9   : > { %v5227_v18 = vadd.f32 %v5192_v47, %v12094_v24  ;;  %v5734_v14 = vpop.f32.mrf.mxu2  ;;  %v8094_v47 = vld [vmem:[%s12961_s11 + $0x188] sm:$0xff] }
 0x9aa   : > { %v5496_v13 = vpop.f32.mrf.mxu3 }
 0x9ab   : > { %v12356_v6 = vadd.f32 %v5418_v39, %v5227_v18  ;;  %8025 = vmatmul.msk.f32.gmra.mxu1 %vm732_vm2, %v5496_v13 }
 0x9ac   : > { %v5430_v29 = vpop.f32.mrf.mxu0  ;;  %8208 = vmatmul.msk.f32.vlgmr.msrb.gmra.mxu2 %vm627_vm1, %v12368_v42 }
 0x9af   : > { %8089 = vmatmul.msk.f32.gmra.mxu3 %vm627_vm1, %v12044_v31  ;;  %8076 = vmatmul.msk.f32.gmra.mxu0 %vm732_vm2, %v5734_v14  ;;  %v8100_v31 = vld [vmem:[%s12961_s11 + $0x1b8] sm:$0xff]  ;;  %v8141_v14 = vld [vmem:[%s12960_s10 + $0x1c8] sm:$0xff] }
 0x9b0   : > { %v5195_v24 = vpop.f32.mrf.mxu1  ;;  %5975 = vmatpush.msra.mxu1 %v8100_v31 }
 0x9b1   : > { %v5228_v20 = vadd.f32 %v5195_v24, %v12112_v40  ;;  %v5737_v40 = vpop.f32.mrf.mxu2  ;;  %v8140_v24 = vld [vmem:[%s12960_s10 + $0x1c0] sm:$0xff] }
 0x9b2   : > { %v5499_v54 = vpop.f32.mrf.mxu3 }
 0x9b3   : > { %v12370_v53 = vadd.f32 %v5421_v62, %v5228_v20  ;;  %8026 = vmatmul.msk.f32.gmra.mxu1 %vm732_vm2, %v5499_v54  ;;  %v8145_v62 = vld [vmem:[%s12960_s10 + $0x1e8] sm:$0xff] }
 0x9b4   : > { %v12381_v59 = vpop.f32.mrf.mxu0  ;;  %8209 = vmatmul.msk.f32.gmra.mxu2 %vm627_vm1, %v12387_v0 }
 0x9b7   : > { %8090 = vmatmul.msk.f32.gmra.mxu3 %vm627_vm1, %v12060_v25  ;;  %8077 = vmatmul.msk.f32.gmra.mxu0 %vm732_vm2, %v5737_v40  ;;  %v8099_v25 = vld [vmem:[%s12961_s11 + $0x1b0] sm:$0xff]  ;;  %v12476_v40 = vld [vmem:[%s12959_s9 + $0x360] sm:$0xff] }
 0x9b8   : > { %v5198_v3 = vpop.f32.mrf.mxu1  ;;  %5976 = vmatpush.msra.mxu1 %v8099_v25 }
 0x9b9   : > { %v5229_v16 = vadd.f32 %v5198_v3, %v12133_v63  ;;  %v8147_v63 = vld [vmem:[%s12960_s10 + $0x1f8] sm:$0xff]  ;;  %v5740_v58 = vpop.f32.mrf.mxu2 }
 0x9ba   : > { %v5502_v8 = vpop.f32.mrf.mxu3  ;;  %6201 = vmatpush.msrb.mxu0 %v8147_v63  ;;  %5977 = vmatpush.msra.mxu1 %v8098_v33 }
 0x9bb   : > { %v12389_v1 = vadd.f32 %v5424_v9, %v5229_v16  ;;  %8027 = vmatmul.msk.f32.gmra.mxu1 %vm732_vm2, %v5502_v8 }
 0x9bc   : > { %v12403_v12 = vpop.f32.mrf.mxu0  ;;  %6202 = vmatpush.msrb.mxu0 %v8146_v61  ;;  %8210 = vmatmul.msk.f32.gmra.mxu2 %vm627_vm1, %v12415_v44 }
 0x9be   : > { %6203 = vmatpush.msrb.mxu0 %v8145_v62  ;;  %v12520_v62 = vld [vmem:[%s12959_s9 + $0x378] sm:$0xff] }
 0x9bf   : > { %8091 = vmatmul.msk.f32.gmra.mxu3 %vm627_vm1, %v12076_v17  ;;  %8078 = vmatmul.msk.f32.gmra.mxu0 %vm732_vm2, %v5740_v58 }
 0x9c0   : > { %v5201_v19 = vpop.f32.mrf.mxu1  ;;  %6204 = vmatpush.msrb.mxu0 %v8144_v2 }
 0x9c1   : > { %v5230_v39 = vadd.f32 %v5201_v19, %v12163_v28  ;;  %v8097_v28 = vld [vmem:[%s12961_s11 + $0x1a0] sm:$0xff]  ;;  %v5743_v9 = vpop.f32.mrf.mxu2 }
 0x9c2   : > { %v5505_v17 = vpop.f32.mrf.mxu3  ;;  %5978 = vmatpush.msra.mxu1 %v8097_v28  ;;  %6205 = vmatpush.msrb.mxu0 %v8143_v43 }
 0x9c3   : > { %v12417_v11 = vadd.f32 %v5427_v41, %v5230_v39  ;;  %8028 = vmatmul.msk.f32.gmra.mxu1 %vm732_vm2, %v5505_v17  ;;  %v8142_v41 = vld [vmem:[%s12960_s10 + $0x1d0] sm:$0xff] }
 0x9c4   : > { %5979 = vmatpush.msra.mxu1 %v8096_v32  ;;  %v5439_v7 = vpop.f32.mrf.mxu0  ;;  %6206 = vmatpush.msrb.mxu0 %v8142_v41  ;;  %v12548_v41 = vld [vmem:[%s12959_s9 + $0x388] sm:$0xff] }
 0x9c6   : > { %5980 = vmatpush.msra.mxu1 %v8095_v4  ;;  %6207 = vmatpush.msrb.mxu0 %v8141_v14 }
 0x9c7   : > { %8092 = vmatmul.msk.f32.gmra.mxu3 %vm627_vm1, %v12092_v48  ;;  %v12453_v48 = vld [vmem:[%s12959_s9 + $0x358] sm:$0xff]  ;;  %8079 = vmatmul.msk.f32.gmra.mxu0 %vm732_vm2, %v5743_v9  ;;  %v12534_v9 = vld [vmem:[%s12959_s9 + $0x380] sm:$0xff] }
 0x9c8   : > { %v5204_v60 = vpop.f32.mrf.mxu1  ;;  %5981 = vmatpush.msra.mxu1 %v8094_v47  ;;  %8211 = vmatmul.msk.f32.gmra.mxu2 %vm627_vm1, %v12453_v48 }
 0x9c9   : > { %v5231_v30 = vadd.f32 %v5204_v60, %v12204_v15  ;;  %v8093_v15 = vld [vmem:[%s12961_s11 + $0x180] sm:$0xff]  ;;  %6208 = vmatpush.msrb.mxu0 %v8140_v24 }
 0x9ca   : > { %v5508_v18 = vpop.f32.mrf.mxu3  ;;  %5982 = vmatpush.msra.mxu1 %v8093_v15 }
 0x9cb   : > { %v12455_v13 = vadd.f32 %v5430_v29, %v5231_v30  ;;  %8029 = vmatmul.msk.f32.gmra.mxu1 %vm732_vm2, %v5508_v18  ;;  %v6106_v29 = vpop.f32.mrf.mxu2 }
 0x9cc   : > { %v5442_v54 = vpop.f32.mrf.mxu0 }
 0x9cf   : > { %8161 = vmatmul.msk.f32.vlgmr.msrb.gmra.mxu3 %vm627_vm1, %v12110_v56  ;;  %8148 = vmatmul.msk.f32.vlgmr.msrb.gmra.mxu0 %vm732_vm2, %v6106_v29  ;;  %v12562_v29 = vld [vmem:[%s12959_s9 + $0x390] sm:$0xff] }
 0x9d0   : > { %v5207_v20 = vpop.f32.mrf.mxu1  ;;  %8212 = vmatmul.msk.f32.gmra.mxu2 %vm627_vm1, %v12476_v40 }
 0x9d1   : > { %v5232_v31 = vadd.f32 %v5207_v20, %v12232_v51 }
 0x9d2   : > { %v5511_v3 = vpop.f32.mrf.mxu3 }
 0x9d3   : > { %v12479_v16 = vadd.f32 %v12381_v59, %v5232_v31  ;;  %8030 = vmatmul.msk.f32.gmra.mxu1 %vm732_vm2, %v5511_v3  ;;  %v6109_v56 = vpop.f32.mrf.mxu2  ;;  %v12491_v59 = vld [vmem:[%s12959_s9 + $0x368] sm:$0xff] }
 0x9d4   : > { %v5445_v8 = vpop.f32.mrf.mxu0 }
 0x9d7   : > { %8162 = vmatmul.msk.f32.gmra.mxu3 %vm627_vm1, %v12131_v26  ;;  %8149 = vmatmul.msk.f32.gmra.mxu0 %vm732_vm2, %v6109_v56  ;;  %v12576_v56 = vld [vmem:[%s12959_s9 + $0x398] sm:$0xff] }
 0x9d8   : > { %v5210_v51 = vpop.f32.mrf.mxu1  ;;  %8213 = vmatmul.msk.f32.gmra.mxu2 %vm627_vm1, %v12491_v59 }
 0x9d9   : > { %v5233_v25 = vadd.f32 %v5210_v51, %v12251_v23 }
 0x9da   : > { %v5514_v63 = vpop.f32.mrf.mxu3 }
 0x9db   : > { %v12494_v58 = vadd.f32 %v12403_v12, %v5233_v25  ;;  %8031 = vmatmul.msk.f32.gmra.mxu1 %vm732_vm2, %v5514_v63  ;;  %v6112_v26 = vpop.f32.mrf.mxu2  ;;  %v12506_v12 = vld [vmem:[%s12959_s9 + $0x370] sm:$0xff] }
 0x9dc   : > { %v5448_v19 = vpop.f32.mrf.mxu0 }
 0x9df   : > { %8163 = vmatmul.msk.f32.gmra.mxu3 %vm627_vm1, %v12161_v35  ;;  %8150 = vmatmul.msk.f32.gmra.mxu0 %vm732_vm2, %v6112_v26  ;;  %v12590_v26 = vld [vmem:[%s12959_s9 + $0x3a0] sm:$0xff] }
 0x9e0   : > { %v5213_v23 = vpop.f32.mrf.mxu1  ;;  %8214 = vmatmul.msk.f32.gmra.mxu2 %vm627_vm1, %v12506_v12 }
 0x9e1   : > { %v5234_v39 = vadd.f32 %v5213_v23, %v12269_v38 }
 0x9e2   : > { %v5517_v33 = vpop.f32.mrf.mxu3 }
 0x9e3   : > { %v12508_v61 = vadd.f32 %v5439_v7, %v5234_v39  ;;  %8032 = vmatmul.msk.f32.gmra.mxu1 %vm732_vm2, %v5517_v33  ;;  %v6115_v35 = vpop.f32.mrf.mxu2 }
 0x9e4   : > { %v5811_v17 = vpop.f32.mrf.mxu0 }
 0x9e7   : > { %8164 = vmatmul.msk.f32.gmra.mxu3 %vm627_vm1, %v12201_v34  ;;  %8151 = vmatmul.msk.f32.gmra.mxu0 %vm732_vm2, %v6115_v35 }
 0x9e8   : > { %v5216_v38 = vpop.f32.mrf.mxu1  ;;  %8215 = vmatmul.msk.f32.gmra.mxu2 %vm627_vm1, %v12520_v62 }
 0x9e9   : > { %v5235_v28 = vadd.f32 %v5216_v38, %v12286_v37 }
 0x9ea   : > { %v5880_v32 = vpop.f32.mrf.mxu3 }
 0x9eb   : > { %v12522_v2 = vadd.f32 %v5442_v54, %v5235_v28  ;;  %8101 = vmatmul.msk.f32.vlgmr.msra.gmra.mxu1 %vm732_vm2, %v5880_v32  ;;  %v6118_v34 = vpop.f32.mrf.mxu2 }
 0x9ec   : > { %v5814_v4 = vpop.f32.mrf.mxu0 }
 0x9ef   : > { %8165 = vmatmul.msk.f32.gmra.mxu3 %vm627_vm1, %v12228_v46  ;;  %8152 = vmatmul.msk.f32.gmra.mxu0 %vm732_vm2, %v6118_v34 }
 0x9f0   : > { %v5219_v37 = vpop.f32.mrf.mxu1  ;;  %8216 = vmatmul.msk.f32.gmra.mxu2 %vm627_vm1, %v12534_v9 }
 0x9f1   : > { %v5236_v43 = vadd.f32 %v5219_v37, %v12300_v22 }
 0x9f2   : > { %v5883_v60 = vpop.f32.mrf.mxu3 }
 0x9f3   : > { %v12536_v7 = vadd.f32 %v5445_v8, %v5236_v43  ;;  %8102 = vmatmul.msk.f32.gmra.mxu1 %vm732_vm2, %v5883_v60  ;;  %v6121_v46 = vpop.f32.mrf.mxu2 }
 0x9f4   : > { %v5817_v30 = vpop.f32.mrf.mxu0 }
 0x9f7   : > { %8166 = vmatmul.msk.f32.gmra.mxu3 %vm627_vm1, %v12247_v49  ;;  %8153 = vmatmul.msk.f32.gmra.mxu0 %vm732_vm2, %v6121_v46 }
 0x9f8   : > { %v5222_v22 = vpop.f32.mrf.mxu1  ;;  %8217 = vmatmul.msk.f32.gmra.mxu2 %vm627_vm1, %v12548_v41 }
 0x9f9   : > { %v5237_v47 = vadd.f32 %v5222_v22, %v12314_v27  ;;  %v8179_v22 = vld [vmem:[%s12961_s11 + $0x1e8] sm:$0xff] }
 0x9fa   : > { %v5886_v18 = vpop.f32.mrf.mxu3 }
 0x9fb   : > { %v12550_v15 = vadd.f32 %v5448_v19, %v5237_v47  ;;  %8103 = vmatmul.msk.f32.gmra.mxu1 %vm732_vm2, %v5886_v18  ;;  %v6124_v49 = vpop.f32.mrf.mxu2 }
 0x9fc   : > { %v5820_v14 = vpop.f32.mrf.mxu0 }
 0x9ff   : > { %8167 = vmatmul.msk.f32.gmra.mxu3 %vm627_vm1, %v12266_v45  ;;  %8154 = vmatmul.msk.f32.gmra.mxu0 %vm732_vm2, %v6124_v49  ;;  %v8177_v49 = vld [vmem:[%s12961_s11 + $0x1d8] sm:$0xff] }
 0xa00   : > { %v5585_v27 = vpop.f32.mrf.mxu1  ;;  %8218 = vmatmul.msk.f32.gmra.mxu2 %vm627_vm1, %v12562_v29 }
 0xa01   : > { %v5624_v24 = vadd.f32 %v5585_v27, %v12328_v50  ;;  %v8225_v27 = vld [vmem:[%s12960_s10 + $0x220] sm:$0xff] }
 0xa02   : > { %v5889_v20 = vpop.f32.mrf.mxu3 }
 0xa03   : > { %v12564_v54 = vadd.f32 %v5811_v17, %v5624_v24  ;;  %8104 = vmatmul.msk.f32.gmra.mxu1 %vm732_vm2, %v5889_v20  ;;  %v6127_v45 = vpop.f32.mrf.mxu2  ;;  %v8181_v17 = vld [vmem:[%s12961_s11 + $0x1f8] sm:$0xff] }
 0xa04   : > { %v5823_v31 = vpop.f32.mrf.mxu0  ;;  %6374 = vmatpush.msrb.mxu1 %v8181_v17  ;;  %v8224_v24 = vld [vmem:[%s12960_s10 + $0x218] sm:$0xff] }
 0xa07   : > { %8168 = vmatmul.msk.f32.gmra.mxu3 %vm627_vm1, %v12284_v36  ;;  %8155 = vmatmul.msk.f32.gmra.mxu0 %vm732_vm2, %v6127_v45 }
 0xa08   : > { %v5588_v50 = vpop.f32.mrf.mxu1  ;;  %8219 = vmatmul.msk.f32.gmra.mxu2 %vm627_vm1, %v12576_v56 }
 0xa09   : > { %v5625_v3 = vadd.f32 %v5588_v50, %v12342_v57 }
 0xa0a   : > { %v5892_v51 = vpop.f32.mrf.mxu3 }
 0xa0b   : > { %v12578_v8 = vadd.f32 %v5814_v4, %v5625_v3  ;;  %8105 = vmatmul.msk.f32.gmra.mxu1 %vm732_vm2, %v5892_v51  ;;  %v6130_v36 = vpop.f32.mrf.mxu2  ;;  %v8180_v4 = vld [vmem:[%s12961_s11 + $0x1f0] sm:$0xff]  ;;  %v8175_v3 = vld [vmem:[%s12961_s11 + $0x1c8] sm:$0xff] }
 0xa0c   : > { %v5826_v25 = vpop.f32.mrf.mxu0  ;;  %6375 = vmatpush.msrb.mxu1 %v8180_v4  ;;  %v8223_v51 = vld [vmem:[%s12960_s10 + $0x210] sm:$0xff] }
 0xa0e   : > { %6376 = vmatpush.msrb.mxu1 %v8179_v22 }
 0xa0f   : > { %8169 = vmatmul.msk.f32.gmra.mxu3 %vm627_vm1, %v12298_v52  ;;  %8156 = vmatmul.msk.f32.gmra.mxu0 %vm732_vm2, %v6130_v36 }
 0xa10   : > { %v5591_v57 = vpop.f32.mrf.mxu1  ;;  %8220 = vmatmul.msk.f32.gmra.mxu2 %vm627_vm1, %v12590_v26 }
 0xa11   : > { %v5626_v63 = vadd.f32 %v5591_v57, %v12356_v6 }
 0xa12   : > { %v5895_v23 = vpop.f32.mrf.mxu3 }
 0xa13   : > { %v12592_v19 = vadd.f32 %v5817_v30, %v5626_v63  ;;  %8106 = vmatmul.msk.f32.gmra.mxu1 %vm732_vm2, %v5895_v23  ;;  %v6133_v52 = vpop.f32.mrf.mxu2  ;;  %v8227_v30 = vld [vmem:[%s12960_s10 + $0x230] sm:$0xff] }
 0xa14   : > { %v5829_v39 = vpop.f32.mrf.mxu0 }
 0xa17   : > { %8170 = vmatmul.msk.f32.gmra.mxu3 %vm627_vm1, %v12312_v10  ;;  %8157 = vmatmul.msk.f32.gmra.mxu0 %vm732_vm2, %v6133_v52 }
 0xa18   : > { %v5594_v6 = vpop.f32.mrf.mxu1 }
 0xa19   : > { %v5627_v33 = vadd.f32 %v5594_v6, %v12370_v53 }
 0xa1a   : > { %v5898_v35 = vpop.f32.mrf.mxu3 }
 0xa1b   : > { %v12601_v38 = vadd.f32 %v5820_v14, %v5627_v33  ;;  %8107 = vmatmul.msk.f32.gmra.mxu1 %vm732_vm2, %v5898_v35  ;;  %v6136_v10 = vpop.f32.mrf.mxu2  ;;  %v8176_v14 = vld [vmem:[%s12961_s11 + $0x1d0] sm:$0xff] }
 0xa1c   : > { %v5832_v32 = vpop.f32.mrf.mxu0 }
 0xa1f   : > { %8171 = vmatmul.msk.f32.gmra.mxu3 %vm627_vm1, %v12326_v21  ;;  %8158 = vmatmul.msk.f32.gmra.mxu0 %vm732_vm2, %v6136_v10  ;;  %v8228_v21 = vld [vmem:[%s12960_s10 + $0x238] sm:$0xff] }
 0xa20   : > { %v5597_v28 = vpop.f32.mrf.mxu1  ;;  %6600 = vmatpush.msra.mxu0 %v8228_v21 }
 0xa21   : > { %v5628_v53 = vadd.f32 %v5597_v28, %v12389_v1 }
 0xa22   : > { %v5901_v34 = vpop.f32.mrf.mxu3  ;;  %6601 = vmatpush.msra.mxu0 %v8227_v30 }
 0xa23   : > { %v12611_v37 = vadd.f32 %v5823_v31, %v5628_v53  ;;  %8108 = vmatmul.msk.f32.gmra.mxu1 %vm732_vm2, %v5901_v34  ;;  %v6139_v1 = vpop.f32.mrf.mxu2 }
 0xa24   : > { %v5835_v60 = vpop.f32.mrf.mxu0 }
 0xa27   : > { %8172 = vmatmul.msk.f32.gmra.mxu3 %vm627_vm1, %v12340_v55  ;;  %8159 = vmatmul.msk.f32.gmra.mxu0 %vm732_vm2, %v6139_v1  ;;  %v8178_v55 = vld [vmem:[%s12961_s11 + $0x1e0] sm:$0xff] }
 0xa28   : > { %v5600_v43 = vpop.f32.mrf.mxu1  ;;  %6377 = vmatpush.msrb.mxu1 %v8178_v55 }
 0xa29   : > { %v5629_v46 = vadd.f32 %v5600_v43, %v12417_v11  ;;  %v8226_v11 = vld [vmem:[%s12960_s10 + $0x228] sm:$0xff] }
 0xa2a   : > { %v5904_v47 = vpop.f32.mrf.mxu3  ;;  %6602 = vmatpush.msra.mxu0 %v8226_v11  ;;  %6378 = vmatpush.msrb.mxu1 %v8177_v49 }
 0xa2b   : > { %v12630_v18 = vadd.f32 %v5826_v25, %v5629_v46  ;;  %8109 = vmatmul.msk.f32.gmra.mxu1 %vm732_vm2, %v5904_v47  ;;  %v6142_v20 = vpop.f32.mrf.mxu2  ;;  %v8221_v25 = vld [vmem:[%s12960_s10 + $0x200] sm:$0xff] }
 0xa2c   : > { %6603 = vmatpush.msra.mxu0 %v8225_v27  ;;  %v5838_v50 = vpop.f32.mrf.mxu0  ;;  %6379 = vmatpush.msrb.mxu1 %v8176_v14 }
 0xa2e   : > { %6604 = vmatpush.msra.mxu0 %v8224_v24  ;;  %6380 = vmatpush.msrb.mxu1 %v8175_v3 }
 0xa2f   : > { %8173 = vmatmul.msk.f32.gmra.mxu3 %vm627_vm1, %v12354_v5  ;;  %8160 = vmatmul.msk.f32.gmra.mxu0 %vm732_vm2, %v6142_v20  ;;  %v8174_v5 = vld [vmem:[%s12961_s11 + $0x1c0] sm:$0xff] }
 0xa30   : > { %v5603_v45 = vpop.f32.mrf.mxu1  ;;  %6605 = vmatpush.msra.mxu0 %v8223_v51  ;;  %6381 = vmatpush.msrb.mxu1 %v8174_v5 }
 0xa31   : > { %v5630_v31 = vadd.f32 %v5603_v45, %v12455_v13  ;;  %v8222_v13 = vld [vmem:[%s12960_s10 + $0x208] sm:$0xff] }
 0xa32   : > { %v5907_v36 = vpop.f32.mrf.mxu3  ;;  %6606 = vmatpush.msra.mxu0 %v8222_v13 }
 0xa33   : > { %v12661_v57 = vadd.f32 %v5829_v39, %v5630_v31  ;;  %8110 = vmatmul.msk.f32.gmra.mxu1 %vm732_vm2, %v5907_v36  ;;  %v6505_v63 = vpop.f32.mrf.mxu2 }
 0xa34   : > { %6607 = vmatpush.msra.mxu0 %v8221_v25  ;;  %v5841_v52 = vpop.f32.mrf.mxu0 }
 0xa37   : > { %8242 = vmatmul.msk.f32.vlgmr.msra.gmra.mxu3 %vm627_vm1, %v12368_v42  ;;  %8229 = vmatmul.msk.f32.vlgmr.msra.gmra.mxu0 %vm732_vm2, %v6505_v63 }
 0xa38   : > { %v5606_v23 = vpop.f32.mrf.mxu1 }
 0xa39   : > { %v5631_v6 = vadd.f32 %v5606_v23, %v12479_v16 }
 0xa3a   : > { %v5910_v39 = vpop.f32.mrf.mxu3 }
 0xa3b   : > { %v12677_v33 = vadd.f32 %v5832_v32, %v5631_v6  ;;  %8111 = vmatmul.msk.f32.gmra.mxu1 %vm732_vm2, %v5910_v39  ;;  %v6508_v35 = vpop.f32.mrf.mxu2 }
 0xa3c   : > { %v5844_v10 = vpop.f32.mrf.mxu0 }
 0xa3f   : > { %8243 = vmatmul.msk.f32.gmra.mxu3 %vm627_vm1, %v12387_v0  ;;  %8230 = vmatmul.msk.f32.gmra.mxu0 %vm732_vm2, %v6508_v35 }
 0xa40   : > { %v5609_v17 = vpop.f32.mrf.mxu1 }
 0xa41   : > { %v5632_v42 = vadd.f32 %v5609_v17, %v12494_v58 }
 0xa42   : > { %v5913_v28 = vpop.f32.mrf.mxu3 }
 0xa43   : > { %v12684_v53 = vadd.f32 %v5835_v60, %v5632_v42  ;;  %8112 = vmatmul.msk.f32.gmra.mxu1 %vm732_vm2, %v5913_v28  ;;  %v6511_v16 = vpop.f32.mrf.mxu2 }
 0xa44   : > { %v5847_v34 = vpop.f32.mrf.mxu0 }
 0xa47   : > { %8244 = vmatmul.msk.f32.gmra.mxu3 %vm627_vm1, %v12415_v44  ;;  %8231 = vmatmul.msk.f32.gmra.mxu0 %vm732_vm2, %v6511_v16  ;;  %v8260_v16 = vld [vmem:[%s12961_s11 + $0x228] sm:$0xff] }
 0xa48   : > { %v5612_v32 = vpop.f32.mrf.mxu1 }
 0xa49   : > { %v5633_v0 = vadd.f32 %v5612_v32, %v12508_v61 }
 0xa4a   : > { %v5916_v4 = vpop.f32.mrf.mxu3 }
 0xa4b   : > { %v12691_v21 = vadd.f32 %v5838_v50, %v5633_v0  ;;  %8113 = vmatmul.msk.f32.gmra.mxu1 %vm732_vm2, %v5916_v4  ;;  %v6514_v58 = vpop.f32.mrf.mxu2  ;;  %v8257_v0 = vld [vmem:[%s12961_s11 + $0x210] sm:$0xff] }
 0xa4c   : > { %v6210_v43 = vpop.f32.mrf.mxu0 }
 0xa4f   : > { %8245 = vmatmul.msk.f32.gmra.mxu3 %vm627_vm1, %v12453_v48  ;;  %8232 = vmatmul.msk.f32.gmra.mxu0 %vm732_vm2, %v6514_v58 }
 0xa50   : > { %v5615_v1 = vpop.f32.mrf.mxu1 }
 0xa51   : > { %v5634_v44 = vadd.f32 %v5615_v1, %v12522_v2 }
 0xa52   : > { %v6279_v60 = vpop.f32.mrf.mxu3 }
 0xa53   : > { %v12698_v46 = vadd.f32 %v5841_v52, %v5634_v44  ;;  %8182 = vmatmul.msk.f32.vlgmr.msrb.gmra.mxu1 %vm732_vm2, %v6279_v60  ;;  %v6517_v61 = vpop.f32.mrf.mxu2  ;;  %v8256_v44 = vld [vmem:[%s12961_s11 + $0x208] sm:$0xff] }
 0xa54   : > { %v6213_v47 = vpop.f32.mrf.mxu0 }
 0xa57   : > { %8246 = vmatmul.msk.f32.gmra.mxu3 %vm627_vm1, %v12476_v40  ;;  %8233 = vmatmul.msk.f32.gmra.mxu0 %vm732_vm2, %v6517_v61 }
 0xa58   : > { %v5618_v22 = vpop.f32.mrf.mxu1 }
 0xa59   : > { %v5635_v30 = vadd.f32 %v5618_v22, %v12536_v7 }
 0xa5a   : > { %v6282_v48 = vpop.f32.mrf.mxu3 }
 0xa5b   : > { %v12705_v55 = vadd.f32 %v5844_v10, %v5635_v30  ;;  %8183 = vmatmul.msk.f32.gmra.mxu1 %vm732_vm2, %v6282_v48  ;;  %v6520_v2 = vpop.f32.mrf.mxu2  ;;  %v8261_v10 = vld [vmem:[%s12961_s11 + $0x230] sm:$0xff] }
 0xa5c   : > { %v6216_v7 = vpop.f32.mrf.mxu0 }
 0xa5f   : > { %8247 = vmatmul.msk.f32.gmra.mxu3 %vm627_vm1, %v12491_v59  ;;  %8234 = vmatmul.msk.f32.gmra.mxu0 %vm732_vm2, %v6520_v2 }
 0xa60   : > { %v5621_v11 = vpop.f32.mrf.mxu1 }
 0xa61   : > { %v5636_v49 = vadd.f32 %v5621_v11, %v12550_v15 }
 0xa62   : > { %v6285_v40 = vpop.f32.mrf.mxu3 }
 0xa63   : > { %v12712_v27 = vadd.f32 %v5847_v34, %v5636_v49  ;;  %8184 = vmatmul.msk.f32.gmra.mxu1 %vm732_vm2, %v6285_v40  ;;  %v6523_v14 = vpop.f32.mrf.mxu2 }
 0xa64   : > { %v6219_v15 = vpop.f32.mrf.mxu0 }
 0xa67   : > { %8248 = vmatmul.msk.f32.gmra.mxu3 %vm627_vm1, %v12506_v12  ;;  %8235 = vmatmul.msk.f32.gmra.mxu0 %vm732_vm2, %v6523_v14 }
 0xa68   : > { %v5984_v24 = vpop.f32.mrf.mxu1 }
 0xa69   : > { %v6023_v20 = vadd.f32 %v5984_v24, %v12564_v54 }
 0xa6a   : > { %v6288_v59 = vpop.f32.mrf.mxu3 }
 0xa6b   : > { %v12719_v45 = vadd.f32 %v6210_v43, %v6023_v20  ;;  %8185 = vmatmul.msk.f32.gmra.mxu1 %vm732_vm2, %v6288_v59  ;;  %v6526_v50 = vpop.f32.mrf.mxu2 }
 0xa6c   : > { %v6222_v5 = vpop.f32.mrf.mxu0 }
 0xa6f   : > { %8249 = vmatmul.msk.f32.gmra.mxu3 %vm627_vm1, %v12520_v62  ;;  %8236 = vmatmul.msk.f32.gmra.mxu0 %vm732_vm2, %v6526_v50 }
 0xa70   : > { %v5987_v31 = vpop.f32.mrf.mxu1 }
 0xa71   : > { %v6024_v3 = vadd.f32 %v5987_v31, %v12578_v8 }
 0xa72   : > { %v6291_v12 = vpop.f32.mrf.mxu3 }
 0xa73   : > { %v12726_v51 = vadd.f32 %v6213_v47, %v6024_v3  ;;  %8186 = vmatmul.msk.f32.gmra.mxu1 %vm732_vm2, %v6291_v12  ;;  %v6529_v54 = vpop.f32.mrf.mxu2 }
 0xa74   : > { %v6225_v52 = vpop.f32.mrf.mxu0 }
 0xa77   : > { %8250 = vmatmul.msk.f32.gmra.mxu3 %vm627_vm1, %v12534_v9  ;;  %8237 = vmatmul.msk.f32.gmra.mxu0 %vm732_vm2, %v6529_v54 }
 0xa78   : > { %v5990_v36 = vpop.f32.mrf.mxu1 }
 0xa79   : > { %v6025_v13 = vadd.f32 %v5990_v36, %v12592_v19  ;;  %v8262_v19 = vld [vmem:[%s12961_s11 + $0x238] sm:$0xff] }
 0xa7a   : > { %v6294_v62 = vpop.f32.mrf.mxu3  ;;  %6773 = vmatpush.msra.mxu1 %v8262_v19 }
 0xa7b   : > { %v12733_v25 = vadd.f32 %v6216_v7, %v6025_v13  ;;  %8187 = vmatmul.msk.f32.gmra.mxu1 %vm732_vm2, %v6294_v62  ;;  %v6532_v8 = vpop.f32.mrf.mxu2 }
 0xa7c   : > { %v6228_v42 = vpop.f32.mrf.mxu0  ;;  %6774 = vmatpush.msra.mxu1 %v8261_v10 }
 0xa7e   : > { %6775 = vmatpush.msra.mxu1 %v8260_v16 }
 0xa7f   : > { %8251 = vmatmul.msk.f32.gmra.mxu3 %vm627_vm1, %v12548_v41  ;;  %8238 = vmatmul.msk.f32.gmra.mxu0 %vm732_vm2, %v6532_v8 }
 0xa80   : > { %v5993_v63 = vpop.f32.mrf.mxu1 }
 0xa81   : > { %v6026_v23 = vadd.f32 %v5993_v63, %v12601_v38 }
 0xa82   : > { %v6297_v9 = vpop.f32.mrf.mxu3 }
 0xa83   : > { %v12740_v6 = vadd.f32 %v6219_v15, %v6026_v23  ;;  %8188 = vmatmul.msk.f32.gmra.mxu1 %vm732_vm2, %v6297_v9  ;;  %v6535_v41 = vpop.f32.mrf.mxu2 }
 0xa84   : > { %v6231_v4 = vpop.f32.mrf.mxu0 }
 0xa87   : > { %8252 = vmatmul.msk.f32.gmra.mxu3 %vm627_vm1, %v12562_v29  ;;  %8239 = vmatmul.msk.f32.gmra.mxu0 %vm732_vm2, %v6535_v41 }
 0xa88   : > { %v5996_v39 = vpop.f32.mrf.mxu1 }
 0xa89   : > { %v6027_v38 = vadd.f32 %v5996_v39, %v12611_v37 }
 0xa8a   : > { %v6300_v35 = vpop.f32.mrf.mxu3 }
 0xa8b   : > { %v12750_v17 = vadd.f32 %v6222_v5, %v6027_v38  ;;  %8189 = vmatmul.msk.f32.gmra.mxu1 %vm732_vm2, %v6300_v35  ;;  %v6538_v29 = vpop.f32.mrf.mxu2 }
 0xa8c   : > { %v6234_v30 = vpop.f32.mrf.mxu0 }
 0xa8f   : > { %8253 = vmatmul.msk.f32.gmra.mxu3 %vm627_vm1, %v12576_v56  ;;  %8240 = vmatmul.msk.f32.gmra.mxu0 %vm732_vm2, %v6538_v29  ;;  %v8259_v56 = vld [vmem:[%s12961_s11 + $0x220] sm:$0xff] }
 0xa90   : > { %v5999_v28 = vpop.f32.mrf.mxu1  ;;  %6776 = vmatpush.msra.mxu1 %v8259_v56 }
 0xa91   : > { %v6028_v37 = vadd.f32 %v5999_v28, %v12630_v18  ;;  %v8258_v18 = vld [vmem:[%s12961_s11 + $0x218] sm:$0xff] }
 0xa92   : > { %v6303_v32 = vpop.f32.mrf.mxu3  ;;  %6777 = vmatpush.msra.mxu1 %v8258_v18 }
 0xa93   : > { %v12763_v34 = vadd.f32 %v6225_v52, %v6028_v37  ;;  %8190 = vmatmul.msk.f32.gmra.mxu1 %vm732_vm2, %v6303_v32  ;;  %v6541_v1 = vpop.f32.mrf.mxu2 }
 0xa94   : > { %6778 = vmatpush.msra.mxu1 %v8257_v0  ;;  %v6237_v40 = vpop.f32.mrf.mxu0 }
 0xa96   : > { %6779 = vmatpush.msra.mxu1 %v8256_v44 }
 0xa97   : > { %8254 = vmatmul.msk.f32.gmra.mxu3 %vm627_vm1, %v12590_v26  ;;  %8241 = vmatmul.msk.f32.gmra.mxu0 %vm732_vm2, %v6541_v1  ;;  %v8255_v26 = vld [vmem:[%s12961_s11 + $0x200] sm:$0xff]  ;;  %v6869_v1 = vld [vmem:[%s12963_s13 + $0x28] sm:$0xff] }
 0xa98   : > { %v6002_v58 = vpop.f32.mrf.mxu1  ;;  %6780 = vmatpush.msra.mxu1 %v8255_v26  ;;  %v6867_v26 = vld [vmem:[%s12963_s13 + $0x18] sm:$0xff] }
 0xa99   : > { %v6029_v43 = vadd.f32 %v6002_v58, %v12661_v57  ;;  %v6870_v58 = vld [vmem:[%s12963_s13 + $0x30] sm:$0xff] }
 0xa9a   : > { %v6306_v60 = vpop.f32.mrf.mxu3 }
 0xa9b   : > { %v12782_v61 = vadd.f32 %v6228_v42, %v6029_v43  ;;  %8191 = vmatmul.msk.f32.gmra.mxu1 %vm732_vm2, %v6306_v60  ;;  %v6868_v43 = vld [vmem:[%s12963_s13 + $0x20] sm:$0xff] }
 0xaa0   : > { %v6005_v22 = vpop.f32.mrf.mxu1 }
 0xaa1   : > { %v6030_v57 = vadd.f32 %v6005_v22, %v12677_v33  ;;  %v6240_v33 = vpop.f32.mrf.mxu0 }
 0xaa2   : > { %v6309_v48 = vpop.f32.mrf.mxu3 }
 0xaa3   : > { %v6256_v47 = vadd.f32 %v6231_v4, %v6030_v57  ;;  %8192 = vmatmul.msk.f32.gmra.mxu1 %vm732_vm2, %v6309_v48  ;;  %v6865_v57 = vld [vmem:[%s12963_s13 + $0x8] sm:$0xff]  ;;  %v6864_v48 = vld [vmem:[%s12963_s13] sm:$0xff] }
 0xaa8   : > { %v6008_v2 = vpop.f32.mrf.mxu1 }
 0xaa9   : > { %v6031_v11 = vadd.f32 %v6008_v2, %v12684_v53  ;;  %v6243_v53 = vpop.f32.mrf.mxu0 }
 0xaaa   : > { %v6312_v49 = vpop.f32.mrf.mxu3 }
 0xaab   : > { %v6257_v7 = vadd.f32 %v6234_v30, %v6031_v11  ;;  %8193 = vmatmul.msk.f32.gmra.mxu1 %vm732_vm2, %v6312_v49  ;;  %v6866_v30 = vld [vmem:[%s12963_s13 + $0x10] sm:$0xff] }
 0xab0   : > { %v6011_v14 = vpop.f32.mrf.mxu1 }
 0xab1   : > { %v6032_v24 = vadd.f32 %v6011_v14, %v12691_v21  ;;  %v6246_v13 = vpop.f32.mrf.mxu0 }
 0xab2   : > { %v6315_v20 = vpop.f32.mrf.mxu3 }
 0xab3   : > { %v12794_v59 = vadd.f32 %v6237_v40, %v6032_v24  ;;  %8194 = vmatmul.msk.f32.gmra.mxu1 %vm732_vm2, %v6315_v20 }
 0xab8   : > { %v6014_v15 = vpop.f32.mrf.mxu1 }
 0xab9   : > { %v6033_v50 = vadd.f32 %v6014_v15, %v12698_v46  ;;  %v6609_v22 = vpop.f32.mrf.mxu0 }
 0xaba   : > { %v6678_v31 = vpop.f32.mrf.mxu3 }
 0xabb   : > { %v12798_v3 = vadd.f32 %v6240_v33, %v6033_v50  ;;  %8263 = vmatmul.msk.f32.vlgmr.msra.gmra.mxu1 %vm732_vm2, %v6678_v31  ;;  %v12883_v33 = vld [vmem:[%s12962_s12] ss:$0 sm:$0xff] }
 0xac0   : > { %v6017_v12 = vpop.f32.mrf.mxu1 }
 0xac1   : > { %v6034_v54 = vadd.f32 %v6017_v12, %v12705_v55  ;;  %v6612_v11 = vpop.f32.mrf.mxu0 }
 0xac2   : > { %v6681_v36 = vpop.f32.mrf.mxu3 }
 0xac3   : > { %v12802_v21 = vadd.f32 %v6243_v53, %v6034_v54  ;;  %8264 = vmatmul.msk.f32.gmra.mxu1 %vm732_vm2, %v6681_v36 }
 0xac8   : > { %v6020_v5 = vpop.f32.mrf.mxu1 }
 0xac9   : > { %v6035_v62 = vadd.f32 %v6020_v5, %v12712_v27 }
 0xaca   : > { %v6684_v8 = vpop.f32.mrf.mxu3 }
 0xacb   : > { %v12806_v46 = vadd.f32 %v6246_v13, %v6035_v62  ;;  %8265 = vmatmul.msk.f32.gmra.mxu1 %vm732_vm2, %v6684_v8 }
 0xad0   : > { %v12809_v63 = vpop.f32.mrf.mxu1 }
 0xad1   : > { %v6422_v20 = vadd.f32 %v12809_v63, %v12719_v45 }
 0xad2   : > { %v6687_v23 = vpop.f32.mrf.mxu3 }
 0xad3   : > { %8266 = vmatmul.msk.f32.gmra.mxu1 %vm732_vm2, %v6687_v23 }
 0xad8   : > { %v12812_v55 = vpop.f32.mrf.mxu1 }
 0xada   : > { %v6690_v9 = vpop.f32.mrf.mxu3 }
 0xadb   : > { %8267 = vmatmul.msk.f32.gmra.mxu1 %vm732_vm2, %v6690_v9 }
 0xae0   : > { %v6389_v52 = vpop.f32.mrf.mxu1 }
 0xae1   : > { %v12816_v19 = vadd.f32 %v6389_v52, %v12733_v25 }
 0xae2   : > { %v6693_v27 = vpop.f32.mrf.mxu3 }
 0xae3   : > { %8268 = vmatmul.msk.f32.gmra.mxu1 %vm732_vm2, %v6693_v27 }
 0xae8   : > { %v6392_v41 = vpop.f32.mrf.mxu1 }
 0xae9   : > { %v12820_v39 = vadd.f32 %v6392_v41, %v12740_v6 }
 0xaea   : > { %v6696_v38 = vpop.f32.mrf.mxu3 }
 0xaeb   : > { %8269 = vmatmul.msk.f32.gmra.mxu1 %vm732_vm2, %v6696_v38 }
 0xaf0   : > { %v6395_v35 = vpop.f32.mrf.mxu1 }
 0xaf1   : > { %v12824_v10 = vadd.f32 %v6395_v35, %v12750_v17  ;;  %v6871_v17 = vld [vmem:[%s12963_s13 + $0x38] sm:$0xff] }
 0xaf2   : > { %v6699_v42 = vpop.f32.mrf.mxu3  ;;  %6923 = vmatpush.msra.mxu2 %v6871_v17 }
 0xaf3   : > { %8270 = vmatmul.msk.f32.gmra.mxu1 %vm732_vm2, %v6699_v42 }
 0xaf4   : > { %6924 = vmatpush.msra.mxu2 %v6870_v58 }
 0xaf6   : > { %6925 = vmatpush.msra.mxu2 %v6869_v1 }
 0xaf8   : > { %v6398_v29 = vpop.f32.mrf.mxu1  ;;  %6926 = vmatpush.msra.mxu2 %v6868_v43 }
 0xaf9   : > { %v12828_v25 = vadd.f32 %v6398_v29, %v12763_v34 }
 0xafa   : > { %v6702_v28 = vpop.f32.mrf.mxu3  ;;  %6927 = vmatpush.msra.mxu2 %v6867_v26 }
 0xafb   : > { %8271 = vmatmul.msk.f32.gmra.mxu1 %vm732_vm2, %v6702_v28 }
 0xafc   : > { %6928 = vmatpush.msra.mxu2 %v6866_v30 }
 0xafe   : > { %6929 = vmatpush.msra.mxu2 %v6865_v57 }
 0xb00   : > { %v6401_v37 = vpop.f32.mrf.mxu1  ;;  %6930 = vmatpush.msra.mxu2 %v6864_v48 }
 0xb01   : > { %v12832_v6 = vadd.f32 %v6401_v37, %v12782_v61 }
 0xb02   : > { %v6705_v16 = vpop.f32.mrf.mxu3 }
 0xb03   : > { %8272 = vmatmul.msk.f32.gmra.mxu1 %vm732_vm2, %v6705_v16 }
 0xb08   : > { %v6404_v32 = vpop.f32.mrf.mxu1 }
 0xb09   : > { %v12838_v56 = vadd.f32 %v6404_v32, %v6256_v47 }
 0xb0a   : > { %v6708_v34 = vpop.f32.mrf.mxu3 }
 0xb0b   : > { %8273 = vmatmul.msk.f32.gmra.mxu1 %vm732_vm2, %v6708_v34 }
 0xb10   : > { %v6407_v18 = vpop.f32.mrf.mxu1 }
 0xb11   : > { %v12841_v0 = vadd.f32 %v6407_v18, %v6257_v7  ;;  %v6615_v7 = vpop.f32.mrf.mxu0 }
 0xb12   : > { %v6711_v4 = vpop.f32.mrf.mxu3  ;;  %v6650_v62 = vadd.f32 %v6615_v7, %v12816_v19 }
 0xb13   : > { %8274 = vmatmul.msk.f32.gmra.mxu1 %vm732_vm2, %v6711_v4 }
 0xb18   : > { %v6410_v44 = vpop.f32.mrf.mxu1 }
 0xb19   : > { %v12854_v60 = vadd.f32 %v6410_v44, %v12794_v59  ;;  %v6648_v59 = vadd.f32 %v6609_v22, %v6422_v20  ;;  %v6618_v31 = vpop.f32.mrf.mxu0 }
 0xb1a   : > { %v6714_v61 = vpop.f32.mrf.mxu3 }
 0xb1b   : > { %8275 = vmatmul.msk.f32.gmra.mxu1 %vm732_vm2, %v6714_v61 }
 0xb20   : > { %v6413_v47 = vpop.f32.mrf.mxu1 }
 0xb21   : > { %v12870_v2 = vadd.f32 %v6413_v47, %v12798_v3  ;;  %v6423_v3 = vadd.f32 %v12812_v55, %v12726_v51  ;;  %v6621_v5 = vpop.f32.mrf.mxu0  ;;  %v6651_v55 = vadd.f32 %v6618_v31, %v12820_v39 }
 0xb22   : > { %v6652_v38 = vadd.f32 %v6621_v5, %v12824_v10 }
 0xb23   : > { %v6649_v54 = vadd.f32 %v6612_v11, %v6423_v3 }
 0xb28   : > { %v6416_v49 = vpop.f32.mrf.mxu1 }
 0xb29   : > { %v12873_v40 = vadd.f32 %v6416_v49, %v12802_v21  ;;  %v6624_v23 = vpop.f32.mrf.mxu0 }
 0xb2a   : > { %v6653_v37 = vadd.f32 %v6624_v23, %v12828_v25 }
 0xb30   : > { %v6419_v14 = vpop.f32.mrf.mxu1 }
 0xb31   : > { %v12876_v24 = vadd.f32 %v6419_v14, %v12806_v46  ;;  %v6627_v19 = vpop.f32.mrf.mxu0 }
 0xb32   : > { %v6654_v10 = vadd.f32 %v6627_v19, %v12832_v6 }
 0xb38   : > { %v6782_v15 = vpop.f32.mrf.mxu1 }
 0xb39   : > { %v6821_v50 = vadd.f32 %v6782_v15, %v6648_v59  ;;  %v6630_v17 = vpop.f32.mrf.mxu0 }
 0xb3a   : > { %v6655_v25 = vadd.f32 %v6630_v17, %v12838_v56 }
 0xb3b   : > { %v6838_v53 = vadd.f32 %v12883_v33, %v6821_v50 }
 0xb3d   : > { %v6851_v12 = vmax.f32 %v6838_v53, 0.0 }
 0xb3f   : > { %8276 = vmatmul.msk.f32.vlgmr.msra.gmra.mxu2 %vm732_vm2, %v6851_v12 }
 0xb40   : > { %v6785_v36 = vpop.f32.mrf.mxu1 }
 0xb41   : > { %v6822_v45 = vadd.f32 %v6785_v36, %v6649_v54  ;;  %v6633_v1 = vpop.f32.mrf.mxu0 }
 0xb42   : > { %v6656_v6 = vadd.f32 %v6633_v1, %v12841_v0 }
 0xb43   : > { %v6839_v21 = vadd.f32 %v12883_v33, %v6822_v45 }
 0xb45   : > { %v6852_v13 = vmax.f32 %v6839_v21, 0.0 }
 0xb47   : > { %8277 = vmatmul.msk.f32.gmra.mxu2 %vm732_vm2, %v6852_v13 }
 0xb48   : > { %v6788_v8 = vpop.f32.mrf.mxu1 }
 0xb49   : > { %v6823_v46 = vadd.f32 %v6788_v8, %v6650_v62  ;;  %v6636_v30 = vpop.f32.mrf.mxu0 }
 0xb4a   : > { %v6657_v49 = vadd.f32 %v6636_v30, %v12854_v60 }
 0xb4b   : > { %v6840_v51 = vadd.f32 %v12883_v33, %v6823_v46 }
 0xb4d   : > { %v6853_v63 = vmax.f32 %v6840_v51, 0.0 }
 0xb4f   : > { %8278 = vmatmul.msk.f32.gmra.mxu2 %vm732_vm2, %v6853_v63 }
 0xb50   : > { %v6791_v9 = vpop.f32.mrf.mxu1 }
 0xb51   : > { %v6824_v52 = vadd.f32 %v6791_v9, %v6651_v55  ;;  %v6639_v56 = vpop.f32.mrf.mxu0 }
 0xb52   : > { %v6658_v15 = vadd.f32 %v6639_v56, %v12870_v2 }
 0xb53   : > { %v6841_v27 = vadd.f32 %v12883_v33, %v6824_v52 }
 0xb55   : > { %v6854_v41 = vmax.f32 %v6841_v27, 0.0 }
 0xb57   : > { %8279 = vmatmul.msk.f32.gmra.mxu2 %vm732_vm2, %v6854_v41 }
 0xb58   : > { %v6794_v35 = vpop.f32.mrf.mxu1 }
 0xb59   : > { %v6825_v42 = vadd.f32 %v6794_v35, %v6652_v38  ;;  %v6642_v31 = vpop.f32.mrf.mxu0 }
 0xb5a   : > { %v6659_v60 = vadd.f32 %v6642_v31, %v12873_v40  ;;  %v8321_v40 = vld [vmem:[%s12964_s14] ss:$0 sm:$0xff] }
 0xb5b   : > { %v6842_v29 = vadd.f32 %v12883_v33, %v6825_v42 }
 0xb5d   : > { %v6855_v28 = vmax.f32 %v6842_v29, 0.0 }
 0xb5f   : > { %8280 = vmatmul.msk.f32.gmra.mxu2 %vm732_vm2, %v6855_v28 }
 0xb60   : > { %v6797_v39 = vpop.f32.mrf.mxu1 }
 0xb61   : > { %v6826_v16 = vadd.f32 %v6797_v39, %v6653_v37  ;;  %v6645_v45 = vpop.f32.mrf.mxu0 }
 0xb62   : > { %v6660_v2 = vadd.f32 %v6645_v45, %v12876_v24 }
 0xb63   : > { %v6843_v32 = vadd.f32 %v12883_v33, %v6826_v16 }
 0xb65   : > { %v6856_v34 = vmax.f32 %v6843_v32, 0.0 }
 0xb67   : > { %8281 = vmatmul.msk.f32.gmra.mxu2 %vm732_vm2, %v6856_v34 }
 0xb68   : > { %v6800_v18 = vpop.f32.mrf.mxu1 }
 0xb69   : > { %v6827_v4 = vadd.f32 %v6800_v18, %v6654_v10 }
 0xb6b   : > { %v6844_v58 = vadd.f32 %v12883_v33, %v6827_v4 }
 0xb6d   : > { %v6857_v43 = vmax.f32 %v6844_v58, 0.0 }
 0xb6f   : > { %8282 = vmatmul.msk.f32.gmra.mxu2 %vm732_vm2, %v6857_v43 }
 0xb70   : > { %v6803_v44 = vpop.f32.mrf.mxu1 }
 0xb71   : > { %v6828_v61 = vadd.f32 %v6803_v44, %v6655_v25 }
 0xb73   : > { %v6845_v26 = vadd.f32 %v12883_v33, %v6828_v61 }
 0xb75   : > { %v6858_v22 = vmax.f32 %v6845_v26, 0.0 }
 0xb77   : > { %8283 = vmatmul.msk.f32.gmra.mxu2 %vm732_vm2, %v6858_v22 }
 0xb78   : > { %v6806_v57 = vpop.f32.mrf.mxu1 }
 0xb79   : > { %v6829_v48 = vadd.f32 %v6806_v57, %v6656_v6 }
 0xb7b   : > { %v6846_v47 = vadd.f32 %v12883_v33, %v6829_v48 }
 0xb7d   : > { %v6859_v11 = vmax.f32 %v6846_v47, 0.0 }
 0xb7f   : > { %8284 = vmatmul.msk.f32.gmra.mxu2 %vm732_vm2, %v6859_v11 }
 0xb80   : > { %v6809_v7 = vpop.f32.mrf.mxu1 }
 0xb81   : > { %v6830_v14 = vadd.f32 %v6809_v7, %v6657_v49 }
 0xb83   : > { %v6847_v20 = vadd.f32 %v12883_v33, %v6830_v14 }
 0xb85   : > { %v6860_v59 = vmax.f32 %v6847_v20, 0.0 }
 0xb87   : > { %8285 = vmatmul.msk.f32.gmra.mxu2 %vm732_vm2, %v6860_v59 }
 0xb88   : > { %v6812_v0 = vpop.f32.mrf.mxu1 }
 0xb89   : > { %v6831_v50 = vadd.f32 %v6812_v0, %v6658_v15 }
 0xb8b   : > { %v6848_v3 = vadd.f32 %v12883_v33, %v6831_v50 }
 0xb8d   : > { %v6861_v53 = vmax.f32 %v6848_v3, 0.0 }
 0xb8f   : > { %8286 = vmatmul.msk.f32.gmra.mxu2 %vm732_vm2, %v6861_v53 }
 0xb90   : > { %v6815_v12 = vpop.f32.mrf.mxu1 }
 0xb91   : > { %v6832_v54 = vadd.f32 %v6815_v12, %v6659_v60 }
 0xb93   : > { %v6849_v36 = vadd.f32 %v12883_v33, %v6832_v54 }
 0xb95   : > { %v6862_v21 = vmax.f32 %v6849_v36, 0.0 }
 0xb97   : > { %8287 = vmatmul.msk.f32.gmra.mxu2 %vm732_vm2, %v6862_v21 }
 0xb98   : > { %v6818_v5 = vpop.f32.mrf.mxu1 }
 0xb99   : > { %v6833_v13 = vadd.f32 %v6818_v5, %v6660_v2 }
 0xb9b   : > { %v6850_v62 = vadd.f32 %v12883_v33, %v6833_v13 }
 0xb9d   : > { %v6863_v8 = vmax.f32 %v6850_v62, 0.0 }
 0xb9f   : > { %8288 = vmatmul.msk.f32.gmra.mxu2 %vm732_vm2, %v6863_v8 }
 0xbc2   : > { %v6932_v24 = vpop.f32.mrf.mxu2 }
 0xbc3   : > { %v6933_v33 = vadd.f32 %v8321_v40, %v6932_v24 }
 0xbc5   : > { %6971 = vst [vmem:[%s12932_s23] sm:$0xff] %v6933_v33 }
 0xbca   : > { %v6935_v46 = vpop.f32.mrf.mxu2 }
 0xbcb   : > { %v6936_v51 = vadd.f32 %v8321_v40, %v6935_v46 }
 0xbcd   : > { %6972 = vst [vmem:[%s12932_s23 + $0x8] sm:$0xff] %v6936_v51 }
 0xbd2   : > { %v6938_v63 = vpop.f32.mrf.mxu2 }
 0xbd3   : > { %v6939_v23 = vadd.f32 %v8321_v40, %v6938_v63 }
 0xbd5   : > { %6973 = vst [vmem:[%s12932_s23 + $0x10] sm:$0xff] %v6939_v23 }
 0xbda   : > { %v6941_v55 = vpop.f32.mrf.mxu2 }
 0xbdb   : > { %v6942_v9 = vadd.f32 %v8321_v40, %v6941_v55 }
 0xbdd   : > { %6974 = vst [vmem:[%s12932_s23 + $0x18] sm:$0xff] %v6942_v9 }
 0xbe2   : > { %v6944_v52 = vpop.f32.mrf.mxu2 }
 0xbe3   : > { %v6945_v27 = vadd.f32 %v8321_v40, %v6944_v52 }
 0xbe5   : > { %6975 = vst [vmem:[%s12932_s23 + $0x20] sm:$0xff] %v6945_v27 }
 0xbea   : > { %v6947_v41 = vpop.f32.mrf.mxu2 }
 0xbeb   : > { %v6948_v38 = vadd.f32 %v8321_v40, %v6947_v41 }
 0xbed   : > { %6976 = vst [vmem:[%s12932_s23 + $0x28] sm:$0xff] %v6948_v38 }
 0xbf2   : > { %v6950_v19 = vpop.f32.mrf.mxu2 }
 0xbf3   : > { %v6951_v35 = vadd.f32 %v8321_v40, %v6950_v19 }
 0xbf5   : > { %6977 = vst [vmem:[%s12932_s23 + $0x30] sm:$0xff] %v6951_v35 }
 0xbfa   : > { %v6953_v42 = vpop.f32.mrf.mxu2 }
 0xbfb   : > { %v6954_v29 = vadd.f32 %v8321_v40, %v6953_v42 }
 0xbfd   : > { %6978 = vst [vmem:[%s12932_s23 + $0x38] sm:$0xff] %v6954_v29 }
 0xc02   : > { %v6956_v28 = vpop.f32.mrf.mxu2 }
 0xc03   : > { %v6957_v37 = vadd.f32 %v8321_v40, %v6956_v28 }
 0xc05   : > { %6979 = vst [vmem:[%s12932_s23 + $0x40] sm:$0xff] %v6957_v37 }
 0xc0a   : > { %v6959_v39 = vpop.f32.mrf.mxu2 }
 0xc0b   : > { %v6960_v16 = vadd.f32 %v8321_v40, %v6959_v39 }
 0xc0d   : > { %6980 = vst [vmem:[%s12932_s23 + $0x48] sm:$0xff] %v6960_v16 }
 0xc12   : > { %v6962_v17 = vpop.f32.mrf.mxu2 }
 0xc13   : > { %v6963_v32 = vadd.f32 %v8321_v40, %v6962_v17 }
 0xc15   : > { %6981 = vst [vmem:[%s12932_s23 + $0x50] sm:$0xff] %v6963_v32 }
 0xc1a   : > { %v6965_v34 = vpop.f32.mrf.mxu2 }
 0xc1b   : > { %v6966_v10 = vadd.f32 %v8321_v40, %v6965_v34 }
 0xc1d   : > { %6982 = vst [vmem:[%s12932_s23 + $0x58] sm:$0xff] %v6966_v10 }
 0xc22   : > { %v6968_v18 = vpop.f32.mrf.mxu2 }
 0xc23   : > { %v6969_v4 = vadd.f32 %v8321_v40, %v6968_v18 }
 0xc25   : > { %6983 = vst [vmem:[%s12932_s23 + $0x60] sm:$0xff] %v6969_v4 }
 0xc26 PF: > { %s25_s18 = sadd.s32 1, %s8366_s18  }
 0xc27   : > { %p22_p4 = scmp.ge.s32.totalorder %s25_s18, 4  }
 0xc29   :  { %24 = sbr.rel (!%p22_p4) target bundleno = 1 (0x1), region = 166 }

</bundles_post_ra>
